<compile_context>
chip_gen: v7x
topology: tpu7x:2x2x1
jax: 0.10.0
libtpu: 0.0.40
codegen_flags: <defaults>
</compile_context>

<pallas_src>
import functools

import jax
import jax.numpy as jnp
from jax import lax
from jax.experimental import pallas as pl
from jax.experimental.pallas import tpu as pltpu

EPS = 1e-5            # PyTorch BatchNorm2d default
LEAKY_SLOPE = 0.01    # PyTorch nn.LeakyReLU default negative_slope
LANE = 128
_VMEM_LIMIT = 48 * 1024 * 1024   # fits v7x (64 MiB) and v5e/v6e (128 MiB)


def _round_up(x, m):
    return ((x + m - 1) // m) * m


# ----------------------------- Pallas kernel -------------------------------

def _conv_mm_kernel(x_ref, w_ref, b_ref, o_ref, stat_ref=None, *, leaky, want_stats):
    """One M-tile of the im2col matmul.

    acc = x @ w + b   (bf16 operands, f32 MXU accumulation)
    Optionally emits single-pass BN partials (row 0 = sum, row 1 = sum of
    squares) and/or applies LeakyReLU when no BatchNorm follows.
    """
    acc = jnp.dot(x_ref[...], w_ref[...], preferred_element_type=jnp.float32)
    acc = acc + b_ref[...]                       # (TM, Cp) + (1, Cp)
    if want_stats:
        # Two direct row stores; rows 2..7 of the stats block are never read.
        stat_ref[0:1, :] = jnp.sum(acc, axis=0, keepdims=True)
        stat_ref[1:2, :] = jnp.sum(acc * acc, axis=0, keepdims=True)
    if leaky:
        acc = jnp.maximum(acc, LEAKY_SLOPE * acc)
    o_ref[...] = acc.astype(o_ref.dtype)


# ----------------------------- Pallas wrapper ------------------------------

def _conv_matmul(xcol, w_mat, bias_row, *, leaky, want_stats, out_dtype):
    """xcol: (M, Kd) bf16, w_mat: (Kd, Cp) bf16, bias_row: (1, Cp) f32.

    Returns (conv_out (M_pad, Cp) out_dtype, stats or None, n_tiles).
    """
    m, kd = xcol.shape
    cp = w_mat.shape[1]

    # Per-layer tile size: big tiles for small-kd layers, 512 for kd>2048 so
    # the blocks (~<=21 MiB with double-buffering) fit v7x's 64 MiB VMEM.
    target_tm = 1024 if kd <= 2048 else 512
    tm = min(target_tm, _round_up(m, 16))        # multiple of 16 (bf16 tile)
    m_pad = _round_up(m, tm)
    if m_pad != m:
        # zero rows: contribute 0 to the matmul and to sum / sumsq partials
        # (bias_row is all-zero whenever want_stats=True; asserted by caller)
        xcol = jnp.pad(xcol, ((0, m_pad - m), (0, 0)))
    n_tiles = m_pad // tm

    kernel = functools.partial(_conv_mm_kernel, leaky=leaky, want_stats=want_stats)

    out_shape = [jax.ShapeDtypeStruct((m_pad, cp), out_dtype)]
    out_specs = [pl.BlockSpec((tm, cp), lambda i: (i, 0))]
    if want_stats:
        out_shape.append(jax.ShapeDtypeStruct((n_tiles * 8, cp), jnp.float32))
        out_specs.append(pl.BlockSpec((8, cp), lambda i: (i, 0)))

    res = pl.pallas_call(
        kernel,
        out_shape=tuple(out_shape),
        grid=(n_tiles,),
        in_specs=[
            pl.BlockSpec((tm, kd), lambda i: (i, 0)),    # xcol tile (bf16)
            pl.BlockSpec((kd, cp), lambda i: (0, 0)),    # weight (resident)
            pl.BlockSpec((1, cp), lambda i: (0, 0)),     # bias row (f32)
        ],
        out_specs=tuple(out_specs),
        compiler_params=pltpu.CompilerParams(
            dimension_semantics=("parallel",),
            vmem_limit_bytes=_VMEM_LIMIT,
        ),
    )(xcol, w_mat, bias_row)

    if want_stats:
        conv_out, stats = res
    else:
        conv_out, stats = res[0], None
    return conv_out, stats, n_tiles


# ----------------------------- layer building ------------------------------

def _im2col_nhwc(x, k, stride, padding):
    """NHWC im2col; taps flattened in (kh, kw, ci) order -> (N*OH*OW, K*K*C)."""
    n, h, w, c = x.shape
    oh = (h + 2 * padding - k) // stride + 1
    ow = (w + 2 * padding - k) // stride + 1
    xp = jnp.pad(x, ((0, 0), (padding, padding), (padding, padding), (0, 0)))
    cols = []
    for kh in range(k):
        for kw in range(k):
            cols.append(xp[:,
                           kh:kh + stride * (oh - 1) + 1:stride,
                           kw:kw + stride * (ow - 1) + 1:stride, :])
    xcol = jnp.concatenate(cols, axis=-1).reshape(n * oh * ow, k * k * c)
    return xcol, oh, ow


def conv_bn_act(x_nhwc, w_oihw, bias=None, gamma=None, beta=None, *,
                stride, padding, use_bn, use_act):
    """Conv2d (PyTorch OIHW weight) + optional train-mode BN + LeakyReLU, NHWC."""
    n = x_nhwc.shape[0]
    cout, cin, k, _ = w_oihw.shape
    # Zero-padded M rows must not pollute the BN stats -> requires zero bias.
    assert not (use_bn and bias is not None)

    x_bf = x_nhwc.astype(jnp.bfloat16)                   # cast BEFORE im2col
    xcol, oh, ow = _im2col_nhwc(x_bf, k, stride, padding)
    m = n * oh * ow
    kd = k * k * cin
    kd_pad = _round_up(kd, LANE)
    cp = _round_up(cout, LANE)

    # weight -> (kh, kw, ci) x cout, zero-padded lane-dense on both axes
    w_mat = jnp.transpose(w_oihw, (2, 3, 1, 0)).reshape(kd, cout)
    w_mat = jnp.pad(w_mat, ((0, kd_pad - kd), (0, cp - cout))).astype(jnp.bfloat16)
    if kd_pad != kd:
        xcol = jnp.pad(xcol, ((0, 0), (0, kd_pad - kd)))

    if bias is None:
        bias_row = jnp.zeros((1, cp), jnp.float32)
    else:
        bias_row = jnp.pad(bias.astype(jnp.float32), (0, cp - cout)).reshape(1, cp)

    leaky_in_mm = use_act and not use_bn
    # BN layers keep the pre-BN slab in f32 (exact normalize); pure-activation
    # layers write bf16 directly (same rounding point as feeding the next
    # matmul); the final layer (no act) writes its f32 result.
    out_dtype = jnp.bfloat16 if leaky_in_mm else jnp.float32

    conv_out, stats, n_tiles = _conv_matmul(
        xcol, w_mat, bias_row, leaky=leaky_in_mm, want_stats=use_bn,
        out_dtype=out_dtype)

    y = conv_out[:m, :cout]

    if use_bn:
        # finalize BN stats from per-tile single-pass partials (f32)
        st = stats.reshape(n_tiles, 8, cp)
        total = jnp.sum(st[:, 0, :cout], axis=0)
        total_sq = jnp.sum(st[:, 1, :cout], axis=0)
        mean = total / m
        var = total_sq / m - mean * mean                 # biased batch variance
        inv = lax.rsqrt(var + EPS)
        scale = gamma.astype(jnp.float32) * inv          # (cout,)
        shift = beta.astype(jnp.float32) - mean * scale
        # Plain-JAX epilogue: XLA fuses it (plus the bf16 cast / pad / slices)
        # into the next layer's im2col producer -> no extra Pallas pass, no
        # extra slab round trip.
        z = y.astype(jnp.float32) * scale + shift
        y = jnp.maximum(z, LEAKY_SLOPE * z)

    return y.reshape(n, oh, ow, cout)


# ----------------------------- full forward --------------------------------

@jax.jit
def discriminator_forward(x_nchw, p):
    x = jnp.transpose(x_nchw, (0, 2, 3, 1)).astype(jnp.float32)          # NHWC
    # Downsample(6, 64, 4, apply_batchnorm=False)
    x = conv_bn_act(x, p["w1"], stride=2, padding=1, use_bn=False, use_act=True)
    # Downsample(64, 128, 4)
    x = conv_bn_act(x, p["w2"], gamma=p["g2"], beta=p["b2"],
                    stride=2, padding=1, use_bn=True, use_act=True)
    # Downsample(128, 256, 4)
    x = conv_bn_act(x, p["w3"], gamma=p["g3"], beta=p["b3"],
                    stride=2, padding=1, use_bn=True, use_act=True)
    # ZeroPad2d(1) + Conv2d(256,512,k4,s1,bias=False) + BN + LeakyReLU
    x = conv_bn_act(x, p["w4"], gamma=p["g4"], beta=p["b4"],
                    stride=1, padding=1, use_bn=True, use_act=True)
    # ZeroPad2d(1) + Conv2d(512,1,k4,s1,bias=True)
    x = conv_bn_act(x, p["w5"], bias=p["bias5"],
                    stride=1, padding=1, use_bn=False, use_act=False)
    return jnp.transpose(x, (0, 3, 1, 2)).astype(jnp.float32)            # NCHW


# ----------------------------- pure-JAX reference --------------------------

def _conv2d_ref(x_nhwc, w_oihw, stride, padding, bias=None):
    w_hwio = jnp.transpose(w_oihw, (2, 3, 1, 0))
    y = lax.conv_general_dilated(
        x_nhwc.astype(jnp.bfloat16), w_hwio.astype(jnp.bfloat16),
        window_strides=(stride, stride),
        padding=[(padding, padding), (padding, padding)],
        dimension_numbers=("NHWC", "HWIO", "NHWC"),
        preferred_element_type=jnp.float32)
    if bias is not None:
        y = y + bias.reshape(1, 1, 1, -1)
    return y


def _leaky_ref(x):
    return jnp.where(x >= 0, x, LEAKY_SLOPE * x)


def _bn_ref(y, gamma, beta):
    mean = y.mean(axis=(0, 1, 2), keepdims=True)
    var = ((y - mean) ** 2).mean(axis=(0, 1, 2), keepdims=True)
    return ((y - mean) * lax.rsqrt(var + EPS) * gamma.reshape(1, 1, 1, -1)
            + beta.reshape(1, 1, 1, -1))


def discriminator_reference(x_nchw, p):
    x = jnp.transpose(x_nchw, (0, 2, 3, 1)).astype(jnp.float32)
    x = _leaky_ref(_conv2d_ref(x, p["w1"], 2, 1))
    x = _leaky_ref(_bn_ref(_conv2d_ref(x, p["w2"], 2, 1), p["g2"], p["b2"]))
    x = _leaky_ref(_bn_ref(_conv2d_ref(x, p["w3"], 2, 1), p["g3"], p["b3"]))
    x = _leaky_ref(_bn_ref(_conv2d_ref(x, p["w4"], 1, 1), p["g4"], p["b4"]))
    x = _conv2d_ref(x, p["w5"], 1, 1, bias=p["bias5"])
    return jnp.transpose(x, (0, 3, 1, 2))


# ----------------------------- main -----------------------------------------

def init_discriminator_params(key):
    ks = jax.random.split(key, 10)

    def conv_w(k, cout, cin, ksz):
        scale = 1.0 / float(cin * ksz * ksz) ** 0.5
        return jax.random.normal(k, (cout, cin, ksz, ksz), jnp.float32) * scale

    return {
        "w1": conv_w(ks[0], 64, 6, 4),
        "w2": conv_w(ks[1], 128, 64, 4),
        "g2": 1.0 + 0.1 * jax.random.normal(ks[5], (128,), jnp.float32),
        "b2": 0.1 * jax.random.normal(ks[6], (128,), jnp.float32),
        "w3": conv_w(ks[2], 256, 128, 4),
        "g3": 1.0 + 0.1 * jax.random.normal(ks[7], (256,), jnp.float32),
        "b3": 0.1 * jax.random.normal(ks[8], (256,), jnp.float32),
        "w4": conv_w(ks[3], 512, 256, 4),
        "g4": jnp.ones((512,), jnp.float32),
        "b4": jnp.zeros((512,), jnp.float32),
        "w5": conv_w(ks[4], 1, 512, 4),
        "bias5": 0.01 * jax.random.normal(ks[9], (1,), jnp.float32),
    }


if __name__ == "__main__":
    key = jax.random.PRNGKey(0)
    kx, kp = jax.random.split(key)

    # smallest spatial size that survives the whole stack: 32 -> 16 -> 8 -> 4 -> 3 -> 2
    x = jax.random.normal(kx, (2, 6, 32, 32), dtype=jnp.float32)
    params = init_discriminator_params(kp)

    out = jax.block_until_ready(discriminator_forward(x, params))
    assert out.shape == (2, 1, 2, 2), out.shape

    ref = jax.block_until_ready(discriminator_reference(x, params))
    max_err = float(jnp.max(jnp.abs(out - ref)))
    assert jnp.allclose(out, ref, atol=3e-2, rtol=3e-2), max_err

    print("KERNEL_OK")
</pallas_src>

<mosaic_0001>
module attributes {stable_mosaic.version = 11 : i64} {
  func.func @_conv_mm_kernel(%arg0: i32, %arg1: memref<512x128xbf16, #tpu.memory_space<vmem>>, %arg2: memref<128x128xbf16, #tpu.memory_space<vmem>>, %arg3: memref<1x128xf32, #tpu.memory_space<vmem>>, %arg4: memref<512x128xbf16, #tpu.memory_space<vmem>>) attributes {dimension_semantics = [#tpu.dimension_semantics<parallel>], iteration_bounds = array<i64: 1>, scalar_prefetch = 0 : i64, scratch_operands = 0 : i64, tpu.core_type = #tpu.core_type<tc>, window_params = [{transform_indices = @transform_0, window_bounds = array<i64: 512, 128>}, {pipeline_mode = #tpu.pipeline_mode<synchronous>, transform_indices = @transform_1, window_bounds = array<i64: 128, 128>}, {pipeline_mode = #tpu.pipeline_mode<synchronous>, transform_indices = @transform_2, window_bounds = array<i64: 1, 128>}, {transform_indices = @transform_3, window_bounds = array<i64: 512, 128>}]} {
    %c0 = arith.constant 0 : index
    %c0_0 = arith.constant 0 : index
    %0 = vector.load %arg1[%c0, %c0_0] : memref<512x128xbf16, #tpu.memory_space<vmem>>, vector<512x128xbf16>
    %c0_1 = arith.constant 0 : index
    %c0_2 = arith.constant 0 : index
    %1 = vector.load %arg2[%c0_1, %c0_2] : memref<128x128xbf16, #tpu.memory_space<vmem>>, vector<128x128xbf16>
    %cst = arith.constant dense<0.000000e+00> : vector<512x128xf32>
    %2 = tpu.matmul %0, %1, %cst {dimension_numbers = #tpu.dot_dimension_numbers<[1], [0], [0], [1], [0, 0, 1, 1], [], []>} : vector<512x128xbf16>, vector<128x128xbf16>, vector<512x128xf32> -> vector<512x128xf32>
    %c0_3 = arith.constant 0 : index
    %c0_4 = arith.constant 0 : index
    %3 = vector.load %arg3[%c0_3, %c0_4] : memref<1x128xf32, #tpu.memory_space<vmem>>, vector<1x128xf32>
    %4 = vector.broadcast %3 : vector<1x128xf32> to vector<512x128xf32>
    %5 = arith.addf %2, %4 : vector<512x128xf32>
    %cst_5 = arith.constant 0.00999999977 : f32
    %6 = vector.broadcast %cst_5 : f32 to vector<512x128xf32>
    %7 = arith.mulf %6, %5 : vector<512x128xf32>
    %8 = arith.maximumf %5, %7 : vector<512x128xf32>
    %9 = arith.truncf %8 : vector<512x128xf32> to vector<512x128xbf16>
    %c0_6 = arith.constant 0 : index
    %c0_7 = arith.constant 0 : index
    %10 = vector.load %arg4[%c0_6, %c0_7] : memref<512x128xbf16, #tpu.memory_space<vmem>>, vector<512x128xbf16>
    tpu.vector_store %arg4[%c0_6, %c0_7], %9 {strides = array<i32>} : memref<512x128xbf16, #tpu.memory_space<vmem>>, vector<512x128xbf16>,
    return
  }
  func.func @transform_0(%arg0: i32) -> (i32, i32) {
    %c0_i32 = arith.constant 0 : i32
    %c0_i32_0 = arith.constant 0 : i32
    return %arg0, %c0_i32 : i32, i32
  }
  func.func @transform_1(%arg0: i32) -> (i32, i32) {
    %c0_i32 = arith.constant 0 : i32
    %c0_i32_0 = arith.constant 0 : i32
    %c0_i32_1 = arith.constant 0 : i32
    return %c0_i32, %c0_i32_0 : i32, i32
  }
  func.func @transform_2(%arg0: i32) -> (i32, i32) {
    %c0_i32 = arith.constant 0 : i32
    %c0_i32_0 = arith.constant 0 : i32
    %c0_i32_1 = arith.constant 0 : i32
    return %c0_i32, %c0_i32_0 : i32, i32
  }
  func.func @transform_3(%arg0: i32) -> (i32, i32) {
    %c0_i32 = arith.constant 0 : i32
    %c0_i32_0 = arith.constant 0 : i32
    return %arg0, %c0_i32 : i32, i32
  }
}

module attributes {stable_mosaic.version = 11 : i64} {
  func.func @_conv_mm_kernel(%arg0: i32, %arg1: memref<128x1024xbf16, #tpu.memory_space<vmem>>, %arg2: memref<1024x128xbf16, #tpu.memory_space<vmem>>, %arg3: memref<1x128xf32, #tpu.memory_space<vmem>>, %arg4: memref<128x128xf32, #tpu.memory_space<vmem>>, %arg5: memref<8x128xf32, #tpu.memory_space<vmem>>) attributes {dimension_semantics = [#tpu.dimension_semantics<parallel>], iteration_bounds = array<i64: 1>, scalar_prefetch = 0 : i64, scratch_operands = 0 : i64, tpu.core_type = #tpu.core_type<tc>, window_params = [{transform_indices = @transform_0, window_bounds = array<i64: 128, 1024>}, {pipeline_mode = #tpu.pipeline_mode<synchronous>, transform_indices = @transform_1, window_bounds = array<i64: 1024, 128>}, {pipeline_mode = #tpu.pipeline_mode<synchronous>, transform_indices = @transform_2, window_bounds = array<i64: 1, 128>}, {transform_indices = @transform_3, window_bounds = array<i64: 128, 128>}, {transform_indices = @transform_4, window_bounds = array<i64: 8, 128>}]} {
    %c0 = arith.constant 0 : index
    %c0_0 = arith.constant 0 : index
    %0 = vector.load %arg1[%c0, %c0_0] : memref<128x1024xbf16, #tpu.memory_space<vmem>>, vector<128x1024xbf16>
    %c0_1 = arith.constant 0 : index
    %c0_2 = arith.constant 0 : index
    %1 = vector.load %arg2[%c0_1, %c0_2] : memref<1024x128xbf16, #tpu.memory_space<vmem>>, vector<1024x128xbf16>
    %cst = arith.constant dense<0.000000e+00> : vector<128x128xf32>
    %2 = tpu.matmul %0, %1, %cst {dimension_numbers = #tpu.dot_dimension_numbers<[1], [0], [0], [1], [0, 0, 1, 1], [], []>} : vector<128x1024xbf16>, vector<1024x128xbf16>, vector<128x128xf32> -> vector<128x128xf32>
    %c0_3 = arith.constant 0 : index
    %c0_4 = arith.constant 0 : index
    %3 = vector.load %arg3[%c0_3, %c0_4] : memref<1x128xf32, #tpu.memory_space<vmem>>, vector<1x128xf32>
    %4 = vector.broadcast %3 : vector<1x128xf32> to vector<128x128xf32>
    %5 = arith.addf %2, %4 : vector<128x128xf32>
    %cst_5 = arith.constant dense<0.000000e+00> : vector<128xf32>
    %6 = vector.multi_reduction <add>, %5, %cst_5 [0] : vector<128x128xf32> to vector<128xf32>
    %7 = vector.shape_cast %6 : vector<128xf32> to vector<1x128xf32>
    %c0_6 = arith.constant 0 : index
    %c0_7 = arith.constant 0 : index
    %8 = vector.load %arg5[%c0_6, %c0_7] : memref<8x128xf32, #tpu.memory_space<vmem>>, vector<1x128xf32>
    tpu.vector_store %arg5[%c0_6, %c0_7], %7 {strides = array<i32>} : memref<8x128xf32, #tpu.memory_space<vmem>>, vector<1x128xf32>,
    %9 = arith.mulf %5, %5 : vector<128x128xf32>
    %cst_8 = arith.constant dense<0.000000e+00> : vector<128xf32>
    %10 = vector.multi_reduction <add>, %9, %cst_8 [0] : vector<128x128xf32> to vector<128xf32>
    %11 = vector.shape_cast %10 : vector<128xf32> to vector<1x128xf32>
    %c1 = arith.constant 1 : index
    %c0_9 = arith.constant 0 : index
    %12 = vector.load %arg5[%c1, %c0_9] : memref<8x128xf32, #tpu.memory_space<vmem>>, vector<1x128xf32>
    tpu.vector_store %arg5[%c1, %c0_9], %11 {strides = array<i32>} : memref<8x128xf32, #tpu.memory_space<vmem>>, vector<1x128xf32>,
    %c0_10 = arith.constant 0 : index
    %c0_11 = arith.constant 0 : index
    %13 = vector.load %arg4[%c0_10, %c0_11] : memref<128x128xf32, #tpu.memory_space<vmem>>, vector<128x128xf32>
    tpu.vector_store %arg4[%c0_10, %c0_11], %5 {strides = array<i32>} : memref<128x128xf32, #tpu.memory_space<vmem>>, vector<128x128xf32>,
    return
  }
  func.func @transform_0(%arg0: i32) -> (i32, i32) {
    %c0_i32 = arith.constant 0 : i32
    %c0_i32_0 = arith.constant 0 : i32
    return %arg0, %c0_i32 : i32, i32
  }
  func.func @transform_1(%arg0: i32) -> (i32, i32) {
    %c0_i32 = arith.constant 0 : i32
    %c0_i32_0 = arith.constant 0 : i32
    %c0_i32_1 = arith.constant 0 : i32
    return %c0_i32, %c0_i32_0 : i32, i32
  }
  func.func @transform_2(%arg0: i32) -> (i32, i32) {
    %c0_i32 = arith.constant 0 : i32
    %c0_i32_0 = arith.constant 0 : i32
    %c0_i32_1 = arith.constant 0 : i32
    return %c0_i32, %c0_i32_0 : i32, i32
  }
  func.func @transform_3(%arg0: i32) -> (i32, i32) {
    %c0_i32 = arith.constant 0 : i32
    %c0_i32_0 = arith.constant 0 : i32
    return %arg0, %c0_i32 : i32, i32
  }
  func.func @transform_4(%arg0: i32) -> (i32, i32) {
    %c0_i32 = arith.constant 0 : i32
    %c0_i32_0 = arith.constant 0 : i32
    return %arg0, %c0_i32 : i32, i32
  }
}

module attributes {stable_mosaic.version = 11 : i64} {
  func.func @_conv_mm_kernel(%arg0: i32, %arg1: memref<32x2048xbf16, #tpu.memory_space<vmem>>, %arg2: memref<2048x256xbf16, #tpu.memory_space<vmem>>, %arg3: memref<1x256xf32, #tpu.memory_space<vmem>>, %arg4: memref<32x256xf32, #tpu.memory_space<vmem>>, %arg5: memref<8x256xf32, #tpu.memory_space<vmem>>) attributes {dimension_semantics = [#tpu.dimension_semantics<parallel>], iteration_bounds = array<i64: 1>, scalar_prefetch = 0 : i64, scratch_operands = 0 : i64, tpu.core_type = #tpu.core_type<tc>, window_params = [{transform_indices = @transform_0, window_bounds = array<i64: 32, 2048>}, {pipeline_mode = #tpu.pipeline_mode<synchronous>, transform_indices = @transform_1, window_bounds = array<i64: 2048, 256>}, {pipeline_mode = #tpu.pipeline_mode<synchronous>, transform_indices = @transform_2, window_bounds = array<i64: 1, 256>}, {transform_indices = @transform_3, window_bounds = array<i64: 32, 256>}, {transform_indices = @transform_4, window_bounds = array<i64: 8, 256>}]} {
    %c0 = arith.constant 0 : index
    %c0_0 = arith.constant 0 : index
    %0 = vector.load %arg1[%c0, %c0_0] : memref<32x2048xbf16, #tpu.memory_space<vmem>>, vector<32x2048xbf16>
    %c0_1 = arith.constant 0 : index
    %c0_2 = arith.constant 0 : index
    %1 = vector.load %arg2[%c0_1, %c0_2] : memref<2048x256xbf16, #tpu.memory_space<vmem>>, vector<2048x256xbf16>
    %cst = arith.constant dense<0.000000e+00> : vector<32x256xf32>
    %2 = tpu.matmul %0, %1, %cst {dimension_numbers = #tpu.dot_dimension_numbers<[1], [0], [0], [1], [0, 0, 1, 1], [], []>} : vector<32x2048xbf16>, vector<2048x256xbf16>, vector<32x256xf32> -> vector<32x256xf32>
    %c0_3 = arith.constant 0 : index
    %c0_4 = arith.constant 0 : index
    %3 = vector.load %arg3[%c0_3, %c0_4] : memref<1x256xf32, #tpu.memory_space<vmem>>, vector<1x256xf32>
    %4 = vector.broadcast %3 : vector<1x256xf32> to vector<32x256xf32>
    %5 = arith.addf %2, %4 : vector<32x256xf32>
    %cst_5 = arith.constant dense<0.000000e+00> : vector<256xf32>
    %6 = vector.multi_reduction <add>, %5, %cst_5 [0] : vector<32x256xf32> to vector<256xf32>
    %7 = vector.shape_cast %6 : vector<256xf32> to vector<1x256xf32>
    %c0_6 = arith.constant 0 : index
    %c0_7 = arith.constant 0 : index
    %8 = vector.load %arg5[%c0_6, %c0_7] : memref<8x256xf32, #tpu.memory_space<vmem>>, vector<1x256xf32>
    tpu.vector_store %arg5[%c0_6, %c0_7], %7 {strides = array<i32>} : memref<8x256xf32, #tpu.memory_space<vmem>>, vector<1x256xf32>,
    %9 = arith.mulf %5, %5 : vector<32x256xf32>
    %cst_8 = arith.constant dense<0.000000e+00> : vector<256xf32>
    %10 = vector.multi_reduction <add>, %9, %cst_8 [0] : vector<32x256xf32> to vector<256xf32>
    %11 = vector.shape_cast %10 : vector<256xf32> to vector<1x256xf32>
    %c1 = arith.constant 1 : index
    %c0_9 = arith.constant 0 : index
    %12 = vector.load %arg5[%c1, %c0_9] : memref<8x256xf32, #tpu.memory_space<vmem>>, vector<1x256xf32>
    tpu.vector_store %arg5[%c1, %c0_9], %11 {strides = array<i32>} : memref<8x256xf32, #tpu.memory_space<vmem>>, vector<1x256xf32>,
    %c0_10 = arith.constant 0 : index
    %c0_11 = arith.constant 0 : index
    %13 = vector.load %arg4[%c0_10, %c0_11] : memref<32x256xf32, #tpu.memory_space<vmem>>, vector<32x256xf32>
    tpu.vector_store %arg4[%c0_10, %c0_11], %5 {strides = array<i32>} : memref<32x256xf32, #tpu.memory_space<vmem>>, vector<32x256xf32>,
    return
  }
  func.func @transform_0(%arg0: i32) -> (i32, i32) {
    %c0_i32 = arith.constant 0 : i32
    %c0_i32_0 = arith.constant 0 : i32
    return %arg0, %c0_i32 : i32, i32
  }
  func.func @transform_1(%arg0: i32) -> (i32, i32) {
    %c0_i32 = arith.constant 0 : i32
    %c0_i32_0 = arith.constant 0 : i32
    %c0_i32_1 = arith.constant 0 : i32
    return %c0_i32, %c0_i32_0 : i32, i32
  }
  func.func @transform_2(%arg0: i32) -> (i32, i32) {
    %c0_i32 = arith.constant 0 : i32
    %c0_i32_0 = arith.constant 0 : i32
    %c0_i32_1 = arith.constant 0 : i32
    return %c0_i32, %c0_i32_0 : i32, i32
  }
  func.func @transform_3(%arg0: i32) -> (i32, i32) {
    %c0_i32 = arith.constant 0 : i32
    %c0_i32_0 = arith.constant 0 : i32
    return %arg0, %c0_i32 : i32, i32
  }
  func.func @transform_4(%arg0: i32) -> (i32, i32) {
    %c0_i32 = arith.constant 0 : i32
    %c0_i32_0 = arith.constant 0 : i32
    return %arg0, %c0_i32 : i32, i32
  }
}

module attributes {stable_mosaic.version = 11 : i64} {
  func.func @_conv_mm_kernel(%arg0: i32, %arg1: memref<32x4096xbf16, #tpu.memory_space<vmem>>, %arg2: memref<4096x512xbf16, #tpu.memory_space<vmem>>, %arg3: memref<1x512xf32, #tpu.memory_space<vmem>>, %arg4: memref<32x512xf32, #tpu.memory_space<vmem>>, %arg5: memref<8x512xf32, #tpu.memory_space<vmem>>) attributes {dimension_semantics = [#tpu.dimension_semantics<parallel>], iteration_bounds = array<i64: 1>, scalar_prefetch = 0 : i64, scratch_operands = 0 : i64, tpu.core_type = #tpu.core_type<tc>, window_params = [{transform_indices = @transform_0, window_bounds = array<i64: 32, 4096>}, {pipeline_mode = #tpu.pipeline_mode<synchronous>, transform_indices = @transform_1, window_bounds = array<i64: 4096, 512>}, {pipeline_mode = #tpu.pipeline_mode<synchronous>, transform_indices = @transform_2, window_bounds = array<i64: 1, 512>}, {transform_indices = @transform_3, window_bounds = array<i64: 32, 512>}, {transform_indices = @transform_4, window_bounds = array<i64: 8, 512>}]} {
    %c0 = arith.constant 0 : index
    %c0_0 = arith.constant 0 : index
    %0 = vector.load %arg1[%c0, %c0_0] : memref<32x4096xbf16, #tpu.memory_space<vmem>>, vector<32x4096xbf16>
    %c0_1 = arith.constant 0 : index
    %c0_2 = arith.constant 0 : index
    %1 = vector.load %arg2[%c0_1, %c0_2] : memref<4096x512xbf16, #tpu.memory_space<vmem>>, vector<4096x512xbf16>
    %cst = arith.constant dense<0.000000e+00> : vector<32x512xf32>
    %2 = tpu.matmul %0, %1, %cst {dimension_numbers = #tpu.dot_dimension_numbers<[1], [0], [0], [1], [0, 0, 1, 1], [], []>} : vector<32x4096xbf16>, vector<4096x512xbf16>, vector<32x512xf32> -> vector<32x512xf32>
    %c0_3 = arith.constant 0 : index
    %c0_4 = arith.constant 0 : index
    %3 = vector.load %arg3[%c0_3, %c0_4] : memref<1x512xf32, #tpu.memory_space<vmem>>, vector<1x512xf32>
    %4 = vector.broadcast %3 : vector<1x512xf32> to vector<32x512xf32>
    %5 = arith.addf %2, %4 : vector<32x512xf32>
    %cst_5 = arith.constant dense<0.000000e+00> : vector<512xf32>
    %6 = vector.multi_reduction <add>, %5, %cst_5 [0] : vector<32x512xf32> to vector<512xf32>
    %7 = vector.shape_cast %6 : vector<512xf32> to vector<1x512xf32>
    %c0_6 = arith.constant 0 : index
    %c0_7 = arith.constant 0 : index
    %8 = vector.load %arg5[%c0_6, %c0_7] : memref<8x512xf32, #tpu.memory_space<vmem>>, vector<1x512xf32>
    tpu.vector_store %arg5[%c0_6, %c0_7], %7 {strides = array<i32>} : memref<8x512xf32, #tpu.memory_space<vmem>>, vector<1x512xf32>,
    %9 = arith.mulf %5, %5 : vector<32x512xf32>
    %cst_8 = arith.constant dense<0.000000e+00> : vector<512xf32>
    %10 = vector.multi_reduction <add>, %9, %cst_8 [0] : vector<32x512xf32> to vector<512xf32>
    %11 = vector.shape_cast %10 : vector<512xf32> to vector<1x512xf32>
    %c1 = arith.constant 1 : index
    %c0_9 = arith.constant 0 : index
    %12 = vector.load %arg5[%c1, %c0_9] : memref<8x512xf32, #tpu.memory_space<vmem>>, vector<1x512xf32>
    tpu.vector_store %arg5[%c1, %c0_9], %11 {strides = array<i32>} : memref<8x512xf32, #tpu.memory_space<vmem>>, vector<1x512xf32>,
    %c0_10 = arith.constant 0 : index
    %c0_11 = arith.constant 0 : index
    %13 = vector.load %arg4[%c0_10, %c0_11] : memref<32x512xf32, #tpu.memory_space<vmem>>, vector<32x512xf32>
    tpu.vector_store %arg4[%c0_10, %c0_11], %5 {strides = array<i32>} : memref<32x512xf32, #tpu.memory_space<vmem>>, vector<32x512xf32>,
    return
  }
  func.func @transform_0(%arg0: i32) -> (i32, i32) {
    %c0_i32 = arith.constant 0 : i32
    %c0_i32_0 = arith.constant 0 : i32
    return %arg0, %c0_i32 : i32, i32
  }
  func.func @transform_1(%arg0: i32) -> (i32, i32) {
    %c0_i32 = arith.constant 0 : i32
    %c0_i32_0 = arith.constant 0 : i32
    %c0_i32_1 = arith.constant 0 : i32
    return %c0_i32, %c0_i32_0 : i32, i32
  }
  func.func @transform_2(%arg0: i32) -> (i32, i32) {
    %c0_i32 = arith.constant 0 : i32
    %c0_i32_0 = arith.constant 0 : i32
    %c0_i32_1 = arith.constant 0 : i32
    return %c0_i32, %c0_i32_0 : i32, i32
  }
  func.func @transform_3(%arg0: i32) -> (i32, i32) {
    %c0_i32 = arith.constant 0 : i32
    %c0_i32_0 = arith.constant 0 : i32
    return %arg0, %c0_i32 : i32, i32
  }
  func.func @transform_4(%arg0: i32) -> (i32, i32) {
    %c0_i32 = arith.constant 0 : i32
    %c0_i32_0 = arith.constant 0 : i32
    return %arg0, %c0_i32 : i32, i32
  }
}

module attributes {stable_mosaic.version = 11 : i64} {
  func.func @_conv_mm_kernel(%arg0: i32, %arg1: memref<16x8192xbf16, #tpu.memory_space<vmem>>, %arg2: memref<8192x128xbf16, #tpu.memory_space<vmem>>, %arg3: memref<1x128xf32, #tpu.memory_space<vmem>>, %arg4: memref<16x128xf32, #tpu.memory_space<vmem>>) attributes {dimension_semantics = [#tpu.dimension_semantics<parallel>], iteration_bounds = array<i64: 1>, scalar_prefetch = 0 : i64, scratch_operands = 0 : i64, tpu.core_type = #tpu.core_type<tc>, window_params = [{transform_indices = @transform_0, window_bounds = array<i64: 16, 8192>}, {pipeline_mode = #tpu.pipeline_mode<synchronous>, transform_indices = @transform_1, window_bounds = array<i64: 8192, 128>}, {pipeline_mode = #tpu.pipeline_mode<synchronous>, transform_indices = @transform_2, window_bounds = array<i64: 1, 128>}, {transform_indices = @transform_3, window_bounds = array<i64: 16, 128>}]} {
    %c0 = arith.constant 0 : index
    %c0_0 = arith.constant 0 : index
    %0 = vector.load %arg1[%c0, %c0_0] : memref<16x8192xbf16, #tpu.memory_space<vmem>>, vector<16x8192xbf16>
    %c0_1 = arith.constant 0 : index
    %c0_2 = arith.constant 0 : index
    %1 = vector.load %arg2[%c0_1, %c0_2] : memref<8192x128xbf16, #tpu.memory_space<vmem>>, vector<8192x128xbf16>
    %cst = arith.constant dense<0.000000e+00> : vector<16x128xf32>
    %2 = tpu.matmul %0, %1, %cst {dimension_numbers = #tpu.dot_dimension_numbers<[1], [0], [0], [1], [0, 0, 1, 1], [], []>} : vector<16x8192xbf16>, vector<8192x128xbf16>, vector<16x128xf32> -> vector<16x128xf32>
    %c0_3 = arith.constant 0 : index
    %c0_4 = arith.constant 0 : index
    %3 = vector.load %arg3[%c0_3, %c0_4] : memref<1x128xf32, #tpu.memory_space<vmem>>, vector<1x128xf32>
    %4 = vector.broadcast %3 : vector<1x128xf32> to vector<16x128xf32>
    %5 = arith.addf %2, %4 : vector<16x128xf32>
    %c0_5 = arith.constant 0 : index
    %c0_6 = arith.constant 0 : index
    %6 = vector.load %arg4[%c0_5, %c0_6] : memref<16x128xf32, #tpu.memory_space<vmem>>, vector<16x128xf32>
    tpu.vector_store %arg4[%c0_5, %c0_6], %5 {strides = array<i32>} : memref<16x128xf32, #tpu.memory_space<vmem>>, vector<16x128xf32>,
    return
  }
  func.func @transform_0(%arg0: i32) -> (i32, i32) {
    %c0_i32 = arith.constant 0 : i32
    %c0_i32_0 = arith.constant 0 : i32
    return %arg0, %c0_i32 : i32, i32
  }
  func.func @transform_1(%arg0: i32) -> (i32, i32) {
    %c0_i32 = arith.constant 0 : i32
    %c0_i32_0 = arith.constant 0 : i32
    %c0_i32_1 = arith.constant 0 : i32
    return %c0_i32, %c0_i32_0 : i32, i32
  }
  func.func @transform_2(%arg0: i32) -> (i32, i32) {
    %c0_i32 = arith.constant 0 : i32
    %c0_i32_0 = arith.constant 0 : i32
    %c0_i32_1 = arith.constant 0 : i32
    return %c0_i32, %c0_i32_0 : i32, i32
  }
  func.func @transform_3(%arg0: i32) -> (i32, i32) {
    %c0_i32 = arith.constant 0 : i32
    %c0_i32_0 = arith.constant 0 : i32
    return %arg0, %c0_i32 : i32, i32
  }
}

</mosaic_0001>

<bundles_post_ra>
// kernel: discriminator_forward.5
= control target key start
LH: loop header
LB: loop body
LE: loop exit
PB: predicated region body
PF: predicated region fallthrough
CT: control target
= control target key end

     0   :  { %s1924_s1 = inlined_call_operand.vmem [shape: bf16[128,128], index: 1, kind: input, shape index: {}]   ;;  %s1925_s0 = inlined_call_operand.vmem [shape: bf16[512,128], index: 0, kind: input, shape index: {}]   ;;  %s1926_s2 = inlined_call_operand.vmem [shape: f32[1,128], index: 2, kind: input, shape index: {}]   ;;  %s1927_s3 = inlined_call_operand.vmem [shape: bf16[512,128], index: 3, kind: output, shape index: {}]  }
   0x1   :  { %v1579_v0 = vld [vmem:[%s1924_s1] sm:$0xff]   ;;  %v1580_v1 = vld [vmem:[%s1924_s1 + $0x8] sm:$0xff]   ;;  %v1581_v2 = vld [vmem:[%s1924_s1 + $0x10] sm:$0xff]  }
   0x2   :  { %1483 = vmatprep.subr.bf16.mxu0 %v1579_v0  ;;  %1563 = vmatprep.subr.bf16.mxu1 %v1579_v0  ;;  %v1582_v3 = vld [vmem:[%s1924_s1 + $0x18] sm:$0xff]   ;;  %v1587_v4 = vld [vmem:[%s1925_s0] sm:$0xff]   ;;  %v1584_v7 = vld [vmem:[%s1924_s1 + $0x28] sm:$0xff]  }
   0x3   :  { %1484 = vmatpush3.bf16.msra.mxu0 %v1579_v0  ;;  %1571 = vmatpush3.bf16.msra.mxu1 %v1579_v0  ;;  %v1588_v5 = vld [vmem:[%s1925_s0 + $0x80] sm:$0xff]   ;;  %v1585_v8 = vld [vmem:[%s1924_s1 + $0x30] sm:$0xff]   ;;  %v1586_v9 = vld [vmem:[%s1924_s1 + $0x38] sm:$0xff]  }
   0x4   :  { %1485 = vmatprep.subr.bf16.mxu0 %v1580_v1  ;;  %1564 = vmatprep.subr.bf16.mxu1 %v1580_v1  ;;  %v1583_v6 = vld [vmem:[%s1924_s1 + $0x20] sm:$0xff]   ;;  %v1589_v10 = vld [vmem:[%s1925_s0 + $0x8] sm:$0xff]   ;;  %v1591_v12 = vld [vmem:[%s1925_s0 + $0x10] sm:$0xff]  }
   0x5   :  { %1499 = vmatprep.mubr.bf16.mxu0 %v1587_v4  ;;  %1531 = vmatprep.mubr.bf16.mxu1 %v1588_v5  ;;  %v1590_v11 = vld [vmem:[%s1925_s0 + $0x88] sm:$0xff]   ;;  %v1592_v13 = vld [vmem:[%s1925_s0 + $0x90] sm:$0xff]   ;;  %v1593_v14 = vld [vmem:[%s1925_s0 + $0x18] sm:$0xff]  }
   0x6   :  { %v1594_v15 = vld [vmem:[%s1925_s0 + $0x98] sm:$0xff]   ;;  %v1595_v16 = vld [vmem:[%s1925_s0 + $0x20] sm:$0xff]   ;;  %v1597_v18 = vld [vmem:[%s1925_s0 + $0x28] sm:$0xff]  }
   0x7   :  { %1486 = vmatpush3.bf16.msra.mxu0 %v1580_v1  ;;  %1572 = vmatpush3.bf16.msra.mxu1 %v1580_v1  ;;  %v1596_v17 = vld [vmem:[%s1925_s0 + $0xa0] sm:$0xff]   ;;  %v1598_v19 = vld [vmem:[%s1925_s0 + $0xa8] sm:$0xff]   ;;  %v1599_v20 = vld [vmem:[%s1925_s0 + $0x30] sm:$0xff]  }
   0x8   :  { %1487 = vmatprep.subr.bf16.mxu0 %v1581_v2  ;;  %1565 = vmatprep.subr.bf16.mxu1 %v1581_v2  ;;  %v1600_v21 = vld [vmem:[%s1925_s0 + $0xb0] sm:$0xff]   ;;  %v1601_v22 = vld [vmem:[%s1925_s0 + $0x38] sm:$0xff]   ;;  %v1603_v24 = vld [vmem:[%s1925_s0 + $0x40] sm:$0xff]  }
   0x9   :  { %v1602_v23 = vld [vmem:[%s1925_s0 + $0xb8] sm:$0xff]   ;;  %v1604_v25 = vld [vmem:[%s1925_s0 + $0xc0] sm:$0xff]   ;;  %v1605_v26 = vld [vmem:[%s1925_s0 + $0x48] sm:$0xff]  }
   0xa   :  { %v1606_v27 = vld [vmem:[%s1925_s0 + $0xc8] sm:$0xff]   ;;  %v1607_v28 = vld [vmem:[%s1925_s0 + $0x50] sm:$0xff]   ;;  %v1609_v30 = vld [vmem:[%s1925_s0 + $0x58] sm:$0xff]  }
   0xb   :  { %1488 = vmatpush3.bf16.msra.mxu0 %v1581_v2  ;;  %1573 = vmatpush3.bf16.msra.mxu1 %v1581_v2  ;;  %v1608_v29 = vld [vmem:[%s1925_s0 + $0xd0] sm:$0xff]   ;;  %v1610_v31 = vld [vmem:[%s1925_s0 + $0xd8] sm:$0xff]   ;;  %v1611_v32 = vld [vmem:[%s1925_s0 + $0x60] sm:$0xff]  }
   0xc   :  { %1489 = vmatprep.subr.bf16.mxu0 %v1582_v3  ;;  %1566 = vmatprep.subr.bf16.mxu1 %v1582_v3  ;;  %v1612_v33 = vld [vmem:[%s1925_s0 + $0xe0] sm:$0xff]   ;;  %v1613_v34 = vld [vmem:[%s1925_s0 + $0x68] sm:$0xff]   ;;  %v1615_v36 = vld [vmem:[%s1925_s0 + $0x70] sm:$0xff]  }
   0xd   :  { %v1614_v35 = vld [vmem:[%s1925_s0 + $0xe8] sm:$0xff]   ;;  %v1616_v37 = vld [vmem:[%s1925_s0 + $0xf0] sm:$0xff]   ;;  %v1617_v38 = vld [vmem:[%s1925_s0 + $0x78] sm:$0xff]  }
   0xe   :  { %v1618_v39 = vld [vmem:[%s1925_s0 + $0xf8] sm:$0xff]   ;;  %v1762_v40 = vld [vmem:[%s1926_s2] ss:$0 sm:$0xff] }
   0xf   :  { %1490 = vmatpush3.bf16.msra.mxu0 %v1582_v3  ;;  %1574 = vmatpush3.bf16.msra.mxu1 %v1582_v3 }
  0x10   :  { %1491 = vmatprep.subr.bf16.mxu0 %v1583_v6  ;;  %1567 = vmatprep.subr.bf16.mxu1 %v1583_v6 }
  0x13   :  { %1492 = vmatpush3.bf16.msra.mxu0 %v1583_v6  ;;  %1575 = vmatpush3.bf16.msra.mxu1 %v1583_v6 }
  0x14   :  { %1493 = vmatprep.subr.bf16.mxu0 %v1584_v7  ;;  %1568 = vmatprep.subr.bf16.mxu1 %v1584_v7 }
  0x17   :  { %1494 = vmatpush3.bf16.msra.mxu0 %v1584_v7  ;;  %1576 = vmatpush3.bf16.msra.mxu1 %v1584_v7 }
  0x18   :  { %1495 = vmatprep.subr.bf16.mxu0 %v1585_v8  ;;  %1569 = vmatprep.subr.bf16.mxu1 %v1585_v8 }
  0x1b   :  { %1496 = vmatpush3.bf16.msra.mxu0 %v1585_v8  ;;  %1577 = vmatpush3.bf16.msra.mxu1 %v1585_v8 }
  0x1c   :  { %1497 = vmatprep.subr.bf16.mxu0 %v1586_v9  ;;  %1570 = vmatprep.subr.bf16.mxu1 %v1586_v9 }
  0x1f   :  { %1498 = vmatpush3.bf16.msra.mxu0 %v1586_v9  ;;  %1578 = vmatpush3.bf16.msra.mxu1 %v1586_v9 }
  0x22   :  { %1500 = vmatmul.mubr.bf16.vlgmr.msra.gmra.mrb[0].mxu0 %v1589_v10  ;;  %1532 = vmatmul.mubr.bf16.vlgmr.msra.gmra.mrb[0].mxu1 %v1590_v11 }
  0x23   :  { %1503 = vmatprep.mubr.bf16.mxu0 %v1591_v12  ;;  %1535 = vmatprep.mubr.bf16.mxu1 %v1592_v13 }
  0x2a   :  { %1504 = vmatmul.mubr.bf16.gmra.mrb[4].mxu0 %v1593_v14  ;;  %1536 = vmatmul.mubr.bf16.gmra.mrb[4].mxu1 %v1594_v15 }
  0x2b   :  { %1507 = vmatprep.mubr.bf16.mxu0 %v1595_v16  ;;  %1539 = vmatprep.mubr.bf16.mxu1 %v1596_v17 }
  0x32   :  { %1508 = vmatmul.mubr.bf16.gmra.mrb[8].mxu0 %v1597_v18  ;;  %1540 = vmatmul.mubr.bf16.gmra.mrb[8].mxu1 %v1598_v19 }
  0x33   :  { %1511 = vmatprep.mubr.bf16.mxu0 %v1599_v20  ;;  %1543 = vmatprep.mubr.bf16.mxu1 %v1600_v21 }
  0x3a   :  { %1512 = vmatmul.mubr.bf16.gmra.mrb[12].mxu0 %v1601_v22  ;;  %1544 = vmatmul.mubr.bf16.gmra.mrb[12].mxu1 %v1602_v23 }
  0x3b   :  { %1515 = vmatprep.mubr.bf16.mxu0 %v1603_v24  ;;  %1547 = vmatprep.mubr.bf16.mxu1 %v1604_v25 }
  0x42   :  { %1516 = vmatmul.mubr.bf16.gmra.mrb[16].mxu0 %v1605_v26  ;;  %1548 = vmatmul.mubr.bf16.gmra.mrb[16].mxu1 %v1606_v27 }
  0x43   :  { %1519 = vmatprep.mubr.bf16.mxu0 %v1607_v28  ;;  %1551 = vmatprep.mubr.bf16.mxu1 %v1608_v29 }
  0x4a   :  { %1520 = vmatmul.mubr.bf16.gmra.mrb[20].mxu0 %v1609_v30  ;;  %1552 = vmatmul.mubr.bf16.gmra.mrb[20].mxu1 %v1610_v31 }
  0x4b   :  { %1523 = vmatprep.mubr.bf16.mxu0 %v1611_v32  ;;  %1555 = vmatprep.mubr.bf16.mxu1 %v1612_v33 }
  0x52   :  { %1524 = vmatmul.mubr.bf16.gmra.mrb[24].mxu0 %v1613_v34  ;;  %1556 = vmatmul.mubr.bf16.gmra.mrb[24].mxu1 %v1614_v35 }
  0x53   :  { %1527 = vmatprep.mubr.bf16.mxu0 %v1615_v36  ;;  %1559 = vmatprep.mubr.bf16.mxu1 %v1616_v37 }
  0x5a   :  { %1528 = vmatmul.mubr.bf16.gmra.mrb[28].mxu0 %v1617_v38  ;;  %1560 = vmatmul.mubr.bf16.gmra.mrb[28].mxu1 %v1618_v39 }
  0xf5   :  { %v1501_v41 = vpop.f32.mrb[0].mxu0  ;;  %v1533_v42 = vpop.f32.mrb[0].mxu1 }
  0xf6   :  { %v385_v43 = vadd.f32 %v1501_v41, %v1762_v40  ;;  %v513_v44 = vadd.f32 %v1533_v42, %v1762_v40  ;;  %v376_v45 = vpop.f32.mrb[1].mxu0  ;;  %v504_v46 = vpop.f32.mrb[1].mxu1 }
  0xf7   :  { %v377_v47 = vadd.f32 %v1762_v40, %v376_v45  ;;  %v505_v48 = vadd.f32 %v1762_v40, %v504_v46  ;;  %v1502_v49 = vpop.f32.mrb[2].mxu0  ;;  %v1534_v50 = vpop.f32.mrb[2].mxu1 }
  0xf8   :  { %v633_v51 = vmul.f32 0.01, %v385_v43  ;;  %v665_v52 = vmul.f32 0.01, %v513_v44  ;;  %v388_v53 = vadd.f32 %v1502_v49, %v1762_v40  ;;  %v516_v54 = vadd.f32 %v1534_v50, %v1762_v40  ;;  %v379_v55 = vpop.f32.mrb[3].mxu0  ;;  %v507_v56 = vpop.f32.mrb[3].mxu1 }
  0xf9   :  { %v631_v57 = vmul.f32 0.01, %v377_v47  ;;  %v663_v58 = vmul.f32 0.01, %v505_v48  ;;  %v380_v59 = vadd.f32 %v1762_v40, %v379_v55  ;;  %v508_v60 = vadd.f32 %v1762_v40, %v507_v56 }
  0xfa   :  { %v634_v61 = vmul.f32 0.01, %v388_v53  ;;  %v666_v62 = vmul.f32 0.01, %v516_v54  ;;  %v697_v1 = vmax.f32 %v385_v43, %v633_v51  ;;  %v729_v2 = vmax.f32 %v513_v44, %v665_v52 }
  0xfb   :  { %v632_v63 = vmul.f32 0.01, %v380_v59  ;;  %v664_v0 = vmul.f32 0.01, %v508_v60  ;;  %v695_v5 = vmax.f32 %v377_v47, %v631_v57  ;;  %v727_v6 = vmax.f32 %v505_v48, %v663_v58 }
  0xfc   :  { %v698_v3 = vmax.f32 %v388_v53, %v634_v61  ;;  %v730_v4 = vmax.f32 %v516_v54, %v666_v62 }
  0xfd   :  { %v696_v7 = vmax.f32 %v380_v59, %v632_v63  ;;  %v728_v8 = vmax.f32 %v508_v60, %v664_v0  ;;  %v1505_v9 = vpop.f32.mrb[4].mxu0  ;;  %v1537_v10 = vpop.f32.mrb[4].mxu1 }
  0xfe   :  { %v1260_v11 = vpack.c.bf16 %v698_v3, %v697_v1  ;;  %v1340_v12 = vpack.c.bf16 %v730_v4, %v729_v2  ;;  %v401_v13 = vadd.f32 %v1505_v9, %v1762_v40  ;;  %v529_v14 = vadd.f32 %v1537_v10, %v1762_v40  ;;  %v392_v15 = vpop.f32.mrb[5].mxu0  ;;  %v520_v16 = vpop.f32.mrb[5].mxu1 }
  0xff   :  { %v1255_v17 = vpack.c.bf16 %v696_v7, %v695_v5  ;;  %v1335_v18 = vpack.c.bf16 %v728_v8, %v727_v6  ;;  %v393_v19 = vadd.f32 %v1762_v40, %v392_v15  ;;  %v521_v20 = vadd.f32 %v1762_v40, %v520_v16  ;;  %v1506_v21 = vpop.f32.mrb[6].mxu0  ;;  %v1538_v22 = vpop.f32.mrb[6].mxu1 }
 0x100   :  { %1412 = vst [vmem:[%s1927_s3 + $0x8] sm:$0xff] %v1260_v11   ;;  %1428 = vst [vmem:[%s1927_s3 + $0x88] sm:$0xff] %v1340_v12   ;;  %v637_v23 = vmul.f32 0.01, %v401_v13  ;;  %v669_v24 = vmul.f32 0.01, %v529_v14  ;;  %v404_v25 = vadd.f32 %v1506_v21, %v1762_v40  ;;  %v532_v26 = vadd.f32 %v1538_v22, %v1762_v40 }
 0x101   :  { %v395_v27 = vpop.f32.mrb[7].mxu0  ;;  %v523_v28 = vpop.f32.mrb[7].mxu1  ;;  %1256 = vst [vmem:[%s1927_s3] sm:$0xff] %v1255_v17   ;;  %1427 = vst [vmem:[%s1927_s3 + $0x80] sm:$0xff] %v1335_v18   ;;  %v635_v29 = vmul.f32 0.01, %v393_v19 }
 0x102   :  { %v667_v30 = vmul.f32 0.01, %v521_v20  ;;  %v396_v31 = vadd.f32 %v1762_v40, %v395_v27  ;;  %v524_v32 = vadd.f32 %v1762_v40, %v523_v28  ;;  %v638_v33 = vmul.f32 0.01, %v404_v25 }
 0x103   :  { %v670_v34 = vmul.f32 0.01, %v532_v26  ;;  %v701_v37 = vmax.f32 %v401_v13, %v637_v23  ;;  %v733_v38 = vmax.f32 %v529_v14, %v669_v24  ;;  %v699_v42 = vmax.f32 %v393_v19, %v635_v29 }
 0x104   :  { %v636_v35 = vmul.f32 0.01, %v396_v31  ;;  %v668_v36 = vmul.f32 0.01, %v524_v32  ;;  %v702_v39 = vmax.f32 %v404_v25, %v638_v33  ;;  %v731_v43 = vmax.f32 %v521_v20, %v667_v30 }
 0x105   :  { %v734_v41 = vmax.f32 %v532_v26, %v670_v34  ;;  %v1509_v46 = vpop.f32.mrb[8].mxu0  ;;  %v1541_v47 = vpop.f32.mrb[8].mxu1 }
 0x106   :  { %v700_v44 = vmax.f32 %v396_v31, %v636_v35  ;;  %v732_v45 = vmax.f32 %v524_v32, %v668_v36  ;;  %v1270_v48 = vpack.c.bf16 %v702_v39, %v701_v37  ;;  %v417_v50 = vadd.f32 %v1509_v46, %v1762_v40  ;;  %v408_v52 = vpop.f32.mrb[9].mxu0  ;;  %v536_v53 = vpop.f32.mrb[9].mxu1 }
 0x107   :  { %v1350_v49 = vpack.c.bf16 %v734_v41, %v733_v38  ;;  %v545_v51 = vadd.f32 %v1541_v47, %v1762_v40  ;;  %v409_v56 = vadd.f32 %v1762_v40, %v408_v52  ;;  %v537_v57 = vadd.f32 %v1762_v40, %v536_v53  ;;  %v1510_v58 = vpop.f32.mrb[10].mxu0  ;;  %v1542_v59 = vpop.f32.mrb[10].mxu1 }
 0x108   :  { %v1265_v54 = vpack.c.bf16 %v700_v44, %v699_v42  ;;  %v1345_v55 = vpack.c.bf16 %v732_v45, %v731_v43  ;;  %1414 = vst [vmem:[%s1927_s3 + $0x18] sm:$0xff] %v1270_v48   ;;  %v641_v60 = vmul.f32 0.01, %v417_v50  ;;  %v420_v62 = vadd.f32 %v1510_v58, %v1762_v40  ;;  %v411_v0 = vpop.f32.mrb[11].mxu0  ;;  %v539_v1 = vpop.f32.mrb[11].mxu1 }
 0x109   :  { %1430 = vst [vmem:[%s1927_s3 + $0x98] sm:$0xff] %v1350_v49   ;;  %v673_v61 = vmul.f32 0.01, %v545_v51  ;;  %v548_v63 = vadd.f32 %v1542_v59, %v1762_v40  ;;  %v639_v2 = vmul.f32 0.01, %v409_v56  ;;  %v412_v4 = vadd.f32 %v1762_v40, %v411_v0 }
 0x10a   :  { %1413 = vst [vmem:[%s1927_s3 + $0x10] sm:$0xff] %v1265_v54   ;;  %1429 = vst [vmem:[%s1927_s3 + $0x90] sm:$0xff] %v1345_v55   ;;  %v671_v3 = vmul.f32 0.01, %v537_v57  ;;  %v540_v5 = vadd.f32 %v1762_v40, %v539_v1  ;;  %v642_v6 = vmul.f32 0.01, %v420_v62  ;;  %v705_v10 = vmax.f32 %v417_v50, %v641_v60 }
 0x10b   :  { %v674_v7 = vmul.f32 0.01, %v548_v63  ;;  %v640_v8 = vmul.f32 0.01, %v412_v4  ;;  %v737_v11 = vmax.f32 %v545_v51, %v673_v61  ;;  %v703_v14 = vmax.f32 %v409_v56, %v639_v2 }
 0x10c   :  { %v672_v9 = vmul.f32 0.01, %v540_v5  ;;  %v706_v12 = vmax.f32 %v420_v62, %v642_v6  ;;  %v735_v15 = vmax.f32 %v537_v57, %v671_v3 }
 0x10d   :  { %v738_v13 = vmax.f32 %v548_v63, %v674_v7  ;;  %v704_v16 = vmax.f32 %v412_v4, %v640_v8  ;;  %v1513_v18 = vpop.f32.mrb[12].mxu0  ;;  %v1545_v19 = vpop.f32.mrb[12].mxu1 }
 0x10e   :  { %v736_v17 = vmax.f32 %v540_v5, %v672_v9  ;;  %v1280_v20 = vpack.c.bf16 %v706_v12, %v705_v10  ;;  %v433_v22 = vadd.f32 %v1513_v18, %v1762_v40  ;;  %v561_v23 = vadd.f32 %v1545_v19, %v1762_v40  ;;  %v424_v24 = vpop.f32.mrb[13].mxu0  ;;  %v552_v25 = vpop.f32.mrb[13].mxu1 }
 0x10f   :  { %v1360_v21 = vpack.c.bf16 %v738_v13, %v737_v11  ;;  %v1275_v26 = vpack.c.bf16 %v704_v16, %v703_v14  ;;  %v425_v28 = vadd.f32 %v1762_v40, %v424_v24  ;;  %v553_v29 = vadd.f32 %v1762_v40, %v552_v25  ;;  %v1514_v30 = vpop.f32.mrb[14].mxu0  ;;  %v1546_v31 = vpop.f32.mrb[14].mxu1 }
 0x110   :  { %v1355_v27 = vpack.c.bf16 %v736_v17, %v735_v15  ;;  %1416 = vst [vmem:[%s1927_s3 + $0x28] sm:$0xff] %v1280_v20   ;;  %v645_v32 = vmul.f32 0.01, %v433_v22  ;;  %v677_v33 = vmul.f32 0.01, %v561_v23  ;;  %v436_v34 = vadd.f32 %v1514_v30, %v1762_v40  ;;  %v427_v36 = vpop.f32.mrb[15].mxu0 }
 0x111   :  { %1432 = vst [vmem:[%s1927_s3 + $0xa8] sm:$0xff] %v1360_v21   ;;  %v564_v35 = vadd.f32 %v1546_v31, %v1762_v40  ;;  %v555_v37 = vpop.f32.mrb[15].mxu1  ;;  %1415 = vst [vmem:[%s1927_s3 + $0x20] sm:$0xff] %v1275_v26   ;;  %v643_v38 = vmul.f32 0.01, %v425_v28  ;;  %v428_v41 = vadd.f32 %v1762_v40, %v427_v36 }
 0x112   :  { %1431 = vst [vmem:[%s1927_s3 + $0xa0] sm:$0xff] %v1355_v27   ;;  %v675_v39 = vmul.f32 0.01, %v553_v29  ;;  %v556_v42 = vadd.f32 %v1762_v40, %v555_v37  ;;  %v646_v43 = vmul.f32 0.01, %v436_v34  ;;  %v709_v47 = vmax.f32 %v433_v22, %v645_v32 }
 0x113   :  { %v678_v44 = vmul.f32 0.01, %v564_v35  ;;  %v644_v45 = vmul.f32 0.01, %v428_v41  ;;  %v741_v48 = vmax.f32 %v561_v23, %v677_v33  ;;  %v707_v51 = vmax.f32 %v425_v28, %v643_v38 }
 0x114   :  { %v676_v46 = vmul.f32 0.01, %v556_v42  ;;  %v710_v49 = vmax.f32 %v436_v34, %v646_v43  ;;  %v739_v52 = vmax.f32 %v553_v29, %v675_v39 }
 0x115   :  { %v742_v50 = vmax.f32 %v564_v35, %v678_v44  ;;  %v708_v53 = vmax.f32 %v428_v41, %v644_v45  ;;  %v1517_v55 = vpop.f32.mrb[16].mxu0  ;;  %v1549_v56 = vpop.f32.mrb[16].mxu1 }
 0x116   :  { %v740_v54 = vmax.f32 %v556_v42, %v676_v46  ;;  %v1290_v57 = vpack.c.bf16 %v710_v49, %v709_v47  ;;  %v449_v59 = vadd.f32 %v1517_v55, %v1762_v40  ;;  %v577_v60 = vadd.f32 %v1549_v56, %v1762_v40  ;;  %v440_v61 = vpop.f32.mrb[17].mxu0  ;;  %v568_v62 = vpop.f32.mrb[17].mxu1 }
 0x117   :  { %v1370_v58 = vpack.c.bf16 %v742_v50, %v741_v48  ;;  %v1285_v63 = vpack.c.bf16 %v708_v53, %v707_v51  ;;  %v441_v1 = vadd.f32 %v1762_v40, %v440_v61  ;;  %v569_v2 = vadd.f32 %v1762_v40, %v568_v62  ;;  %v1518_v3 = vpop.f32.mrb[18].mxu0  ;;  %v1550_v4 = vpop.f32.mrb[18].mxu1 }
 0x118   :  { %v1365_v0 = vpack.c.bf16 %v740_v54, %v739_v52  ;;  %1418 = vst [vmem:[%s1927_s3 + $0x38] sm:$0xff] %v1290_v57   ;;  %v649_v5 = vmul.f32 0.01, %v449_v59  ;;  %v681_v6 = vmul.f32 0.01, %v577_v60  ;;  %v452_v7 = vadd.f32 %v1518_v3, %v1762_v40  ;;  %v443_v9 = vpop.f32.mrb[19].mxu0 }
 0x119   :  { %1434 = vst [vmem:[%s1927_s3 + $0xb8] sm:$0xff] %v1370_v58   ;;  %v580_v8 = vadd.f32 %v1550_v4, %v1762_v40  ;;  %v571_v10 = vpop.f32.mrb[19].mxu1  ;;  %1417 = vst [vmem:[%s1927_s3 + $0x30] sm:$0xff] %v1285_v63   ;;  %v647_v11 = vmul.f32 0.01, %v441_v1  ;;  %v444_v13 = vadd.f32 %v1762_v40, %v443_v9 }
 0x11a   :  { %1433 = vst [vmem:[%s1927_s3 + $0xb0] sm:$0xff] %v1365_v0   ;;  %v679_v12 = vmul.f32 0.01, %v569_v2  ;;  %v572_v14 = vadd.f32 %v1762_v40, %v571_v10  ;;  %v650_v15 = vmul.f32 0.01, %v452_v7  ;;  %v713_v19 = vmax.f32 %v449_v59, %v649_v5 }
 0x11b   :  { %v682_v16 = vmul.f32 0.01, %v580_v8  ;;  %v648_v17 = vmul.f32 0.01, %v444_v13  ;;  %v745_v20 = vmax.f32 %v577_v60, %v681_v6  ;;  %v711_v23 = vmax.f32 %v441_v1, %v647_v11 }
 0x11c   :  { %v680_v18 = vmul.f32 0.01, %v572_v14  ;;  %v714_v21 = vmax.f32 %v452_v7, %v650_v15  ;;  %v743_v24 = vmax.f32 %v569_v2, %v679_v12 }
 0x11d   :  { %v746_v22 = vmax.f32 %v580_v8, %v682_v16  ;;  %v712_v25 = vmax.f32 %v444_v13, %v648_v17  ;;  %v1521_v27 = vpop.f32.mrb[20].mxu0  ;;  %v1553_v28 = vpop.f32.mrb[20].mxu1 }
 0x11e   :  { %v744_v26 = vmax.f32 %v572_v14, %v680_v18  ;;  %v1300_v29 = vpack.c.bf16 %v714_v21, %v713_v19  ;;  %v465_v31 = vadd.f32 %v1521_v27, %v1762_v40  ;;  %v593_v32 = vadd.f32 %v1553_v28, %v1762_v40  ;;  %v456_v33 = vpop.f32.mrb[21].mxu0  ;;  %v584_v34 = vpop.f32.mrb[21].mxu1 }
 0x11f   :  { %v1380_v30 = vpack.c.bf16 %v746_v22, %v745_v20  ;;  %v1295_v35 = vpack.c.bf16 %v712_v25, %v711_v23  ;;  %v457_v37 = vadd.f32 %v1762_v40, %v456_v33  ;;  %v585_v38 = vadd.f32 %v1762_v40, %v584_v34  ;;  %v1522_v39 = vpop.f32.mrb[22].mxu0  ;;  %v1554_v41 = vpop.f32.mrb[22].mxu1 }
 0x120   :  { %v1375_v36 = vpack.c.bf16 %v744_v26, %v743_v24  ;;  %1420 = vst [vmem:[%s1927_s3 + $0x48] sm:$0xff] %v1300_v29   ;;  %v653_v42 = vmul.f32 0.01, %v465_v31  ;;  %v685_v43 = vmul.f32 0.01, %v593_v32  ;;  %v468_v44 = vadd.f32 %v1522_v39, %v1762_v40  ;;  %v459_v46 = vpop.f32.mrb[23].mxu0 }
 0x121   :  { %1436 = vst [vmem:[%s1927_s3 + $0xc8] sm:$0xff] %v1380_v30   ;;  %v596_v45 = vadd.f32 %v1554_v41, %v1762_v40  ;;  %v587_v47 = vpop.f32.mrb[23].mxu1  ;;  %1419 = vst [vmem:[%s1927_s3 + $0x40] sm:$0xff] %v1295_v35   ;;  %v651_v48 = vmul.f32 0.01, %v457_v37  ;;  %v460_v50 = vadd.f32 %v1762_v40, %v459_v46 }
 0x122   :  { %1435 = vst [vmem:[%s1927_s3 + $0xc0] sm:$0xff] %v1375_v36   ;;  %v683_v49 = vmul.f32 0.01, %v585_v38  ;;  %v588_v51 = vadd.f32 %v1762_v40, %v587_v47  ;;  %v654_v52 = vmul.f32 0.01, %v468_v44  ;;  %v717_v56 = vmax.f32 %v465_v31, %v653_v42 }
 0x123   :  { %v686_v53 = vmul.f32 0.01, %v596_v45  ;;  %v652_v54 = vmul.f32 0.01, %v460_v50  ;;  %v749_v57 = vmax.f32 %v593_v32, %v685_v43  ;;  %v715_v60 = vmax.f32 %v457_v37, %v651_v48 }
 0x124   :  { %v684_v55 = vmul.f32 0.01, %v588_v51  ;;  %v718_v58 = vmax.f32 %v468_v44, %v654_v52  ;;  %v747_v61 = vmax.f32 %v585_v38, %v683_v49 }
 0x125   :  { %v750_v59 = vmax.f32 %v596_v45, %v686_v53  ;;  %v716_v62 = vmax.f32 %v460_v50, %v652_v54  ;;  %v1525_v0 = vpop.f32.mrb[24].mxu0  ;;  %v1557_v1 = vpop.f32.mrb[24].mxu1 }
 0x126   :  { %v748_v63 = vmax.f32 %v588_v51, %v684_v55  ;;  %v1310_v2 = vpack.c.bf16 %v718_v58, %v717_v56  ;;  %v481_v4 = vadd.f32 %v1525_v0, %v1762_v40  ;;  %v609_v5 = vadd.f32 %v1557_v1, %v1762_v40  ;;  %v472_v6 = vpop.f32.mrb[25].mxu0  ;;  %v600_v7 = vpop.f32.mrb[25].mxu1 }
 0x127   :  { %v1390_v3 = vpack.c.bf16 %v750_v59, %v749_v57  ;;  %v1305_v8 = vpack.c.bf16 %v716_v62, %v715_v60  ;;  %v473_v10 = vadd.f32 %v1762_v40, %v472_v6  ;;  %v601_v11 = vadd.f32 %v1762_v40, %v600_v7  ;;  %v1526_v12 = vpop.f32.mrb[26].mxu0  ;;  %v1558_v13 = vpop.f32.mrb[26].mxu1 }
 0x128   :  { %v1385_v9 = vpack.c.bf16 %v748_v63, %v747_v61  ;;  %1422 = vst [vmem:[%s1927_s3 + $0x58] sm:$0xff] %v1310_v2   ;;  %v657_v14 = vmul.f32 0.01, %v481_v4  ;;  %v689_v15 = vmul.f32 0.01, %v609_v5  ;;  %v484_v16 = vadd.f32 %v1526_v12, %v1762_v40  ;;  %v475_v18 = vpop.f32.mrb[27].mxu0 }
 0x129   :  { %1438 = vst [vmem:[%s1927_s3 + $0xd8] sm:$0xff] %v1390_v3   ;;  %v612_v17 = vadd.f32 %v1558_v13, %v1762_v40  ;;  %v603_v19 = vpop.f32.mrb[27].mxu1  ;;  %1421 = vst [vmem:[%s1927_s3 + $0x50] sm:$0xff] %v1305_v8   ;;  %v655_v20 = vmul.f32 0.01, %v473_v10  ;;  %v476_v22 = vadd.f32 %v1762_v40, %v475_v18 }
 0x12a   :  { %1437 = vst [vmem:[%s1927_s3 + $0xd0] sm:$0xff] %v1385_v9   ;;  %v687_v21 = vmul.f32 0.01, %v601_v11  ;;  %v604_v23 = vadd.f32 %v1762_v40, %v603_v19  ;;  %v658_v24 = vmul.f32 0.01, %v484_v16  ;;  %v721_v28 = vmax.f32 %v481_v4, %v657_v14 }
 0x12b   :  { %v690_v25 = vmul.f32 0.01, %v612_v17  ;;  %v656_v26 = vmul.f32 0.01, %v476_v22  ;;  %v753_v29 = vmax.f32 %v609_v5, %v689_v15  ;;  %v719_v32 = vmax.f32 %v473_v10, %v655_v20 }
 0x12c   :  { %v688_v27 = vmul.f32 0.01, %v604_v23  ;;  %v722_v30 = vmax.f32 %v484_v16, %v658_v24  ;;  %v751_v33 = vmax.f32 %v601_v11, %v687_v21 }
 0x12d   :  { %v754_v31 = vmax.f32 %v612_v17, %v690_v25  ;;  %v720_v34 = vmax.f32 %v476_v22, %v656_v26  ;;  %v1529_v36 = vpop.f32.mrb[28].mxu0  ;;  %v1561_v37 = vpop.f32.mrb[28].mxu1 }
 0x12e   :  { %v752_v35 = vmax.f32 %v604_v23, %v688_v27  ;;  %v1320_v38 = vpack.c.bf16 %v722_v30, %v721_v28  ;;  %v497_v41 = vadd.f32 %v1529_v36, %v1762_v40  ;;  %v625_v42 = vadd.f32 %v1561_v37, %v1762_v40  ;;  %v488_v43 = vpop.f32.mrb[29].mxu0  ;;  %v616_v44 = vpop.f32.mrb[29].mxu1 }
 0x12f   :  { %v1400_v39 = vpack.c.bf16 %v754_v31, %v753_v29  ;;  %v1315_v45 = vpack.c.bf16 %v720_v34, %v719_v32  ;;  %v489_v47 = vadd.f32 %v1762_v40, %v488_v43  ;;  %v617_v48 = vadd.f32 %v1762_v40, %v616_v44  ;;  %v1530_v49 = vpop.f32.mrb[30].mxu0  ;;  %v1562_v50 = vpop.f32.mrb[30].mxu1 }
 0x130   :  { %v1395_v46 = vpack.c.bf16 %v752_v35, %v751_v33  ;;  %1424 = vst [vmem:[%s1927_s3 + $0x68] sm:$0xff] %v1320_v38   ;;  %v661_v51 = vmul.f32 0.01, %v497_v41  ;;  %v693_v52 = vmul.f32 0.01, %v625_v42  ;;  %v500_v53 = vadd.f32 %v1530_v49, %v1762_v40  ;;  %v491_v55 = vpop.f32.mrb[31].mxu0 }
 0x131   :  { %1440 = vst [vmem:[%s1927_s3 + $0xe8] sm:$0xff] %v1400_v39   ;;  %v628_v54 = vadd.f32 %v1562_v50, %v1762_v40  ;;  %v619_v56 = vpop.f32.mrb[31].mxu1  ;;  %1423 = vst [vmem:[%s1927_s3 + $0x60] sm:$0xff] %v1315_v45   ;;  %v659_v57 = vmul.f32 0.01, %v489_v47  ;;  %v492_v59 = vadd.f32 %v1762_v40, %v491_v55 }
 0x132   :  { %1439 = vst [vmem:[%s1927_s3 + $0xe0] sm:$0xff] %v1395_v46   ;;  %v691_v58 = vmul.f32 0.01, %v617_v48  ;;  %v620_v60 = vadd.f32 %v1762_v40, %v619_v56  ;;  %v662_v61 = vmul.f32 0.01, %v500_v53  ;;  %v725_v1 = vmax.f32 %v497_v41, %v661_v51 }
 0x133   :  { %v694_v62 = vmul.f32 0.01, %v628_v54  ;;  %v660_v63 = vmul.f32 0.01, %v492_v59  ;;  %v757_v2 = vmax.f32 %v625_v42, %v693_v52  ;;  %v723_v5 = vmax.f32 %v489_v47, %v659_v57 }
 0x134   :  { %v692_v0 = vmul.f32 0.01, %v620_v60  ;;  %v726_v3 = vmax.f32 %v500_v53, %v662_v61  ;;  %v755_v6 = vmax.f32 %v617_v48, %v691_v58 }
 0x135   :  { %v758_v4 = vmax.f32 %v628_v54, %v694_v62  ;;  %v724_v7 = vmax.f32 %v492_v59, %v660_v63 }
 0x136   :  { %v756_v8 = vmax.f32 %v620_v60, %v692_v0  ;;  %v1330_v9 = vpack.c.bf16 %v726_v3, %v725_v1 }
 0x137   :  { %v1410_v10 = vpack.c.bf16 %v758_v4, %v757_v2  ;;  %v1325_v11 = vpack.c.bf16 %v724_v7, %v723_v5 }
 0x138   :  { %v1405_v12 = vpack.c.bf16 %v756_v8, %v755_v6  ;;  %1426 = vst [vmem:[%s1927_s3 + $0x78] sm:$0xff] %v1330_v9  }
 0x139   :  { %1442 = vst [vmem:[%s1927_s3 + $0xf8] sm:$0xff] %v1410_v10   ;;  %1425 = vst [vmem:[%s1927_s3 + $0x70] sm:$0xff] %v1325_v11  }
 0x13a   :  { %1441 = vst [vmem:[%s1927_s3 + $0xf0] sm:$0xff] %v1405_v12  }

// kernel: discriminator_forward.6
= control target key start
LH: loop header
LB: loop body
LE: loop exit
PB: predicated region body
PF: predicated region fallthrough
CT: control target
= control target key end

     0   :  { %s2373_s1 = inlined_call_operand.vmem [shape: bf16[1024,128], index: 1, kind: input, shape index: {}]   ;;  %s2374_s0 = inlined_call_operand.vmem [shape: bf16[128,1024], index: 0, kind: input, shape index: {}]   ;;  %s2375_s2 = inlined_call_operand.vmem [shape: f32[1,128], index: 2, kind: input, shape index: {}]   ;;  %s2376_s3 = inlined_call_operand.vmem [shape: f32[128,128], index: 3, kind: output, shape index: {0}]   ;;  %s2377_s4 = inlined_call_operand.vmem [shape: f32[8,128], index: 4, kind: output, shape index: {1}]  }
   0x1   :  { %v1777_v0 = vld [vmem:[%s2373_s1 + $0x40] sm:$0xff]   ;;  %v1781_v4 = vld [vmem:[%s2373_s1 + $0x48] sm:$0xff]   ;;  %v1785_v8 = vld [vmem:[%s2373_s1 + $0x50] sm:$0xff]  }
   0x2   :  { %v1778_v1 = vld [vmem:[%s2373_s1 + $0xc0] sm:$0xff]   ;;  %1521 = vmatprep.subr.bf16.mxu0 %v1777_v0  ;;  %v1782_v5 = vld [vmem:[%s2373_s1 + $0xc8] sm:$0xff]   ;;  %v1786_v9 = vld [vmem:[%s2373_s1 + $0xd0] sm:$0xff]  }
   0x3   :  { %v1779_v2 = vld [vmem:[%s2373_s1] sm:$0xff]   ;;  %1585 = vmatprep.subr.bf16.mxu1 %v1778_v1  ;;  %v1783_v6 = vld [vmem:[%s2373_s1 + $0x8] sm:$0xff]   ;;  %v1787_v10 = vld [vmem:[%s2373_s1 + $0x10] sm:$0xff]  }
   0x4   :  { %v1780_v3 = vld [vmem:[%s2373_s1 + $0x80] sm:$0xff]   ;;  %1522 = vmatpush3.bf16.msra.mxu0 %v1779_v2  ;;  %v1784_v7 = vld [vmem:[%s2373_s1 + $0x88] sm:$0xff]   ;;  %v1788_v11 = vld [vmem:[%s2373_s1 + $0x90] sm:$0xff]  }
   0x5   :  { %1586 = vmatpush3.bf16.msra.mxu1 %v1780_v3  ;;  %1523 = vmatprep.subr.bf16.mxu0 %v1781_v4  ;;  %v1789_v12 = vld [vmem:[%s2373_s1 + $0x58] sm:$0xff]   ;;  %v1793_v16 = vld [vmem:[%s2373_s1 + $0x60] sm:$0xff]   ;;  %v1797_v20 = vld [vmem:[%s2373_s1 + $0x68] sm:$0xff]  }
   0x6   :  { %1587 = vmatprep.subr.bf16.mxu1 %v1782_v5  ;;  %v1790_v13 = vld [vmem:[%s2373_s1 + $0xd8] sm:$0xff]   ;;  %v1794_v17 = vld [vmem:[%s2373_s1 + $0xe0] sm:$0xff]   ;;  %v1798_v21 = vld [vmem:[%s2373_s1 + $0xe8] sm:$0xff]  }
   0x7   :  { %v1791_v14 = vld [vmem:[%s2373_s1 + $0x18] sm:$0xff]   ;;  %v1795_v18 = vld [vmem:[%s2373_s1 + $0x20] sm:$0xff]   ;;  %v1799_v22 = vld [vmem:[%s2373_s1 + $0x28] sm:$0xff]  }
   0x8   :  { %1524 = vmatpush3.bf16.msra.mxu0 %v1783_v6  ;;  %v1792_v15 = vld [vmem:[%s2373_s1 + $0x98] sm:$0xff]   ;;  %v1796_v19 = vld [vmem:[%s2373_s1 + $0xa0] sm:$0xff]   ;;  %v1800_v23 = vld [vmem:[%s2373_s1 + $0xa8] sm:$0xff]  }
   0x9   :  { %1588 = vmatpush3.bf16.msra.mxu1 %v1784_v7  ;;  %1525 = vmatprep.subr.bf16.mxu0 %v1785_v8  ;;  %v1801_v24 = vld [vmem:[%s2373_s1 + $0x70] sm:$0xff]   ;;  %v1805_v28 = vld [vmem:[%s2373_s1 + $0x78] sm:$0xff]   ;;  %v17_v32 = vld [vmem:[%s2374_s0] sm:$0xff] }
   0xa   :  { %1589 = vmatprep.subr.bf16.mxu1 %v1786_v9  ;;  %v1802_v25 = vld [vmem:[%s2373_s1 + $0xf0] sm:$0xff]   ;;  %v1806_v29 = vld [vmem:[%s2373_s1 + $0xf8] sm:$0xff]   ;;  %v21_v33 = vld [vmem:[%s2374_s0 + $0x20] sm:$0xff] }
   0xb   :  { %v1803_v26 = vld [vmem:[%s2373_s1 + $0x30] sm:$0xff]   ;;  %v1807_v30 = vld [vmem:[%s2373_s1 + $0x38] sm:$0xff]   ;;  %v18_v34 = vld [vmem:[%s2374_s0 + $0x8] sm:$0xff]  ;;  %v1393_v35 = vcombine.low %v17_v32, %v21_v33  ;;  %v1394_v36 = vcombine.high %v17_v32, %v21_v33 }
   0xc   :  { %1526 = vmatpush3.bf16.msra.mxu0 %v1787_v10  ;;  %v1804_v27 = vld [vmem:[%s2373_s1 + $0xb0] sm:$0xff]   ;;  %v1808_v31 = vld [vmem:[%s2373_s1 + $0xb8] sm:$0xff]   ;;  %v22_v37 = vld [vmem:[%s2374_s0 + $0x28] sm:$0xff] }
   0xd   :  { %1590 = vmatpush3.bf16.msra.mxu1 %v1788_v11  ;;  %1527 = vmatprep.subr.bf16.mxu0 %v1789_v12  ;;  %v1395_v38 = vcombine.low %v18_v34, %v22_v37  ;;  %v1396_v39 = vcombine.high %v18_v34, %v22_v37  ;;  %v1809_v40 = vld [vmem:[%s2373_s1 + $0x140] sm:$0xff]   ;;  %v26_v47 = vld [vmem:[%s2374_s0 + $0x48] sm:$0xff]  ;;  %v1817_v62 = vld [vmem:[%s2373_s1 + $0x150] sm:$0xff]  }
   0xe   :  { %1591 = vmatprep.subr.bf16.mxu1 %v1790_v13  ;;  %952 = vmatprep.mubr.bf16.mxu0 %v1394_v36  ;;  %v1810_v41 = vld [vmem:[%s2373_s1 + $0x100] sm:$0xff]   ;;  %v30_v48 = vld [vmem:[%s2374_s0 + $0x68] sm:$0xff]  ;;  %v1818_v63 = vld [vmem:[%s2373_s1 + $0x110] sm:$0xff]  }
   0xf   :  { %1049 = vmatprep.mubr.bf16.mxu1 %v1396_v39  ;;  %v1811_v42 = vld [vmem:[%s2373_s1 + $0x1c0] sm:$0xff]   ;;  %v1404_v49 = vcombine.high %v26_v47, %v30_v48  ;;  %v1813_v50 = vld [vmem:[%s2373_s1 + $0x148] sm:$0xff]   ;;  %v1403_v53 = vcombine.low %v26_v47, %v30_v48  ;;  %v1819_v0 = vld [vmem:[%s2373_s1 + $0x1d0] sm:$0xff]  }
  0x10   :  { %1528 = vmatpush3.bf16.msra.mxu0 %v1791_v14  ;;  %v1812_v43 = vld [vmem:[%s2373_s1 + $0x180] sm:$0xff]   ;;  %v1814_v52 = vld [vmem:[%s2373_s1 + $0x108] sm:$0xff]   ;;  %v1820_v1 = vld [vmem:[%s2373_s1 + $0x190] sm:$0xff]  }
  0x11   :  { %1592 = vmatpush3.bf16.msra.mxu1 %v1792_v15  ;;  %1529 = vmatprep.subr.bf16.mxu0 %v1793_v16  ;;  %v25_v44 = vld [vmem:[%s2374_s0 + $0x40] sm:$0xff]  ;;  %v1815_v54 = vld [vmem:[%s2373_s1 + $0x1c8] sm:$0xff]   ;;  %v1821_v10 = vld [vmem:[%s2373_s1 + $0x158] sm:$0xff]  }
  0x12   :  { %1593 = vmatprep.subr.bf16.mxu1 %v1794_v17  ;;  %v29_v45 = vld [vmem:[%s2374_s0 + $0x60] sm:$0xff]  ;;  %v1816_v55 = vld [vmem:[%s2373_s1 + $0x188] sm:$0xff]   ;;  %v1822_v11 = vld [vmem:[%s2373_s1 + $0x118] sm:$0xff]  }
  0x13   :  { %v1402_v46 = vcombine.high %v25_v44, %v29_v45  ;;  %v1401_v51 = vcombine.low %v25_v44, %v29_v45  ;;  %v33_v56 = vld [vmem:[%s2374_s0 + $0x80] sm:$0xff]  ;;  %v34_v58 = vld [vmem:[%s2374_s0 + $0x88] sm:$0xff]  ;;  %v1823_v12 = vld [vmem:[%s2373_s1 + $0x1d8] sm:$0xff]  }
  0x14   :  { %1530 = vmatpush3.bf16.msra.mxu0 %v1795_v18  ;;  %v37_v57 = vld [vmem:[%s2374_s0 + $0xa0] sm:$0xff]  ;;  %v38_v59 = vld [vmem:[%s2374_s0 + $0xa8] sm:$0xff]  ;;  %v1824_v13 = vld [vmem:[%s2373_s1 + $0x198] sm:$0xff]  }
  0x15   :  { %1594 = vmatpush3.bf16.msra.mxu1 %v1796_v19  ;;  %1531 = vmatprep.subr.bf16.mxu0 %v1797_v20  ;;  %v1410_v60 = vcombine.high %v33_v56, %v37_v57  ;;  %v1412_v61 = vcombine.high %v34_v58, %v38_v59  ;;  %v1409_v2 = vcombine.low %v33_v56, %v37_v57  ;;  %v41_v3 = vld [vmem:[%s2374_s0 + $0xc0] sm:$0xff]  ;;  %v42_v5 = vld [vmem:[%s2374_s0 + $0xc8] sm:$0xff]  ;;  %v1834_v39 = vld [vmem:[%s2373_s1 + $0x130] sm:$0xff]  }
  0x16   :  { %1595 = vmatprep.subr.bf16.mxu1 %v1798_v21  ;;  %v45_v4 = vld [vmem:[%s2374_s0 + $0xe0] sm:$0xff]  ;;  %v1411_v6 = vcombine.low %v34_v58, %v38_v59  ;;  %v46_v8 = vld [vmem:[%s2374_s0 + $0xe8] sm:$0xff]  ;;  %v1838_v48 = vld [vmem:[%s2373_s1 + $0x138] sm:$0xff]  }
  0x17   :  { %v1418_v7 = vcombine.high %v41_v3, %v45_v4  ;;  %v1420_v9 = vcombine.high %v42_v5, %v46_v8  ;;  %v49_v14 = vld [vmem:[%s2374_s0 + $0x100] sm:$0xff]  ;;  %v50_v16 = vld [vmem:[%s2374_s0 + $0x108] sm:$0xff]  ;;  %v1417_v19 = vcombine.low %v41_v3, %v45_v4  ;;  %v1419_v21 = vcombine.low %v42_v5, %v46_v8  ;;  %v28_v8 = vld [vmem:[%s2374_s0 + $0x58] sm:$0xff] }
  0x18   :  { %1532 = vmatpush3.bf16.msra.mxu0 %v1799_v22  ;;  %v53_v15 = vld [vmem:[%s2374_s0 + $0x120] sm:$0xff]  ;;  %v54_v17 = vld [vmem:[%s2374_s0 + $0x128] sm:$0xff] }
  0x19   :  { %1596 = vmatpush3.bf16.msra.mxu1 %v1800_v23  ;;  %1533 = vmatprep.subr.bf16.mxu0 %v1801_v24  ;;  %v1825_v18 = vld [vmem:[%s2373_s1 + $0x160] sm:$0xff]   ;;  %v1426_v22 = vcombine.high %v49_v14, %v53_v15  ;;  %v1428_v24 = vcombine.high %v50_v16, %v54_v17  ;;  %v1831_v32 = vld [vmem:[%s2373_s1 + $0x1e8] sm:$0xff]   ;;  %v1425_v34 = vcombine.low %v49_v14, %v53_v15  ;;  %v35_v14 = vld [vmem:[%s2374_s0 + $0x90] sm:$0xff] }
  0x1a   :  { %1597 = vmatprep.subr.bf16.mxu1 %v1802_v25  ;;  %v1826_v20 = vld [vmem:[%s2373_s1 + $0x120] sm:$0xff]   ;;  %v1832_v33 = vld [vmem:[%s2373_s1 + $0x1a8] sm:$0xff]   ;;  %v39_v15 = vld [vmem:[%s2374_s0 + $0xb0] sm:$0xff] }
  0x1b   :  { %v1827_v23 = vld [vmem:[%s2373_s1 + $0x1e0] sm:$0xff]   ;;  %v66_v44 = vld [vmem:[%s2374_s0 + $0x188] sm:$0xff] }
  0x1c   :  { %1534 = vmatpush3.bf16.msra.mxu0 %v1803_v26  ;;  %v1828_v25 = vld [vmem:[%s2373_s1 + $0x1a0] sm:$0xff]   ;;  %v70_v45 = vld [vmem:[%s2374_s0 + $0x1a8] sm:$0xff] }
  0x1d   :  { %1598 = vmatpush3.bf16.msra.mxu1 %v1804_v27  ;;  %1535 = vmatprep.subr.bf16.mxu0 %v1805_v28  ;;  %v57_v26 = vld [vmem:[%s2374_s0 + $0x140] sm:$0xff]  ;;  %v1829_v28 = vld [vmem:[%s2373_s1 + $0x168] sm:$0xff]   ;;  %v1443_v59 = vcombine.low %v66_v44, %v70_v45 }
  0x1e   :  { %1599 = vmatprep.subr.bf16.mxu1 %v1806_v29  ;;  %v61_v27 = vld [vmem:[%s2374_s0 + $0x160] sm:$0xff]  ;;  %v58_v29 = vld [vmem:[%s2374_s0 + $0x148] sm:$0xff] }
  0x1f   :  { %v1434_v36 = vcombine.high %v57_v26, %v61_v27  ;;  %v1433_v47 = vcombine.low %v57_v26, %v61_v27  ;;  %v74_v56 = vld [vmem:[%s2374_s0 + $0x1c8] sm:$0xff]  ;;  %v1413_v26 = vcombine.low %v35_v14, %v39_v15 }
  0x20   :  { %1536 = vmatpush3.bf16.msra.mxu0 %v1807_v30  ;;  %v62_v30 = vld [vmem:[%s2374_s0 + $0x168] sm:$0xff] }
  0x21   :  { %1600 = vmatpush3.bf16.msra.mxu1 %v1808_v31  ;;  %1649 = vmatprep.subr.bf16.mxu0 %v1809_v40  ;;  %v1830_v31 = vld [vmem:[%s2373_s1 + $0x128] sm:$0xff]   ;;  %v1436_v37 = vcombine.high %v58_v29, %v62_v30  ;;  %v1835_v40 = vld [vmem:[%s2373_s1 + $0x1f0] sm:$0xff]  }
  0x22   :  { %1713 = vmatprep.subr.bf16.mxu1 %v1811_v42  ;;  %v69_v42 = vld [vmem:[%s2374_s0 + $0x1a0] sm:$0xff]  ;;  %v78_v57 = vld [vmem:[%s2374_s0 + $0x1e8] sm:$0xff] }
  0x23   :  { %953 = vmatmul.mubr.bf16.vlgmr.msra.gmra.mrb[0].mxu0 %v1393_v35  ;;  %v1427_v35 = vcombine.low %v50_v16, %v54_v17  ;;  %v1451_v3 = vcombine.low %v74_v56, %v78_v57  ;;  %v36_v16 = vld [vmem:[%s2374_s0 + $0x98] sm:$0xff] }
  0x24   :  { %1050 = vmatmul.mubr.bf16.vlgmr.msra.gmra.mrb[0].mxu1 %v1395_v38  ;;  %1650 = vmatpush3.bf16.msra.mxu0 %v1810_v41  ;;  %v1833_v38 = vld [vmem:[%s2373_s1 + $0x170] sm:$0xff]   ;;  %v65_v41 = vld [vmem:[%s2374_s0 + $0x180] sm:$0xff]  ;;  %v40_v17 = vld [vmem:[%s2374_s0 + $0xb8] sm:$0xff] }
  0x25   :  { %1714 = vmatpush3.bf16.msra.mxu1 %v1812_v43  ;;  %960 = vmatprep.mubr.bf16.mxu0 %v1402_v46  ;;  %v1836_v43 = vld [vmem:[%s2373_s1 + $0x1b0] sm:$0xff]   ;;  %v1837_v46 = vld [vmem:[%s2373_s1 + $0x178] sm:$0xff]   ;;  %v1441_v58 = vcombine.low %v65_v41, %v69_v42  ;;  %v1415_v27 = vcombine.low %v36_v16, %v40_v17 }
  0x26   :  { %1057 = vmatprep.mubr.bf16.mxu1 %v1404_v49  ;;  %1651 = vmatprep.subr.bf16.mxu0 %v1813_v50  ;;  %v1435_v49 = vcombine.low %v58_v29, %v62_v30  ;;  %v1442_v50 = vcombine.high %v65_v41, %v69_v42  ;;  %v51_v30 = vld [vmem:[%s2374_s0 + $0x110] sm:$0xff]  ;;  %v64_v41 = vld [vmem:[%s2374_s0 + $0x178] sm:$0xff] }
  0x27   :  { %1715 = vmatprep.subr.bf16.mxu1 %v1815_v54  ;;  %v73_v54 = vld [vmem:[%s2374_s0 + $0x1c0] sm:$0xff] }
  0x28   :  { %1652 = vmatpush3.bf16.msra.mxu0 %v1814_v52  ;;  %v1444_v52 = vcombine.high %v66_v44, %v70_v45 }
  0x29   :  { %1716 = vmatpush3.bf16.msra.mxu1 %v1816_v55  ;;  %1653 = vmatprep.subr.bf16.mxu0 %v1817_v62  ;;  %v77_v55 = vld [vmem:[%s2374_s0 + $0x1e0] sm:$0xff]  ;;  %v19_v62 = vld [vmem:[%s2374_s0 + $0x10] sm:$0xff] }
  0x2a   :  { %1717 = vmatprep.subr.bf16.mxu1 %v1819_v0  ;;  %v20_v0 = vld [vmem:[%s2374_s0 + $0x18] sm:$0xff] }
  0x2b   :  { %961 = vmatmul.mubr.bf16.gmra.mrb[4].mxu0 %v1401_v51  ;;  %v1839_v51 = vld [vmem:[%s2373_s1 + $0x1f8] sm:$0xff]  }
  0x2c   :  { %1058 = vmatmul.mubr.bf16.gmra.mrb[4].mxu1 %v1403_v53  ;;  %968 = vmatprep.mubr.bf16.mxu0 %v1410_v60  ;;  %v1840_v53 = vld [vmem:[%s2373_s1 + $0x1b8] sm:$0xff]   ;;  %v1450_v60 = vcombine.high %v73_v54, %v77_v55 }
  0x2d   :  { %1065 = vmatprep.mubr.bf16.mxu1 %v1412_v61  ;;  %1654 = vmatpush3.bf16.msra.mxu0 %v1818_v63  ;;  %v1452_v61 = vcombine.high %v74_v56, %v78_v57  ;;  %v23_v63 = vld [vmem:[%s2374_s0 + $0x30] sm:$0xff]  ;;  %v76_v56 = vld [vmem:[%s2374_s0 + $0x1d8] sm:$0xff] }
  0x2e   :  { %1718 = vmatpush3.bf16.msra.mxu1 %v1820_v1  ;;  %1655 = vmatprep.subr.bf16.mxu0 %v1821_v10  ;;  %v24_v1 = vld [vmem:[%s2374_s0 + $0x38] sm:$0xff]  ;;  %v1398_v4 = vcombine.high %v19_v62, %v23_v63  ;;  %v1397_v10 = vcombine.low %v19_v62, %v23_v63 }
  0x2f   :  { %1719 = vmatprep.subr.bf16.mxu1 %v1823_v12  ;;  %v1400_v5 = vcombine.high %v20_v0, %v24_v1  ;;  %v80_v57 = vld [vmem:[%s2374_s0 + $0x1f8] sm:$0xff] }
  0x30   :  { %v1455_v63 = vcombine.low %v76_v56, %v80_v57 }
  0x31   :  { %1656 = vmatpush3.bf16.msra.mxu0 %v1822_v11  ;;  %v1399_v11 = vcombine.low %v20_v0, %v24_v1 }
  0x32   :  { %1720 = vmatpush3.bf16.msra.mxu1 %v1824_v13  ;;  %1657 = vmatprep.subr.bf16.mxu0 %v1825_v18 }
  0x33   :  { %969 = vmatmul.mubr.bf16.gmra.mrb[8].mxu0 %v1409_v2  ;;  %1721 = vmatprep.subr.bf16.mxu1 %v1827_v23  ;;  %v1449_v2 = vcombine.low %v73_v54, %v77_v55  ;;  %v47_v23 = vld [vmem:[%s2374_s0 + $0xf0] sm:$0xff] }
  0x34   :  { %1066 = vmatmul.mubr.bf16.gmra.mrb[8].mxu1 %v1411_v6  ;;  %976 = vmatprep.mubr.bf16.mxu0 %v1418_v7  ;;  %v27_v6 = vld [vmem:[%s2374_s0 + $0x50] sm:$0xff] }
  0x35   :  { %1073 = vmatprep.mubr.bf16.mxu1 %v1420_v9  ;;  %1658 = vmatpush3.bf16.msra.mxu0 %v1826_v20  ;;  %v31_v7 = vld [vmem:[%s2374_s0 + $0x70] sm:$0xff]  ;;  %v32_v9 = vld [vmem:[%s2374_s0 + $0x78] sm:$0xff]  ;;  %v1414_v20 = vcombine.high %v35_v14, %v39_v15 }
  0x36   :  { %1722 = vmatpush3.bf16.msra.mxu1 %v1828_v25  ;;  %1659 = vmatprep.subr.bf16.mxu0 %v1829_v28  ;;  %v1406_v12 = vcombine.high %v27_v6, %v31_v7  ;;  %v1408_v13 = vcombine.high %v28_v8, %v32_v9  ;;  %v1405_v18 = vcombine.low %v27_v6, %v31_v7  ;;  %v48_v25 = vld [vmem:[%s2374_s0 + $0xf8] sm:$0xff]  ;;  %v75_v54 = vld [vmem:[%s2374_s0 + $0x1d0] sm:$0xff] }
  0x37   :  { %1723 = vmatprep.subr.bf16.mxu1 %v1831_v32  ;;  %v52_v32 = vld [vmem:[%s2374_s0 + $0x118] sm:$0xff]  ;;  %v79_v55 = vld [vmem:[%s2374_s0 + $0x1f0] sm:$0xff] }
  0x38   :  { %v1453_v62 = vcombine.low %v75_v54, %v79_v55 }
  0x39   :  { %1660 = vmatpush3.bf16.msra.mxu0 %v1830_v31  ;;  %v55_v31 = vld [vmem:[%s2374_s0 + $0x130] sm:$0xff] }
  0x3a   :  { %1724 = vmatpush3.bf16.msra.mxu1 %v1832_v33  ;;  %1661 = vmatprep.subr.bf16.mxu0 %v1833_v38  ;;  %v56_v33 = vld [vmem:[%s2374_s0 + $0x138] sm:$0xff]  ;;  %v59_v38 = vld [vmem:[%s2374_s0 + $0x150] sm:$0xff]  ;;  %v1429_v42 = vcombine.low %v51_v30, %v55_v31 }
  0x3b   :  { %977 = vmatmul.mubr.bf16.gmra.mrb[12].mxu0 %v1417_v19  ;;  %1725 = vmatprep.subr.bf16.mxu1 %v1835_v40  ;;  %v1407_v19 = vcombine.low %v28_v8, %v32_v9  ;;  %v60_v40 = vld [vmem:[%s2374_s0 + $0x158] sm:$0xff] }
  0x3c   :  { %1074 = vmatmul.mubr.bf16.gmra.mrb[12].mxu1 %v1419_v21  ;;  %984 = vmatprep.mubr.bf16.mxu0 %v1426_v22  ;;  %v1416_v21 = vcombine.high %v36_v16, %v40_v17  ;;  %v43_v22 = vld [vmem:[%s2374_s0 + $0xd0] sm:$0xff]  ;;  %v1440_v45 = vcombine.high %v60_v40, %v64_v41 }
  0x3d   :  { %1081 = vmatprep.mubr.bf16.mxu1 %v1428_v24  ;;  %1662 = vmatpush3.bf16.msra.mxu0 %v1834_v39  ;;  %v44_v24 = vld [vmem:[%s2374_s0 + $0xd8] sm:$0xff]  ;;  %v1422_v28 = vcombine.high %v43_v22, %v47_v23  ;;  %v63_v39 = vld [vmem:[%s2374_s0 + $0x170] sm:$0xff] }
  0x3e   :  { %1726 = vmatpush3.bf16.msra.mxu1 %v1836_v43  ;;  %1663 = vmatprep.subr.bf16.mxu0 %v1837_v46  ;;  %v1424_v29 = vcombine.high %v44_v24, %v48_v25  ;;  %v1431_v43 = vcombine.low %v52_v32, %v56_v33  ;;  %v1438_v44 = vcombine.high %v59_v38, %v63_v39  ;;  %v67_v46 = vld [vmem:[%s2374_s0 + $0x190] sm:$0xff] }
  0x3f   :  { %1727 = vmatprep.subr.bf16.mxu1 %v1839_v51  ;;  %v1439_v51 = vcombine.low %v60_v40, %v64_v41 }
  0x41   :  { %1664 = vmatpush3.bf16.msra.mxu0 %v1838_v48  ;;  %v68_v48 = vld [vmem:[%s2374_s0 + $0x198] sm:$0xff] }
  0x42   :  { %1728 = vmatpush3.bf16.msra.mxu1 %v1840_v53 }
  0x43   :  { %985 = vmatmul.mubr.bf16.gmra.mrb[16].mxu0 %v1425_v34  ;;  %v1421_v34 = vcombine.low %v43_v22, %v47_v23 }
  0x44   :  { %1082 = vmatmul.mubr.bf16.gmra.mrb[16].mxu1 %v1427_v35  ;;  %992 = vmatprep.mubr.bf16.mxu0 %v1434_v36  ;;  %v1423_v35 = vcombine.low %v44_v24, %v48_v25  ;;  %v1430_v36 = vcombine.high %v51_v30, %v55_v31 }
  0x45   :  { %1089 = vmatprep.mubr.bf16.mxu1 %v1436_v37  ;;  %v1432_v37 = vcombine.high %v52_v32, %v56_v33 }
  0x4b   :  { %993 = vmatmul.mubr.bf16.gmra.mrb[20].mxu0 %v1433_v47  ;;  %v71_v47 = vld [vmem:[%s2374_s0 + $0x1b0] sm:$0xff] }
  0x4c   :  { %1090 = vmatmul.mubr.bf16.gmra.mrb[20].mxu1 %v1435_v49  ;;  %1000 = vmatprep.mubr.bf16.mxu0 %v1442_v50  ;;  %v72_v49 = vld [vmem:[%s2374_s0 + $0x1b8] sm:$0xff]  ;;  %v1437_v50 = vcombine.low %v59_v38, %v63_v39 }
  0x4d   :  { %1097 = vmatprep.mubr.bf16.mxu1 %v1444_v52  ;;  %v1446_v52 = vcombine.high %v67_v46, %v71_v47  ;;  %v1448_v53 = vcombine.high %v68_v48, %v72_v49 }
  0x53   :  { %1001 = vmatmul.mubr.bf16.gmra.mrb[24].mxu0 %v1441_v58  ;;  %v1445_v58 = vcombine.low %v67_v46, %v71_v47 }
  0x54   :  { %1098 = vmatmul.mubr.bf16.gmra.mrb[24].mxu1 %v1443_v59  ;;  %1008 = vmatprep.mubr.bf16.mxu0 %v1450_v60  ;;  %v1447_v59 = vcombine.low %v68_v48, %v72_v49  ;;  %v1454_v60 = vcombine.high %v75_v54, %v79_v55 }
  0x55   :  { %1105 = vmatprep.mubr.bf16.mxu1 %v1452_v61  ;;  %v1456_v61 = vcombine.high %v76_v56, %v80_v57 }
  0x5b   :  { %1009 = vmatmul.mubr.bf16.gmra.mrb[28].mxu0 %v1449_v2  ;;  %v2253_v2 = vld [vmem:[%s2375_s2] ss:$0 sm:$0xff] }
  0x5c   :  { %1106 = vmatmul.mubr.bf16.gmra.mrb[28].mxu1 %v1451_v3  ;;  %1146 = vmatprep.mubr.bf16.mxu0 %v1398_v4 }
  0x5d   :  { %1243 = vmatprep.mubr.bf16.mxu1 %v1400_v5 }
  0x63   :  { %1147 = vmatmul.mubr.bf16.vlgmr.msra.gmra.mrb[32].mxu0 %v1397_v10 }
  0x64   :  { %1244 = vmatmul.mubr.bf16.vlgmr.msra.gmra.mrb[32].mxu1 %v1399_v11  ;;  %1154 = vmatprep.mubr.bf16.mxu0 %v1406_v12 }
  0x65   :  { %1251 = vmatprep.mubr.bf16.mxu1 %v1408_v13 }
  0x6b   :  { %1155 = vmatmul.mubr.bf16.gmra.mrb[36].mxu0 %v1405_v18 }
  0x6c   :  { %1252 = vmatmul.mubr.bf16.gmra.mrb[36].mxu1 %v1407_v19  ;;  %1162 = vmatprep.mubr.bf16.mxu0 %v1414_v20 }
  0x6d   :  { %1259 = vmatprep.mubr.bf16.mxu1 %v1416_v21 }
  0x73   :  { %1163 = vmatmul.mubr.bf16.gmra.mrb[40].mxu0 %v1413_v26 }
  0x74   :  { %1260 = vmatmul.mubr.bf16.gmra.mrb[40].mxu1 %v1415_v27  ;;  %1170 = vmatprep.mubr.bf16.mxu0 %v1422_v28 }
  0x75   :  { %1267 = vmatprep.mubr.bf16.mxu1 %v1424_v29 }
  0x7b   :  { %1171 = vmatmul.mubr.bf16.gmra.mrb[44].mxu0 %v1421_v34 }
  0x7c   :  { %1268 = vmatmul.mubr.bf16.gmra.mrb[44].mxu1 %v1423_v35  ;;  %1178 = vmatprep.mubr.bf16.mxu0 %v1430_v36 }
  0x7d   :  { %1275 = vmatprep.mubr.bf16.mxu1 %v1432_v37 }
  0x83   :  { %1179 = vmatmul.mubr.bf16.gmra.mrb[48].mxu0 %v1429_v42 }
  0x84   :  { %1276 = vmatmul.mubr.bf16.gmra.mrb[48].mxu1 %v1431_v43  ;;  %1186 = vmatprep.mubr.bf16.mxu0 %v1438_v44 }
  0x85   :  { %1283 = vmatprep.mubr.bf16.mxu1 %v1440_v45 }
  0x8b   :  { %1187 = vmatmul.mubr.bf16.gmra.mrb[52].mxu0 %v1437_v50 }
  0x8c   :  { %1284 = vmatmul.mubr.bf16.gmra.mrb[52].mxu1 %v1439_v51  ;;  %1194 = vmatprep.mubr.bf16.mxu0 %v1446_v52 }
  0x8d   :  { %1291 = vmatprep.mubr.bf16.mxu1 %v1448_v53 }
  0x93   :  { %1195 = vmatmul.mubr.bf16.gmra.mrb[56].mxu0 %v1445_v58 }
  0x94   :  { %1292 = vmatmul.mubr.bf16.gmra.mrb[56].mxu1 %v1447_v59  ;;  %1202 = vmatprep.mubr.bf16.mxu0 %v1454_v60 }
  0x95   :  { %1299 = vmatprep.mubr.bf16.mxu1 %v1456_v61 }
  0x9b   :  { %1203 = vmatmul.mubr.bf16.gmra.mrb[60].mxu0 %v1453_v62 }
  0x9c   :  { %1300 = vmatmul.mubr.bf16.gmra.mrb[60].mxu1 %v1455_v63 }
  0xf6   :  { %v1537_v0 = vpop.f32.mrb[0].mxu0 }
  0xf7   :  { %v1601_v1 = vpop.f32.mrb[0].mxu1  ;;  %v1538_v3 = vpop.f32.mrb[1].mxu0 }
  0xf8   :  { %v1539_v4 = vadd.f32 %v1538_v3, %v1537_v0  ;;  %v1602_v5 = vpop.f32.mrb[1].mxu1  ;;  %v1540_v6 = vpop.f32.mrb[2].mxu0 }
  0xf9   :  { %v1603_v7 = vadd.f32 %v1602_v5, %v1601_v1  ;;  %v1604_v8 = vpop.f32.mrb[2].mxu1  ;;  %v1541_v9 = vpop.f32.mrb[3].mxu0 }
  0xfa   :  { %v955_v10 = vadd.f32 %v1539_v4, %v2253_v2  ;;  %v1542_v11 = vadd.f32 %v1541_v9, %v1540_v6  ;;  %v1605_v12 = vpop.f32.mrb[3].mxu1 }
  0xfb   :  { %v1606_v13 = vadd.f32 %v1605_v12, %v1604_v8 }
  0xfc   :  { %v2256_v14 = vadd.f32 %v1603_v7, %v955_v10  ;;  %v958_v15 = vadd.f32 %v1542_v11, %v2253_v2 }
  0xfe   :  { %v2259_v16 = vadd.f32 %v1606_v13, %v958_v15  ;;  %v1543_v17 = vpop.f32.mrb[4].mxu0 }
  0xff   :  { %v1607_v18 = vpop.f32.mrb[4].mxu1  ;;  %v1544_v19 = vpop.f32.mrb[5].mxu0 }
 0x100   :  { %v1545_v20 = vadd.f32 %v1544_v19, %v1543_v17  ;;  %v1608_v21 = vpop.f32.mrb[5].mxu1  ;;  %v1546_v22 = vpop.f32.mrb[6].mxu0 }
 0x101   :  { %v1609_v23 = vadd.f32 %v1608_v21, %v1607_v18  ;;  %v1610_v24 = vpop.f32.mrb[6].mxu1  ;;  %v1547_v25 = vpop.f32.mrb[7].mxu0 }
 0x102   :  { %v963_v26 = vadd.f32 %v1545_v20, %v2253_v2  ;;  %v1548_v27 = vadd.f32 %v1547_v25, %v1546_v22  ;;  %v1611_v28 = vpop.f32.mrb[7].mxu1 }
 0x103   :  { %v1612_v29 = vadd.f32 %v1611_v28, %v1610_v24 }
 0x104   :  { %v2262_v30 = vadd.f32 %v1609_v23, %v963_v26  ;;  %v966_v31 = vadd.f32 %v1548_v27, %v2253_v2 }
 0x106   :  { %v2265_v32 = vadd.f32 %v1612_v29, %v966_v31  ;;  %v1549_v33 = vpop.f32.mrb[8].mxu0 }
 0x107   :  { %v1613_v34 = vpop.f32.mrb[8].mxu1  ;;  %v1550_v35 = vpop.f32.mrb[9].mxu0 }
 0x108   :  { %v1551_v36 = vadd.f32 %v1550_v35, %v1549_v33  ;;  %v1614_v37 = vpop.f32.mrb[9].mxu1  ;;  %v1552_v38 = vpop.f32.mrb[10].mxu0 }
 0x109   :  { %v1615_v39 = vadd.f32 %v1614_v37, %v1613_v34  ;;  %v1616_v40 = vpop.f32.mrb[10].mxu1  ;;  %v1553_v41 = vpop.f32.mrb[11].mxu0 }
 0x10a   :  { %v971_v42 = vadd.f32 %v1551_v36, %v2253_v2  ;;  %v1554_v43 = vadd.f32 %v1553_v41, %v1552_v38  ;;  %v1617_v44 = vpop.f32.mrb[11].mxu1 }
 0x10b   :  { %v1618_v45 = vadd.f32 %v1617_v44, %v1616_v40 }
 0x10c   :  { %v2268_v46 = vadd.f32 %v1615_v39, %v971_v42  ;;  %v974_v47 = vadd.f32 %v1554_v43, %v2253_v2 }
 0x10e   :  { %v2271_v48 = vadd.f32 %v1618_v45, %v974_v47  ;;  %v1555_v49 = vpop.f32.mrb[12].mxu0 }
 0x10f   :  { %v1619_v50 = vpop.f32.mrb[12].mxu1  ;;  %v1556_v51 = vpop.f32.mrb[13].mxu0 }
 0x110   :  { %v1557_v52 = vadd.f32 %v1556_v51, %v1555_v49  ;;  %v1620_v53 = vpop.f32.mrb[13].mxu1  ;;  %v1558_v54 = vpop.f32.mrb[14].mxu0 }
 0x111   :  { %v1621_v55 = vadd.f32 %v1620_v53, %v1619_v50  ;;  %v1622_v56 = vpop.f32.mrb[14].mxu1  ;;  %v1559_v57 = vpop.f32.mrb[15].mxu0 }
 0x112   :  { %v979_v58 = vadd.f32 %v1557_v52, %v2253_v2  ;;  %v1560_v59 = vadd.f32 %v1559_v57, %v1558_v54  ;;  %v1623_v60 = vpop.f32.mrb[15].mxu1 }
 0x113   :  { %v1624_v61 = vadd.f32 %v1623_v60, %v1622_v56 }
 0x114   :  { %v2274_v62 = vadd.f32 %v1621_v55, %v979_v58  ;;  %v982_v63 = vadd.f32 %v1560_v59, %v2253_v2 }
 0x116   :  { %v2277_v0 = vadd.f32 %v1624_v61, %v982_v63  ;;  %v1561_v1 = vpop.f32.mrb[16].mxu0 }
 0x117   :  { %v1625_v3 = vpop.f32.mrb[16].mxu1  ;;  %v1562_v4 = vpop.f32.mrb[17].mxu0 }
 0x118   :  { %v1563_v5 = vadd.f32 %v1562_v4, %v1561_v1  ;;  %v1626_v6 = vpop.f32.mrb[17].mxu1  ;;  %v1564_v7 = vpop.f32.mrb[18].mxu0 }
 0x119   :  { %v1627_v8 = vadd.f32 %v1626_v6, %v1625_v3  ;;  %v1628_v9 = vpop.f32.mrb[18].mxu1  ;;  %v1565_v10 = vpop.f32.mrb[19].mxu0 }
 0x11a   :  { %v987_v11 = vadd.f32 %v1563_v5, %v2253_v2  ;;  %v1566_v12 = vadd.f32 %v1565_v10, %v1564_v7  ;;  %v1629_v13 = vpop.f32.mrb[19].mxu1 }
 0x11b   :  { %v1630_v15 = vadd.f32 %v1629_v13, %v1628_v9 }
 0x11c   :  { %v2280_v17 = vadd.f32 %v1627_v8, %v987_v11  ;;  %v990_v18 = vadd.f32 %v1566_v12, %v2253_v2 }
 0x11e   :  { %v2283_v19 = vadd.f32 %v1630_v15, %v990_v18  ;;  %v1567_v20 = vpop.f32.mrb[20].mxu0 }
 0x11f   :  { %v1631_v21 = vpop.f32.mrb[20].mxu1  ;;  %v1568_v22 = vpop.f32.mrb[21].mxu0 }
 0x120   :  { %v1569_v23 = vadd.f32 %v1568_v22, %v1567_v20  ;;  %v1632_v24 = vpop.f32.mrb[21].mxu1  ;;  %v1570_v25 = vpop.f32.mrb[22].mxu0 }
 0x121   :  { %v1633_v26 = vadd.f32 %v1632_v24, %v1631_v21  ;;  %v1634_v27 = vpop.f32.mrb[22].mxu1  ;;  %v1571_v28 = vpop.f32.mrb[23].mxu0 }
 0x122   :  { %v995_v29 = vadd.f32 %v1569_v23, %v2253_v2  ;;  %v1572_v31 = vadd.f32 %v1571_v28, %v1570_v25  ;;  %v1635_v33 = vpop.f32.mrb[23].mxu1 }
 0x123   :  { %v1636_v34 = vadd.f32 %v1635_v33, %v1634_v27 }
 0x124   :  { %v2286_v35 = vadd.f32 %v1633_v26, %v995_v29  ;;  %v998_v36 = vadd.f32 %v1572_v31, %v2253_v2 }
 0x126   :  { %v2289_v37 = vadd.f32 %v1636_v34, %v998_v36  ;;  %v1573_v38 = vpop.f32.mrb[24].mxu0 }
 0x127   :  { %v1637_v39 = vpop.f32.mrb[24].mxu1  ;;  %v1574_v40 = vpop.f32.mrb[25].mxu0 }
 0x128   :  { %v1575_v41 = vadd.f32 %v1574_v40, %v1573_v38  ;;  %v1638_v42 = vpop.f32.mrb[25].mxu1  ;;  %v1576_v43 = vpop.f32.mrb[26].mxu0 }
 0x129   :  { %v1639_v44 = vadd.f32 %v1638_v42, %v1637_v39  ;;  %v1640_v45 = vpop.f32.mrb[26].mxu1  ;;  %v1577_v47 = vpop.f32.mrb[27].mxu0 }
 0x12a   :  { %v1003_v49 = vadd.f32 %v1575_v41, %v2253_v2  ;;  %v1578_v50 = vadd.f32 %v1577_v47, %v1576_v43  ;;  %v1641_v51 = vpop.f32.mrb[27].mxu1 }
 0x12b   :  { %v1642_v52 = vadd.f32 %v1641_v51, %v1640_v45 }
 0x12c   :  { %v2292_v53 = vadd.f32 %v1639_v44, %v1003_v49  ;;  %v1006_v54 = vadd.f32 %v1578_v50, %v2253_v2 }
 0x12e   :  { %v2295_v55 = vadd.f32 %v1642_v52, %v1006_v54  ;;  %v1579_v56 = vpop.f32.mrb[28].mxu0 }
 0x12f   :  { %v1643_v57 = vpop.f32.mrb[28].mxu1  ;;  %v1580_v58 = vpop.f32.mrb[29].mxu0 }
 0x130   :  { %v1581_v59 = vadd.f32 %v1580_v58, %v1579_v56  ;;  %v1644_v60 = vpop.f32.mrb[29].mxu1  ;;  %v1582_v61 = vpop.f32.mrb[30].mxu0 }
 0x131   :  { %v1645_v63 = vadd.f32 %v1644_v60, %v1643_v57  ;;  %v1646_v1 = vpop.f32.mrb[30].mxu1  ;;  %v1583_v3 = vpop.f32.mrb[31].mxu0 }
 0x132   :  { %v1011_v4 = vadd.f32 %v1581_v59, %v2253_v2  ;;  %v1584_v5 = vadd.f32 %v1583_v3, %v1582_v61  ;;  %v1647_v6 = vpop.f32.mrb[31].mxu1 }
 0x133   :  { %v1648_v7 = vadd.f32 %v1647_v6, %v1646_v1 }
 0x134   :  { %v2298_v8 = vadd.f32 %v1645_v63, %v1011_v4  ;;  %v1014_v9 = vadd.f32 %v1584_v5, %v2253_v2 }
 0x136   :  { %v2301_v10 = vadd.f32 %v1648_v7, %v1014_v9  ;;  %v1665_v11 = vpop.f32.mrb[32].mxu0 }
 0x137   :  { %v1729_v12 = vpop.f32.mrb[32].mxu1  ;;  %v1666_v13 = vpop.f32.mrb[33].mxu0 }
 0x138   :  { %v1667_v15 = vadd.f32 %v1666_v13, %v1665_v11  ;;  %v1730_v18 = vpop.f32.mrb[33].mxu1  ;;  %v1668_v20 = vpop.f32.mrb[34].mxu0 }
 0x139   :  { %v1731_v21 = vadd.f32 %v1730_v18, %v1729_v12  ;;  %v1732_v22 = vpop.f32.mrb[34].mxu1  ;;  %v1669_v23 = vpop.f32.mrb[35].mxu0 }
 0x13a   :  { %v1149_v24 = vadd.f32 %v1667_v15, %v2256_v14  ;;  %v1670_v25 = vadd.f32 %v1669_v23, %v1668_v20  ;;  %v1733_v26 = vpop.f32.mrb[35].mxu1 }
 0x13b   :  { %v1734_v27 = vadd.f32 %v1733_v26, %v1732_v22 }
 0x13c   :  { %v1246_v28 = vadd.f32 %v1731_v21, %v1149_v24  ;;  %v1152_v29 = vadd.f32 %v1670_v25, %v2259_v16 }
 0x13e   :  { %1368 = vst [vmem:[%s2376_s3] sm:$0xff] %v1246_v28  ;;  %v1249_v2 = vadd.f32 %v1734_v27, %v1152_v29  ;;  %v1671_v31 = vpop.f32.mrb[36].mxu0  ;;  %v1330_v36 = vmul.f32 %v1246_v28, %v1246_v28 }
 0x13f   :  { %v1735_v33 = vpop.f32.mrb[36].mxu1  ;;  %v1672_v34 = vpop.f32.mrb[37].mxu0 }
 0x140   :  { %v1308_v38 = vadd.f32 %v1249_v2, %v1246_v28  ;;  %v1331_v39 = vmul.f32 %v1249_v2, %v1249_v2  ;;  %1369 = vst [vmem:[%s2376_s3 + $0x8] sm:$0xff] %v1249_v2  ;;  %v1673_v14 = vadd.f32 %v1672_v34, %v1671_v31  ;;  %v1736_v40 = vpop.f32.mrb[37].mxu1  ;;  %v1674_v41 = vpop.f32.mrb[38].mxu0 }
 0x141   :  { %v1737_v42 = vadd.f32 %v1736_v40, %v1735_v33  ;;  %v1738_v16 = vpop.f32.mrb[38].mxu1  ;;  %v1675_v43 = vpop.f32.mrb[39].mxu0 }
 0x142   :  { %v1346_v44 = vadd.f32 %v1331_v39, %v1330_v36  ;;  %v1157_v45 = vadd.f32 %v1673_v14, %v2262_v30  ;;  %v1676_v47 = vadd.f32 %v1675_v43, %v1674_v41  ;;  %v1739_v49 = vpop.f32.mrb[39].mxu1 }
 0x143   :  { %v1740_v50 = vadd.f32 %v1739_v49, %v1738_v16 }
 0x144   :  { %v1254_v51 = vadd.f32 %v1737_v42, %v1157_v45  ;;  %v1160_v52 = vadd.f32 %v1676_v47, %v2265_v32 }
 0x146   :  { %v1309_v54 = vadd.f32 %v1308_v38, %v1254_v51  ;;  %v1332_v56 = vmul.f32 %v1254_v51, %v1254_v51  ;;  %1370 = vst [vmem:[%s2376_s3 + $0x10] sm:$0xff] %v1254_v51  ;;  %v1257_v57 = vadd.f32 %v1740_v50, %v1160_v52  ;;  %v1677_v58 = vpop.f32.mrb[40].mxu0 }
 0x147   :  { %v1741_v59 = vpop.f32.mrb[40].mxu1  ;;  %v1678_v60 = vpop.f32.mrb[41].mxu0 }
 0x148   :  { %v1347_v61 = vadd.f32 %v1346_v44, %v1332_v56  ;;  %v1310_v63 = vadd.f32 %v1309_v54, %v1257_v57  ;;  %v1333_v1 = vmul.f32 %v1257_v57, %v1257_v57  ;;  %1371 = vst [vmem:[%s2376_s3 + $0x18] sm:$0xff] %v1257_v57  ;;  %v1679_v30 = vadd.f32 %v1678_v60, %v1677_v58  ;;  %v1742_v3 = vpop.f32.mrb[41].mxu1  ;;  %v1680_v32 = vpop.f32.mrb[42].mxu0 }
 0x149   :  { %v1743_v4 = vadd.f32 %v1742_v3, %v1741_v59  ;;  %v1744_v5 = vpop.f32.mrb[42].mxu1  ;;  %v1681_v6 = vpop.f32.mrb[43].mxu0 }
 0x14a   :  { %v1348_v7 = vadd.f32 %v1347_v61, %v1333_v1  ;;  %v1165_v9 = vadd.f32 %v1679_v30, %v2268_v46  ;;  %v1682_v11 = vadd.f32 %v1681_v6, %v1680_v32  ;;  %v1745_v12 = vpop.f32.mrb[43].mxu1 }
 0x14b   :  { %v1746_v13 = vadd.f32 %v1745_v12, %v1744_v5 }
 0x14c   :  { %v1262_v15 = vadd.f32 %v1743_v4, %v1165_v9  ;;  %v1168_v18 = vadd.f32 %v1682_v11, %v2271_v48 }
 0x14e   :  { %v1311_v20 = vadd.f32 %v1310_v63, %v1262_v15  ;;  %v1334_v21 = vmul.f32 %v1262_v15, %v1262_v15  ;;  %1372 = vst [vmem:[%s2376_s3 + $0x20] sm:$0xff] %v1262_v15  ;;  %v1265_v22 = vadd.f32 %v1746_v13, %v1168_v18  ;;  %v1683_v23 = vpop.f32.mrb[44].mxu0 }
 0x14f   :  { %v1747_v24 = vpop.f32.mrb[44].mxu1  ;;  %v1684_v25 = vpop.f32.mrb[45].mxu0 }
 0x150   :  { %v1349_v26 = vadd.f32 %v1348_v7, %v1334_v21  ;;  %v1312_v27 = vadd.f32 %v1311_v20, %v1265_v22  ;;  %v1335_v28 = vmul.f32 %v1265_v22, %v1265_v22  ;;  %1373 = vst [vmem:[%s2376_s3 + $0x28] sm:$0xff] %v1265_v22  ;;  %v1685_v46 = vadd.f32 %v1684_v25, %v1683_v23  ;;  %v1748_v29 = vpop.f32.mrb[45].mxu1  ;;  %v1686_v48 = vpop.f32.mrb[46].mxu0 }
 0x151   :  { %v1749_v2 = vadd.f32 %v1748_v29, %v1747_v24  ;;  %v1750_v31 = vpop.f32.mrb[46].mxu1  ;;  %v1687_v33 = vpop.f32.mrb[47].mxu0 }
 0x152   :  { %v1350_v34 = vadd.f32 %v1349_v26, %v1335_v28  ;;  %v1173_v36 = vadd.f32 %v1685_v46, %v2274_v62  ;;  %v1688_v38 = vadd.f32 %v1687_v33, %v1686_v48  ;;  %v1751_v39 = vpop.f32.mrb[47].mxu1 }
 0x153   :  { %v1752_v14 = vadd.f32 %v1751_v39, %v1750_v31 }
 0x154   :  { %v1270_v40 = vadd.f32 %v1749_v2, %v1173_v36  ;;  %v1176_v41 = vadd.f32 %v1688_v38, %v2277_v0 }
 0x156   :  { %v1313_v42 = vadd.f32 %v1312_v27, %v1270_v40  ;;  %v1336_v16 = vmul.f32 %v1270_v40, %v1270_v40  ;;  %1374 = vst [vmem:[%s2376_s3 + $0x30] sm:$0xff] %v1270_v40  ;;  %v1273_v43 = vadd.f32 %v1752_v14, %v1176_v41  ;;  %v1689_v44 = vpop.f32.mrb[48].mxu0 }
 0x157   :  { %v1753_v45 = vpop.f32.mrb[48].mxu1  ;;  %v1690_v47 = vpop.f32.mrb[49].mxu0 }
 0x158   :  { %v1351_v49 = vadd.f32 %v1350_v34, %v1336_v16  ;;  %v1314_v50 = vadd.f32 %v1313_v42, %v1273_v43  ;;  %v1337_v51 = vmul.f32 %v1273_v43, %v1273_v43  ;;  %1375 = vst [vmem:[%s2376_s3 + $0x38] sm:$0xff] %v1273_v43  ;;  %v1691_v62 = vadd.f32 %v1690_v47, %v1689_v44  ;;  %v1754_v52 = vpop.f32.mrb[49].mxu1  ;;  %v1692_v0 = vpop.f32.mrb[50].mxu0 }
 0x159   :  { %v1755_v54 = vadd.f32 %v1754_v52, %v1753_v45  ;;  %v1756_v56 = vpop.f32.mrb[50].mxu1  ;;  %v1693_v57 = vpop.f32.mrb[51].mxu0 }
 0x15a   :  { %v1352_v58 = vadd.f32 %v1351_v49, %v1337_v51  ;;  %v1181_v59 = vadd.f32 %v1691_v62, %v2280_v17  ;;  %v1694_v60 = vadd.f32 %v1693_v57, %v1692_v0  ;;  %v1757_v61 = vpop.f32.mrb[51].mxu1 }
 0x15b   :  { %v1758_v63 = vadd.f32 %v1757_v61, %v1756_v56 }
 0x15c   :  { %v1278_v1 = vadd.f32 %v1755_v54, %v1181_v59  ;;  %v1184_v30 = vadd.f32 %v1694_v60, %v2283_v19 }
 0x15e   :  { %v1315_v3 = vadd.f32 %v1314_v50, %v1278_v1  ;;  %v1338_v32 = vmul.f32 %v1278_v1, %v1278_v1  ;;  %1376 = vst [vmem:[%s2376_s3 + $0x40] sm:$0xff] %v1278_v1  ;;  %v1281_v4 = vadd.f32 %v1758_v63, %v1184_v30  ;;  %v1695_v5 = vpop.f32.mrb[52].mxu0 }
 0x15f   :  { %v1759_v6 = vpop.f32.mrb[52].mxu1  ;;  %v1696_v7 = vpop.f32.mrb[53].mxu0 }
 0x160   :  { %v1353_v9 = vadd.f32 %v1352_v58, %v1338_v32  ;;  %v1316_v11 = vadd.f32 %v1315_v3, %v1281_v4  ;;  %v1339_v12 = vmul.f32 %v1281_v4, %v1281_v4  ;;  %1377 = vst [vmem:[%s2376_s3 + $0x48] sm:$0xff] %v1281_v4  ;;  %v1697_v17 = vadd.f32 %v1696_v7, %v1695_v5  ;;  %v1760_v13 = vpop.f32.mrb[53].mxu1  ;;  %v1698_v19 = vpop.f32.mrb[54].mxu0 }
 0x161   :  { %v1761_v15 = vadd.f32 %v1760_v13, %v1759_v6  ;;  %v1762_v18 = vpop.f32.mrb[54].mxu1  ;;  %v1699_v20 = vpop.f32.mrb[55].mxu0 }
 0x162   :  { %v1354_v21 = vadd.f32 %v1353_v9, %v1339_v12  ;;  %v1189_v22 = vadd.f32 %v1697_v17, %v2286_v35  ;;  %v1700_v23 = vadd.f32 %v1699_v20, %v1698_v19  ;;  %v1763_v24 = vpop.f32.mrb[55].mxu1 }
 0x163   :  { %v1764_v25 = vadd.f32 %v1763_v24, %v1762_v18 }
 0x164   :  { %v1286_v26 = vadd.f32 %v1761_v15, %v1189_v22  ;;  %v1192_v27 = vadd.f32 %v1700_v23, %v2289_v37 }
 0x166   :  { %v1317_v28 = vadd.f32 %v1316_v11, %v1286_v26  ;;  %v1340_v46 = vmul.f32 %v1286_v26, %v1286_v26  ;;  %1378 = vst [vmem:[%s2376_s3 + $0x50] sm:$0xff] %v1286_v26  ;;  %v1289_v29 = vadd.f32 %v1764_v25, %v1192_v27  ;;  %v1701_v48 = vpop.f32.mrb[56].mxu0 }
 0x167   :  { %v1765_v2 = vpop.f32.mrb[56].mxu1  ;;  %v1702_v31 = vpop.f32.mrb[57].mxu0 }
 0x168   :  { %v1355_v33 = vadd.f32 %v1354_v21, %v1340_v46  ;;  %v1318_v34 = vadd.f32 %v1317_v28, %v1289_v29  ;;  %v1341_v36 = vmul.f32 %v1289_v29, %v1289_v29  ;;  %1379 = vst [vmem:[%s2376_s3 + $0x58] sm:$0xff] %v1289_v29  ;;  %v1703_v35 = vadd.f32 %v1702_v31, %v1701_v48  ;;  %v1766_v38 = vpop.f32.mrb[57].mxu1  ;;  %v1704_v37 = vpop.f32.mrb[58].mxu0 }
 0x169   :  { %v1767_v39 = vadd.f32 %v1766_v38, %v1765_v2  ;;  %v1768_v14 = vpop.f32.mrb[58].mxu1  ;;  %v1705_v40 = vpop.f32.mrb[59].mxu0 }
 0x16a   :  { %v1356_v41 = vadd.f32 %v1355_v33, %v1341_v36  ;;  %v1197_v42 = vadd.f32 %v1703_v35, %v2292_v53  ;;  %v1706_v16 = vadd.f32 %v1705_v40, %v1704_v37  ;;  %v1769_v43 = vpop.f32.mrb[59].mxu1 }
 0x16b   :  { %v1770_v44 = vadd.f32 %v1769_v43, %v1768_v14 }
 0x16c   :  { %v1294_v45 = vadd.f32 %v1767_v39, %v1197_v42  ;;  %v1200_v47 = vadd.f32 %v1706_v16, %v2295_v55 }
 0x16e   :  { %v1319_v49 = vadd.f32 %v1318_v34, %v1294_v45  ;;  %v1342_v50 = vmul.f32 %v1294_v45, %v1294_v45  ;;  %1380 = vst [vmem:[%s2376_s3 + $0x60] sm:$0xff] %v1294_v45  ;;  %v1297_v51 = vadd.f32 %v1770_v44, %v1200_v47  ;;  %v1707_v62 = vpop.f32.mrb[60].mxu0 }
 0x16f   :  { %v1771_v52 = vpop.f32.mrb[60].mxu1  ;;  %v1708_v0 = vpop.f32.mrb[61].mxu0 }
 0x170   :  { %v1357_v54 = vadd.f32 %v1356_v41, %v1342_v50  ;;  %v1320_v56 = vadd.f32 %v1319_v49, %v1297_v51  ;;  %v1343_v57 = vmul.f32 %v1297_v51, %v1297_v51  ;;  %1381 = vst [vmem:[%s2376_s3 + $0x68] sm:$0xff] %v1297_v51  ;;  %v1709_v53 = vadd.f32 %v1708_v0, %v1707_v62  ;;  %v1772_v58 = vpop.f32.mrb[61].mxu1  ;;  %v1710_v55 = vpop.f32.mrb[62].mxu0 }
 0x171   :  { %v1773_v59 = vadd.f32 %v1772_v58, %v1771_v52  ;;  %v1774_v60 = vpop.f32.mrb[62].mxu1  ;;  %v1711_v61 = vpop.f32.mrb[63].mxu0 }
 0x172   :  { %v1358_v63 = vadd.f32 %v1357_v54, %v1343_v57  ;;  %v1205_v1 = vadd.f32 %v1709_v53, %v2298_v8  ;;  %v1712_v30 = vadd.f32 %v1711_v61, %v1710_v55  ;;  %v1775_v3 = vpop.f32.mrb[63].mxu1 }
 0x173   :  { %v1776_v32 = vadd.f32 %v1775_v3, %v1774_v60 }
 0x174   :  { %v1302_v4 = vadd.f32 %v1773_v59, %v1205_v1  ;;  %v1208_v5 = vadd.f32 %v1712_v30, %v2301_v10 }
 0x176   :  { %v1321_v6 = vadd.f32 %v1320_v56, %v1302_v4  ;;  %v1344_v7 = vmul.f32 %v1302_v4, %v1302_v4  ;;  %1382 = vst [vmem:[%s2376_s3 + $0x70] sm:$0xff] %v1302_v4  ;;  %v1305_v9 = vadd.f32 %v1776_v32, %v1208_v5 }
 0x178   :  { %v1359_v11 = vadd.f32 %v1358_v63, %v1344_v7  ;;  %v1322_v12 = vadd.f32 %v1321_v6, %v1305_v9  ;;  %v1345_v17 = vmul.f32 %v1305_v9, %v1305_v9  ;;  %1383 = vst [vmem:[%s2376_s3 + $0x78] sm:$0xff] %v1305_v9 }
 0x17a   :  { %v1323_v8 = vrot.slane %v1322_v12, 4  ;;  %v1360_v13 = vadd.f32 %v1359_v11, %v1345_v17 }
 0x17c   :  { %v1324_v19 = vadd.f32 %v1323_v8, %v1322_v12  ;;  %v1361_v15 = vrot.slane %v1360_v13, 4 }
 0x17e   :  { %v1325_v18 = vrot.slane %v1324_v19, 2  ;;  %v1362_v10 = vadd.f32 %v1361_v15, %v1360_v13 }
 0x180   :  { %v1326_v20 = vadd.f32 %v1325_v18, %v1324_v19  ;;  %v1363_v21 = vrot.slane %v1362_v10, 2 }
 0x182   :  { %v1327_v22 = vrot.slane %v1326_v20, 1  ;;  %v1364_v23 = vadd.f32 %v1363_v21, %v1362_v10 }
 0x184   :  { %v1328_v24 = vadd.f32 %v1327_v22, %v1326_v20  ;;  %v1365_v25 = vrot.slane %v1364_v23, 1 }
 0x186   :  { %1329 = vst [vmem:[%s2377_s4] sm:$0x1] %v1328_v24  ;;  %v1366_v26 = vadd.f32 %v1365_v25, %v1364_v23 }
 0x188   :  { %1367 = vst [vmem:[%s2377_s4 + $0x1] sm:$0x1] %v1366_v26 }

// kernel: discriminator_forward.7
= control target key start
LH: loop header
LB: loop body
LE: loop exit
PB: predicated region body
PF: predicated region fallthrough
CT: control target
= control target key end

     0   :  { %s4001_s1 = inlined_call_operand.vmem [shape: bf16[2048,256], index: 1, kind: input, shape index: {}]   ;;  %s4002_s0 = inlined_call_operand.vmem [shape: bf16[32,2048], index: 0, kind: input, shape index: {}]   ;;  %s4003_s2 = inlined_call_operand.vmem [shape: f32[1,256], index: 2, kind: input, shape index: {}]   ;;  %s4004_s3 = inlined_call_operand.vmem [shape: f32[32,256], index: 3, kind: output, shape index: {0}]   ;;  %s4005_s4 = inlined_call_operand.vmem [shape: f32[8,256], index: 4, kind: output, shape index: {1}]  }
   0x1   :  { %v2639_v0 = vld [vmem:[%s4001_s1 + $0x4] ss:$8 sps:$4 sm:$0xff]   ;;  %v2643_v2 = vld [vmem:[%s4001_s1] ss:$8 sps:$4 sm:$0xff]   ;;  %v2645_v4 = vld [vmem:[%s4001_s1 + $0x14] ss:$8 sps:$4 sm:$0xff]  }
   0x2   :  { %v2641_v1 = vld [vmem:[%s4001_s1 + $0x404] ss:$8 sps:$4 sm:$0xff]   ;;  %1756 = vmatprep.subr.bf16.mxu1 %v2639_v0  ;;  %v2644_v3 = vld [vmem:[%s4001_s1 + $0x400] ss:$8 sps:$4 sm:$0xff]   ;;  %v2647_v5 = vld [vmem:[%s4001_s1 + $0x414] ss:$8 sps:$4 sm:$0xff]  }
   0x3   :  { %1968 = vmatprep.subr.bf16.mxu0 %v2641_v1  ;;  %1757 = vmatpush1.bf16.msra.mxu1 %v2643_v2  ;;  %v2649_v6 = vld [vmem:[%s4001_s1 + $0x10] ss:$8 sps:$4 sm:$0xff]   ;;  %v2651_v8 = vld [vmem:[%s4001_s1 + $0x24] ss:$8 sps:$4 sm:$0xff]   ;;  %v2655_v10 = vld [vmem:[%s4001_s1 + $0x20] ss:$8 sps:$4 sm:$0xff]  }
   0x4   :  { %1969 = vmatpush1.bf16.msra.mxu0 %v2644_v3  ;;  %1758 = vmatprep.subr.bf16.mxu1 %v2645_v4  ;;  %v2650_v7 = vld [vmem:[%s4001_s1 + $0x410] ss:$8 sps:$4 sm:$0xff]   ;;  %v2653_v9 = vld [vmem:[%s4001_s1 + $0x424] ss:$8 sps:$4 sm:$0xff]   ;;  %v2656_v11 = vld [vmem:[%s4001_s1 + $0x420] ss:$8 sps:$4 sm:$0xff]  }
   0x5   :  { %1970 = vmatprep.subr.bf16.mxu0 %v2647_v5  ;;  %v2657_v12 = vld [vmem:[%s4001_s1 + $0x34] ss:$8 sps:$4 sm:$0xff]   ;;  %v2661_v14 = vld [vmem:[%s4001_s1 + $0x30] ss:$8 sps:$4 sm:$0xff]   ;;  %v2663_v16 = vld [vmem:[%s4001_s1 + $0x44] ss:$8 sps:$4 sm:$0xff]  }
   0x6   :  { %v2659_v13 = vld [vmem:[%s4001_s1 + $0x434] ss:$8 sps:$4 sm:$0xff]   ;;  %v2662_v15 = vld [vmem:[%s4001_s1 + $0x430] ss:$8 sps:$4 sm:$0xff]   ;;  %v2665_v17 = vld [vmem:[%s4001_s1 + $0x444] ss:$8 sps:$4 sm:$0xff]  }
   0x7   :  { %1759 = vmatpush1.bf16.msra.mxu1 %v2649_v6  ;;  %v2667_v18 = vld [vmem:[%s4001_s1 + $0x40] ss:$8 sps:$4 sm:$0xff]   ;;  %v2669_v20 = vld [vmem:[%s4001_s1 + $0x54] ss:$8 sps:$4 sm:$0xff]   ;;  %v2673_v22 = vld [vmem:[%s4001_s1 + $0x50] ss:$8 sps:$4 sm:$0xff]  }
   0x8   :  { %1971 = vmatpush1.bf16.msra.mxu0 %v2650_v7  ;;  %1760 = vmatprep.subr.bf16.mxu1 %v2651_v8  ;;  %v2668_v19 = vld [vmem:[%s4001_s1 + $0x440] ss:$8 sps:$4 sm:$0xff]   ;;  %v2671_v21 = vld [vmem:[%s4001_s1 + $0x454] ss:$8 sps:$4 sm:$0xff]   ;;  %v2674_v23 = vld [vmem:[%s4001_s1 + $0x450] ss:$8 sps:$4 sm:$0xff]  }
   0x9   :  { %1972 = vmatprep.subr.bf16.mxu0 %v2653_v9  ;;  %v2675_v24 = vld [vmem:[%s4001_s1 + $0x64] ss:$8 sps:$4 sm:$0xff]   ;;  %v2679_v26 = vld [vmem:[%s4001_s1 + $0x60] ss:$8 sps:$4 sm:$0xff]   ;;  %v2681_v28 = vld [vmem:[%s4001_s1 + $0x74] ss:$8 sps:$4 sm:$0xff]  }
   0xa   :  { %v2677_v25 = vld [vmem:[%s4001_s1 + $0x464] ss:$8 sps:$4 sm:$0xff]   ;;  %v2680_v27 = vld [vmem:[%s4001_s1 + $0x460] ss:$8 sps:$4 sm:$0xff]   ;;  %v2683_v29 = vld [vmem:[%s4001_s1 + $0x474] ss:$8 sps:$4 sm:$0xff]  }
   0xb   :  { %1761 = vmatpush1.bf16.msra.mxu1 %v2655_v10  ;;  %v2685_v30 = vld [vmem:[%s4001_s1 + $0x70] ss:$8 sps:$4 sm:$0xff]   ;;  %v2687_v32 = vld [vmem:[%s4001_s1 + $0x84] ss:$8 sps:$4 sm:$0xff]   ;;  %v2691_v34 = vld [vmem:[%s4001_s1 + $0x80] ss:$8 sps:$4 sm:$0xff]  }
   0xc   :  { %1973 = vmatpush1.bf16.msra.mxu0 %v2656_v11  ;;  %1762 = vmatprep.subr.bf16.mxu1 %v2657_v12  ;;  %v2686_v31 = vld [vmem:[%s4001_s1 + $0x470] ss:$8 sps:$4 sm:$0xff]   ;;  %v2689_v33 = vld [vmem:[%s4001_s1 + $0x484] ss:$8 sps:$4 sm:$0xff]   ;;  %v2692_v35 = vld [vmem:[%s4001_s1 + $0x480] ss:$8 sps:$4 sm:$0xff]  }
   0xd   :  { %1974 = vmatprep.subr.bf16.mxu0 %v2659_v13  ;;  %v2693_v36 = vld [vmem:[%s4001_s1 + $0x94] ss:$8 sps:$4 sm:$0xff]   ;;  %v2697_v38 = vld [vmem:[%s4001_s1 + $0x90] ss:$8 sps:$4 sm:$0xff]   ;;  %v2699_v40 = vld [vmem:[%s4001_s1 + $0xa4] ss:$8 sps:$4 sm:$0xff]  }
   0xe   :  { %v2695_v37 = vld [vmem:[%s4001_s1 + $0x494] ss:$8 sps:$4 sm:$0xff]   ;;  %v2698_v39 = vld [vmem:[%s4001_s1 + $0x490] ss:$8 sps:$4 sm:$0xff]   ;;  %v2701_v41 = vld [vmem:[%s4001_s1 + $0x4a4] ss:$8 sps:$4 sm:$0xff]  }
   0xf   :  { %1763 = vmatpush1.bf16.msra.mxu1 %v2661_v14  ;;  %v2703_v42 = vld [vmem:[%s4001_s1 + $0xa0] ss:$8 sps:$4 sm:$0xff]   ;;  %v2705_v44 = vld [vmem:[%s4001_s1 + $0xb4] ss:$8 sps:$4 sm:$0xff]   ;;  %v2709_v46 = vld [vmem:[%s4001_s1 + $0xb0] ss:$8 sps:$4 sm:$0xff]  }
  0x10   :  { %1975 = vmatpush1.bf16.msra.mxu0 %v2662_v15  ;;  %1764 = vmatprep.subr.bf16.mxu1 %v2663_v16  ;;  %v2704_v43 = vld [vmem:[%s4001_s1 + $0x4a0] ss:$8 sps:$4 sm:$0xff]   ;;  %v2707_v45 = vld [vmem:[%s4001_s1 + $0x4b4] ss:$8 sps:$4 sm:$0xff]   ;;  %v2710_v47 = vld [vmem:[%s4001_s1 + $0x4b0] ss:$8 sps:$4 sm:$0xff]  }
  0x11   :  { %1976 = vmatprep.subr.bf16.mxu0 %v2665_v17  ;;  %v16_v48 = vld [vmem:[%s4002_s0] sm:$0xff]  ;;  %v2717_v58 = vld [vmem:[%s4001_s1 + $0xd4] ss:$8 sps:$4 sm:$0xff]   ;;  %v2721_v60 = vld [vmem:[%s4001_s1 + $0xd0] ss:$8 sps:$4 sm:$0xff]  }
  0x12   :  { %v24_v49 = vld [vmem:[%s4002_s0 + $0x40] sm:$0xff]  ;;  %v2719_v59 = vld [vmem:[%s4001_s1 + $0x4d4] ss:$8 sps:$4 sm:$0xff]   ;;  %v2722_v61 = vld [vmem:[%s4001_s1 + $0x4d0] ss:$8 sps:$4 sm:$0xff]  }
  0x13   :  { %1765 = vmatpush1.bf16.msra.mxu1 %v2667_v18  ;;  %v2711_v50 = vld [vmem:[%s4001_s1 + $0xc4] ss:$8 sps:$4 sm:$0xff]   ;;  %v2286_v52 = vcombine.high %v16_v48, %v24_v49  ;;  %v2715_v56 = vld [vmem:[%s4001_s1 + $0xc0] ss:$8 sps:$4 sm:$0xff]   ;;  %v2729_v2 = vld [vmem:[%s4001_s1 + $0xf4] ss:$8 sps:$4 sm:$0xff]   ;;  %v2285_v8 = vcombine.low %v16_v48, %v24_v49 }
  0x14   :  { %1977 = vmatpush1.bf16.msra.mxu0 %v2668_v19  ;;  %1766 = vmatprep.subr.bf16.mxu1 %v2669_v20  ;;  %v2713_v51 = vld [vmem:[%s4001_s1 + $0x4c4] ss:$8 sps:$4 sm:$0xff]   ;;  %v2716_v57 = vld [vmem:[%s4001_s1 + $0x4c0] ss:$8 sps:$4 sm:$0xff]   ;;  %v2731_v3 = vld [vmem:[%s4001_s1 + $0x4f4] ss:$8 sps:$4 sm:$0xff]  }
  0x15   :  { %1978 = vmatprep.subr.bf16.mxu0 %v2671_v21  ;;  %v20_v53 = vld [vmem:[%s4002_s0 + $0x20] sm:$0xff]  ;;  %1788 = vmatprep.mubr.bf16.mxu1 %v2286_v52  ;;  %v2733_v4 = vld [vmem:[%s4001_s1 + $0xf0] ss:$8 sps:$4 sm:$0xff]   ;;  %v2743_v12 = vld [vmem:[%s4001_s1 + $0x114] ss:$8 sps:$4 sm:$0xff]  }
  0x16   :  { %v28_v54 = vld [vmem:[%s4002_s0 + $0x60] sm:$0xff]  ;;  %v2734_v5 = vld [vmem:[%s4001_s1 + $0x4f0] ss:$8 sps:$4 sm:$0xff]   ;;  %v2746_v13 = vld [vmem:[%s4001_s1 + $0x514] ss:$8 sps:$4 sm:$0xff]  }
  0x17   :  { %1767 = vmatpush1.bf16.msra.mxu1 %v2673_v22  ;;  %v2294_v55 = vcombine.high %v20_v53, %v28_v54  ;;  %v2723_v62 = vld [vmem:[%s4001_s1 + $0xe4] ss:$8 sps:$4 sm:$0xff]   ;;  %v2727_v0 = vld [vmem:[%s4001_s1 + $0xe0] ss:$8 sps:$4 sm:$0xff]   ;;  %v2293_v10 = vcombine.low %v20_v53, %v28_v54  ;;  %v2741_v14 = vld [vmem:[%s4001_s1 + $0x110] ss:$8 sps:$4 sm:$0xff]  }
  0x18   :  { %1979 = vmatpush1.bf16.msra.mxu0 %v2674_v23  ;;  %1768 = vmatprep.subr.bf16.mxu1 %v2675_v24  ;;  %v2725_v63 = vld [vmem:[%s4001_s1 + $0x4e4] ss:$8 sps:$4 sm:$0xff]   ;;  %v2728_v1 = vld [vmem:[%s4001_s1 + $0x4e0] ss:$8 sps:$4 sm:$0xff]   ;;  %v2744_v15 = vld [vmem:[%s4001_s1 + $0x510] ss:$8 sps:$4 sm:$0xff]  }
  0x19   :  { %1980 = vmatprep.subr.bf16.mxu0 %v2677_v25  ;;  %2000 = vmatprep.mubr.bf16.mxu0 %v2294_v55  ;;  %v2737_v6 = vld [vmem:[%s4001_s1 + $0x104] ss:$8 sps:$4 sm:$0xff]   ;;  %v2735_v9 = vld [vmem:[%s4001_s1 + $0x100] ss:$8 sps:$4 sm:$0xff]   ;;  %v2755_v20 = vld [vmem:[%s4001_s1 + $0x134] ss:$8 sps:$4 sm:$0xff]  }
  0x1a   :  { %v2740_v7 = vld [vmem:[%s4001_s1 + $0x504] ss:$8 sps:$4 sm:$0xff]   ;;  %v2738_v11 = vld [vmem:[%s4001_s1 + $0x500] ss:$8 sps:$4 sm:$0xff]   ;;  %v2758_v21 = vld [vmem:[%s4001_s1 + $0x534] ss:$8 sps:$4 sm:$0xff]  }
  0x1b   :  { %1769 = vmatpush1.bf16.msra.mxu1 %v2679_v26  ;;  %v2749_v16 = vld [vmem:[%s4001_s1 + $0x124] ss:$8 sps:$4 sm:$0xff]   ;;  %v2747_v18 = vld [vmem:[%s4001_s1 + $0x120] ss:$8 sps:$4 sm:$0xff]   ;;  %v2753_v22 = vld [vmem:[%s4001_s1 + $0x130] ss:$8 sps:$4 sm:$0xff]  }
  0x1c   :  { %1981 = vmatpush1.bf16.msra.mxu0 %v2680_v27  ;;  %1770 = vmatprep.subr.bf16.mxu1 %v2681_v28  ;;  %v2752_v17 = vld [vmem:[%s4001_s1 + $0x524] ss:$8 sps:$4 sm:$0xff]   ;;  %v2750_v19 = vld [vmem:[%s4001_s1 + $0x520] ss:$8 sps:$4 sm:$0xff]   ;;  %v2756_v23 = vld [vmem:[%s4001_s1 + $0x530] ss:$8 sps:$4 sm:$0xff]  }
  0x1d   :  { %1982 = vmatprep.subr.bf16.mxu0 %v2683_v29  ;;  %v2761_v24 = vld [vmem:[%s4001_s1 + $0x144] ss:$8 sps:$4 sm:$0xff]   ;;  %v2759_v26 = vld [vmem:[%s4001_s1 + $0x140] ss:$8 sps:$4 sm:$0xff]   ;;  %v2767_v28 = vld [vmem:[%s4001_s1 + $0x154] ss:$8 sps:$4 sm:$0xff]  }
  0x1e   :  { %v2764_v25 = vld [vmem:[%s4001_s1 + $0x544] ss:$8 sps:$4 sm:$0xff]   ;;  %v2762_v27 = vld [vmem:[%s4001_s1 + $0x540] ss:$8 sps:$4 sm:$0xff]   ;;  %v2770_v29 = vld [vmem:[%s4001_s1 + $0x554] ss:$8 sps:$4 sm:$0xff]  }
  0x1f   :  { %1771 = vmatpush1.bf16.msra.mxu1 %v2685_v30  ;;  %v32_v30 = vld [vmem:[%s4002_s0 + $0x80] sm:$0xff]  ;;  %v3370_v49 = vld [vmem:[%s4002_s0 + $0x28] sm:$0xff]  ;;  %v2780_v52 = vld [vmem:[%s4001_s1 + $0x570] ss:$8 sps:$4 sm:$0xff]  }
  0x20   :  { %1983 = vmatpush1.bf16.msra.mxu0 %v2686_v31  ;;  %1772 = vmatprep.subr.bf16.mxu1 %v2687_v32  ;;  %v40_v31 = vld [vmem:[%s4002_s0 + $0xc0] sm:$0xff]  ;;  %v2765_v32 = vld [vmem:[%s4001_s1 + $0x150] ss:$8 sps:$4 sm:$0xff]  }
  0x21   :  { %1984 = vmatprep.subr.bf16.mxu0 %v2689_v33  ;;  %v2302_v33 = vcombine.high %v32_v30, %v40_v31  ;;  %v2785_v54 = vld [vmem:[%s4001_s1 + $0x184] ss:$8 sps:$4 sm:$0xff]  }
  0x22   :  { %v2788_v55 = vld [vmem:[%s4001_s1 + $0x584] ss:$8 sps:$4 sm:$0xff]  }
  0x23   :  { %1773 = vmatpush1.bf16.msra.mxu1 %v2691_v34  ;;  %v2768_v34 = vld [vmem:[%s4001_s1 + $0x550] ss:$8 sps:$4 sm:$0xff]  }
  0x24   :  { %1985 = vmatpush1.bf16.msra.mxu0 %v2692_v35  ;;  %1774 = vmatprep.subr.bf16.mxu1 %v2693_v36  ;;  %v36_v35 = vld [vmem:[%s4002_s0 + $0xa0] sm:$0xff] }
  0x25   :  { %1986 = vmatprep.subr.bf16.mxu0 %v2695_v37  ;;  %v44_v36 = vld [vmem:[%s4002_s0 + $0xe0] sm:$0xff]  ;;  %v2301_v37 = vcombine.low %v32_v30, %v40_v31  ;;  %v2839_v30 = vld [vmem:[%s4001_s1 + $0x214] ss:$8 sps:$4 sm:$0xff]  }
  0x26   :  { %v2842_v31 = vld [vmem:[%s4001_s1 + $0x614] ss:$8 sps:$4 sm:$0xff]  }
  0x27   :  { %1775 = vmatpush1.bf16.msra.mxu1 %v2697_v38  ;;  %v2773_v38 = vld [vmem:[%s4001_s1 + $0x164] ss:$8 sps:$4 sm:$0xff]  }
  0x28   :  { %1987 = vmatpush1.bf16.msra.mxu0 %v2698_v39  ;;  %1776 = vmatprep.subr.bf16.mxu1 %v2699_v40  ;;  %v2310_v39 = vcombine.high %v36_v35, %v44_v36  ;;  %v2309_v40 = vcombine.low %v36_v35, %v44_v36  ;;  %v2837_v36 = vld [vmem:[%s4001_s1 + $0x210] ss:$8 sps:$4 sm:$0xff]  }
  0x29   :  { %1988 = vmatprep.subr.bf16.mxu0 %v2701_v41  ;;  %v2776_v41 = vld [vmem:[%s4001_s1 + $0x564] ss:$8 sps:$4 sm:$0xff]  }
  0x2b   :  { %1777 = vmatpush1.bf16.msra.mxu1 %v2703_v42  ;;  %v2771_v42 = vld [vmem:[%s4001_s1 + $0x160] ss:$8 sps:$4 sm:$0xff]  }
  0x2c   :  { %1989 = vmatpush1.bf16.msra.mxu0 %v2704_v43  ;;  %1778 = vmatprep.subr.bf16.mxu1 %v2705_v44  ;;  %v2774_v43 = vld [vmem:[%s4001_s1 + $0x560] ss:$8 sps:$4 sm:$0xff]  }
  0x2d   :  { %1990 = vmatprep.subr.bf16.mxu0 %v2707_v45  ;;  %v3352_v44 = vld [vmem:[%s4002_s0 + $0x8] sm:$0xff] }
  0x2e   :  { %v3357_v45 = vld [vmem:[%s4002_s0 + $0x48] sm:$0xff] }
  0x2f   :  { %1779 = vmatpush1.bf16.msra.mxu1 %v2709_v46  ;;  %v2779_v46 = vld [vmem:[%s4001_s1 + $0x174] ss:$8 sps:$4 sm:$0xff]   ;;  %v2288_v48 = vcombine.high %v3352_v44, %v3357_v45 }
  0x30   :  { %1991 = vmatpush1.bf16.msra.mxu0 %v2710_v47  ;;  %1780 = vmatprep.subr.bf16.mxu1 %v2711_v50  ;;  %v2782_v47 = vld [vmem:[%s4001_s1 + $0x574] ss:$8 sps:$4 sm:$0xff]   ;;  %v3375_v50 = vld [vmem:[%s4002_s0 + $0x68] sm:$0xff] }
  0x31   :  { %1992 = vmatprep.subr.bf16.mxu0 %v2713_v51  ;;  %v2777_v51 = vld [vmem:[%s4001_s1 + $0x170] ss:$8 sps:$4 sm:$0xff]   ;;  %v2296_v53 = vcombine.high %v3370_v49, %v3375_v50 }
  0x33   :  { %1781 = vmatpush1.bf16.msra.mxu1 %v2715_v56  ;;  %v2783_v56 = vld [vmem:[%s4001_s1 + $0x180] ss:$8 sps:$4 sm:$0xff]  }
  0x34   :  { %1993 = vmatpush1.bf16.msra.mxu0 %v2716_v57  ;;  %1782 = vmatprep.subr.bf16.mxu1 %v2717_v58  ;;  %v2786_v57 = vld [vmem:[%s4001_s1 + $0x580] ss:$8 sps:$4 sm:$0xff]   ;;  %v2791_v58 = vld [vmem:[%s4001_s1 + $0x194] ss:$8 sps:$4 sm:$0xff]  }
  0x35   :  { %1994 = vmatprep.subr.bf16.mxu0 %v2719_v59  ;;  %v2794_v59 = vld [vmem:[%s4001_s1 + $0x594] ss:$8 sps:$4 sm:$0xff]  }
  0x37   :  { %1783 = vmatpush1.bf16.msra.mxu1 %v2721_v60  ;;  %v2789_v60 = vld [vmem:[%s4001_s1 + $0x190] ss:$8 sps:$4 sm:$0xff]  }
  0x38   :  { %1995 = vmatpush1.bf16.msra.mxu0 %v2722_v61  ;;  %1784 = vmatprep.subr.bf16.mxu1 %v2723_v62  ;;  %v2792_v61 = vld [vmem:[%s4001_s1 + $0x590] ss:$8 sps:$4 sm:$0xff]   ;;  %v2797_v62 = vld [vmem:[%s4001_s1 + $0x1a4] ss:$8 sps:$4 sm:$0xff]  }
  0x39   :  { %1996 = vmatprep.subr.bf16.mxu0 %v2725_v63  ;;  %v2800_v63 = vld [vmem:[%s4001_s1 + $0x5a4] ss:$8 sps:$4 sm:$0xff]  }
  0x3b   :  { %1785 = vmatpush1.bf16.msra.mxu1 %v2727_v0  ;;  %v2795_v0 = vld [vmem:[%s4001_s1 + $0x1a0] ss:$8 sps:$4 sm:$0xff]  }
  0x3c   :  { %1997 = vmatpush1.bf16.msra.mxu0 %v2728_v1  ;;  %1786 = vmatprep.subr.bf16.mxu1 %v2729_v2  ;;  %v2798_v1 = vld [vmem:[%s4001_s1 + $0x5a0] ss:$8 sps:$4 sm:$0xff]   ;;  %v2803_v2 = vld [vmem:[%s4001_s1 + $0x1b4] ss:$8 sps:$4 sm:$0xff]  }
  0x3d   :  { %1998 = vmatprep.subr.bf16.mxu0 %v2731_v3  ;;  %v2806_v3 = vld [vmem:[%s4001_s1 + $0x5b4] ss:$8 sps:$4 sm:$0xff]  }
  0x3f   :  { %1787 = vmatpush1.bf16.msra.mxu1 %v2733_v4  ;;  %v2801_v4 = vld [vmem:[%s4001_s1 + $0x1b0] ss:$8 sps:$4 sm:$0xff]  }
  0x40   :  { %1999 = vmatpush1.bf16.msra.mxu0 %v2734_v5  ;;  %1809 = vmatprep.subr.bf16.mxu1 %v2737_v6  ;;  %v2804_v5 = vld [vmem:[%s4001_s1 + $0x5b0] ss:$8 sps:$4 sm:$0xff]   ;;  %v2809_v6 = vld [vmem:[%s4001_s1 + $0x1c4] ss:$8 sps:$4 sm:$0xff]  }
  0x41   :  { %2021 = vmatprep.subr.bf16.mxu0 %v2740_v7  ;;  %v2812_v7 = vld [vmem:[%s4001_s1 + $0x5c4] ss:$8 sps:$4 sm:$0xff]  }
  0x42   :  { %1789 = vmatmul.mubr.bf16.vlgmr.msra.gmra.mrb[0].mxu1 %v2285_v8  ;;  %v2807_v8 = vld [vmem:[%s4001_s1 + $0x1c0] ss:$8 sps:$4 sm:$0xff]  }
  0x43   :  { %2001 = vmatmul.mubr.bf16.vlgmr.msra.gmra.mrb[0].mxu0 %v2293_v10  ;;  %1810 = vmatpush1.bf16.msra.mxu1 %v2735_v9  ;;  %v2810_v9 = vld [vmem:[%s4001_s1 + $0x5c0] ss:$8 sps:$4 sm:$0xff]   ;;  %v2815_v10 = vld [vmem:[%s4001_s1 + $0x1d4] ss:$8 sps:$4 sm:$0xff]  }
  0x44   :  { %2022 = vmatpush1.bf16.msra.mxu0 %v2738_v11  ;;  %1811 = vmatprep.subr.bf16.mxu1 %v2743_v12  ;;  %v2818_v11 = vld [vmem:[%s4001_s1 + $0x5d4] ss:$8 sps:$4 sm:$0xff]   ;;  %v2813_v12 = vld [vmem:[%s4001_s1 + $0x1d0] ss:$8 sps:$4 sm:$0xff]  }
  0x45   :  { %2023 = vmatprep.subr.bf16.mxu0 %v2746_v13  ;;  %1798 = vmatprep.mubr.bf16.mxu1 %v2302_v33  ;;  %v2816_v13 = vld [vmem:[%s4001_s1 + $0x5d0] ss:$8 sps:$4 sm:$0xff]   ;;  %v45_v33 = vld [vmem:[%s4002_s0 + $0xe8] sm:$0xff] }
  0x46   :  { %2010 = vmatprep.mubr.bf16.mxu0 %v2310_v39  ;;  %v2848_v39 = vld [vmem:[%s4001_s1 + $0x624] ss:$8 sps:$4 sm:$0xff]  }
  0x47   :  { %1812 = vmatpush1.bf16.msra.mxu1 %v2741_v14  ;;  %v2821_v14 = vld [vmem:[%s4001_s1 + $0x1e4] ss:$8 sps:$4 sm:$0xff]  }
  0x48   :  { %2024 = vmatpush1.bf16.msra.mxu0 %v2744_v15  ;;  %1813 = vmatprep.subr.bf16.mxu1 %v2749_v16  ;;  %v2824_v15 = vld [vmem:[%s4001_s1 + $0x5e4] ss:$8 sps:$4 sm:$0xff]   ;;  %v2819_v16 = vld [vmem:[%s4001_s1 + $0x1e0] ss:$8 sps:$4 sm:$0xff]  }
  0x49   :  { %2025 = vmatprep.subr.bf16.mxu0 %v2752_v17  ;;  %v2822_v17 = vld [vmem:[%s4001_s1 + $0x5e0] ss:$8 sps:$4 sm:$0xff]  }
  0x4a   :  { %1799 = vmatmul.mubr.bf16.gmra.mrb[4].mxu1 %v2301_v37  ;;  %v2840_v37 = vld [vmem:[%s4001_s1 + $0x610] ss:$8 sps:$4 sm:$0xff]  }
  0x4b   :  { %1814 = vmatpush1.bf16.msra.mxu1 %v2747_v18  ;;  %2011 = vmatmul.mubr.bf16.gmra.mrb[4].mxu0 %v2309_v40  ;;  %v2827_v18 = vld [vmem:[%s4001_s1 + $0x1f4] ss:$8 sps:$4 sm:$0xff]   ;;  %v2843_v40 = vld [vmem:[%s4001_s1 + $0x220] ss:$8 sps:$4 sm:$0xff]  }
  0x4c   :  { %2026 = vmatpush1.bf16.msra.mxu0 %v2750_v19  ;;  %1815 = vmatprep.subr.bf16.mxu1 %v2755_v20  ;;  %v2830_v19 = vld [vmem:[%s4001_s1 + $0x5f4] ss:$8 sps:$4 sm:$0xff]   ;;  %v2825_v20 = vld [vmem:[%s4001_s1 + $0x1f0] ss:$8 sps:$4 sm:$0xff]  }
  0x4d   :  { %2027 = vmatprep.subr.bf16.mxu0 %v2758_v21  ;;  %1841 = vmatprep.mubr.bf16.mxu1 %v2288_v48  ;;  %v2828_v21 = vld [vmem:[%s4001_s1 + $0x5f0] ss:$8 sps:$4 sm:$0xff]   ;;  %v2851_v48 = vld [vmem:[%s4001_s1 + $0x234] ss:$8 sps:$4 sm:$0xff]  }
  0x4e   :  { %2053 = vmatprep.mubr.bf16.mxu0 %v2296_v53  ;;  %v2852_v53 = vld [vmem:[%s4001_s1 + $0x630] ss:$8 sps:$4 sm:$0xff]  }
  0x4f   :  { %1816 = vmatpush1.bf16.msra.mxu1 %v2753_v22  ;;  %v2833_v22 = vld [vmem:[%s4001_s1 + $0x204] ss:$8 sps:$4 sm:$0xff]  }
  0x50   :  { %2028 = vmatpush1.bf16.msra.mxu0 %v2756_v23  ;;  %1817 = vmatprep.subr.bf16.mxu1 %v2761_v24  ;;  %v2836_v23 = vld [vmem:[%s4001_s1 + $0x604] ss:$8 sps:$4 sm:$0xff]   ;;  %v2831_v24 = vld [vmem:[%s4001_s1 + $0x200] ss:$8 sps:$4 sm:$0xff]  }
  0x51   :  { %2029 = vmatprep.subr.bf16.mxu0 %v2764_v25  ;;  %v2834_v25 = vld [vmem:[%s4001_s1 + $0x600] ss:$8 sps:$4 sm:$0xff]  }
  0x53   :  { %1818 = vmatpush1.bf16.msra.mxu1 %v2759_v26  ;;  %v33_v26 = vld [vmem:[%s4002_s0 + $0x88] sm:$0xff] }
  0x54   :  { %2030 = vmatpush1.bf16.msra.mxu0 %v2762_v27  ;;  %1819 = vmatprep.subr.bf16.mxu1 %v2767_v28  ;;  %v2287_v27 = vcombine.low %v3352_v44, %v3357_v45  ;;  %v2295_v28 = vcombine.low %v3370_v49, %v3375_v50  ;;  %v3541_v45 = vld [vmem:[%s4002_s0 + $0x50] sm:$0xff] }
  0x55   :  { %2031 = vmatprep.subr.bf16.mxu0 %v2770_v29  ;;  %v41_v29 = vld [vmem:[%s4002_s0 + $0xc8] sm:$0xff]  ;;  %v2854_v49 = vld [vmem:[%s4001_s1 + $0x634] ss:$8 sps:$4 sm:$0xff]  }
  0x57   :  { %1820 = vmatpush1.bf16.msra.mxu1 %v2765_v32  ;;  %v37_v32 = vld [vmem:[%s4002_s0 + $0xa8] sm:$0xff] }
  0x58   :  { %2032 = vmatpush1.bf16.msra.mxu0 %v2768_v34  ;;  %1821 = vmatprep.subr.bf16.mxu1 %v2773_v38  ;;  %v2304_v34 = vcombine.high %v33_v26, %v41_v29  ;;  %v2312_v35 = vcombine.high %v37_v32, %v45_v33  ;;  %v2845_v38 = vld [vmem:[%s4001_s1 + $0x224] ss:$8 sps:$4 sm:$0xff]   ;;  %v2311_v44 = vcombine.low %v37_v32, %v45_v33  ;;  %v2915_v32 = vld [vmem:[%s4001_s1 + $0x2e0] ss:$8 sps:$4 sm:$0xff]  }
  0x59   :  { %2033 = vmatprep.subr.bf16.mxu0 %v2776_v41  ;;  %v2846_v41 = vld [vmem:[%s4001_s1 + $0x620] ss:$8 sps:$4 sm:$0xff]  }
  0x5a   :  { %v2918_v33 = vld [vmem:[%s4001_s1 + $0x6e0] ss:$8 sps:$4 sm:$0xff]  }
  0x5b   :  { %1822 = vmatpush1.bf16.msra.mxu1 %v2771_v42  ;;  %v3536_v42 = vld [vmem:[%s4002_s0 + $0x10] sm:$0xff] }
  0x5c   :  { %2034 = vmatpush1.bf16.msra.mxu0 %v2774_v43  ;;  %1823 = vmatprep.subr.bf16.mxu1 %v2779_v46  ;;  %v2303_v43 = vcombine.low %v33_v26, %v41_v29  ;;  %v3546_v46 = vld [vmem:[%s4002_s0 + $0x30] sm:$0xff]  ;;  %v2290_v50 = vcombine.high %v3536_v42, %v3541_v45 }
  0x5d   :  { %2035 = vmatprep.subr.bf16.mxu0 %v2782_v47  ;;  %v3551_v47 = vld [vmem:[%s4002_s0 + $0x70] sm:$0xff] }
  0x5e   :  { %v2911_v26 = vld [vmem:[%s4001_s1 + $0x2d4] ss:$8 sps:$4 sm:$0xff]   ;;  %v2912_v29 = vld [vmem:[%s4001_s1 + $0x6d0] ss:$8 sps:$4 sm:$0xff]  }
  0x5f   :  { %1824 = vmatpush1.bf16.msra.mxu1 %v2777_v51  ;;  %v2298_v51 = vcombine.high %v3546_v46, %v3551_v47 }
  0x60   :  { %2036 = vmatpush1.bf16.msra.mxu0 %v2780_v52  ;;  %1825 = vmatprep.subr.bf16.mxu1 %v2785_v54  ;;  %v2849_v52 = vld [vmem:[%s4001_s1 + $0x230] ss:$8 sps:$4 sm:$0xff]   ;;  %v2857_v54 = vld [vmem:[%s4001_s1 + $0x244] ss:$8 sps:$4 sm:$0xff]  }
  0x61   :  { %2037 = vmatprep.subr.bf16.mxu0 %v2788_v55  ;;  %v2860_v55 = vld [vmem:[%s4001_s1 + $0x644] ss:$8 sps:$4 sm:$0xff]  }
  0x63   :  { %1826 = vmatpush1.bf16.msra.mxu1 %v2783_v56  ;;  %v2855_v56 = vld [vmem:[%s4001_s1 + $0x240] ss:$8 sps:$4 sm:$0xff]  }
  0x64   :  { %2038 = vmatpush1.bf16.msra.mxu0 %v2786_v57  ;;  %1827 = vmatprep.subr.bf16.mxu1 %v2791_v58  ;;  %v2858_v57 = vld [vmem:[%s4001_s1 + $0x640] ss:$8 sps:$4 sm:$0xff]   ;;  %v2863_v58 = vld [vmem:[%s4001_s1 + $0x254] ss:$8 sps:$4 sm:$0xff]  }
  0x65   :  { %2039 = vmatprep.subr.bf16.mxu0 %v2794_v59  ;;  %v2866_v59 = vld [vmem:[%s4001_s1 + $0x654] ss:$8 sps:$4 sm:$0xff]  }
  0x67   :  { %1828 = vmatpush1.bf16.msra.mxu1 %v2789_v60  ;;  %v2861_v60 = vld [vmem:[%s4001_s1 + $0x250] ss:$8 sps:$4 sm:$0xff]  }
  0x68   :  { %2040 = vmatpush1.bf16.msra.mxu0 %v2792_v61  ;;  %1829 = vmatprep.subr.bf16.mxu1 %v2797_v62  ;;  %v2864_v61 = vld [vmem:[%s4001_s1 + $0x650] ss:$8 sps:$4 sm:$0xff]   ;;  %v2869_v62 = vld [vmem:[%s4001_s1 + $0x264] ss:$8 sps:$4 sm:$0xff]  }
  0x69   :  { %2041 = vmatprep.subr.bf16.mxu0 %v2800_v63  ;;  %v2872_v63 = vld [vmem:[%s4001_s1 + $0x664] ss:$8 sps:$4 sm:$0xff]  }
  0x6b   :  { %1830 = vmatpush1.bf16.msra.mxu1 %v2795_v0  ;;  %v2867_v0 = vld [vmem:[%s4001_s1 + $0x260] ss:$8 sps:$4 sm:$0xff]  }
  0x6c   :  { %2042 = vmatpush1.bf16.msra.mxu0 %v2798_v1  ;;  %1831 = vmatprep.subr.bf16.mxu1 %v2803_v2  ;;  %v2870_v1 = vld [vmem:[%s4001_s1 + $0x660] ss:$8 sps:$4 sm:$0xff]   ;;  %v2875_v2 = vld [vmem:[%s4001_s1 + $0x274] ss:$8 sps:$4 sm:$0xff]  }
  0x6d   :  { %2043 = vmatprep.subr.bf16.mxu0 %v2806_v3  ;;  %v2878_v3 = vld [vmem:[%s4001_s1 + $0x674] ss:$8 sps:$4 sm:$0xff]  }
  0x6f   :  { %1832 = vmatpush1.bf16.msra.mxu1 %v2801_v4  ;;  %v2873_v4 = vld [vmem:[%s4001_s1 + $0x270] ss:$8 sps:$4 sm:$0xff]  }
  0x70   :  { %2044 = vmatpush1.bf16.msra.mxu0 %v2804_v5  ;;  %1833 = vmatprep.subr.bf16.mxu1 %v2809_v6  ;;  %v2876_v5 = vld [vmem:[%s4001_s1 + $0x670] ss:$8 sps:$4 sm:$0xff]   ;;  %v2881_v6 = vld [vmem:[%s4001_s1 + $0x284] ss:$8 sps:$4 sm:$0xff]  }
  0x71   :  { %2045 = vmatprep.subr.bf16.mxu0 %v2812_v7  ;;  %v2884_v7 = vld [vmem:[%s4001_s1 + $0x684] ss:$8 sps:$4 sm:$0xff]  }
  0x73   :  { %1834 = vmatpush1.bf16.msra.mxu1 %v2807_v8  ;;  %v2879_v8 = vld [vmem:[%s4001_s1 + $0x280] ss:$8 sps:$4 sm:$0xff]  }
  0x74   :  { %2046 = vmatpush1.bf16.msra.mxu0 %v2810_v9  ;;  %1835 = vmatprep.subr.bf16.mxu1 %v2815_v10  ;;  %v2882_v9 = vld [vmem:[%s4001_s1 + $0x680] ss:$8 sps:$4 sm:$0xff]   ;;  %v2887_v10 = vld [vmem:[%s4001_s1 + $0x294] ss:$8 sps:$4 sm:$0xff]  }
  0x75   :  { %2047 = vmatprep.subr.bf16.mxu0 %v2818_v11  ;;  %v2890_v11 = vld [vmem:[%s4001_s1 + $0x694] ss:$8 sps:$4 sm:$0xff]  }
  0x77   :  { %1836 = vmatpush1.bf16.msra.mxu1 %v2813_v12  ;;  %v2885_v12 = vld [vmem:[%s4001_s1 + $0x290] ss:$8 sps:$4 sm:$0xff]  }
  0x78   :  { %2048 = vmatpush1.bf16.msra.mxu0 %v2816_v13  ;;  %1837 = vmatprep.subr.bf16.mxu1 %v2821_v14  ;;  %v2888_v13 = vld [vmem:[%s4001_s1 + $0x690] ss:$8 sps:$4 sm:$0xff]   ;;  %v2893_v14 = vld [vmem:[%s4001_s1 + $0x2a4] ss:$8 sps:$4 sm:$0xff]  }
  0x79   :  { %2049 = vmatprep.subr.bf16.mxu0 %v2824_v15  ;;  %v2896_v15 = vld [vmem:[%s4001_s1 + $0x6a4] ss:$8 sps:$4 sm:$0xff]  }
  0x7b   :  { %1838 = vmatpush1.bf16.msra.mxu1 %v2819_v16  ;;  %v2891_v16 = vld [vmem:[%s4001_s1 + $0x2a0] ss:$8 sps:$4 sm:$0xff]  }
  0x7c   :  { %2050 = vmatpush1.bf16.msra.mxu0 %v2822_v17  ;;  %1839 = vmatprep.subr.bf16.mxu1 %v2827_v18  ;;  %v2894_v17 = vld [vmem:[%s4001_s1 + $0x6a0] ss:$8 sps:$4 sm:$0xff]   ;;  %v2899_v18 = vld [vmem:[%s4001_s1 + $0x2b4] ss:$8 sps:$4 sm:$0xff]  }
  0x7d   :  { %2051 = vmatprep.subr.bf16.mxu0 %v2830_v19  ;;  %v2902_v19 = vld [vmem:[%s4001_s1 + $0x6b4] ss:$8 sps:$4 sm:$0xff]  }
  0x7f   :  { %1840 = vmatpush1.bf16.msra.mxu1 %v2825_v20  ;;  %v2897_v20 = vld [vmem:[%s4001_s1 + $0x2b0] ss:$8 sps:$4 sm:$0xff]  }
  0x80   :  { %2052 = vmatpush1.bf16.msra.mxu0 %v2828_v21  ;;  %1862 = vmatprep.subr.bf16.mxu1 %v2833_v22  ;;  %v2900_v21 = vld [vmem:[%s4001_s1 + $0x6b0] ss:$8 sps:$4 sm:$0xff]   ;;  %v2905_v22 = vld [vmem:[%s4001_s1 + $0x2c4] ss:$8 sps:$4 sm:$0xff]  }
  0x81   :  { %2074 = vmatprep.subr.bf16.mxu0 %v2836_v23  ;;  %v2908_v23 = vld [vmem:[%s4001_s1 + $0x6c4] ss:$8 sps:$4 sm:$0xff]  }
  0x82   :  { %1842 = vmatmul.mubr.bf16.vlgmr.msra.gmra.mrb[0].mxu1 %v2287_v27  ;;  %v2914_v27 = vld [vmem:[%s4001_s1 + $0x6d4] ss:$8 sps:$4 sm:$0xff]  }
  0x83   :  { %2054 = vmatmul.mubr.bf16.vlgmr.msra.gmra.mrb[0].mxu0 %v2295_v28  ;;  %1863 = vmatpush1.bf16.msra.mxu1 %v2831_v24  ;;  %v2903_v24 = vld [vmem:[%s4001_s1 + $0x2c0] ss:$8 sps:$4 sm:$0xff]   ;;  %v2909_v28 = vld [vmem:[%s4001_s1 + $0x2d0] ss:$8 sps:$4 sm:$0xff]  }
  0x84   :  { %2075 = vmatpush1.bf16.msra.mxu0 %v2834_v25  ;;  %1864 = vmatprep.subr.bf16.mxu1 %v2839_v30  ;;  %v2906_v25 = vld [vmem:[%s4001_s1 + $0x6c0] ss:$8 sps:$4 sm:$0xff]   ;;  %v2917_v30 = vld [vmem:[%s4001_s1 + $0x2e4] ss:$8 sps:$4 sm:$0xff]  }
  0x85   :  { %2076 = vmatprep.subr.bf16.mxu0 %v2842_v31  ;;  %1851 = vmatprep.mubr.bf16.mxu1 %v2304_v34  ;;  %v2920_v31 = vld [vmem:[%s4001_s1 + $0x6e4] ss:$8 sps:$4 sm:$0xff]   ;;  %v2923_v34 = vld [vmem:[%s4001_s1 + $0x2f4] ss:$8 sps:$4 sm:$0xff]  }
  0x86   :  { %2063 = vmatprep.mubr.bf16.mxu0 %v2312_v35  ;;  %v2926_v35 = vld [vmem:[%s4001_s1 + $0x6f4] ss:$8 sps:$4 sm:$0xff]  }
  0x87   :  { %1865 = vmatpush1.bf16.msra.mxu1 %v2837_v36  ;;  %v2921_v36 = vld [vmem:[%s4001_s1 + $0x2f0] ss:$8 sps:$4 sm:$0xff]  }
  0x88   :  { %2077 = vmatpush1.bf16.msra.mxu0 %v2840_v37  ;;  %1866 = vmatprep.subr.bf16.mxu1 %v2845_v38  ;;  %v2924_v37 = vld [vmem:[%s4001_s1 + $0x6f0] ss:$8 sps:$4 sm:$0xff]   ;;  %v2929_v38 = vld [vmem:[%s4001_s1 + $0x304] ss:$8 sps:$4 sm:$0xff]  }
  0x89   :  { %2078 = vmatprep.subr.bf16.mxu0 %v2848_v39  ;;  %v2932_v39 = vld [vmem:[%s4001_s1 + $0x704] ss:$8 sps:$4 sm:$0xff]  }
  0x8a   :  { %1852 = vmatmul.mubr.bf16.gmra.mrb[4].mxu1 %v2303_v43  ;;  %v2297_v43 = vcombine.low %v3546_v46, %v3551_v47  ;;  %v2935_v46 = vld [vmem:[%s4001_s1 + $0x314] ss:$8 sps:$4 sm:$0xff]  }
  0x8b   :  { %2064 = vmatmul.mubr.bf16.gmra.mrb[4].mxu0 %v2311_v44  ;;  %1867 = vmatpush1.bf16.msra.mxu1 %v2843_v40  ;;  %v34_v40 = vld [vmem:[%s4002_s0 + $0x90] sm:$0xff] }
  0x8c   :  { %2079 = vmatpush1.bf16.msra.mxu0 %v2846_v41  ;;  %1868 = vmatprep.subr.bf16.mxu1 %v2851_v48  ;;  %v2289_v41 = vcombine.low %v3536_v42, %v3541_v45  ;;  %v42_v44 = vld [vmem:[%s4002_s0 + $0xd0] sm:$0xff]  ;;  %v2927_v42 = vld [vmem:[%s4001_s1 + $0x300] ss:$8 sps:$4 sm:$0xff]  }
  0x8d   :  { %2080 = vmatprep.subr.bf16.mxu0 %v2854_v49  ;;  %1894 = vmatprep.mubr.bf16.mxu1 %v2290_v50  ;;  %v38_v48 = vld [vmem:[%s4002_s0 + $0xb0] sm:$0xff]  ;;  %v2930_v45 = vld [vmem:[%s4001_s1 + $0x700] ss:$8 sps:$4 sm:$0xff]   ;;  %v2306_v50 = vcombine.high %v34_v40, %v42_v44 }
  0x8e   :  { %2106 = vmatprep.mubr.bf16.mxu0 %v2298_v51  ;;  %v46_v49 = vld [vmem:[%s4002_s0 + $0xf0] sm:$0xff] }
  0x8f   :  { %1869 = vmatpush1.bf16.msra.mxu1 %v2849_v52  ;;  %v2938_v47 = vld [vmem:[%s4001_s1 + $0x714] ss:$8 sps:$4 sm:$0xff]   ;;  %v2314_v51 = vcombine.high %v38_v48, %v46_v49  ;;  %v2933_v52 = vld [vmem:[%s4001_s1 + $0x310] ss:$8 sps:$4 sm:$0xff]  }
  0x90   :  { %2081 = vmatpush1.bf16.msra.mxu0 %v2852_v53  ;;  %1870 = vmatprep.subr.bf16.mxu1 %v2857_v54  ;;  %v2936_v53 = vld [vmem:[%s4001_s1 + $0x710] ss:$8 sps:$4 sm:$0xff]   ;;  %v2941_v54 = vld [vmem:[%s4001_s1 + $0x324] ss:$8 sps:$4 sm:$0xff]  }
  0x91   :  { %2082 = vmatprep.subr.bf16.mxu0 %v2860_v55  ;;  %v2944_v55 = vld [vmem:[%s4001_s1 + $0x724] ss:$8 sps:$4 sm:$0xff]  }
  0x93   :  { %1871 = vmatpush1.bf16.msra.mxu1 %v2855_v56  ;;  %v3762_v56 = vld [vmem:[%s4002_s0 + $0x18] sm:$0xff] }
  0x94   :  { %2083 = vmatpush1.bf16.msra.mxu0 %v2858_v57  ;;  %1872 = vmatprep.subr.bf16.mxu1 %v2863_v58  ;;  %v2305_v57 = vcombine.low %v34_v40, %v42_v44  ;;  %v2313_v58 = vcombine.low %v38_v48, %v46_v49  ;;  %v2999_v40 = vld [vmem:[%s4001_s1 + $0x3c0] ss:$8 sps:$4 sm:$0xff]   ;;  %v3010_v44 = vld [vmem:[%s4001_s1 + $0x7d4] ss:$8 sps:$4 sm:$0xff]   ;;  %v3005_v48 = vld [vmem:[%s4001_s1 + $0x3d0] ss:$8 sps:$4 sm:$0xff]  }
  0x95   :  { %2084 = vmatprep.subr.bf16.mxu0 %v2866_v59  ;;  %v3767_v59 = vld [vmem:[%s4002_s0 + $0x58] sm:$0xff] }
  0x96   :  { %v3008_v49 = vld [vmem:[%s4001_s1 + $0x7d0] ss:$8 sps:$4 sm:$0xff]  }
  0x97   :  { %1873 = vmatpush1.bf16.msra.mxu1 %v2861_v60  ;;  %v3772_v60 = vld [vmem:[%s4002_s0 + $0x38] sm:$0xff] }
  0x98   :  { %2085 = vmatpush1.bf16.msra.mxu0 %v2864_v61  ;;  %1874 = vmatprep.subr.bf16.mxu1 %v2869_v62  ;;  %v3777_v61 = vld [vmem:[%s4002_s0 + $0x78] sm:$0xff]  ;;  %v2939_v62 = vld [vmem:[%s4001_s1 + $0x320] ss:$8 sps:$4 sm:$0xff]  }
  0x99   :  { %2086 = vmatprep.subr.bf16.mxu0 %v2872_v63  ;;  %v2942_v63 = vld [vmem:[%s4001_s1 + $0x720] ss:$8 sps:$4 sm:$0xff]  }
  0x9b   :  { %1875 = vmatpush1.bf16.msra.mxu1 %v2867_v0  ;;  %v2947_v0 = vld [vmem:[%s4001_s1 + $0x334] ss:$8 sps:$4 sm:$0xff]  }
  0x9c   :  { %2087 = vmatpush1.bf16.msra.mxu0 %v2870_v1  ;;  %1876 = vmatprep.subr.bf16.mxu1 %v2875_v2  ;;  %v2950_v1 = vld [vmem:[%s4001_s1 + $0x734] ss:$8 sps:$4 sm:$0xff]   ;;  %v2292_v2 = vcombine.high %v3762_v56, %v3767_v59 }
  0x9d   :  { %2088 = vmatprep.subr.bf16.mxu0 %v2878_v3  ;;  %v2300_v3 = vcombine.high %v3772_v60, %v3777_v61 }
  0x9f   :  { %1877 = vmatpush1.bf16.msra.mxu1 %v2873_v4  ;;  %v2945_v4 = vld [vmem:[%s4001_s1 + $0x330] ss:$8 sps:$4 sm:$0xff]  }
  0xa0   :  { %2089 = vmatpush1.bf16.msra.mxu0 %v2876_v5  ;;  %1878 = vmatprep.subr.bf16.mxu1 %v2881_v6  ;;  %v2948_v5 = vld [vmem:[%s4001_s1 + $0x730] ss:$8 sps:$4 sm:$0xff]   ;;  %v2953_v6 = vld [vmem:[%s4001_s1 + $0x344] ss:$8 sps:$4 sm:$0xff]  }
  0xa1   :  { %2090 = vmatprep.subr.bf16.mxu0 %v2884_v7  ;;  %v2956_v7 = vld [vmem:[%s4001_s1 + $0x744] ss:$8 sps:$4 sm:$0xff]  }
  0xa3   :  { %1879 = vmatpush1.bf16.msra.mxu1 %v2879_v8  ;;  %v2951_v8 = vld [vmem:[%s4001_s1 + $0x340] ss:$8 sps:$4 sm:$0xff]  }
  0xa4   :  { %2091 = vmatpush1.bf16.msra.mxu0 %v2882_v9  ;;  %1880 = vmatprep.subr.bf16.mxu1 %v2887_v10  ;;  %v2954_v9 = vld [vmem:[%s4001_s1 + $0x740] ss:$8 sps:$4 sm:$0xff]   ;;  %v2959_v10 = vld [vmem:[%s4001_s1 + $0x354] ss:$8 sps:$4 sm:$0xff]  }
  0xa5   :  { %2092 = vmatprep.subr.bf16.mxu0 %v2890_v11  ;;  %v2962_v11 = vld [vmem:[%s4001_s1 + $0x754] ss:$8 sps:$4 sm:$0xff]  }
  0xa7   :  { %1881 = vmatpush1.bf16.msra.mxu1 %v2885_v12  ;;  %v2957_v12 = vld [vmem:[%s4001_s1 + $0x350] ss:$8 sps:$4 sm:$0xff]  }
  0xa8   :  { %2093 = vmatpush1.bf16.msra.mxu0 %v2888_v13  ;;  %1882 = vmatprep.subr.bf16.mxu1 %v2893_v14  ;;  %v2960_v13 = vld [vmem:[%s4001_s1 + $0x750] ss:$8 sps:$4 sm:$0xff]   ;;  %v2965_v14 = vld [vmem:[%s4001_s1 + $0x364] ss:$8 sps:$4 sm:$0xff]  }
  0xa9   :  { %2094 = vmatprep.subr.bf16.mxu0 %v2896_v15  ;;  %v2968_v15 = vld [vmem:[%s4001_s1 + $0x764] ss:$8 sps:$4 sm:$0xff]  }
  0xab   :  { %1883 = vmatpush1.bf16.msra.mxu1 %v2891_v16  ;;  %v2963_v16 = vld [vmem:[%s4001_s1 + $0x360] ss:$8 sps:$4 sm:$0xff]  }
  0xac   :  { %2095 = vmatpush1.bf16.msra.mxu0 %v2894_v17  ;;  %1884 = vmatprep.subr.bf16.mxu1 %v2899_v18  ;;  %v2966_v17 = vld [vmem:[%s4001_s1 + $0x760] ss:$8 sps:$4 sm:$0xff]   ;;  %v2971_v18 = vld [vmem:[%s4001_s1 + $0x374] ss:$8 sps:$4 sm:$0xff]  }
  0xad   :  { %2096 = vmatprep.subr.bf16.mxu0 %v2902_v19  ;;  %v2974_v19 = vld [vmem:[%s4001_s1 + $0x774] ss:$8 sps:$4 sm:$0xff]  }
  0xaf   :  { %1885 = vmatpush1.bf16.msra.mxu1 %v2897_v20  ;;  %v2969_v20 = vld [vmem:[%s4001_s1 + $0x370] ss:$8 sps:$4 sm:$0xff]  }
  0xb0   :  { %2097 = vmatpush1.bf16.msra.mxu0 %v2900_v21  ;;  %1886 = vmatprep.subr.bf16.mxu1 %v2905_v22  ;;  %v2972_v21 = vld [vmem:[%s4001_s1 + $0x770] ss:$8 sps:$4 sm:$0xff]   ;;  %v2977_v22 = vld [vmem:[%s4001_s1 + $0x384] ss:$8 sps:$4 sm:$0xff]  }
  0xb1   :  { %2098 = vmatprep.subr.bf16.mxu0 %v2908_v23  ;;  %v2980_v23 = vld [vmem:[%s4001_s1 + $0x784] ss:$8 sps:$4 sm:$0xff]  }
  0xb3   :  { %1887 = vmatpush1.bf16.msra.mxu1 %v2903_v24  ;;  %v2975_v24 = vld [vmem:[%s4001_s1 + $0x380] ss:$8 sps:$4 sm:$0xff]  }
  0xb4   :  { %2099 = vmatpush1.bf16.msra.mxu0 %v2906_v25  ;;  %1888 = vmatprep.subr.bf16.mxu1 %v2911_v26  ;;  %v2978_v25 = vld [vmem:[%s4001_s1 + $0x780] ss:$8 sps:$4 sm:$0xff]   ;;  %v2983_v26 = vld [vmem:[%s4001_s1 + $0x394] ss:$8 sps:$4 sm:$0xff]  }
  0xb5   :  { %2100 = vmatprep.subr.bf16.mxu0 %v2914_v27  ;;  %v2986_v27 = vld [vmem:[%s4001_s1 + $0x794] ss:$8 sps:$4 sm:$0xff]  }
  0xb7   :  { %1889 = vmatpush1.bf16.msra.mxu1 %v2909_v28  ;;  %v2981_v28 = vld [vmem:[%s4001_s1 + $0x390] ss:$8 sps:$4 sm:$0xff]  }
  0xb8   :  { %2101 = vmatpush1.bf16.msra.mxu0 %v2912_v29  ;;  %1890 = vmatprep.subr.bf16.mxu1 %v2917_v30  ;;  %v2984_v29 = vld [vmem:[%s4001_s1 + $0x790] ss:$8 sps:$4 sm:$0xff]   ;;  %v2989_v30 = vld [vmem:[%s4001_s1 + $0x3a4] ss:$8 sps:$4 sm:$0xff]  }
  0xb9   :  { %2102 = vmatprep.subr.bf16.mxu0 %v2920_v31  ;;  %v2992_v31 = vld [vmem:[%s4001_s1 + $0x7a4] ss:$8 sps:$4 sm:$0xff]  }
  0xbb   :  { %1891 = vmatpush1.bf16.msra.mxu1 %v2915_v32  ;;  %v2987_v32 = vld [vmem:[%s4001_s1 + $0x3a0] ss:$8 sps:$4 sm:$0xff]  }
  0xbc   :  { %2103 = vmatpush1.bf16.msra.mxu0 %v2918_v33  ;;  %1892 = vmatprep.subr.bf16.mxu1 %v2923_v34  ;;  %v2990_v33 = vld [vmem:[%s4001_s1 + $0x7a0] ss:$8 sps:$4 sm:$0xff]   ;;  %v2995_v34 = vld [vmem:[%s4001_s1 + $0x3b4] ss:$8 sps:$4 sm:$0xff]  }
  0xbd   :  { %2104 = vmatprep.subr.bf16.mxu0 %v2926_v35  ;;  %v2998_v35 = vld [vmem:[%s4001_s1 + $0x7b4] ss:$8 sps:$4 sm:$0xff]  }
  0xbf   :  { %1893 = vmatpush1.bf16.msra.mxu1 %v2921_v36  ;;  %v2993_v36 = vld [vmem:[%s4001_s1 + $0x3b0] ss:$8 sps:$4 sm:$0xff]  }
  0xc0   :  { %2105 = vmatpush1.bf16.msra.mxu0 %v2924_v37  ;;  %1915 = vmatprep.subr.bf16.mxu1 %v2929_v38  ;;  %v2996_v37 = vld [vmem:[%s4001_s1 + $0x7b0] ss:$8 sps:$4 sm:$0xff]   ;;  %v3001_v38 = vld [vmem:[%s4001_s1 + $0x3c4] ss:$8 sps:$4 sm:$0xff]  }
  0xc1   :  { %2127 = vmatprep.subr.bf16.mxu0 %v2932_v39  ;;  %v3004_v39 = vld [vmem:[%s4001_s1 + $0x7c4] ss:$8 sps:$4 sm:$0xff]  }
  0xc2   :  { %1895 = vmatmul.mubr.bf16.vlgmr.msra.gmra.mrb[0].mxu1 %v2289_v41  ;;  %v3002_v41 = vld [vmem:[%s4001_s1 + $0x7c0] ss:$8 sps:$4 sm:$0xff]  }
  0xc3   :  { %2107 = vmatmul.mubr.bf16.vlgmr.msra.gmra.mrb[0].mxu0 %v2297_v43  ;;  %1916 = vmatpush1.bf16.msra.mxu1 %v2927_v42  ;;  %v3007_v43 = vld [vmem:[%s4001_s1 + $0x3d4] ss:$8 sps:$4 sm:$0xff]   ;;  %v3013_v42 = vld [vmem:[%s4001_s1 + $0x3e4] ss:$8 sps:$4 sm:$0xff]  }
  0xc4   :  { %2128 = vmatpush1.bf16.msra.mxu0 %v2930_v45  ;;  %1917 = vmatprep.subr.bf16.mxu1 %v2935_v46  ;;  %v3016_v45 = vld [vmem:[%s4001_s1 + $0x7e4] ss:$8 sps:$4 sm:$0xff]   ;;  %v3011_v46 = vld [vmem:[%s4001_s1 + $0x3e0] ss:$8 sps:$4 sm:$0xff]  }
  0xc5   :  { %2129 = vmatprep.subr.bf16.mxu0 %v2938_v47  ;;  %1904 = vmatprep.mubr.bf16.mxu1 %v2306_v50  ;;  %v3014_v47 = vld [vmem:[%s4001_s1 + $0x7e0] ss:$8 sps:$4 sm:$0xff]   ;;  %v3019_v50 = vld [vmem:[%s4001_s1 + $0x3f4] ss:$8 sps:$4 sm:$0xff]  }
  0xc6   :  { %2116 = vmatprep.mubr.bf16.mxu0 %v2314_v51  ;;  %v3022_v51 = vld [vmem:[%s4001_s1 + $0x7f4] ss:$8 sps:$4 sm:$0xff]  }
  0xc7   :  { %1918 = vmatpush1.bf16.msra.mxu1 %v2933_v52  ;;  %v3017_v52 = vld [vmem:[%s4001_s1 + $0x3f0] ss:$8 sps:$4 sm:$0xff]  }
  0xc8   :  { %2130 = vmatpush1.bf16.msra.mxu0 %v2936_v53  ;;  %1919 = vmatprep.subr.bf16.mxu1 %v2941_v54  ;;  %v3020_v53 = vld [vmem:[%s4001_s1 + $0x7f0] ss:$8 sps:$4 sm:$0xff]  }
  0xc9   :  { %2131 = vmatprep.subr.bf16.mxu0 %v2944_v55  ;;  %v35_v54 = vld [vmem:[%s4002_s0 + $0x98] sm:$0xff] }
  0xca   :  { %1905 = vmatmul.mubr.bf16.gmra.mrb[4].mxu1 %v2305_v57  ;;  %v43_v55 = vld [vmem:[%s4002_s0 + $0xd8] sm:$0xff] }
  0xcb   :  { %2117 = vmatmul.mubr.bf16.gmra.mrb[4].mxu0 %v2313_v58  ;;  %1920 = vmatpush1.bf16.msra.mxu1 %v2939_v62  ;;  %v39_v57 = vld [vmem:[%s4002_s0 + $0xb8] sm:$0xff]  ;;  %v2291_v62 = vcombine.low %v3762_v56, %v3767_v59  ;;  %v304_v59 = vld [vmem:[%s4003_s2] sm:$0x3] }
  0xcc   :  { %2132 = vmatpush1.bf16.msra.mxu0 %v2942_v63  ;;  %1921 = vmatprep.subr.bf16.mxu1 %v2947_v0  ;;  %v47_v58 = vld [vmem:[%s4002_s0 + $0xf8] sm:$0xff]  ;;  %v2299_v63 = vcombine.low %v3772_v60, %v3777_v61  ;;  %v2308_v0 = vcombine.high %v35_v54, %v43_v55 }
  0xcd   :  { %2133 = vmatprep.subr.bf16.mxu0 %v2950_v1  ;;  %1947 = vmatprep.mubr.bf16.mxu1 %v2292_v2  ;;  %v2316_v1 = vcombine.high %v39_v57, %v47_v58  ;;  %v2307_v2 = vcombine.low %v35_v54, %v43_v55 }
  0xce   :  { %2159 = vmatprep.mubr.bf16.mxu0 %v2300_v3  ;;  %v2315_v3 = vcombine.low %v39_v57, %v47_v58 }
  0xcf   :  { %1922 = vmatpush1.bf16.msra.mxu1 %v2945_v4  ;;  %v306_v4 = vlaneseq }
  0xd0   :  { %2134 = vmatpush1.bf16.msra.mxu0 %v2948_v5  ;;  %1923 = vmatprep.subr.bf16.mxu1 %v2953_v6 }
  0xd1   :  { %2135 = vmatprep.subr.bf16.mxu0 %v2956_v7  ;;  %v3962_v5 = vshrl.u32 %v306_v4, 7  ;;  %vm2218_vm0 = vcmp.lt.s32.totalorder %v306_v4, 256 }
  0xd3   :  { %1924 = vmatpush1.bf16.msra.mxu1 %v2951_v8  ;;  %v308_v56 = vsub.s32 0, %v3962_v5  ;;  %v312_v60 = vsub.s32 1, %v3962_v5 }
  0xd4   :  { %2136 = vmatpush1.bf16.msra.mxu0 %v2954_v9  ;;  %1925 = vmatprep.subr.bf16.mxu1 %v2959_v10 }
  0xd5   :  { %2137 = vmatprep.subr.bf16.mxu0 %v2962_v11  ;;  %v309_v61 = vrot.slane %v304_v59, %v308_v56  ;;  %v313_v6 = vrot.slane %v304_v59, %v312_v60 }
  0xd7   :  { %1926 = vmatpush1.bf16.msra.mxu1 %v2957_v12 }
  0xd8   :  { %2138 = vmatpush1.bf16.msra.mxu0 %v2960_v13  ;;  %1927 = vmatprep.subr.bf16.mxu1 %v2965_v14 }
  0xd9   :  { %2139 = vmatprep.subr.bf16.mxu0 %v2968_v15 }
  0xdb   :  { %1928 = vmatpush1.bf16.msra.mxu1 %v2963_v16 }
  0xdc   :  { %2140 = vmatpush1.bf16.msra.mxu0 %v2966_v17  ;;  %1929 = vmatprep.subr.bf16.mxu1 %v2971_v18 }
  0xdd   :  { %2141 = vmatprep.subr.bf16.mxu0 %v2974_v19 }
  0xdf   :  { %1930 = vmatpush1.bf16.msra.mxu1 %v2969_v20 }
  0xe0   :  { %2142 = vmatpush1.bf16.msra.mxu0 %v2972_v21  ;;  %1931 = vmatprep.subr.bf16.mxu1 %v2977_v22 }
  0xe1   :  { %2143 = vmatprep.subr.bf16.mxu0 %v2980_v23 }
  0xe3   :  { %1932 = vmatpush1.bf16.msra.mxu1 %v2975_v24 }
  0xe4   :  { %2144 = vmatpush1.bf16.msra.mxu0 %v2978_v25  ;;  %1933 = vmatprep.subr.bf16.mxu1 %v2983_v26 }
  0xe5   :  { %2145 = vmatprep.subr.bf16.mxu0 %v2986_v27 }
  0xe7   :  { %1934 = vmatpush1.bf16.msra.mxu1 %v2981_v28 }
  0xe8   :  { %2146 = vmatpush1.bf16.msra.mxu0 %v2984_v29  ;;  %1935 = vmatprep.subr.bf16.mxu1 %v2989_v30 }
  0xe9   :  { %2147 = vmatprep.subr.bf16.mxu0 %v2992_v31 }
  0xeb   :  { %1936 = vmatpush1.bf16.msra.mxu1 %v2987_v32 }
  0xec   :  { %2148 = vmatpush1.bf16.msra.mxu0 %v2990_v33  ;;  %1937 = vmatprep.subr.bf16.mxu1 %v2995_v34 }
  0xed   :  { %2149 = vmatprep.subr.bf16.mxu0 %v2998_v35 }
  0xef   :  { %1938 = vmatpush1.bf16.msra.mxu1 %v2993_v36 }
  0xf0   :  { %2150 = vmatpush1.bf16.msra.mxu0 %v2996_v37  ;;  %1939 = vmatprep.subr.bf16.mxu1 %v3001_v38 }
  0xf1   :  { %2151 = vmatprep.subr.bf16.mxu0 %v3004_v39 }
  0xf3   :  { %1940 = vmatpush1.bf16.msra.mxu1 %v2999_v40 }
  0xf4   :  { %2152 = vmatpush1.bf16.msra.mxu0 %v3002_v41  ;;  %1941 = vmatprep.subr.bf16.mxu1 %v3007_v43 }
  0xf5   :  { %2153 = vmatprep.subr.bf16.mxu0 %v3010_v44 }
  0xf7   :  { %1942 = vmatpush1.bf16.msra.mxu1 %v3005_v48 }
  0xf8   :  { %2154 = vmatpush1.bf16.msra.mxu0 %v3008_v49  ;;  %1943 = vmatprep.subr.bf16.mxu1 %v3013_v42 }
  0xf9   :  { %2155 = vmatprep.subr.bf16.mxu0 %v3016_v45 }
  0xfb   :  { %1944 = vmatpush1.bf16.msra.mxu1 %v3011_v46 }
  0xfc   :  { %2156 = vmatpush1.bf16.msra.mxu0 %v3014_v47  ;;  %1945 = vmatprep.subr.bf16.mxu1 %v3019_v50 }
  0xfd   :  { %2157 = vmatprep.subr.bf16.mxu0 %v3022_v51 }
  0xff   :  { %1946 = vmatpush1.bf16.msra.mxu1 %v3017_v52 }
 0x100   :  { %2158 = vmatpush1.bf16.msra.mxu0 %v3020_v53 }
 0x102   :  { %1948 = vmatmul.mubr.bf16.vlgmr.msra.gmra.mrb[0].mxu1 %v2291_v62 }
 0x103   :  { %2160 = vmatmul.mubr.bf16.vlgmr.msra.gmra.mrb[0].mxu0 %v2299_v63  ;;  %1957 = vmatprep.mubr.bf16.mxu1 %v2308_v0 }
 0x104   :  { %2169 = vmatprep.mubr.bf16.mxu0 %v2316_v1 }
 0x10a   :  { %1958 = vmatmul.mubr.bf16.gmra.mrb[4].mxu1 %v2307_v2 }
 0x10b   :  { %2170 = vmatmul.mubr.bf16.gmra.mrb[4].mxu0 %v2315_v3  ;;  %v3023_v3 = vmov 1966171168  }
 0x10c   :  { %v2202_v56 = vunpack.c.l.s4 %v3023_v3 }
 0x1d5   :  { %v1949_v7 = vpop.f32.mrb[0].mxu1 }
 0x1d6   :  { %v2161_v8 = vpop.f32.mrb[0].mxu0  ;;  %v2574_v9 = vadd.f32 %v1949_v7, %v309_v61  ;;  %v1951_v10 = vpop.f32.mrb[1].mxu1 }
 0x1d7   :  { %v2163_v11 = vpop.f32.mrb[1].mxu0  ;;  %v2576_v12 = vadd.f32 %v1951_v10, %v313_v6  ;;  %v1953_v13 = vpop.f32.mrb[2].mxu1 }
 0x1d8   :  { %v2165_v14 = vpop.f32.mrb[2].mxu0  ;;  %v2575_v15 = vadd.f32 %v2574_v9, %v2161_v8  ;;  %v2578_v16 = vadd.f32 %v1953_v13, %v309_v61  ;;  %v1955_v17 = vpop.f32.mrb[3].mxu1 }
 0x1d9   :  { %v2167_v18 = vpop.f32.mrb[3].mxu0  ;;  %v2577_v19 = vadd.f32 %v2576_v12, %v2163_v11  ;;  %v2580_v20 = vadd.f32 %v1955_v17, %v313_v6  ;;  %v2203_v11 = vunpack.c.0.s8 %v2202_v56 }
 0x1da   :  { %2269 = vst [vmem:[%s4004_s3] sm:$0xff] %v2575_v15  ;;  %v2579_v21 = vadd.f32 %v2578_v16, %v2165_v14  ;;  %v2222_v23 = vmul.f32 %v2575_v15, %v2575_v15 }
 0x1db   :  { %2270 = vst [vmem:[%s4004_s3 + $0x8] sm:$0xff] %v2577_v19  ;;  %v2581_v22 = vadd.f32 %v2580_v20, %v2167_v18  ;;  %v2223_v26 = vmul.f32 %v2577_v19, %v2577_v19  ;;  %v2206_v20 = vsub.s32 %v2203_v11, %v3962_v5 }
 0x1dc   :  { %v2180_v24 = vadd.f32 %v2579_v21, %v2575_v15  ;;  %v2224_v25 = vmul.f32 %v2579_v21, %v2579_v21  ;;  %2271 = vst [vmem:[%s4004_s3 + $0x10] sm:$0xff] %v2579_v21 }
 0x1dd   :  { %v2189_v27 = vadd.f32 %v2581_v22, %v2577_v19  ;;  %v2225_v28 = vmul.f32 %v2581_v22, %v2581_v22  ;;  %2272 = vst [vmem:[%s4004_s3 + $0x18] sm:$0xff] %v2581_v22  ;;  %v1959_v29 = vpop.f32.mrb[4].mxu1 }
 0x1de   :  { %v2171_v30 = vpop.f32.mrb[4].mxu0  ;;  %v2230_v31 = vadd.f32 %v2224_v25, %v2222_v23  ;;  %v2582_v32 = vadd.f32 %v1959_v29, %v309_v61  ;;  %v1961_v33 = vpop.f32.mrb[5].mxu1 }
 0x1df   :  { %v2173_v34 = vpop.f32.mrb[5].mxu0  ;;  %v2239_v35 = vadd.f32 %v2225_v28, %v2223_v26  ;;  %v2584_v36 = vadd.f32 %v1961_v33, %v313_v6  ;;  %v1963_v37 = vpop.f32.mrb[6].mxu1 }
 0x1e0   :  { %v2175_v38 = vpop.f32.mrb[6].mxu0  ;;  %v2583_v39 = vadd.f32 %v2582_v32, %v2171_v30  ;;  %v2586_v40 = vadd.f32 %v1963_v37, %v309_v61  ;;  %v1965_v41 = vpop.f32.mrb[7].mxu1 }
 0x1e1   :  { %v2177_v43 = vpop.f32.mrb[7].mxu0  ;;  %v2585_v44 = vadd.f32 %v2584_v36, %v2173_v34  ;;  %v2588_v48 = vadd.f32 %v1965_v41, %v313_v6 }
 0x1e2   :  { %v2181_v49 = vadd.f32 %v2583_v39, %v2180_v24  ;;  %v2226_v42 = vmul.f32 %v2583_v39, %v2583_v39  ;;  %2273 = vst [vmem:[%s4004_s3 + $0x20] sm:$0xff] %v2583_v39  ;;  %v2587_v45 = vadd.f32 %v2586_v40, %v2175_v38 }
 0x1e3   :  { %v2190_v46 = vadd.f32 %v2585_v44, %v2189_v27  ;;  %v2227_v47 = vmul.f32 %v2585_v44, %v2585_v44  ;;  %2274 = vst [vmem:[%s4004_s3 + $0x28] sm:$0xff] %v2585_v44  ;;  %v2589_v50 = vadd.f32 %v2588_v48, %v2177_v43 }
 0x1e4   :  { %v2231_v51 = vadd.f32 %v2230_v31, %v2226_v42  ;;  %v2182_v52 = vadd.f32 %v2587_v45, %v2181_v49  ;;  %v2228_v53 = vmul.f32 %v2587_v45, %v2587_v45  ;;  %2275 = vst [vmem:[%s4004_s3 + $0x30] sm:$0xff] %v2587_v45 }
 0x1e5   :  { %v2240_v54 = vadd.f32 %v2239_v35, %v2227_v47  ;;  %v2191_v55 = vadd.f32 %v2589_v50, %v2190_v46  ;;  %v2229_v57 = vmul.f32 %v2589_v50, %v2589_v50  ;;  %2276 = vst [vmem:[%s4004_s3 + $0x38] sm:$0xff] %v2589_v50 }
 0x1e6   :  { %v2183_v58 = vrot.slane %v2182_v52, 4  ;;  %v2232_v62 = vadd.f32 %v2231_v51, %v2228_v53 }
 0x1e7   :  { %v2192_v63 = vrot.slane %v2191_v55, 4  ;;  %v2241_v0 = vadd.f32 %v2240_v54, %v2229_v57 }
 0x1e8   :  { %v2184_v1 = vadd.f32 %v2183_v58, %v2182_v52  ;;  %v2233_v2 = vrot.slane %v2232_v62, 4 }
 0x1e9   :  { %v2193_v59 = vadd.f32 %v2192_v63, %v2191_v55  ;;  %v2242_v60 = vrot.slane %v2241_v0, 4 }
 0x1ea   :  { %v2185_v61 = vrot.slane %v2184_v1, 2  ;;  %v2234_v6 = vadd.f32 %v2233_v2, %v2232_v62 }
 0x1eb   :  { %v2194_v7 = vrot.slane %v2193_v59, 2  ;;  %v2243_v8 = vadd.f32 %v2242_v60, %v2241_v0 }
 0x1ec   :  { %v2186_v9 = vadd.f32 %v2185_v61, %v2184_v1  ;;  %v2235_v10 = vrot.slane %v2234_v6, 2 }
 0x1ed   :  { %v2195_v12 = vadd.f32 %v2194_v7, %v2193_v59  ;;  %v2244_v13 = vrot.slane %v2243_v8, 2 }
 0x1ee   :  { %v2187_v14 = vrot.slane %v2186_v9, 1  ;;  %v2236_v15 = vadd.f32 %v2235_v10, %v2234_v6 }
 0x1ef   :  { %v2196_v16 = vrot.slane %v2195_v12, 1  ;;  %v2245_v17 = vadd.f32 %v2244_v13, %v2243_v8 }
 0x1f0   :  { %v2188_v18 = vadd.f32 %v2187_v14, %v2186_v9  ;;  %v2237_v19 = vrot.slane %v2236_v15, 1 }
 0x1f1   :  { %v2197_v21 = vadd.f32 %v2196_v16, %v2195_v12  ;;  %v2246_v22 = vrot.slane %v2245_v17, 1 }
 0x1f2   :  { %v2238_v23 = vadd.f32 %v2237_v19, %v2236_v15 }
 0x1f3   :  { %v2200_v24 = vcombine.low %v2188_v18, %v2197_v21  ;;  %v2247_v25 = vadd.f32 %v2246_v22, %v2245_v17 }
 0x1f5   :  { %v2207_v26 = vrot.slane %v2200_v24, %v2206_v20  ;;  %v2250_v27 = vcombine.low %v2238_v23, %v2247_v25 }
 0x1f7   :  { %v2214_v28 = vrot.slane %v2207_v26, %v2206_v20  ;;  %v2257_v29 = vrot.slane %v2250_v27, %v2206_v20 }
 0x1f9   :  { %2220 = vst.msk [vmem:[%s4005_s4] ss:$8 sm:$0x3] %vm2218_vm0, %v2214_v28  ;;  %v2264_v30 = vrot.slane %v2257_v29, %v2206_v20 }
 0x1fb   :  { %2573 = vst.msk [vmem:[%s4005_s4 + $0x1] ss:$8 sm:$0x3] %vm2218_vm0, %v2264_v30 }

// kernel: discriminator_forward.8
= control target key start
LH: loop header
LB: loop body
LE: loop exit
PB: predicated region body
PF: predicated region fallthrough
CT: control target
= control target key end

     0   :  { %s14831_s1 = inlined_call_operand.vmem [shape: bf16[4096,512], index: 1, kind: input, shape index: {}]   ;;  %s14832_s0 = inlined_call_operand.vmem [shape: bf16[32,4096], index: 0, kind: input, shape index: {}]   ;;  %s14833_s2 = inlined_call_operand.vmem [shape: f32[1,512], index: 2, kind: input, shape index: {}]   ;;  %s14834_s3 = inlined_call_operand.vmem [shape: f32[32,512], index: 3, kind: output, shape index: {0}]   ;;  %s14835_s4 = inlined_call_operand.vmem [shape: f32[8,512], index: 4, kind: output, shape index: {1}]  }
   0x1   :  { %v9787_v0 = vld [vmem:[%s14831_s1 + $0x4] ss:$16 sps:$4 sm:$0xff]   ;;  %v9789_v1 = vld [vmem:[%s14831_s1 + $0xc] ss:$16 sps:$4 sm:$0xff]   ;;  %v9791_v2 = vld [vmem:[%s14831_s1] ss:$16 sps:$4 sm:$0xff]  }
   0x2   :  { %6566 = vmatprep.subr.bf16.mxu0 %v9787_v0  ;;  %v9792_v3 = vld [vmem:[%s14831_s1 + $0x8] ss:$16 sps:$4 sm:$0xff]   ;;  %7414 = vmatprep.subr.bf16.mxu1 %v9789_v1  ;;  %v9793_v4 = vld [vmem:[%s14831_s1 + $0x24] ss:$16 sps:$4 sm:$0xff]   ;;  %v9795_v5 = vld [vmem:[%s14831_s1 + $0x2c] ss:$16 sps:$4 sm:$0xff]  }
   0x3   :  { %6567 = vmatpush1.bf16.msra.mxu0 %v9791_v2  ;;  %7415 = vmatpush1.bf16.msra.mxu1 %v9792_v3  ;;  %v9797_v6 = vld [vmem:[%s14831_s1 + $0x20] ss:$16 sps:$4 sm:$0xff]   ;;  %v9798_v7 = vld [vmem:[%s14831_s1 + $0x28] ss:$16 sps:$4 sm:$0xff]   ;;  %v9799_v8 = vld [vmem:[%s14831_s1 + $0x44] ss:$16 sps:$4 sm:$0xff]  }
   0x4   :  { %6568 = vmatprep.subr.bf16.mxu0 %v9793_v4  ;;  %7416 = vmatprep.subr.bf16.mxu1 %v9795_v5  ;;  %v9801_v9 = vld [vmem:[%s14831_s1 + $0x4c] ss:$16 sps:$4 sm:$0xff]   ;;  %v9803_v10 = vld [vmem:[%s14831_s1 + $0x40] ss:$16 sps:$4 sm:$0xff]   ;;  %v9804_v11 = vld [vmem:[%s14831_s1 + $0x48] ss:$16 sps:$4 sm:$0xff]  }
   0x5   :  { %v9805_v12 = vld [vmem:[%s14831_s1 + $0x64] ss:$16 sps:$4 sm:$0xff]   ;;  %v9807_v13 = vld [vmem:[%s14831_s1 + $0x6c] ss:$16 sps:$4 sm:$0xff]   ;;  %v9809_v14 = vld [vmem:[%s14831_s1 + $0x60] ss:$16 sps:$4 sm:$0xff]  }
   0x6   :  { %v9810_v15 = vld [vmem:[%s14831_s1 + $0x68] ss:$16 sps:$4 sm:$0xff]   ;;  %v9811_v16 = vld [vmem:[%s14831_s1 + $0x84] ss:$16 sps:$4 sm:$0xff]   ;;  %v9813_v17 = vld [vmem:[%s14831_s1 + $0x8c] ss:$16 sps:$4 sm:$0xff]  }
   0x7   :  { %6569 = vmatpush1.bf16.msra.mxu0 %v9797_v6  ;;  %7417 = vmatpush1.bf16.msra.mxu1 %v9798_v7  ;;  %v9815_v18 = vld [vmem:[%s14831_s1 + $0x80] ss:$16 sps:$4 sm:$0xff]   ;;  %v9816_v19 = vld [vmem:[%s14831_s1 + $0x88] ss:$16 sps:$4 sm:$0xff]   ;;  %v9817_v20 = vld [vmem:[%s14831_s1 + $0xa4] ss:$16 sps:$4 sm:$0xff]  }
   0x8   :  { %6570 = vmatprep.subr.bf16.mxu0 %v9799_v8  ;;  %7418 = vmatprep.subr.bf16.mxu1 %v9801_v9  ;;  %v9819_v21 = vld [vmem:[%s14831_s1 + $0xac] ss:$16 sps:$4 sm:$0xff]   ;;  %v9821_v22 = vld [vmem:[%s14831_s1 + $0xa0] ss:$16 sps:$4 sm:$0xff]   ;;  %v9822_v23 = vld [vmem:[%s14831_s1 + $0xa8] ss:$16 sps:$4 sm:$0xff]  }
   0x9   :  { %v9823_v24 = vld [vmem:[%s14831_s1 + $0xc4] ss:$16 sps:$4 sm:$0xff]   ;;  %v9825_v25 = vld [vmem:[%s14831_s1 + $0xcc] ss:$16 sps:$4 sm:$0xff]   ;;  %v9827_v26 = vld [vmem:[%s14831_s1 + $0xc0] ss:$16 sps:$4 sm:$0xff]  }
   0xa   :  { %v9828_v27 = vld [vmem:[%s14831_s1 + $0xc8] ss:$16 sps:$4 sm:$0xff]   ;;  %v9829_v28 = vld [vmem:[%s14831_s1 + $0xe4] ss:$16 sps:$4 sm:$0xff]   ;;  %v9831_v29 = vld [vmem:[%s14831_s1 + $0xec] ss:$16 sps:$4 sm:$0xff]  }
   0xb   :  { %6571 = vmatpush1.bf16.msra.mxu0 %v9803_v10  ;;  %7419 = vmatpush1.bf16.msra.mxu1 %v9804_v11  ;;  %v9833_v30 = vld [vmem:[%s14831_s1 + $0xe0] ss:$16 sps:$4 sm:$0xff]   ;;  %v9834_v31 = vld [vmem:[%s14831_s1 + $0xe8] ss:$16 sps:$4 sm:$0xff]   ;;  %v9835_v32 = vld [vmem:[%s14831_s1 + $0x104] ss:$16 sps:$4 sm:$0xff]  }
   0xc   :  { %6572 = vmatprep.subr.bf16.mxu0 %v9805_v12  ;;  %7420 = vmatprep.subr.bf16.mxu1 %v9807_v13  ;;  %v9837_v33 = vld [vmem:[%s14831_s1 + $0x10c] ss:$16 sps:$4 sm:$0xff]   ;;  %v9839_v34 = vld [vmem:[%s14831_s1 + $0x100] ss:$16 sps:$4 sm:$0xff]   ;;  %v9840_v35 = vld [vmem:[%s14831_s1 + $0x108] ss:$16 sps:$4 sm:$0xff]  }
   0xd   :  { %v9841_v36 = vld [vmem:[%s14831_s1 + $0x124] ss:$16 sps:$4 sm:$0xff]   ;;  %v9843_v37 = vld [vmem:[%s14831_s1 + $0x12c] ss:$16 sps:$4 sm:$0xff]   ;;  %v9845_v38 = vld [vmem:[%s14831_s1 + $0x120] ss:$16 sps:$4 sm:$0xff]  }
   0xe   :  { %v9846_v39 = vld [vmem:[%s14831_s1 + $0x128] ss:$16 sps:$4 sm:$0xff]   ;;  %v9847_v40 = vld [vmem:[%s14831_s1 + $0x144] ss:$16 sps:$4 sm:$0xff]   ;;  %v9849_v41 = vld [vmem:[%s14831_s1 + $0x14c] ss:$16 sps:$4 sm:$0xff]  }
   0xf   :  { %6573 = vmatpush1.bf16.msra.mxu0 %v9809_v14  ;;  %7421 = vmatpush1.bf16.msra.mxu1 %v9810_v15  ;;  %v9851_v42 = vld [vmem:[%s14831_s1 + $0x140] ss:$16 sps:$4 sm:$0xff]   ;;  %v9852_v43 = vld [vmem:[%s14831_s1 + $0x148] ss:$16 sps:$4 sm:$0xff]   ;;  %v9853_v44 = vld [vmem:[%s14831_s1 + $0x164] ss:$16 sps:$4 sm:$0xff]  }
  0x10   :  { %6574 = vmatprep.subr.bf16.mxu0 %v9811_v16  ;;  %7422 = vmatprep.subr.bf16.mxu1 %v9813_v17  ;;  %v9855_v45 = vld [vmem:[%s14831_s1 + $0x16c] ss:$16 sps:$4 sm:$0xff]   ;;  %v16_v46 = vld [vmem:[%s14832_s0] sm:$0xff]  ;;  %v9858_v49 = vld [vmem:[%s14831_s1 + $0x168] ss:$16 sps:$4 sm:$0xff]  }
  0x11   :  { %v32_v47 = vld [vmem:[%s14832_s0 + $0x80] sm:$0xff]  ;;  %v9861_v52 = vld [vmem:[%s14831_s1 + $0x18c] ss:$16 sps:$4 sm:$0xff]   ;;  %v9864_v54 = vld [vmem:[%s14831_s1 + $0x188] ss:$16 sps:$4 sm:$0xff]  }
  0x12   :  { %v9857_v48 = vld [vmem:[%s14831_s1 + $0x160] ss:$16 sps:$4 sm:$0xff]   ;;  %v8442_v50 = vcombine.high %v16_v46, %v32_v47  ;;  %v9859_v51 = vld [vmem:[%s14831_s1 + $0x184] ss:$16 sps:$4 sm:$0xff]   ;;  %v9867_v56 = vld [vmem:[%s14831_s1 + $0x1ac] ss:$16 sps:$4 sm:$0xff]   ;;  %v8441_v5 = vcombine.low %v16_v46, %v32_v47 }
  0x13   :  { %6575 = vmatpush1.bf16.msra.mxu0 %v9815_v18  ;;  %7423 = vmatpush1.bf16.msra.mxu1 %v9816_v19  ;;  %v9863_v53 = vld [vmem:[%s14831_s1 + $0x180] ss:$16 sps:$4 sm:$0xff]   ;;  %v9865_v55 = vld [vmem:[%s14831_s1 + $0x1a4] ss:$16 sps:$4 sm:$0xff]   ;;  %v9870_v58 = vld [vmem:[%s14831_s1 + $0x1a8] ss:$16 sps:$4 sm:$0xff]  }
  0x14   :  { %6576 = vmatprep.subr.bf16.mxu0 %v9817_v20  ;;  %7424 = vmatprep.subr.bf16.mxu1 %v9819_v21  ;;  %v9869_v57 = vld [vmem:[%s14831_s1 + $0x1a0] ss:$16 sps:$4 sm:$0xff]   ;;  %v9871_v59 = vld [vmem:[%s14831_s1 + $0x1c4] ss:$16 sps:$4 sm:$0xff]   ;;  %v9873_v60 = vld [vmem:[%s14831_s1 + $0x1cc] ss:$16 sps:$4 sm:$0xff]  }
  0x15   :  { %6598 = vmatprep.mubr.bf16.mxu0 %v8442_v50  ;;  %7446 = vmatprep.mubr.bf16.mxu1 %v8442_v50  ;;  %v9875_v61 = vld [vmem:[%s14831_s1 + $0x1c0] ss:$16 sps:$4 sm:$0xff]   ;;  %v9876_v62 = vld [vmem:[%s14831_s1 + $0x1c8] ss:$16 sps:$4 sm:$0xff]   ;;  %v9877_v63 = vld [vmem:[%s14831_s1 + $0x1e4] ss:$16 sps:$4 sm:$0xff]  }
  0x16   :  { %v9879_v0 = vld [vmem:[%s14831_s1 + $0x1ec] ss:$16 sps:$4 sm:$0xff]   ;;  %v9881_v1 = vld [vmem:[%s14831_s1 + $0x1e0] ss:$16 sps:$4 sm:$0xff]   ;;  %v9882_v2 = vld [vmem:[%s14831_s1 + $0x1e8] ss:$16 sps:$4 sm:$0xff]  }
  0x17   :  { %6577 = vmatpush1.bf16.msra.mxu0 %v9821_v22  ;;  %7425 = vmatpush1.bf16.msra.mxu1 %v9822_v23  ;;  %v9885_v3 = vld [vmem:[%s14831_s1 + $0x204] ss:$16 sps:$4 sm:$0xff]   ;;  %v9888_v4 = vld [vmem:[%s14831_s1 + $0x20c] ss:$16 sps:$4 sm:$0xff]   ;;  %v9883_v6 = vld [vmem:[%s14831_s1 + $0x200] ss:$16 sps:$4 sm:$0xff]  }
  0x18   :  { %6578 = vmatprep.subr.bf16.mxu0 %v9823_v24  ;;  %7426 = vmatprep.subr.bf16.mxu1 %v9825_v25  ;;  %v9886_v7 = vld [vmem:[%s14831_s1 + $0x208] ss:$16 sps:$4 sm:$0xff]   ;;  %v9891_v8 = vld [vmem:[%s14831_s1 + $0x224] ss:$16 sps:$4 sm:$0xff]   ;;  %v9894_v9 = vld [vmem:[%s14831_s1 + $0x22c] ss:$16 sps:$4 sm:$0xff]  }
  0x19   :  { %v9889_v10 = vld [vmem:[%s14831_s1 + $0x220] ss:$16 sps:$4 sm:$0xff]   ;;  %v9892_v11 = vld [vmem:[%s14831_s1 + $0x228] ss:$16 sps:$4 sm:$0xff]   ;;  %v9897_v12 = vld [vmem:[%s14831_s1 + $0x244] ss:$16 sps:$4 sm:$0xff]  }
  0x1a   :  { %v9900_v13 = vld [vmem:[%s14831_s1 + $0x24c] ss:$16 sps:$4 sm:$0xff]   ;;  %v9895_v14 = vld [vmem:[%s14831_s1 + $0x240] ss:$16 sps:$4 sm:$0xff]   ;;  %v9898_v15 = vld [vmem:[%s14831_s1 + $0x248] ss:$16 sps:$4 sm:$0xff]  }
  0x1b   :  { %6579 = vmatpush1.bf16.msra.mxu0 %v9827_v26  ;;  %7427 = vmatpush1.bf16.msra.mxu1 %v9828_v27  ;;  %v9903_v16 = vld [vmem:[%s14831_s1 + $0x264] ss:$16 sps:$4 sm:$0xff]   ;;  %v9906_v17 = vld [vmem:[%s14831_s1 + $0x26c] ss:$16 sps:$4 sm:$0xff]   ;;  %v9901_v18 = vld [vmem:[%s14831_s1 + $0x260] ss:$16 sps:$4 sm:$0xff]  }
  0x1c   :  { %6580 = vmatprep.subr.bf16.mxu0 %v9829_v28  ;;  %7428 = vmatprep.subr.bf16.mxu1 %v9831_v29  ;;  %v9904_v19 = vld [vmem:[%s14831_s1 + $0x268] ss:$16 sps:$4 sm:$0xff]   ;;  %v9909_v20 = vld [vmem:[%s14831_s1 + $0x284] ss:$16 sps:$4 sm:$0xff]   ;;  %v9912_v21 = vld [vmem:[%s14831_s1 + $0x28c] ss:$16 sps:$4 sm:$0xff]  }
  0x1d   :  { %v9907_v22 = vld [vmem:[%s14831_s1 + $0x280] ss:$16 sps:$4 sm:$0xff]   ;;  %v9910_v23 = vld [vmem:[%s14831_s1 + $0x288] ss:$16 sps:$4 sm:$0xff]   ;;  %v9915_v24 = vld [vmem:[%s14831_s1 + $0x2a4] ss:$16 sps:$4 sm:$0xff]  }
  0x1e   :  { %v9918_v25 = vld [vmem:[%s14831_s1 + $0x2ac] ss:$16 sps:$4 sm:$0xff]   ;;  %v48_v26 = vld [vmem:[%s14832_s0 + $0x100] sm:$0xff]  ;;  %v9934_v46 = vld [vmem:[%s14831_s1 + $0x308] ss:$16 sps:$4 sm:$0xff]  }
  0x1f   :  { %6581 = vmatpush1.bf16.msra.mxu0 %v9833_v30  ;;  %7429 = vmatpush1.bf16.msra.mxu1 %v9834_v31  ;;  %v64_v27 = vld [vmem:[%s14832_s0 + $0x180] sm:$0xff]  ;;  %v9916_v30 = vld [vmem:[%s14831_s1 + $0x2a8] ss:$16 sps:$4 sm:$0xff]  }
  0x20   :  { %6582 = vmatprep.subr.bf16.mxu0 %v9835_v32  ;;  %7430 = vmatprep.subr.bf16.mxu1 %v9837_v33  ;;  %v8474_v28 = vcombine.high %v48_v26, %v64_v27  ;;  %v9913_v29 = vld [vmem:[%s14831_s1 + $0x2a0] ss:$16 sps:$4 sm:$0xff]   ;;  %v8473_v31 = vcombine.low %v48_v26, %v64_v27  ;;  %v9921_v32 = vld [vmem:[%s14831_s1 + $0x2c4] ss:$16 sps:$4 sm:$0xff]   ;;  %v9924_v33 = vld [vmem:[%s14831_s1 + $0x2cc] ss:$16 sps:$4 sm:$0xff]  }
  0x21   :  { %v9939_v47 = vld [vmem:[%s14831_s1 + $0x324] ss:$16 sps:$4 sm:$0xff]   ;;  %v9940_v50 = vld [vmem:[%s14831_s1 + $0x328] ss:$16 sps:$4 sm:$0xff]  }
  0x22   :  { %v11803_v27 = vld [vmem:[%s14832_s0 + $0x90] sm:$0xff] }
  0x23   :  { %6583 = vmatpush1.bf16.msra.mxu0 %v9839_v34  ;;  %7431 = vmatpush1.bf16.msra.mxu1 %v9840_v35  ;;  %v11634_v34 = vld [vmem:[%s14832_s0 + $0x8] sm:$0xff] }
  0x24   :  { %6584 = vmatprep.subr.bf16.mxu0 %v9841_v36  ;;  %7432 = vmatprep.subr.bf16.mxu1 %v9843_v37  ;;  %v11639_v35 = vld [vmem:[%s14832_s0 + $0x88] sm:$0xff]  ;;  %v9919_v36 = vld [vmem:[%s14831_s1 + $0x2c0] ss:$16 sps:$4 sm:$0xff]  }
  0x25   :  { %v9922_v37 = vld [vmem:[%s14831_s1 + $0x2c8] ss:$16 sps:$4 sm:$0xff]  }
  0x27   :  { %6585 = vmatpush1.bf16.msra.mxu0 %v9845_v38  ;;  %7433 = vmatpush1.bf16.msra.mxu1 %v9846_v39  ;;  %v8444_v38 = vcombine.high %v11634_v34, %v11639_v35  ;;  %v9927_v39 = vld [vmem:[%s14831_s1 + $0x2e4] ss:$16 sps:$4 sm:$0xff]  }
  0x28   :  { %6586 = vmatprep.subr.bf16.mxu0 %v9847_v40  ;;  %7434 = vmatprep.subr.bf16.mxu1 %v9849_v41  ;;  %v9930_v40 = vld [vmem:[%s14831_s1 + $0x2ec] ss:$16 sps:$4 sm:$0xff]   ;;  %v9925_v41 = vld [vmem:[%s14831_s1 + $0x2e0] ss:$16 sps:$4 sm:$0xff]  }
  0x2b   :  { %6587 = vmatpush1.bf16.msra.mxu0 %v9851_v42  ;;  %7435 = vmatpush1.bf16.msra.mxu1 %v9852_v43  ;;  %v9928_v42 = vld [vmem:[%s14831_s1 + $0x2e8] ss:$16 sps:$4 sm:$0xff]   ;;  %v9933_v43 = vld [vmem:[%s14831_s1 + $0x304] ss:$16 sps:$4 sm:$0xff]  }
  0x2c   :  { %6588 = vmatprep.subr.bf16.mxu0 %v9853_v44  ;;  %7436 = vmatprep.subr.bf16.mxu1 %v9855_v45  ;;  %v9936_v44 = vld [vmem:[%s14831_s1 + $0x30c] ss:$16 sps:$4 sm:$0xff]   ;;  %v9931_v45 = vld [vmem:[%s14831_s1 + $0x300] ss:$16 sps:$4 sm:$0xff]  }
  0x2f   :  { %6589 = vmatpush1.bf16.msra.mxu0 %v9857_v48  ;;  %7437 = vmatpush1.bf16.msra.mxu1 %v9858_v49  ;;  %v9942_v48 = vld [vmem:[%s14831_s1 + $0x32c] ss:$16 sps:$4 sm:$0xff]   ;;  %v9937_v49 = vld [vmem:[%s14831_s1 + $0x320] ss:$16 sps:$4 sm:$0xff]  }
  0x30   :  { %6590 = vmatprep.subr.bf16.mxu0 %v9859_v51  ;;  %7438 = vmatprep.subr.bf16.mxu1 %v9861_v52  ;;  %v9945_v51 = vld [vmem:[%s14831_s1 + $0x344] ss:$16 sps:$4 sm:$0xff]   ;;  %v9948_v52 = vld [vmem:[%s14831_s1 + $0x34c] ss:$16 sps:$4 sm:$0xff]  }
  0x33   :  { %6591 = vmatpush1.bf16.msra.mxu0 %v9863_v53  ;;  %7439 = vmatpush1.bf16.msra.mxu1 %v9864_v54  ;;  %v9943_v53 = vld [vmem:[%s14831_s1 + $0x340] ss:$16 sps:$4 sm:$0xff]   ;;  %v9946_v54 = vld [vmem:[%s14831_s1 + $0x348] ss:$16 sps:$4 sm:$0xff]  }
  0x34   :  { %6592 = vmatprep.subr.bf16.mxu0 %v9865_v55  ;;  %7440 = vmatprep.subr.bf16.mxu1 %v9867_v56  ;;  %v9951_v55 = vld [vmem:[%s14831_s1 + $0x364] ss:$16 sps:$4 sm:$0xff]   ;;  %v9954_v56 = vld [vmem:[%s14831_s1 + $0x36c] ss:$16 sps:$4 sm:$0xff]  }
  0x37   :  { %6593 = vmatpush1.bf16.msra.mxu0 %v9869_v57  ;;  %7441 = vmatpush1.bf16.msra.mxu1 %v9870_v58  ;;  %v9949_v57 = vld [vmem:[%s14831_s1 + $0x360] ss:$16 sps:$4 sm:$0xff]   ;;  %v9952_v58 = vld [vmem:[%s14831_s1 + $0x368] ss:$16 sps:$4 sm:$0xff]  }
  0x38   :  { %6594 = vmatprep.subr.bf16.mxu0 %v9871_v59  ;;  %7442 = vmatprep.subr.bf16.mxu1 %v9873_v60  ;;  %v9957_v59 = vld [vmem:[%s14831_s1 + $0x384] ss:$16 sps:$4 sm:$0xff]   ;;  %v9960_v60 = vld [vmem:[%s14831_s1 + $0x38c] ss:$16 sps:$4 sm:$0xff]  }
  0x3b   :  { %6595 = vmatpush1.bf16.msra.mxu0 %v9875_v61  ;;  %7443 = vmatpush1.bf16.msra.mxu1 %v9876_v62  ;;  %v9955_v61 = vld [vmem:[%s14831_s1 + $0x380] ss:$16 sps:$4 sm:$0xff]   ;;  %v9958_v62 = vld [vmem:[%s14831_s1 + $0x388] ss:$16 sps:$4 sm:$0xff]  }
  0x3c   :  { %6596 = vmatprep.subr.bf16.mxu0 %v9877_v63  ;;  %7444 = vmatprep.subr.bf16.mxu1 %v9879_v0  ;;  %v9963_v63 = vld [vmem:[%s14831_s1 + $0x3a4] ss:$16 sps:$4 sm:$0xff]   ;;  %v9966_v0 = vld [vmem:[%s14831_s1 + $0x3ac] ss:$16 sps:$4 sm:$0xff]  }
  0x3f   :  { %6597 = vmatpush1.bf16.msra.mxu0 %v9881_v1  ;;  %7445 = vmatpush1.bf16.msra.mxu1 %v9882_v2  ;;  %v9961_v1 = vld [vmem:[%s14831_s1 + $0x3a0] ss:$16 sps:$4 sm:$0xff]   ;;  %v9964_v2 = vld [vmem:[%s14831_s1 + $0x3a8] ss:$16 sps:$4 sm:$0xff]  }
  0x40   :  { %6619 = vmatprep.subr.bf16.mxu0 %v9885_v3  ;;  %7467 = vmatprep.subr.bf16.mxu1 %v9888_v4  ;;  %v9969_v3 = vld [vmem:[%s14831_s1 + $0x3c4] ss:$16 sps:$4 sm:$0xff]   ;;  %v9972_v4 = vld [vmem:[%s14831_s1 + $0x3cc] ss:$16 sps:$4 sm:$0xff]  }
  0x42   :  { %6599 = vmatmul.mubr.bf16.vlgmr.msra.gmra.mrb[0].mxu0 %v8441_v5  ;;  %7447 = vmatmul.mubr.bf16.vlgmr.msra.gmra.mrb[0].mxu1 %v8441_v5  ;;  %v9967_v5 = vld [vmem:[%s14831_s1 + $0x3c0] ss:$16 sps:$4 sm:$0xff]  }
  0x43   :  { %6620 = vmatpush1.bf16.msra.mxu0 %v9883_v6  ;;  %7468 = vmatpush1.bf16.msra.mxu1 %v9886_v7  ;;  %v9970_v6 = vld [vmem:[%s14831_s1 + $0x3c8] ss:$16 sps:$4 sm:$0xff]   ;;  %v9975_v7 = vld [vmem:[%s14831_s1 + $0x3e4] ss:$16 sps:$4 sm:$0xff]  }
  0x44   :  { %6621 = vmatprep.subr.bf16.mxu0 %v9891_v8  ;;  %7469 = vmatprep.subr.bf16.mxu1 %v9894_v9  ;;  %v9978_v8 = vld [vmem:[%s14831_s1 + $0x3ec] ss:$16 sps:$4 sm:$0xff]   ;;  %v9973_v9 = vld [vmem:[%s14831_s1 + $0x3e0] ss:$16 sps:$4 sm:$0xff]  }
  0x45   :  { %6608 = vmatprep.mubr.bf16.mxu0 %v8474_v28  ;;  %7456 = vmatprep.mubr.bf16.mxu1 %v8474_v28  ;;  %v9991_v28 = vld [vmem:[%s14831_s1 + $0x440] ss:$16 sps:$4 sm:$0xff]  }
  0x47   :  { %6622 = vmatpush1.bf16.msra.mxu0 %v9889_v10  ;;  %7470 = vmatpush1.bf16.msra.mxu1 %v9892_v11  ;;  %v9976_v10 = vld [vmem:[%s14831_s1 + $0x3e8] ss:$16 sps:$4 sm:$0xff]   ;;  %v9981_v11 = vld [vmem:[%s14831_s1 + $0x404] ss:$16 sps:$4 sm:$0xff]  }
  0x48   :  { %6623 = vmatprep.subr.bf16.mxu0 %v9897_v12  ;;  %7471 = vmatprep.subr.bf16.mxu1 %v9900_v13  ;;  %v9984_v12 = vld [vmem:[%s14831_s1 + $0x40c] ss:$16 sps:$4 sm:$0xff]   ;;  %v9979_v13 = vld [vmem:[%s14831_s1 + $0x400] ss:$16 sps:$4 sm:$0xff]  }
  0x4a   :  { %6609 = vmatmul.mubr.bf16.gmra.mrb[4].mxu0 %v8473_v31  ;;  %7457 = vmatmul.mubr.bf16.gmra.mrb[4].mxu1 %v8473_v31  ;;  %v10002_v31 = vld [vmem:[%s14831_s1 + $0x46c] ss:$16 sps:$4 sm:$0xff]  }
  0x4b   :  { %6624 = vmatpush1.bf16.msra.mxu0 %v9895_v14  ;;  %7472 = vmatpush1.bf16.msra.mxu1 %v9898_v15  ;;  %v9982_v14 = vld [vmem:[%s14831_s1 + $0x408] ss:$16 sps:$4 sm:$0xff]   ;;  %v8443_v15 = vcombine.low %v11634_v34, %v11639_v35  ;;  %v10005_v35 = vld [vmem:[%s14831_s1 + $0x484] ss:$16 sps:$4 sm:$0xff]  }
  0x4c   :  { %6625 = vmatprep.subr.bf16.mxu0 %v9903_v16  ;;  %7473 = vmatprep.subr.bf16.mxu1 %v9906_v17  ;;  %v49_v16 = vld [vmem:[%s14832_s0 + $0x108] sm:$0xff] }
  0x4d   :  { %6651 = vmatprep.mubr.bf16.mxu0 %v8444_v38  ;;  %7499 = vmatprep.mubr.bf16.mxu1 %v8444_v38  ;;  %v65_v17 = vld [vmem:[%s14832_s0 + $0x188] sm:$0xff] }
  0x4e   :  { %v8475_v26 = vcombine.low %v49_v16, %v65_v17  ;;  %v10000_v34 = vld [vmem:[%s14831_s1 + $0x468] ss:$16 sps:$4 sm:$0xff]  }
  0x4f   :  { %6626 = vmatpush1.bf16.msra.mxu0 %v9901_v18  ;;  %7474 = vmatpush1.bf16.msra.mxu1 %v9904_v19  ;;  %v9987_v18 = vld [vmem:[%s14831_s1 + $0x424] ss:$16 sps:$4 sm:$0xff]   ;;  %v9990_v19 = vld [vmem:[%s14831_s1 + $0x42c] ss:$16 sps:$4 sm:$0xff]   ;;  %v10006_v38 = vld [vmem:[%s14831_s1 + $0x488] ss:$16 sps:$4 sm:$0xff]  }
  0x50   :  { %6627 = vmatprep.subr.bf16.mxu0 %v9909_v20  ;;  %7475 = vmatprep.subr.bf16.mxu1 %v9912_v21  ;;  %v8476_v20 = vcombine.high %v49_v16, %v65_v17  ;;  %v9985_v21 = vld [vmem:[%s14831_s1 + $0x420] ss:$16 sps:$4 sm:$0xff]   ;;  %v10074_v16 = vld [vmem:[%s14831_s1 + $0x5ec] ss:$16 sps:$4 sm:$0xff]  }
  0x51   :  { %v10069_v17 = vld [vmem:[%s14831_s1 + $0x5e0] ss:$16 sps:$4 sm:$0xff]  }
  0x53   :  { %6628 = vmatpush1.bf16.msra.mxu0 %v9907_v22  ;;  %7476 = vmatpush1.bf16.msra.mxu1 %v9910_v23  ;;  %v9988_v22 = vld [vmem:[%s14831_s1 + $0x428] ss:$16 sps:$4 sm:$0xff]   ;;  %v9993_v23 = vld [vmem:[%s14831_s1 + $0x444] ss:$16 sps:$4 sm:$0xff]  }
  0x54   :  { %6629 = vmatprep.subr.bf16.mxu0 %v9915_v24  ;;  %7477 = vmatprep.subr.bf16.mxu1 %v9918_v25  ;;  %v9996_v24 = vld [vmem:[%s14831_s1 + $0x44c] ss:$16 sps:$4 sm:$0xff]   ;;  %v11798_v25 = vld [vmem:[%s14832_s0 + $0x10] sm:$0xff] }
  0x57   :  { %6630 = vmatpush1.bf16.msra.mxu0 %v9913_v29  ;;  %7478 = vmatpush1.bf16.msra.mxu1 %v9916_v30  ;;  %v9994_v29 = vld [vmem:[%s14831_s1 + $0x448] ss:$16 sps:$4 sm:$0xff]   ;;  %v9999_v30 = vld [vmem:[%s14831_s1 + $0x464] ss:$16 sps:$4 sm:$0xff]  }
  0x58   :  { %6631 = vmatprep.subr.bf16.mxu0 %v9921_v32  ;;  %7479 = vmatprep.subr.bf16.mxu1 %v9924_v33  ;;  %v8446_v32 = vcombine.high %v11798_v25, %v11803_v27  ;;  %v9997_v33 = vld [vmem:[%s14831_s1 + $0x460] ss:$16 sps:$4 sm:$0xff]  }
  0x5b   :  { %6632 = vmatpush1.bf16.msra.mxu0 %v9919_v36  ;;  %7480 = vmatpush1.bf16.msra.mxu1 %v9922_v37  ;;  %v10008_v36 = vld [vmem:[%s14831_s1 + $0x48c] ss:$16 sps:$4 sm:$0xff]   ;;  %v10003_v37 = vld [vmem:[%s14831_s1 + $0x480] ss:$16 sps:$4 sm:$0xff]  }
  0x5c   :  { %6633 = vmatprep.subr.bf16.mxu0 %v9927_v39  ;;  %7481 = vmatprep.subr.bf16.mxu1 %v9930_v40  ;;  %v10011_v39 = vld [vmem:[%s14831_s1 + $0x4a4] ss:$16 sps:$4 sm:$0xff]   ;;  %v10014_v40 = vld [vmem:[%s14831_s1 + $0x4ac] ss:$16 sps:$4 sm:$0xff]  }
  0x5f   :  { %6634 = vmatpush1.bf16.msra.mxu0 %v9925_v41  ;;  %7482 = vmatpush1.bf16.msra.mxu1 %v9928_v42  ;;  %v10009_v41 = vld [vmem:[%s14831_s1 + $0x4a0] ss:$16 sps:$4 sm:$0xff]   ;;  %v10012_v42 = vld [vmem:[%s14831_s1 + $0x4a8] ss:$16 sps:$4 sm:$0xff]  }
  0x60   :  { %6635 = vmatprep.subr.bf16.mxu0 %v9933_v43  ;;  %7483 = vmatprep.subr.bf16.mxu1 %v9936_v44  ;;  %v10017_v43 = vld [vmem:[%s14831_s1 + $0x4c4] ss:$16 sps:$4 sm:$0xff]   ;;  %v10020_v44 = vld [vmem:[%s14831_s1 + $0x4cc] ss:$16 sps:$4 sm:$0xff]  }
  0x63   :  { %6636 = vmatpush1.bf16.msra.mxu0 %v9931_v45  ;;  %7484 = vmatpush1.bf16.msra.mxu1 %v9934_v46  ;;  %v10015_v45 = vld [vmem:[%s14831_s1 + $0x4c0] ss:$16 sps:$4 sm:$0xff]   ;;  %v10018_v46 = vld [vmem:[%s14831_s1 + $0x4c8] ss:$16 sps:$4 sm:$0xff]  }
  0x64   :  { %6637 = vmatprep.subr.bf16.mxu0 %v9939_v47  ;;  %7485 = vmatprep.subr.bf16.mxu1 %v9942_v48  ;;  %v10023_v47 = vld [vmem:[%s14831_s1 + $0x4e4] ss:$16 sps:$4 sm:$0xff]   ;;  %v10026_v48 = vld [vmem:[%s14831_s1 + $0x4ec] ss:$16 sps:$4 sm:$0xff]  }
  0x67   :  { %6638 = vmatpush1.bf16.msra.mxu0 %v9937_v49  ;;  %7486 = vmatpush1.bf16.msra.mxu1 %v9940_v50  ;;  %v10021_v49 = vld [vmem:[%s14831_s1 + $0x4e0] ss:$16 sps:$4 sm:$0xff]   ;;  %v10024_v50 = vld [vmem:[%s14831_s1 + $0x4e8] ss:$16 sps:$4 sm:$0xff]  }
  0x68   :  { %6639 = vmatprep.subr.bf16.mxu0 %v9945_v51  ;;  %7487 = vmatprep.subr.bf16.mxu1 %v9948_v52  ;;  %v10029_v51 = vld [vmem:[%s14831_s1 + $0x504] ss:$16 sps:$4 sm:$0xff]   ;;  %v10032_v52 = vld [vmem:[%s14831_s1 + $0x50c] ss:$16 sps:$4 sm:$0xff]  }
  0x6b   :  { %6640 = vmatpush1.bf16.msra.mxu0 %v9943_v53  ;;  %7488 = vmatpush1.bf16.msra.mxu1 %v9946_v54  ;;  %v10027_v53 = vld [vmem:[%s14831_s1 + $0x500] ss:$16 sps:$4 sm:$0xff]   ;;  %v10030_v54 = vld [vmem:[%s14831_s1 + $0x508] ss:$16 sps:$4 sm:$0xff]  }
  0x6c   :  { %6641 = vmatprep.subr.bf16.mxu0 %v9951_v55  ;;  %7489 = vmatprep.subr.bf16.mxu1 %v9954_v56  ;;  %v10035_v55 = vld [vmem:[%s14831_s1 + $0x524] ss:$16 sps:$4 sm:$0xff]   ;;  %v10038_v56 = vld [vmem:[%s14831_s1 + $0x52c] ss:$16 sps:$4 sm:$0xff]  }
  0x6f   :  { %6642 = vmatpush1.bf16.msra.mxu0 %v9949_v57  ;;  %7490 = vmatpush1.bf16.msra.mxu1 %v9952_v58  ;;  %v10033_v57 = vld [vmem:[%s14831_s1 + $0x520] ss:$16 sps:$4 sm:$0xff]   ;;  %v10036_v58 = vld [vmem:[%s14831_s1 + $0x528] ss:$16 sps:$4 sm:$0xff]  }
  0x70   :  { %6643 = vmatprep.subr.bf16.mxu0 %v9957_v59  ;;  %7491 = vmatprep.subr.bf16.mxu1 %v9960_v60  ;;  %v10041_v59 = vld [vmem:[%s14831_s1 + $0x544] ss:$16 sps:$4 sm:$0xff]   ;;  %v10044_v60 = vld [vmem:[%s14831_s1 + $0x54c] ss:$16 sps:$4 sm:$0xff]  }
  0x73   :  { %6644 = vmatpush1.bf16.msra.mxu0 %v9955_v61  ;;  %7492 = vmatpush1.bf16.msra.mxu1 %v9958_v62  ;;  %v10039_v61 = vld [vmem:[%s14831_s1 + $0x540] ss:$16 sps:$4 sm:$0xff]   ;;  %v10042_v62 = vld [vmem:[%s14831_s1 + $0x548] ss:$16 sps:$4 sm:$0xff]  }
  0x74   :  { %6645 = vmatprep.subr.bf16.mxu0 %v9963_v63  ;;  %7493 = vmatprep.subr.bf16.mxu1 %v9966_v0  ;;  %v10047_v63 = vld [vmem:[%s14831_s1 + $0x564] ss:$16 sps:$4 sm:$0xff]   ;;  %v10050_v0 = vld [vmem:[%s14831_s1 + $0x56c] ss:$16 sps:$4 sm:$0xff]  }
  0x77   :  { %6646 = vmatpush1.bf16.msra.mxu0 %v9961_v1  ;;  %7494 = vmatpush1.bf16.msra.mxu1 %v9964_v2  ;;  %v10045_v1 = vld [vmem:[%s14831_s1 + $0x560] ss:$16 sps:$4 sm:$0xff]   ;;  %v10048_v2 = vld [vmem:[%s14831_s1 + $0x568] ss:$16 sps:$4 sm:$0xff]  }
  0x78   :  { %6647 = vmatprep.subr.bf16.mxu0 %v9969_v3  ;;  %7495 = vmatprep.subr.bf16.mxu1 %v9972_v4  ;;  %v10053_v3 = vld [vmem:[%s14831_s1 + $0x584] ss:$16 sps:$4 sm:$0xff]   ;;  %v10056_v4 = vld [vmem:[%s14831_s1 + $0x58c] ss:$16 sps:$4 sm:$0xff]  }
  0x7b   :  { %6648 = vmatpush1.bf16.msra.mxu0 %v9967_v5  ;;  %7496 = vmatpush1.bf16.msra.mxu1 %v9970_v6  ;;  %v10051_v5 = vld [vmem:[%s14831_s1 + $0x580] ss:$16 sps:$4 sm:$0xff]   ;;  %v10054_v6 = vld [vmem:[%s14831_s1 + $0x588] ss:$16 sps:$4 sm:$0xff]  }
  0x7c   :  { %6649 = vmatprep.subr.bf16.mxu0 %v9975_v7  ;;  %7497 = vmatprep.subr.bf16.mxu1 %v9978_v8  ;;  %v10059_v7 = vld [vmem:[%s14831_s1 + $0x5a4] ss:$16 sps:$4 sm:$0xff]   ;;  %v10062_v8 = vld [vmem:[%s14831_s1 + $0x5ac] ss:$16 sps:$4 sm:$0xff]  }
  0x7f   :  { %6650 = vmatpush1.bf16.msra.mxu0 %v9973_v9  ;;  %7498 = vmatpush1.bf16.msra.mxu1 %v9976_v10  ;;  %v10057_v9 = vld [vmem:[%s14831_s1 + $0x5a0] ss:$16 sps:$4 sm:$0xff]   ;;  %v10060_v10 = vld [vmem:[%s14831_s1 + $0x5a8] ss:$16 sps:$4 sm:$0xff]  }
  0x80   :  { %6672 = vmatprep.subr.bf16.mxu0 %v9981_v11  ;;  %7520 = vmatprep.subr.bf16.mxu1 %v9984_v12  ;;  %v10065_v11 = vld [vmem:[%s14831_s1 + $0x5c4] ss:$16 sps:$4 sm:$0xff]   ;;  %v10068_v12 = vld [vmem:[%s14831_s1 + $0x5cc] ss:$16 sps:$4 sm:$0xff]  }
  0x82   :  { %6652 = vmatmul.mubr.bf16.vlgmr.msra.gmra.mrb[0].mxu0 %v8443_v15  ;;  %7500 = vmatmul.mubr.bf16.vlgmr.msra.gmra.mrb[0].mxu1 %v8443_v15  ;;  %v10071_v15 = vld [vmem:[%s14831_s1 + $0x5e4] ss:$16 sps:$4 sm:$0xff]  }
  0x83   :  { %6673 = vmatpush1.bf16.msra.mxu0 %v9979_v13  ;;  %7521 = vmatpush1.bf16.msra.mxu1 %v9982_v14  ;;  %v10063_v13 = vld [vmem:[%s14831_s1 + $0x5c0] ss:$16 sps:$4 sm:$0xff]   ;;  %v10066_v14 = vld [vmem:[%s14831_s1 + $0x5c8] ss:$16 sps:$4 sm:$0xff]  }
  0x84   :  { %6674 = vmatprep.subr.bf16.mxu0 %v9987_v18  ;;  %7522 = vmatprep.subr.bf16.mxu1 %v9990_v19  ;;  %v10072_v18 = vld [vmem:[%s14831_s1 + $0x5e8] ss:$16 sps:$4 sm:$0xff]   ;;  %v10077_v19 = vld [vmem:[%s14831_s1 + $0x604] ss:$16 sps:$4 sm:$0xff]  }
  0x85   :  { %6661 = vmatprep.mubr.bf16.mxu0 %v8476_v20  ;;  %7509 = vmatprep.mubr.bf16.mxu1 %v8476_v20  ;;  %v10080_v20 = vld [vmem:[%s14831_s1 + $0x60c] ss:$16 sps:$4 sm:$0xff]  }
  0x87   :  { %6675 = vmatpush1.bf16.msra.mxu0 %v9985_v21  ;;  %7523 = vmatpush1.bf16.msra.mxu1 %v9988_v22  ;;  %v50_v21 = vld [vmem:[%s14832_s0 + $0x110] sm:$0xff]  ;;  %v8445_v22 = vcombine.low %v11798_v25, %v11803_v27  ;;  %v10086_v27 = vld [vmem:[%s14831_s1 + $0x62c] ss:$16 sps:$4 sm:$0xff]  }
  0x88   :  { %6676 = vmatprep.subr.bf16.mxu0 %v9993_v23  ;;  %7524 = vmatprep.subr.bf16.mxu1 %v9996_v24  ;;  %v66_v23 = vld [vmem:[%s14832_s0 + $0x190] sm:$0xff] }
  0x89   :  { %v10075_v24 = vld [vmem:[%s14831_s1 + $0x600] ss:$16 sps:$4 sm:$0xff]   ;;  %v10083_v25 = vld [vmem:[%s14831_s1 + $0x624] ss:$16 sps:$4 sm:$0xff]  }
  0x8a   :  { %6662 = vmatmul.mubr.bf16.gmra.mrb[4].mxu0 %v8475_v26  ;;  %7510 = vmatmul.mubr.bf16.gmra.mrb[4].mxu1 %v8475_v26  ;;  %v10078_v26 = vld [vmem:[%s14831_s1 + $0x608] ss:$16 sps:$4 sm:$0xff]  }
  0x8b   :  { %6677 = vmatpush1.bf16.msra.mxu0 %v9991_v28  ;;  %7525 = vmatpush1.bf16.msra.mxu1 %v9994_v29  ;;  %v8478_v28 = vcombine.high %v50_v21, %v66_v23  ;;  %v10081_v29 = vld [vmem:[%s14831_s1 + $0x620] ss:$16 sps:$4 sm:$0xff]  }
  0x8c   :  { %6678 = vmatprep.subr.bf16.mxu0 %v9999_v30  ;;  %7526 = vmatprep.subr.bf16.mxu1 %v10002_v31  ;;  %v10084_v30 = vld [vmem:[%s14831_s1 + $0x628] ss:$16 sps:$4 sm:$0xff]   ;;  %v10089_v31 = vld [vmem:[%s14831_s1 + $0x644] ss:$16 sps:$4 sm:$0xff]  }
  0x8d   :  { %6704 = vmatprep.mubr.bf16.mxu0 %v8446_v32  ;;  %7552 = vmatprep.mubr.bf16.mxu1 %v8446_v32  ;;  %v10092_v32 = vld [vmem:[%s14831_s1 + $0x64c] ss:$16 sps:$4 sm:$0xff]  }
  0x8f   :  { %6679 = vmatpush1.bf16.msra.mxu0 %v9997_v33  ;;  %7527 = vmatpush1.bf16.msra.mxu1 %v10000_v34  ;;  %v12010_v33 = vld [vmem:[%s14832_s0 + $0x18] sm:$0xff]  ;;  %v8477_v34 = vcombine.low %v50_v21, %v66_v23  ;;  %v10159_v21 = vld [vmem:[%s14831_s1 + $0x7c0] ss:$16 sps:$4 sm:$0xff]   ;;  %v10167_v23 = vld [vmem:[%s14831_s1 + $0x7e4] ss:$16 sps:$4 sm:$0xff]  }
  0x90   :  { %6680 = vmatprep.subr.bf16.mxu0 %v10005_v35  ;;  %7528 = vmatprep.subr.bf16.mxu1 %v10008_v36  ;;  %v12015_v35 = vld [vmem:[%s14832_s0 + $0x98] sm:$0xff]  ;;  %v10087_v36 = vld [vmem:[%s14831_s1 + $0x640] ss:$16 sps:$4 sm:$0xff]  }
  0x93   :  { %6681 = vmatpush1.bf16.msra.mxu0 %v10003_v37  ;;  %7529 = vmatpush1.bf16.msra.mxu1 %v10006_v38  ;;  %v10090_v37 = vld [vmem:[%s14831_s1 + $0x648] ss:$16 sps:$4 sm:$0xff]   ;;  %v10095_v38 = vld [vmem:[%s14831_s1 + $0x664] ss:$16 sps:$4 sm:$0xff]  }
  0x94   :  { %6682 = vmatprep.subr.bf16.mxu0 %v10011_v39  ;;  %7530 = vmatprep.subr.bf16.mxu1 %v10014_v40  ;;  %v10098_v39 = vld [vmem:[%s14831_s1 + $0x66c] ss:$16 sps:$4 sm:$0xff]   ;;  %v8448_v40 = vcombine.high %v12010_v33, %v12015_v35 }
  0x97   :  { %6683 = vmatpush1.bf16.msra.mxu0 %v10009_v41  ;;  %7531 = vmatpush1.bf16.msra.mxu1 %v10012_v42  ;;  %v10093_v41 = vld [vmem:[%s14831_s1 + $0x660] ss:$16 sps:$4 sm:$0xff]   ;;  %v10096_v42 = vld [vmem:[%s14831_s1 + $0x668] ss:$16 sps:$4 sm:$0xff]  }
  0x98   :  { %6684 = vmatprep.subr.bf16.mxu0 %v10017_v43  ;;  %7532 = vmatprep.subr.bf16.mxu1 %v10020_v44  ;;  %v10101_v43 = vld [vmem:[%s14831_s1 + $0x684] ss:$16 sps:$4 sm:$0xff]   ;;  %v10104_v44 = vld [vmem:[%s14831_s1 + $0x68c] ss:$16 sps:$4 sm:$0xff]  }
  0x9b   :  { %6685 = vmatpush1.bf16.msra.mxu0 %v10015_v45  ;;  %7533 = vmatpush1.bf16.msra.mxu1 %v10018_v46  ;;  %v10099_v45 = vld [vmem:[%s14831_s1 + $0x680] ss:$16 sps:$4 sm:$0xff]   ;;  %v10102_v46 = vld [vmem:[%s14831_s1 + $0x688] ss:$16 sps:$4 sm:$0xff]  }
  0x9c   :  { %6686 = vmatprep.subr.bf16.mxu0 %v10023_v47  ;;  %7534 = vmatprep.subr.bf16.mxu1 %v10026_v48  ;;  %v10107_v47 = vld [vmem:[%s14831_s1 + $0x6a4] ss:$16 sps:$4 sm:$0xff]   ;;  %v10110_v48 = vld [vmem:[%s14831_s1 + $0x6ac] ss:$16 sps:$4 sm:$0xff]  }
  0x9f   :  { %6687 = vmatpush1.bf16.msra.mxu0 %v10021_v49  ;;  %7535 = vmatpush1.bf16.msra.mxu1 %v10024_v50  ;;  %v10105_v49 = vld [vmem:[%s14831_s1 + $0x6a0] ss:$16 sps:$4 sm:$0xff]   ;;  %v10108_v50 = vld [vmem:[%s14831_s1 + $0x6a8] ss:$16 sps:$4 sm:$0xff]  }
  0xa0   :  { %6688 = vmatprep.subr.bf16.mxu0 %v10029_v51  ;;  %7536 = vmatprep.subr.bf16.mxu1 %v10032_v52  ;;  %v10113_v51 = vld [vmem:[%s14831_s1 + $0x6c4] ss:$16 sps:$4 sm:$0xff]   ;;  %v10116_v52 = vld [vmem:[%s14831_s1 + $0x6cc] ss:$16 sps:$4 sm:$0xff]  }
  0xa3   :  { %6689 = vmatpush1.bf16.msra.mxu0 %v10027_v53  ;;  %7537 = vmatpush1.bf16.msra.mxu1 %v10030_v54  ;;  %v10111_v53 = vld [vmem:[%s14831_s1 + $0x6c0] ss:$16 sps:$4 sm:$0xff]   ;;  %v10114_v54 = vld [vmem:[%s14831_s1 + $0x6c8] ss:$16 sps:$4 sm:$0xff]  }
  0xa4   :  { %6690 = vmatprep.subr.bf16.mxu0 %v10035_v55  ;;  %7538 = vmatprep.subr.bf16.mxu1 %v10038_v56  ;;  %v10119_v55 = vld [vmem:[%s14831_s1 + $0x6e4] ss:$16 sps:$4 sm:$0xff]   ;;  %v10122_v56 = vld [vmem:[%s14831_s1 + $0x6ec] ss:$16 sps:$4 sm:$0xff]  }
  0xa7   :  { %6691 = vmatpush1.bf16.msra.mxu0 %v10033_v57  ;;  %7539 = vmatpush1.bf16.msra.mxu1 %v10036_v58  ;;  %v10117_v57 = vld [vmem:[%s14831_s1 + $0x6e0] ss:$16 sps:$4 sm:$0xff]   ;;  %v10120_v58 = vld [vmem:[%s14831_s1 + $0x6e8] ss:$16 sps:$4 sm:$0xff]  }
  0xa8   :  { %6692 = vmatprep.subr.bf16.mxu0 %v10041_v59  ;;  %7540 = vmatprep.subr.bf16.mxu1 %v10044_v60  ;;  %v10125_v59 = vld [vmem:[%s14831_s1 + $0x704] ss:$16 sps:$4 sm:$0xff]   ;;  %v10128_v60 = vld [vmem:[%s14831_s1 + $0x70c] ss:$16 sps:$4 sm:$0xff]  }
  0xab   :  { %6693 = vmatpush1.bf16.msra.mxu0 %v10039_v61  ;;  %7541 = vmatpush1.bf16.msra.mxu1 %v10042_v62  ;;  %v10123_v61 = vld [vmem:[%s14831_s1 + $0x700] ss:$16 sps:$4 sm:$0xff]   ;;  %v10126_v62 = vld [vmem:[%s14831_s1 + $0x708] ss:$16 sps:$4 sm:$0xff]  }
  0xac   :  { %6694 = vmatprep.subr.bf16.mxu0 %v10047_v63  ;;  %7542 = vmatprep.subr.bf16.mxu1 %v10050_v0  ;;  %v10131_v63 = vld [vmem:[%s14831_s1 + $0x724] ss:$16 sps:$4 sm:$0xff]   ;;  %v10134_v0 = vld [vmem:[%s14831_s1 + $0x72c] ss:$16 sps:$4 sm:$0xff]  }
  0xaf   :  { %6695 = vmatpush1.bf16.msra.mxu0 %v10045_v1  ;;  %7543 = vmatpush1.bf16.msra.mxu1 %v10048_v2  ;;  %v10129_v1 = vld [vmem:[%s14831_s1 + $0x720] ss:$16 sps:$4 sm:$0xff]   ;;  %v10132_v2 = vld [vmem:[%s14831_s1 + $0x728] ss:$16 sps:$4 sm:$0xff]  }
  0xb0   :  { %6696 = vmatprep.subr.bf16.mxu0 %v10053_v3  ;;  %7544 = vmatprep.subr.bf16.mxu1 %v10056_v4  ;;  %v10137_v3 = vld [vmem:[%s14831_s1 + $0x744] ss:$16 sps:$4 sm:$0xff]   ;;  %v10140_v4 = vld [vmem:[%s14831_s1 + $0x74c] ss:$16 sps:$4 sm:$0xff]  }
  0xb3   :  { %6697 = vmatpush1.bf16.msra.mxu0 %v10051_v5  ;;  %7545 = vmatpush1.bf16.msra.mxu1 %v10054_v6  ;;  %v10135_v5 = vld [vmem:[%s14831_s1 + $0x740] ss:$16 sps:$4 sm:$0xff]   ;;  %v10138_v6 = vld [vmem:[%s14831_s1 + $0x748] ss:$16 sps:$4 sm:$0xff]  }
  0xb4   :  { %6698 = vmatprep.subr.bf16.mxu0 %v10059_v7  ;;  %7546 = vmatprep.subr.bf16.mxu1 %v10062_v8  ;;  %v10143_v7 = vld [vmem:[%s14831_s1 + $0x764] ss:$16 sps:$4 sm:$0xff]   ;;  %v10146_v8 = vld [vmem:[%s14831_s1 + $0x76c] ss:$16 sps:$4 sm:$0xff]  }
  0xb7   :  { %6699 = vmatpush1.bf16.msra.mxu0 %v10057_v9  ;;  %7547 = vmatpush1.bf16.msra.mxu1 %v10060_v10  ;;  %v10141_v9 = vld [vmem:[%s14831_s1 + $0x760] ss:$16 sps:$4 sm:$0xff]   ;;  %v10144_v10 = vld [vmem:[%s14831_s1 + $0x768] ss:$16 sps:$4 sm:$0xff]  }
  0xb8   :  { %6700 = vmatprep.subr.bf16.mxu0 %v10065_v11  ;;  %7548 = vmatprep.subr.bf16.mxu1 %v10068_v12  ;;  %v10149_v11 = vld [vmem:[%s14831_s1 + $0x784] ss:$16 sps:$4 sm:$0xff]   ;;  %v10152_v12 = vld [vmem:[%s14831_s1 + $0x78c] ss:$16 sps:$4 sm:$0xff]  }
  0xbb   :  { %6701 = vmatpush1.bf16.msra.mxu0 %v10063_v13  ;;  %7549 = vmatpush1.bf16.msra.mxu1 %v10066_v14  ;;  %v10147_v13 = vld [vmem:[%s14831_s1 + $0x780] ss:$16 sps:$4 sm:$0xff]   ;;  %v10150_v14 = vld [vmem:[%s14831_s1 + $0x788] ss:$16 sps:$4 sm:$0xff]  }
  0xbc   :  { %6702 = vmatprep.subr.bf16.mxu0 %v10071_v15  ;;  %7550 = vmatprep.subr.bf16.mxu1 %v10074_v16  ;;  %v10155_v15 = vld [vmem:[%s14831_s1 + $0x7a4] ss:$16 sps:$4 sm:$0xff]   ;;  %v10158_v16 = vld [vmem:[%s14831_s1 + $0x7ac] ss:$16 sps:$4 sm:$0xff]  }
  0xbf   :  { %6703 = vmatpush1.bf16.msra.mxu0 %v10069_v17  ;;  %7551 = vmatpush1.bf16.msra.mxu1 %v10072_v18  ;;  %v10153_v17 = vld [vmem:[%s14831_s1 + $0x7a0] ss:$16 sps:$4 sm:$0xff]   ;;  %v10156_v18 = vld [vmem:[%s14831_s1 + $0x7a8] ss:$16 sps:$4 sm:$0xff]  }
  0xc0   :  { %6725 = vmatprep.subr.bf16.mxu0 %v10077_v19  ;;  %7573 = vmatprep.subr.bf16.mxu1 %v10080_v20  ;;  %v10161_v19 = vld [vmem:[%s14831_s1 + $0x7c4] ss:$16 sps:$4 sm:$0xff]   ;;  %v10164_v20 = vld [vmem:[%s14831_s1 + $0x7cc] ss:$16 sps:$4 sm:$0xff]  }
  0xc2   :  { %6705 = vmatmul.mubr.bf16.vlgmr.msra.gmra.mrb[0].mxu0 %v8445_v22  ;;  %7553 = vmatmul.mubr.bf16.vlgmr.msra.gmra.mrb[0].mxu1 %v8445_v22  ;;  %v10162_v22 = vld [vmem:[%s14831_s1 + $0x7c8] ss:$16 sps:$4 sm:$0xff]  }
  0xc3   :  { %6726 = vmatpush1.bf16.msra.mxu0 %v10075_v24  ;;  %7574 = vmatpush1.bf16.msra.mxu1 %v10078_v26  ;;  %v10170_v24 = vld [vmem:[%s14831_s1 + $0x7ec] ss:$16 sps:$4 sm:$0xff]   ;;  %v10165_v26 = vld [vmem:[%s14831_s1 + $0x7e0] ss:$16 sps:$4 sm:$0xff]  }
  0xc4   :  { %6727 = vmatprep.subr.bf16.mxu0 %v10083_v25  ;;  %7575 = vmatprep.subr.bf16.mxu1 %v10086_v27  ;;  %v10168_v25 = vld [vmem:[%s14831_s1 + $0x7e8] ss:$16 sps:$4 sm:$0xff]   ;;  %v10173_v27 = vld [vmem:[%s14831_s1 + $0x804] ss:$16 sps:$4 sm:$0xff]  }
  0xc5   :  { %6714 = vmatprep.mubr.bf16.mxu0 %v8478_v28  ;;  %7562 = vmatprep.mubr.bf16.mxu1 %v8478_v28  ;;  %v10176_v28 = vld [vmem:[%s14831_s1 + $0x80c] ss:$16 sps:$4 sm:$0xff]  }
  0xc7   :  { %6728 = vmatpush1.bf16.msra.mxu0 %v10081_v29  ;;  %7576 = vmatpush1.bf16.msra.mxu1 %v10084_v30  ;;  %v51_v29 = vld [vmem:[%s14832_s0 + $0x118] sm:$0xff]  ;;  %v8447_v30 = vcombine.low %v12010_v33, %v12015_v35 }
  0xc8   :  { %6729 = vmatprep.subr.bf16.mxu0 %v10089_v31  ;;  %7577 = vmatprep.subr.bf16.mxu1 %v10092_v32  ;;  %v67_v31 = vld [vmem:[%s14832_s0 + $0x198] sm:$0xff]  ;;  %v10171_v32 = vld [vmem:[%s14831_s1 + $0x800] ss:$16 sps:$4 sm:$0xff]  }
  0xc9   :  { %v10182_v33 = vld [vmem:[%s14831_s1 + $0x82c] ss:$16 sps:$4 sm:$0xff]   ;;  %v8480_v35 = vcombine.high %v51_v29, %v67_v31 }
  0xca   :  { %6715 = vmatmul.mubr.bf16.gmra.mrb[4].mxu0 %v8477_v34  ;;  %7563 = vmatmul.mubr.bf16.gmra.mrb[4].mxu1 %v8477_v34  ;;  %v10174_v34 = vld [vmem:[%s14831_s1 + $0x808] ss:$16 sps:$4 sm:$0xff]  }
  0xcb   :  { %6730 = vmatpush1.bf16.msra.mxu0 %v10087_v36  ;;  %7578 = vmatpush1.bf16.msra.mxu1 %v10090_v37  ;;  %v10179_v36 = vld [vmem:[%s14831_s1 + $0x824] ss:$16 sps:$4 sm:$0xff]   ;;  %v10177_v37 = vld [vmem:[%s14831_s1 + $0x820] ss:$16 sps:$4 sm:$0xff]  }
  0xcc   :  { %6731 = vmatprep.subr.bf16.mxu0 %v10095_v38  ;;  %7579 = vmatprep.subr.bf16.mxu1 %v10098_v39  ;;  %v10180_v38 = vld [vmem:[%s14831_s1 + $0x828] ss:$16 sps:$4 sm:$0xff]   ;;  %v10185_v39 = vld [vmem:[%s14831_s1 + $0x844] ss:$16 sps:$4 sm:$0xff]  }
  0xcd   :  { %6757 = vmatprep.mubr.bf16.mxu0 %v8448_v40  ;;  %7605 = vmatprep.mubr.bf16.mxu1 %v8448_v40  ;;  %v10188_v40 = vld [vmem:[%s14831_s1 + $0x84c] ss:$16 sps:$4 sm:$0xff]  }
  0xcf   :  { %6732 = vmatpush1.bf16.msra.mxu0 %v10093_v41  ;;  %7580 = vmatpush1.bf16.msra.mxu1 %v10096_v42  ;;  %v12222_v41 = vld [vmem:[%s14832_s0 + $0x20] sm:$0xff]  ;;  %v8479_v42 = vcombine.low %v51_v29, %v67_v31 }
  0xd0   :  { %6733 = vmatprep.subr.bf16.mxu0 %v10101_v43  ;;  %7581 = vmatprep.subr.bf16.mxu1 %v10104_v44  ;;  %v12227_v43 = vld [vmem:[%s14832_s0 + $0xa0] sm:$0xff] }
  0xd1   :  { %v10183_v44 = vld [vmem:[%s14831_s1 + $0x840] ss:$16 sps:$4 sm:$0xff]   ;;  %v10263_v31 = vld [vmem:[%s14831_s1 + $0x9e4] ss:$16 sps:$4 sm:$0xff]  }
  0xd2   :  { %v10255_v29 = vld [vmem:[%s14831_s1 + $0x9c0] ss:$16 sps:$4 sm:$0xff]  }
  0xd3   :  { %6734 = vmatpush1.bf16.msra.mxu0 %v10099_v45  ;;  %7582 = vmatpush1.bf16.msra.mxu1 %v10102_v46  ;;  %v10186_v45 = vld [vmem:[%s14831_s1 + $0x848] ss:$16 sps:$4 sm:$0xff]   ;;  %v10191_v46 = vld [vmem:[%s14831_s1 + $0x864] ss:$16 sps:$4 sm:$0xff]  }
  0xd4   :  { %6735 = vmatprep.subr.bf16.mxu0 %v10107_v47  ;;  %7583 = vmatprep.subr.bf16.mxu1 %v10110_v48  ;;  %v10194_v47 = vld [vmem:[%s14831_s1 + $0x86c] ss:$16 sps:$4 sm:$0xff]   ;;  %v8450_v48 = vcombine.high %v12222_v41, %v12227_v43 }
  0xd7   :  { %6736 = vmatpush1.bf16.msra.mxu0 %v10105_v49  ;;  %7584 = vmatpush1.bf16.msra.mxu1 %v10108_v50  ;;  %v10189_v49 = vld [vmem:[%s14831_s1 + $0x860] ss:$16 sps:$4 sm:$0xff]   ;;  %v10192_v50 = vld [vmem:[%s14831_s1 + $0x868] ss:$16 sps:$4 sm:$0xff]  }
  0xd8   :  { %6737 = vmatprep.subr.bf16.mxu0 %v10113_v51  ;;  %7585 = vmatprep.subr.bf16.mxu1 %v10116_v52  ;;  %v10197_v51 = vld [vmem:[%s14831_s1 + $0x884] ss:$16 sps:$4 sm:$0xff]   ;;  %v10200_v52 = vld [vmem:[%s14831_s1 + $0x88c] ss:$16 sps:$4 sm:$0xff]  }
  0xdb   :  { %6738 = vmatpush1.bf16.msra.mxu0 %v10111_v53  ;;  %7586 = vmatpush1.bf16.msra.mxu1 %v10114_v54  ;;  %v10195_v53 = vld [vmem:[%s14831_s1 + $0x880] ss:$16 sps:$4 sm:$0xff]   ;;  %v10198_v54 = vld [vmem:[%s14831_s1 + $0x888] ss:$16 sps:$4 sm:$0xff]  }
  0xdc   :  { %6739 = vmatprep.subr.bf16.mxu0 %v10119_v55  ;;  %7587 = vmatprep.subr.bf16.mxu1 %v10122_v56  ;;  %v10203_v55 = vld [vmem:[%s14831_s1 + $0x8a4] ss:$16 sps:$4 sm:$0xff]   ;;  %v10206_v56 = vld [vmem:[%s14831_s1 + $0x8ac] ss:$16 sps:$4 sm:$0xff]  }
  0xdf   :  { %6740 = vmatpush1.bf16.msra.mxu0 %v10117_v57  ;;  %7588 = vmatpush1.bf16.msra.mxu1 %v10120_v58  ;;  %v10201_v57 = vld [vmem:[%s14831_s1 + $0x8a0] ss:$16 sps:$4 sm:$0xff]   ;;  %v10204_v58 = vld [vmem:[%s14831_s1 + $0x8a8] ss:$16 sps:$4 sm:$0xff]  }
  0xe0   :  { %6741 = vmatprep.subr.bf16.mxu0 %v10125_v59  ;;  %7589 = vmatprep.subr.bf16.mxu1 %v10128_v60  ;;  %v10209_v59 = vld [vmem:[%s14831_s1 + $0x8c4] ss:$16 sps:$4 sm:$0xff]   ;;  %v10212_v60 = vld [vmem:[%s14831_s1 + $0x8cc] ss:$16 sps:$4 sm:$0xff]  }
  0xe3   :  { %6742 = vmatpush1.bf16.msra.mxu0 %v10123_v61  ;;  %7590 = vmatpush1.bf16.msra.mxu1 %v10126_v62  ;;  %v10207_v61 = vld [vmem:[%s14831_s1 + $0x8c0] ss:$16 sps:$4 sm:$0xff]   ;;  %v10210_v62 = vld [vmem:[%s14831_s1 + $0x8c8] ss:$16 sps:$4 sm:$0xff]  }
  0xe4   :  { %6743 = vmatprep.subr.bf16.mxu0 %v10131_v63  ;;  %7591 = vmatprep.subr.bf16.mxu1 %v10134_v0  ;;  %v10215_v63 = vld [vmem:[%s14831_s1 + $0x8e4] ss:$16 sps:$4 sm:$0xff]   ;;  %v10218_v0 = vld [vmem:[%s14831_s1 + $0x8ec] ss:$16 sps:$4 sm:$0xff]  }
  0xe7   :  { %6744 = vmatpush1.bf16.msra.mxu0 %v10129_v1  ;;  %7592 = vmatpush1.bf16.msra.mxu1 %v10132_v2  ;;  %v10213_v1 = vld [vmem:[%s14831_s1 + $0x8e0] ss:$16 sps:$4 sm:$0xff]   ;;  %v10216_v2 = vld [vmem:[%s14831_s1 + $0x8e8] ss:$16 sps:$4 sm:$0xff]  }
  0xe8   :  { %6745 = vmatprep.subr.bf16.mxu0 %v10137_v3  ;;  %7593 = vmatprep.subr.bf16.mxu1 %v10140_v4  ;;  %v10221_v3 = vld [vmem:[%s14831_s1 + $0x904] ss:$16 sps:$4 sm:$0xff]   ;;  %v10224_v4 = vld [vmem:[%s14831_s1 + $0x90c] ss:$16 sps:$4 sm:$0xff]  }
  0xeb   :  { %6746 = vmatpush1.bf16.msra.mxu0 %v10135_v5  ;;  %7594 = vmatpush1.bf16.msra.mxu1 %v10138_v6  ;;  %v10219_v5 = vld [vmem:[%s14831_s1 + $0x900] ss:$16 sps:$4 sm:$0xff]   ;;  %v10222_v6 = vld [vmem:[%s14831_s1 + $0x908] ss:$16 sps:$4 sm:$0xff]  }
  0xec   :  { %6747 = vmatprep.subr.bf16.mxu0 %v10143_v7  ;;  %7595 = vmatprep.subr.bf16.mxu1 %v10146_v8  ;;  %v10227_v7 = vld [vmem:[%s14831_s1 + $0x924] ss:$16 sps:$4 sm:$0xff]   ;;  %v10230_v8 = vld [vmem:[%s14831_s1 + $0x92c] ss:$16 sps:$4 sm:$0xff]  }
  0xef   :  { %6748 = vmatpush1.bf16.msra.mxu0 %v10141_v9  ;;  %7596 = vmatpush1.bf16.msra.mxu1 %v10144_v10  ;;  %v10225_v9 = vld [vmem:[%s14831_s1 + $0x920] ss:$16 sps:$4 sm:$0xff]   ;;  %v10228_v10 = vld [vmem:[%s14831_s1 + $0x928] ss:$16 sps:$4 sm:$0xff]  }
  0xf0   :  { %6749 = vmatprep.subr.bf16.mxu0 %v10149_v11  ;;  %7597 = vmatprep.subr.bf16.mxu1 %v10152_v12  ;;  %v10233_v11 = vld [vmem:[%s14831_s1 + $0x944] ss:$16 sps:$4 sm:$0xff]   ;;  %v10236_v12 = vld [vmem:[%s14831_s1 + $0x94c] ss:$16 sps:$4 sm:$0xff]  }
  0xf3   :  { %6750 = vmatpush1.bf16.msra.mxu0 %v10147_v13  ;;  %7598 = vmatpush1.bf16.msra.mxu1 %v10150_v14  ;;  %v10231_v13 = vld [vmem:[%s14831_s1 + $0x940] ss:$16 sps:$4 sm:$0xff]   ;;  %v10234_v14 = vld [vmem:[%s14831_s1 + $0x948] ss:$16 sps:$4 sm:$0xff]  }
  0xf4   :  { %6751 = vmatprep.subr.bf16.mxu0 %v10155_v15  ;;  %7599 = vmatprep.subr.bf16.mxu1 %v10158_v16  ;;  %v10239_v15 = vld [vmem:[%s14831_s1 + $0x964] ss:$16 sps:$4 sm:$0xff]   ;;  %v10242_v16 = vld [vmem:[%s14831_s1 + $0x96c] ss:$16 sps:$4 sm:$0xff]  }
  0xf7   :  { %6752 = vmatpush1.bf16.msra.mxu0 %v10153_v17  ;;  %7600 = vmatpush1.bf16.msra.mxu1 %v10156_v18  ;;  %v10237_v17 = vld [vmem:[%s14831_s1 + $0x960] ss:$16 sps:$4 sm:$0xff]   ;;  %v10240_v18 = vld [vmem:[%s14831_s1 + $0x968] ss:$16 sps:$4 sm:$0xff]  }
  0xf8   :  { %6753 = vmatprep.subr.bf16.mxu0 %v10161_v19  ;;  %7601 = vmatprep.subr.bf16.mxu1 %v10164_v20  ;;  %v10245_v19 = vld [vmem:[%s14831_s1 + $0x984] ss:$16 sps:$4 sm:$0xff]   ;;  %v10248_v20 = vld [vmem:[%s14831_s1 + $0x98c] ss:$16 sps:$4 sm:$0xff]  }
  0xfb   :  { %6754 = vmatpush1.bf16.msra.mxu0 %v10159_v21  ;;  %7602 = vmatpush1.bf16.msra.mxu1 %v10162_v22  ;;  %v10243_v21 = vld [vmem:[%s14831_s1 + $0x980] ss:$16 sps:$4 sm:$0xff]   ;;  %v10246_v22 = vld [vmem:[%s14831_s1 + $0x988] ss:$16 sps:$4 sm:$0xff]  }
  0xfc   :  { %6755 = vmatprep.subr.bf16.mxu0 %v10167_v23  ;;  %7603 = vmatprep.subr.bf16.mxu1 %v10170_v24  ;;  %v10251_v23 = vld [vmem:[%s14831_s1 + $0x9a4] ss:$16 sps:$4 sm:$0xff]   ;;  %v10254_v24 = vld [vmem:[%s14831_s1 + $0x9ac] ss:$16 sps:$4 sm:$0xff]  }
  0xff   :  { %6756 = vmatpush1.bf16.msra.mxu0 %v10165_v26  ;;  %7604 = vmatpush1.bf16.msra.mxu1 %v10168_v25  ;;  %v10249_v26 = vld [vmem:[%s14831_s1 + $0x9a0] ss:$16 sps:$4 sm:$0xff]   ;;  %v10252_v25 = vld [vmem:[%s14831_s1 + $0x9a8] ss:$16 sps:$4 sm:$0xff]  }
 0x100   :  { %6778 = vmatprep.subr.bf16.mxu0 %v10173_v27  ;;  %7626 = vmatprep.subr.bf16.mxu1 %v10176_v28  ;;  %v10257_v27 = vld [vmem:[%s14831_s1 + $0x9c4] ss:$16 sps:$4 sm:$0xff]   ;;  %v10260_v28 = vld [vmem:[%s14831_s1 + $0x9cc] ss:$16 sps:$4 sm:$0xff]  }
 0x102   :  { %6758 = vmatmul.mubr.bf16.vlgmr.msra.gmra.mrb[0].mxu0 %v8447_v30  ;;  %7606 = vmatmul.mubr.bf16.vlgmr.msra.gmra.mrb[0].mxu1 %v8447_v30  ;;  %v10258_v30 = vld [vmem:[%s14831_s1 + $0x9c8] ss:$16 sps:$4 sm:$0xff]  }
 0x103   :  { %6779 = vmatpush1.bf16.msra.mxu0 %v10171_v32  ;;  %7627 = vmatpush1.bf16.msra.mxu1 %v10174_v34  ;;  %v10266_v32 = vld [vmem:[%s14831_s1 + $0x9ec] ss:$16 sps:$4 sm:$0xff]   ;;  %v10261_v34 = vld [vmem:[%s14831_s1 + $0x9e0] ss:$16 sps:$4 sm:$0xff]  }
 0x104   :  { %6780 = vmatprep.subr.bf16.mxu0 %v10179_v36  ;;  %7628 = vmatprep.subr.bf16.mxu1 %v10182_v33  ;;  %v10264_v36 = vld [vmem:[%s14831_s1 + $0x9e8] ss:$16 sps:$4 sm:$0xff]   ;;  %v10269_v33 = vld [vmem:[%s14831_s1 + $0xa04] ss:$16 sps:$4 sm:$0xff]  }
 0x105   :  { %6767 = vmatprep.mubr.bf16.mxu0 %v8480_v35  ;;  %7615 = vmatprep.mubr.bf16.mxu1 %v8480_v35  ;;  %v10272_v35 = vld [vmem:[%s14831_s1 + $0xa0c] ss:$16 sps:$4 sm:$0xff]  }
 0x107   :  { %6781 = vmatpush1.bf16.msra.mxu0 %v10177_v37  ;;  %7629 = vmatpush1.bf16.msra.mxu1 %v10180_v38  ;;  %v52_v37 = vld [vmem:[%s14832_s0 + $0x120] sm:$0xff] }
 0x108   :  { %6782 = vmatprep.subr.bf16.mxu0 %v10185_v39  ;;  %7630 = vmatprep.subr.bf16.mxu1 %v10188_v40  ;;  %v68_v38 = vld [vmem:[%s14832_s0 + $0x1a0] sm:$0xff]  ;;  %v8449_v39 = vcombine.low %v12222_v41, %v12227_v43  ;;  %v10278_v41 = vld [vmem:[%s14831_s1 + $0xa2c] ss:$16 sps:$4 sm:$0xff]  }
 0x109   :  { %v10267_v40 = vld [vmem:[%s14831_s1 + $0xa00] ss:$16 sps:$4 sm:$0xff]  }
 0x10a   :  { %6768 = vmatmul.mubr.bf16.gmra.mrb[4].mxu0 %v8479_v42  ;;  %7616 = vmatmul.mubr.bf16.gmra.mrb[4].mxu1 %v8479_v42  ;;  %v10270_v42 = vld [vmem:[%s14831_s1 + $0xa08] ss:$16 sps:$4 sm:$0xff]   ;;  %v10273_v43 = vld [vmem:[%s14831_s1 + $0xa20] ss:$16 sps:$4 sm:$0xff]  }
 0x10b   :  { %6783 = vmatpush1.bf16.msra.mxu0 %v10183_v44  ;;  %7631 = vmatpush1.bf16.msra.mxu1 %v10186_v45  ;;  %v10275_v44 = vld [vmem:[%s14831_s1 + $0xa24] ss:$16 sps:$4 sm:$0xff]   ;;  %v10276_v45 = vld [vmem:[%s14831_s1 + $0xa28] ss:$16 sps:$4 sm:$0xff]  }
 0x10c   :  { %6784 = vmatprep.subr.bf16.mxu0 %v10191_v46  ;;  %7632 = vmatprep.subr.bf16.mxu1 %v10194_v47  ;;  %v8482_v46 = vcombine.high %v52_v37, %v68_v38  ;;  %v10281_v47 = vld [vmem:[%s14831_s1 + $0xa44] ss:$16 sps:$4 sm:$0xff]  }
 0x10d   :  { %6810 = vmatprep.mubr.bf16.mxu0 %v8450_v48  ;;  %7658 = vmatprep.mubr.bf16.mxu1 %v8450_v48  ;;  %v10284_v48 = vld [vmem:[%s14831_s1 + $0xa4c] ss:$16 sps:$4 sm:$0xff]  }
 0x10f   :  { %6785 = vmatpush1.bf16.msra.mxu0 %v10189_v49  ;;  %7633 = vmatpush1.bf16.msra.mxu1 %v10192_v50  ;;  %v12434_v49 = vld [vmem:[%s14832_s0 + $0x28] sm:$0xff] }
 0x110   :  { %6786 = vmatprep.subr.bf16.mxu0 %v10197_v51  ;;  %7634 = vmatprep.subr.bf16.mxu1 %v10200_v52  ;;  %v12439_v50 = vld [vmem:[%s14832_s0 + $0xa8] sm:$0xff]  ;;  %v8481_v51 = vcombine.low %v52_v37, %v68_v38  ;;  %v10279_v52 = vld [vmem:[%s14831_s1 + $0xa40] ss:$16 sps:$4 sm:$0xff]  }
 0x111   :  { %v10351_v37 = vld [vmem:[%s14831_s1 + $0xbc0] ss:$16 sps:$4 sm:$0xff]   ;;  %v10354_v38 = vld [vmem:[%s14831_s1 + $0xbc8] ss:$16 sps:$4 sm:$0xff]  }
 0x113   :  { %6787 = vmatpush1.bf16.msra.mxu0 %v10195_v53  ;;  %7635 = vmatpush1.bf16.msra.mxu1 %v10198_v54  ;;  %v10282_v53 = vld [vmem:[%s14831_s1 + $0xa48] ss:$16 sps:$4 sm:$0xff]   ;;  %v10287_v54 = vld [vmem:[%s14831_s1 + $0xa64] ss:$16 sps:$4 sm:$0xff]  }
 0x114   :  { %6788 = vmatprep.subr.bf16.mxu0 %v10203_v55  ;;  %7636 = vmatprep.subr.bf16.mxu1 %v10206_v56  ;;  %v10290_v55 = vld [vmem:[%s14831_s1 + $0xa6c] ss:$16 sps:$4 sm:$0xff]   ;;  %v8452_v56 = vcombine.high %v12434_v49, %v12439_v50 }
 0x117   :  { %6789 = vmatpush1.bf16.msra.mxu0 %v10201_v57  ;;  %7637 = vmatpush1.bf16.msra.mxu1 %v10204_v58  ;;  %v10285_v57 = vld [vmem:[%s14831_s1 + $0xa60] ss:$16 sps:$4 sm:$0xff]   ;;  %v10288_v58 = vld [vmem:[%s14831_s1 + $0xa68] ss:$16 sps:$4 sm:$0xff]  }
 0x118   :  { %6790 = vmatprep.subr.bf16.mxu0 %v10209_v59  ;;  %7638 = vmatprep.subr.bf16.mxu1 %v10212_v60  ;;  %v10293_v59 = vld [vmem:[%s14831_s1 + $0xa84] ss:$16 sps:$4 sm:$0xff]   ;;  %v10296_v60 = vld [vmem:[%s14831_s1 + $0xa8c] ss:$16 sps:$4 sm:$0xff]  }
 0x11b   :  { %6791 = vmatpush1.bf16.msra.mxu0 %v10207_v61  ;;  %7639 = vmatpush1.bf16.msra.mxu1 %v10210_v62  ;;  %v10291_v61 = vld [vmem:[%s14831_s1 + $0xa80] ss:$16 sps:$4 sm:$0xff]   ;;  %v10294_v62 = vld [vmem:[%s14831_s1 + $0xa88] ss:$16 sps:$4 sm:$0xff]  }
 0x11c   :  { %6792 = vmatprep.subr.bf16.mxu0 %v10215_v63  ;;  %7640 = vmatprep.subr.bf16.mxu1 %v10218_v0  ;;  %v10299_v63 = vld [vmem:[%s14831_s1 + $0xaa4] ss:$16 sps:$4 sm:$0xff]   ;;  %v10302_v0 = vld [vmem:[%s14831_s1 + $0xaac] ss:$16 sps:$4 sm:$0xff]  }
 0x11f   :  { %6793 = vmatpush1.bf16.msra.mxu0 %v10213_v1  ;;  %7641 = vmatpush1.bf16.msra.mxu1 %v10216_v2  ;;  %v10297_v1 = vld [vmem:[%s14831_s1 + $0xaa0] ss:$16 sps:$4 sm:$0xff]   ;;  %v10300_v2 = vld [vmem:[%s14831_s1 + $0xaa8] ss:$16 sps:$4 sm:$0xff]  }
 0x120   :  { %6794 = vmatprep.subr.bf16.mxu0 %v10221_v3  ;;  %7642 = vmatprep.subr.bf16.mxu1 %v10224_v4  ;;  %v10305_v3 = vld [vmem:[%s14831_s1 + $0xac4] ss:$16 sps:$4 sm:$0xff]   ;;  %v10308_v4 = vld [vmem:[%s14831_s1 + $0xacc] ss:$16 sps:$4 sm:$0xff]  }
 0x123   :  { %6795 = vmatpush1.bf16.msra.mxu0 %v10219_v5  ;;  %7643 = vmatpush1.bf16.msra.mxu1 %v10222_v6  ;;  %v10303_v5 = vld [vmem:[%s14831_s1 + $0xac0] ss:$16 sps:$4 sm:$0xff]   ;;  %v10306_v6 = vld [vmem:[%s14831_s1 + $0xac8] ss:$16 sps:$4 sm:$0xff]  }
 0x124   :  { %6796 = vmatprep.subr.bf16.mxu0 %v10227_v7  ;;  %7644 = vmatprep.subr.bf16.mxu1 %v10230_v8  ;;  %v10311_v7 = vld [vmem:[%s14831_s1 + $0xae4] ss:$16 sps:$4 sm:$0xff]   ;;  %v10314_v8 = vld [vmem:[%s14831_s1 + $0xaec] ss:$16 sps:$4 sm:$0xff]  }
 0x127   :  { %6797 = vmatpush1.bf16.msra.mxu0 %v10225_v9  ;;  %7645 = vmatpush1.bf16.msra.mxu1 %v10228_v10  ;;  %v10309_v9 = vld [vmem:[%s14831_s1 + $0xae0] ss:$16 sps:$4 sm:$0xff]   ;;  %v10312_v10 = vld [vmem:[%s14831_s1 + $0xae8] ss:$16 sps:$4 sm:$0xff]  }
 0x128   :  { %6798 = vmatprep.subr.bf16.mxu0 %v10233_v11  ;;  %7646 = vmatprep.subr.bf16.mxu1 %v10236_v12  ;;  %v10317_v11 = vld [vmem:[%s14831_s1 + $0xb04] ss:$16 sps:$4 sm:$0xff]   ;;  %v10320_v12 = vld [vmem:[%s14831_s1 + $0xb0c] ss:$16 sps:$4 sm:$0xff]  }
 0x12b   :  { %6799 = vmatpush1.bf16.msra.mxu0 %v10231_v13  ;;  %7647 = vmatpush1.bf16.msra.mxu1 %v10234_v14  ;;  %v10315_v13 = vld [vmem:[%s14831_s1 + $0xb00] ss:$16 sps:$4 sm:$0xff]   ;;  %v10318_v14 = vld [vmem:[%s14831_s1 + $0xb08] ss:$16 sps:$4 sm:$0xff]  }
 0x12c   :  { %6800 = vmatprep.subr.bf16.mxu0 %v10239_v15  ;;  %7648 = vmatprep.subr.bf16.mxu1 %v10242_v16  ;;  %v10323_v15 = vld [vmem:[%s14831_s1 + $0xb24] ss:$16 sps:$4 sm:$0xff]   ;;  %v10326_v16 = vld [vmem:[%s14831_s1 + $0xb2c] ss:$16 sps:$4 sm:$0xff]  }
 0x12f   :  { %6801 = vmatpush1.bf16.msra.mxu0 %v10237_v17  ;;  %7649 = vmatpush1.bf16.msra.mxu1 %v10240_v18  ;;  %v10321_v17 = vld [vmem:[%s14831_s1 + $0xb20] ss:$16 sps:$4 sm:$0xff]   ;;  %v10324_v18 = vld [vmem:[%s14831_s1 + $0xb28] ss:$16 sps:$4 sm:$0xff]  }
 0x130   :  { %6802 = vmatprep.subr.bf16.mxu0 %v10245_v19  ;;  %7650 = vmatprep.subr.bf16.mxu1 %v10248_v20  ;;  %v10329_v19 = vld [vmem:[%s14831_s1 + $0xb44] ss:$16 sps:$4 sm:$0xff]   ;;  %v10332_v20 = vld [vmem:[%s14831_s1 + $0xb4c] ss:$16 sps:$4 sm:$0xff]  }
 0x133   :  { %6803 = vmatpush1.bf16.msra.mxu0 %v10243_v21  ;;  %7651 = vmatpush1.bf16.msra.mxu1 %v10246_v22  ;;  %v10327_v21 = vld [vmem:[%s14831_s1 + $0xb40] ss:$16 sps:$4 sm:$0xff]   ;;  %v10330_v22 = vld [vmem:[%s14831_s1 + $0xb48] ss:$16 sps:$4 sm:$0xff]  }
 0x134   :  { %6804 = vmatprep.subr.bf16.mxu0 %v10251_v23  ;;  %7652 = vmatprep.subr.bf16.mxu1 %v10254_v24  ;;  %v10335_v23 = vld [vmem:[%s14831_s1 + $0xb64] ss:$16 sps:$4 sm:$0xff]   ;;  %v10338_v24 = vld [vmem:[%s14831_s1 + $0xb6c] ss:$16 sps:$4 sm:$0xff]  }
 0x137   :  { %6805 = vmatpush1.bf16.msra.mxu0 %v10249_v26  ;;  %7653 = vmatpush1.bf16.msra.mxu1 %v10252_v25  ;;  %v10333_v26 = vld [vmem:[%s14831_s1 + $0xb60] ss:$16 sps:$4 sm:$0xff]   ;;  %v10336_v25 = vld [vmem:[%s14831_s1 + $0xb68] ss:$16 sps:$4 sm:$0xff]  }
 0x138   :  { %6806 = vmatprep.subr.bf16.mxu0 %v10257_v27  ;;  %7654 = vmatprep.subr.bf16.mxu1 %v10260_v28  ;;  %v10341_v27 = vld [vmem:[%s14831_s1 + $0xb84] ss:$16 sps:$4 sm:$0xff]   ;;  %v10344_v28 = vld [vmem:[%s14831_s1 + $0xb8c] ss:$16 sps:$4 sm:$0xff]  }
 0x13b   :  { %6807 = vmatpush1.bf16.msra.mxu0 %v10255_v29  ;;  %7655 = vmatpush1.bf16.msra.mxu1 %v10258_v30  ;;  %v10339_v29 = vld [vmem:[%s14831_s1 + $0xb80] ss:$16 sps:$4 sm:$0xff]   ;;  %v10342_v30 = vld [vmem:[%s14831_s1 + $0xb88] ss:$16 sps:$4 sm:$0xff]  }
 0x13c   :  { %6808 = vmatprep.subr.bf16.mxu0 %v10263_v31  ;;  %7656 = vmatprep.subr.bf16.mxu1 %v10266_v32  ;;  %v10347_v31 = vld [vmem:[%s14831_s1 + $0xba4] ss:$16 sps:$4 sm:$0xff]   ;;  %v10350_v32 = vld [vmem:[%s14831_s1 + $0xbac] ss:$16 sps:$4 sm:$0xff]  }
 0x13f   :  { %6809 = vmatpush1.bf16.msra.mxu0 %v10261_v34  ;;  %7657 = vmatpush1.bf16.msra.mxu1 %v10264_v36  ;;  %v10345_v34 = vld [vmem:[%s14831_s1 + $0xba0] ss:$16 sps:$4 sm:$0xff]   ;;  %v10348_v36 = vld [vmem:[%s14831_s1 + $0xba8] ss:$16 sps:$4 sm:$0xff]  }
 0x140   :  { %6831 = vmatprep.subr.bf16.mxu0 %v10269_v33  ;;  %7679 = vmatprep.subr.bf16.mxu1 %v10272_v35  ;;  %v10353_v33 = vld [vmem:[%s14831_s1 + $0xbc4] ss:$16 sps:$4 sm:$0xff]   ;;  %v10356_v35 = vld [vmem:[%s14831_s1 + $0xbcc] ss:$16 sps:$4 sm:$0xff]  }
 0x142   :  { %6811 = vmatmul.mubr.bf16.vlgmr.msra.gmra.mrb[0].mxu0 %v8449_v39  ;;  %7659 = vmatmul.mubr.bf16.vlgmr.msra.gmra.mrb[0].mxu1 %v8449_v39  ;;  %v10359_v39 = vld [vmem:[%s14831_s1 + $0xbe4] ss:$16 sps:$4 sm:$0xff]  }
 0x143   :  { %6832 = vmatpush1.bf16.msra.mxu0 %v10267_v40  ;;  %7680 = vmatpush1.bf16.msra.mxu1 %v10270_v42  ;;  %v10362_v40 = vld [vmem:[%s14831_s1 + $0xbec] ss:$16 sps:$4 sm:$0xff]   ;;  %v10357_v42 = vld [vmem:[%s14831_s1 + $0xbe0] ss:$16 sps:$4 sm:$0xff]  }
 0x144   :  { %6833 = vmatprep.subr.bf16.mxu0 %v10275_v44  ;;  %7681 = vmatprep.subr.bf16.mxu1 %v10278_v41  ;;  %v10360_v44 = vld [vmem:[%s14831_s1 + $0xbe8] ss:$16 sps:$4 sm:$0xff]   ;;  %v10365_v41 = vld [vmem:[%s14831_s1 + $0xc04] ss:$16 sps:$4 sm:$0xff]  }
 0x145   :  { %6820 = vmatprep.mubr.bf16.mxu0 %v8482_v46  ;;  %7668 = vmatprep.mubr.bf16.mxu1 %v8482_v46  ;;  %v69_v46 = vld [vmem:[%s14832_s0 + $0x1a8] sm:$0xff] }
 0x147   :  { %6834 = vmatpush1.bf16.msra.mxu0 %v10273_v43  ;;  %7682 = vmatpush1.bf16.msra.mxu1 %v10276_v45  ;;  %v10368_v43 = vld [vmem:[%s14831_s1 + $0xc0c] ss:$16 sps:$4 sm:$0xff]  }
 0x148   :  { %6835 = vmatprep.subr.bf16.mxu0 %v10281_v47  ;;  %7683 = vmatprep.subr.bf16.mxu1 %v10284_v48  ;;  %v53_v45 = vld [vmem:[%s14832_s0 + $0x128] sm:$0xff]  ;;  %v8451_v47 = vcombine.low %v12434_v49, %v12439_v50  ;;  %v10363_v48 = vld [vmem:[%s14831_s1 + $0xc00] ss:$16 sps:$4 sm:$0xff]  }
 0x149   :  { %v10374_v49 = vld [vmem:[%s14831_s1 + $0xc2c] ss:$16 sps:$4 sm:$0xff]   ;;  %v10369_v50 = vld [vmem:[%s14831_s1 + $0xc20] ss:$16 sps:$4 sm:$0xff]  }
 0x14a   :  { %6821 = vmatmul.mubr.bf16.gmra.mrb[4].mxu0 %v8481_v51  ;;  %7669 = vmatmul.mubr.bf16.gmra.mrb[4].mxu1 %v8481_v51  ;;  %v10366_v51 = vld [vmem:[%s14831_s1 + $0xc08] ss:$16 sps:$4 sm:$0xff]  }
 0x14b   :  { %6836 = vmatpush1.bf16.msra.mxu0 %v10279_v52  ;;  %7684 = vmatpush1.bf16.msra.mxu1 %v10282_v53  ;;  %v10371_v52 = vld [vmem:[%s14831_s1 + $0xc24] ss:$16 sps:$4 sm:$0xff]   ;;  %v10372_v53 = vld [vmem:[%s14831_s1 + $0xc28] ss:$16 sps:$4 sm:$0xff]  }
 0x14c   :  { %6837 = vmatprep.subr.bf16.mxu0 %v10287_v54  ;;  %7685 = vmatprep.subr.bf16.mxu1 %v10290_v55  ;;  %v8484_v54 = vcombine.high %v53_v45, %v69_v46  ;;  %v10377_v55 = vld [vmem:[%s14831_s1 + $0xc44] ss:$16 sps:$4 sm:$0xff]  }
 0x14d   :  { %6863 = vmatprep.mubr.bf16.mxu0 %v8452_v56  ;;  %7711 = vmatprep.mubr.bf16.mxu1 %v8452_v56  ;;  %v10380_v56 = vld [vmem:[%s14831_s1 + $0xc4c] ss:$16 sps:$4 sm:$0xff]  }
 0x14f   :  { %6838 = vmatpush1.bf16.msra.mxu0 %v10285_v57  ;;  %7686 = vmatpush1.bf16.msra.mxu1 %v10288_v58  ;;  %v12646_v57 = vld [vmem:[%s14832_s0 + $0x30] sm:$0xff] }
 0x150   :  { %6839 = vmatprep.subr.bf16.mxu0 %v10293_v59  ;;  %7687 = vmatprep.subr.bf16.mxu1 %v10296_v60  ;;  %v12651_v58 = vld [vmem:[%s14832_s0 + $0xb0] sm:$0xff]  ;;  %v8483_v59 = vcombine.low %v53_v45, %v69_v46  ;;  %v10450_v46 = vld [vmem:[%s14831_s1 + $0xdc8] ss:$16 sps:$4 sm:$0xff]  }
 0x151   :  { %v10375_v60 = vld [vmem:[%s14831_s1 + $0xc40] ss:$16 sps:$4 sm:$0xff]  }
 0x152   :  { %v10447_v45 = vld [vmem:[%s14831_s1 + $0xdc0] ss:$16 sps:$4 sm:$0xff]  }
 0x153   :  { %6840 = vmatpush1.bf16.msra.mxu0 %v10291_v61  ;;  %7688 = vmatpush1.bf16.msra.mxu1 %v10294_v62  ;;  %v10378_v61 = vld [vmem:[%s14831_s1 + $0xc48] ss:$16 sps:$4 sm:$0xff]   ;;  %v10383_v62 = vld [vmem:[%s14831_s1 + $0xc64] ss:$16 sps:$4 sm:$0xff]  }
 0x154   :  { %6841 = vmatprep.subr.bf16.mxu0 %v10299_v63  ;;  %7689 = vmatprep.subr.bf16.mxu1 %v10302_v0  ;;  %v10386_v63 = vld [vmem:[%s14831_s1 + $0xc6c] ss:$16 sps:$4 sm:$0xff]   ;;  %v8454_v0 = vcombine.high %v12646_v57, %v12651_v58 }
 0x157   :  { %6842 = vmatpush1.bf16.msra.mxu0 %v10297_v1  ;;  %7690 = vmatpush1.bf16.msra.mxu1 %v10300_v2  ;;  %v10381_v1 = vld [vmem:[%s14831_s1 + $0xc60] ss:$16 sps:$4 sm:$0xff]   ;;  %v10384_v2 = vld [vmem:[%s14831_s1 + $0xc68] ss:$16 sps:$4 sm:$0xff]  }
 0x158   :  { %6843 = vmatprep.subr.bf16.mxu0 %v10305_v3  ;;  %7691 = vmatprep.subr.bf16.mxu1 %v10308_v4  ;;  %v10389_v3 = vld [vmem:[%s14831_s1 + $0xc84] ss:$16 sps:$4 sm:$0xff]   ;;  %v10392_v4 = vld [vmem:[%s14831_s1 + $0xc8c] ss:$16 sps:$4 sm:$0xff]  }
 0x15b   :  { %6844 = vmatpush1.bf16.msra.mxu0 %v10303_v5  ;;  %7692 = vmatpush1.bf16.msra.mxu1 %v10306_v6  ;;  %v10387_v5 = vld [vmem:[%s14831_s1 + $0xc80] ss:$16 sps:$4 sm:$0xff]   ;;  %v10390_v6 = vld [vmem:[%s14831_s1 + $0xc88] ss:$16 sps:$4 sm:$0xff]  }
 0x15c   :  { %6845 = vmatprep.subr.bf16.mxu0 %v10311_v7  ;;  %7693 = vmatprep.subr.bf16.mxu1 %v10314_v8  ;;  %v10395_v7 = vld [vmem:[%s14831_s1 + $0xca4] ss:$16 sps:$4 sm:$0xff]   ;;  %v10398_v8 = vld [vmem:[%s14831_s1 + $0xcac] ss:$16 sps:$4 sm:$0xff]  }
 0x15f   :  { %6846 = vmatpush1.bf16.msra.mxu0 %v10309_v9  ;;  %7694 = vmatpush1.bf16.msra.mxu1 %v10312_v10  ;;  %v10393_v9 = vld [vmem:[%s14831_s1 + $0xca0] ss:$16 sps:$4 sm:$0xff]   ;;  %v10396_v10 = vld [vmem:[%s14831_s1 + $0xca8] ss:$16 sps:$4 sm:$0xff]  }
 0x160   :  { %6847 = vmatprep.subr.bf16.mxu0 %v10317_v11  ;;  %7695 = vmatprep.subr.bf16.mxu1 %v10320_v12  ;;  %v10401_v11 = vld [vmem:[%s14831_s1 + $0xcc4] ss:$16 sps:$4 sm:$0xff]   ;;  %v10404_v12 = vld [vmem:[%s14831_s1 + $0xccc] ss:$16 sps:$4 sm:$0xff]  }
 0x163   :  { %6848 = vmatpush1.bf16.msra.mxu0 %v10315_v13  ;;  %7696 = vmatpush1.bf16.msra.mxu1 %v10318_v14  ;;  %v10399_v13 = vld [vmem:[%s14831_s1 + $0xcc0] ss:$16 sps:$4 sm:$0xff]   ;;  %v10402_v14 = vld [vmem:[%s14831_s1 + $0xcc8] ss:$16 sps:$4 sm:$0xff]  }
 0x164   :  { %6849 = vmatprep.subr.bf16.mxu0 %v10323_v15  ;;  %7697 = vmatprep.subr.bf16.mxu1 %v10326_v16  ;;  %v10407_v15 = vld [vmem:[%s14831_s1 + $0xce4] ss:$16 sps:$4 sm:$0xff]   ;;  %v10410_v16 = vld [vmem:[%s14831_s1 + $0xcec] ss:$16 sps:$4 sm:$0xff]  }
 0x167   :  { %6850 = vmatpush1.bf16.msra.mxu0 %v10321_v17  ;;  %7698 = vmatpush1.bf16.msra.mxu1 %v10324_v18  ;;  %v10405_v17 = vld [vmem:[%s14831_s1 + $0xce0] ss:$16 sps:$4 sm:$0xff]   ;;  %v10408_v18 = vld [vmem:[%s14831_s1 + $0xce8] ss:$16 sps:$4 sm:$0xff]  }
 0x168   :  { %6851 = vmatprep.subr.bf16.mxu0 %v10329_v19  ;;  %7699 = vmatprep.subr.bf16.mxu1 %v10332_v20  ;;  %v10413_v19 = vld [vmem:[%s14831_s1 + $0xd04] ss:$16 sps:$4 sm:$0xff]   ;;  %v10416_v20 = vld [vmem:[%s14831_s1 + $0xd0c] ss:$16 sps:$4 sm:$0xff]  }
 0x16b   :  { %6852 = vmatpush1.bf16.msra.mxu0 %v10327_v21  ;;  %7700 = vmatpush1.bf16.msra.mxu1 %v10330_v22  ;;  %v10411_v21 = vld [vmem:[%s14831_s1 + $0xd00] ss:$16 sps:$4 sm:$0xff]   ;;  %v10414_v22 = vld [vmem:[%s14831_s1 + $0xd08] ss:$16 sps:$4 sm:$0xff]  }
 0x16c   :  { %6853 = vmatprep.subr.bf16.mxu0 %v10335_v23  ;;  %7701 = vmatprep.subr.bf16.mxu1 %v10338_v24  ;;  %v10419_v23 = vld [vmem:[%s14831_s1 + $0xd24] ss:$16 sps:$4 sm:$0xff]   ;;  %v10422_v24 = vld [vmem:[%s14831_s1 + $0xd2c] ss:$16 sps:$4 sm:$0xff]  }
 0x16f   :  { %6854 = vmatpush1.bf16.msra.mxu0 %v10333_v26  ;;  %7702 = vmatpush1.bf16.msra.mxu1 %v10336_v25  ;;  %v10417_v26 = vld [vmem:[%s14831_s1 + $0xd20] ss:$16 sps:$4 sm:$0xff]   ;;  %v10420_v25 = vld [vmem:[%s14831_s1 + $0xd28] ss:$16 sps:$4 sm:$0xff]  }
 0x170   :  { %6855 = vmatprep.subr.bf16.mxu0 %v10341_v27  ;;  %7703 = vmatprep.subr.bf16.mxu1 %v10344_v28  ;;  %v10425_v27 = vld [vmem:[%s14831_s1 + $0xd44] ss:$16 sps:$4 sm:$0xff]   ;;  %v10428_v28 = vld [vmem:[%s14831_s1 + $0xd4c] ss:$16 sps:$4 sm:$0xff]  }
 0x173   :  { %6856 = vmatpush1.bf16.msra.mxu0 %v10339_v29  ;;  %7704 = vmatpush1.bf16.msra.mxu1 %v10342_v30  ;;  %v10423_v29 = vld [vmem:[%s14831_s1 + $0xd40] ss:$16 sps:$4 sm:$0xff]   ;;  %v10426_v30 = vld [vmem:[%s14831_s1 + $0xd48] ss:$16 sps:$4 sm:$0xff]  }
 0x174   :  { %6857 = vmatprep.subr.bf16.mxu0 %v10347_v31  ;;  %7705 = vmatprep.subr.bf16.mxu1 %v10350_v32  ;;  %v10431_v31 = vld [vmem:[%s14831_s1 + $0xd64] ss:$16 sps:$4 sm:$0xff]   ;;  %v10434_v32 = vld [vmem:[%s14831_s1 + $0xd6c] ss:$16 sps:$4 sm:$0xff]  }
 0x177   :  { %6858 = vmatpush1.bf16.msra.mxu0 %v10345_v34  ;;  %7706 = vmatpush1.bf16.msra.mxu1 %v10348_v36  ;;  %v10429_v34 = vld [vmem:[%s14831_s1 + $0xd60] ss:$16 sps:$4 sm:$0xff]   ;;  %v10432_v36 = vld [vmem:[%s14831_s1 + $0xd68] ss:$16 sps:$4 sm:$0xff]  }
 0x178   :  { %6859 = vmatprep.subr.bf16.mxu0 %v10353_v33  ;;  %7707 = vmatprep.subr.bf16.mxu1 %v10356_v35  ;;  %v10437_v33 = vld [vmem:[%s14831_s1 + $0xd84] ss:$16 sps:$4 sm:$0xff]   ;;  %v10440_v35 = vld [vmem:[%s14831_s1 + $0xd8c] ss:$16 sps:$4 sm:$0xff]  }
 0x17b   :  { %6860 = vmatpush1.bf16.msra.mxu0 %v10351_v37  ;;  %7708 = vmatpush1.bf16.msra.mxu1 %v10354_v38  ;;  %v10435_v37 = vld [vmem:[%s14831_s1 + $0xd80] ss:$16 sps:$4 sm:$0xff]   ;;  %v10438_v38 = vld [vmem:[%s14831_s1 + $0xd88] ss:$16 sps:$4 sm:$0xff]  }
 0x17c   :  { %6861 = vmatprep.subr.bf16.mxu0 %v10359_v39  ;;  %7709 = vmatprep.subr.bf16.mxu1 %v10362_v40  ;;  %v10443_v39 = vld [vmem:[%s14831_s1 + $0xda4] ss:$16 sps:$4 sm:$0xff]   ;;  %v10446_v40 = vld [vmem:[%s14831_s1 + $0xdac] ss:$16 sps:$4 sm:$0xff]  }
 0x17f   :  { %6862 = vmatpush1.bf16.msra.mxu0 %v10357_v42  ;;  %7710 = vmatpush1.bf16.msra.mxu1 %v10360_v44  ;;  %v10441_v42 = vld [vmem:[%s14831_s1 + $0xda0] ss:$16 sps:$4 sm:$0xff]   ;;  %v10444_v44 = vld [vmem:[%s14831_s1 + $0xda8] ss:$16 sps:$4 sm:$0xff]  }
 0x180   :  { %6884 = vmatprep.subr.bf16.mxu0 %v10365_v41  ;;  %7732 = vmatprep.subr.bf16.mxu1 %v10368_v43  ;;  %v10449_v41 = vld [vmem:[%s14831_s1 + $0xdc4] ss:$16 sps:$4 sm:$0xff]   ;;  %v10452_v43 = vld [vmem:[%s14831_s1 + $0xdcc] ss:$16 sps:$4 sm:$0xff]  }
 0x182   :  { %6864 = vmatmul.mubr.bf16.vlgmr.msra.gmra.mrb[0].mxu0 %v8451_v47  ;;  %7712 = vmatmul.mubr.bf16.vlgmr.msra.gmra.mrb[0].mxu1 %v8451_v47  ;;  %v10455_v47 = vld [vmem:[%s14831_s1 + $0xde4] ss:$16 sps:$4 sm:$0xff]  }
 0x183   :  { %6885 = vmatpush1.bf16.msra.mxu0 %v10363_v48  ;;  %7733 = vmatpush1.bf16.msra.mxu1 %v10366_v51  ;;  %v10458_v48 = vld [vmem:[%s14831_s1 + $0xdec] ss:$16 sps:$4 sm:$0xff]   ;;  %v10453_v51 = vld [vmem:[%s14831_s1 + $0xde0] ss:$16 sps:$4 sm:$0xff]  }
 0x184   :  { %6886 = vmatprep.subr.bf16.mxu0 %v10371_v52  ;;  %7734 = vmatprep.subr.bf16.mxu1 %v10374_v49  ;;  %v10456_v52 = vld [vmem:[%s14831_s1 + $0xde8] ss:$16 sps:$4 sm:$0xff]   ;;  %v10461_v49 = vld [vmem:[%s14831_s1 + $0xe04] ss:$16 sps:$4 sm:$0xff]  }
 0x185   :  { %6873 = vmatprep.mubr.bf16.mxu0 %v8484_v54  ;;  %7721 = vmatprep.mubr.bf16.mxu1 %v8484_v54  ;;  %v70_v54 = vld [vmem:[%s14832_s0 + $0x1b0] sm:$0xff] }
 0x187   :  { %6887 = vmatpush1.bf16.msra.mxu0 %v10369_v50  ;;  %7735 = vmatpush1.bf16.msra.mxu1 %v10372_v53  ;;  %v10464_v50 = vld [vmem:[%s14831_s1 + $0xe0c] ss:$16 sps:$4 sm:$0xff]   ;;  %v54_v53 = vld [vmem:[%s14832_s0 + $0x130] sm:$0xff] }
 0x188   :  { %6888 = vmatprep.subr.bf16.mxu0 %v10377_v55  ;;  %7736 = vmatprep.subr.bf16.mxu1 %v10380_v56  ;;  %v8453_v55 = vcombine.low %v12646_v57, %v12651_v58  ;;  %v10459_v56 = vld [vmem:[%s14831_s1 + $0xe00] ss:$16 sps:$4 sm:$0xff]   ;;  %v10470_v57 = vld [vmem:[%s14831_s1 + $0xe2c] ss:$16 sps:$4 sm:$0xff]  }
 0x189   :  { %v10465_v58 = vld [vmem:[%s14831_s1 + $0xe20] ss:$16 sps:$4 sm:$0xff]  }
 0x18a   :  { %6874 = vmatmul.mubr.bf16.gmra.mrb[4].mxu0 %v8483_v59  ;;  %7722 = vmatmul.mubr.bf16.gmra.mrb[4].mxu1 %v8483_v59  ;;  %v10462_v59 = vld [vmem:[%s14831_s1 + $0xe08] ss:$16 sps:$4 sm:$0xff]  }
 0x18b   :  { %6889 = vmatpush1.bf16.msra.mxu0 %v10375_v60  ;;  %7737 = vmatpush1.bf16.msra.mxu1 %v10378_v61  ;;  %v10467_v60 = vld [vmem:[%s14831_s1 + $0xe24] ss:$16 sps:$4 sm:$0xff]   ;;  %v10468_v61 = vld [vmem:[%s14831_s1 + $0xe28] ss:$16 sps:$4 sm:$0xff]  }
 0x18c   :  { %6890 = vmatprep.subr.bf16.mxu0 %v10383_v62  ;;  %7738 = vmatprep.subr.bf16.mxu1 %v10386_v63  ;;  %v8486_v62 = vcombine.high %v54_v53, %v70_v54  ;;  %v10473_v63 = vld [vmem:[%s14831_s1 + $0xe44] ss:$16 sps:$4 sm:$0xff]  }
 0x18d   :  { %6916 = vmatprep.mubr.bf16.mxu0 %v8454_v0  ;;  %7764 = vmatprep.mubr.bf16.mxu1 %v8454_v0  ;;  %v10476_v0 = vld [vmem:[%s14831_s1 + $0xe4c] ss:$16 sps:$4 sm:$0xff]  }
 0x18f   :  { %6891 = vmatpush1.bf16.msra.mxu0 %v10381_v1  ;;  %7739 = vmatpush1.bf16.msra.mxu1 %v10384_v2  ;;  %v12858_v1 = vld [vmem:[%s14832_s0 + $0x38] sm:$0xff] }
 0x190   :  { %6892 = vmatprep.subr.bf16.mxu0 %v10389_v3  ;;  %7740 = vmatprep.subr.bf16.mxu1 %v10392_v4  ;;  %v12863_v2 = vld [vmem:[%s14832_s0 + $0xb8] sm:$0xff]  ;;  %v8485_v3 = vcombine.low %v54_v53, %v70_v54  ;;  %v10471_v4 = vld [vmem:[%s14831_s1 + $0xe40] ss:$16 sps:$4 sm:$0xff]  }
 0x191   :  { %v10543_v53 = vld [vmem:[%s14831_s1 + $0xfc0] ss:$16 sps:$4 sm:$0xff]   ;;  %v10546_v54 = vld [vmem:[%s14831_s1 + $0xfc8] ss:$16 sps:$4 sm:$0xff]  }
 0x193   :  { %6893 = vmatpush1.bf16.msra.mxu0 %v10387_v5  ;;  %7741 = vmatpush1.bf16.msra.mxu1 %v10390_v6  ;;  %v10474_v5 = vld [vmem:[%s14831_s1 + $0xe48] ss:$16 sps:$4 sm:$0xff]   ;;  %v10479_v6 = vld [vmem:[%s14831_s1 + $0xe64] ss:$16 sps:$4 sm:$0xff]  }
 0x194   :  { %6894 = vmatprep.subr.bf16.mxu0 %v10395_v7  ;;  %7742 = vmatprep.subr.bf16.mxu1 %v10398_v8  ;;  %v10482_v7 = vld [vmem:[%s14831_s1 + $0xe6c] ss:$16 sps:$4 sm:$0xff]   ;;  %v8456_v8 = vcombine.high %v12858_v1, %v12863_v2 }
 0x197   :  { %6895 = vmatpush1.bf16.msra.mxu0 %v10393_v9  ;;  %7743 = vmatpush1.bf16.msra.mxu1 %v10396_v10  ;;  %v10477_v9 = vld [vmem:[%s14831_s1 + $0xe60] ss:$16 sps:$4 sm:$0xff]   ;;  %v10480_v10 = vld [vmem:[%s14831_s1 + $0xe68] ss:$16 sps:$4 sm:$0xff]  }
 0x198   :  { %6896 = vmatprep.subr.bf16.mxu0 %v10401_v11  ;;  %7744 = vmatprep.subr.bf16.mxu1 %v10404_v12  ;;  %v10485_v11 = vld [vmem:[%s14831_s1 + $0xe84] ss:$16 sps:$4 sm:$0xff]   ;;  %v10488_v12 = vld [vmem:[%s14831_s1 + $0xe8c] ss:$16 sps:$4 sm:$0xff]  }
 0x19b   :  { %6897 = vmatpush1.bf16.msra.mxu0 %v10399_v13  ;;  %7745 = vmatpush1.bf16.msra.mxu1 %v10402_v14  ;;  %v10483_v13 = vld [vmem:[%s14831_s1 + $0xe80] ss:$16 sps:$4 sm:$0xff]   ;;  %v10486_v14 = vld [vmem:[%s14831_s1 + $0xe88] ss:$16 sps:$4 sm:$0xff]  }
 0x19c   :  { %6898 = vmatprep.subr.bf16.mxu0 %v10407_v15  ;;  %7746 = vmatprep.subr.bf16.mxu1 %v10410_v16  ;;  %v10491_v15 = vld [vmem:[%s14831_s1 + $0xea4] ss:$16 sps:$4 sm:$0xff]   ;;  %v10494_v16 = vld [vmem:[%s14831_s1 + $0xeac] ss:$16 sps:$4 sm:$0xff]  }
 0x19f   :  { %6899 = vmatpush1.bf16.msra.mxu0 %v10405_v17  ;;  %7747 = vmatpush1.bf16.msra.mxu1 %v10408_v18  ;;  %v10489_v17 = vld [vmem:[%s14831_s1 + $0xea0] ss:$16 sps:$4 sm:$0xff]   ;;  %v10492_v18 = vld [vmem:[%s14831_s1 + $0xea8] ss:$16 sps:$4 sm:$0xff]  }
 0x1a0   :  { %6900 = vmatprep.subr.bf16.mxu0 %v10413_v19  ;;  %7748 = vmatprep.subr.bf16.mxu1 %v10416_v20  ;;  %v10497_v19 = vld [vmem:[%s14831_s1 + $0xec4] ss:$16 sps:$4 sm:$0xff]   ;;  %v10500_v20 = vld [vmem:[%s14831_s1 + $0xecc] ss:$16 sps:$4 sm:$0xff]  }
 0x1a3   :  { %6901 = vmatpush1.bf16.msra.mxu0 %v10411_v21  ;;  %7749 = vmatpush1.bf16.msra.mxu1 %v10414_v22  ;;  %v10495_v21 = vld [vmem:[%s14831_s1 + $0xec0] ss:$16 sps:$4 sm:$0xff]   ;;  %v10498_v22 = vld [vmem:[%s14831_s1 + $0xec8] ss:$16 sps:$4 sm:$0xff]  }
 0x1a4   :  { %6902 = vmatprep.subr.bf16.mxu0 %v10419_v23  ;;  %7750 = vmatprep.subr.bf16.mxu1 %v10422_v24  ;;  %v10503_v23 = vld [vmem:[%s14831_s1 + $0xee4] ss:$16 sps:$4 sm:$0xff]   ;;  %v10506_v24 = vld [vmem:[%s14831_s1 + $0xeec] ss:$16 sps:$4 sm:$0xff]  }
 0x1a7   :  { %6903 = vmatpush1.bf16.msra.mxu0 %v10417_v26  ;;  %7751 = vmatpush1.bf16.msra.mxu1 %v10420_v25  ;;  %v10501_v26 = vld [vmem:[%s14831_s1 + $0xee0] ss:$16 sps:$4 sm:$0xff]   ;;  %v10504_v25 = vld [vmem:[%s14831_s1 + $0xee8] ss:$16 sps:$4 sm:$0xff]  }
 0x1a8   :  { %6904 = vmatprep.subr.bf16.mxu0 %v10425_v27  ;;  %7752 = vmatprep.subr.bf16.mxu1 %v10428_v28  ;;  %v10509_v27 = vld [vmem:[%s14831_s1 + $0xf04] ss:$16 sps:$4 sm:$0xff]   ;;  %v10512_v28 = vld [vmem:[%s14831_s1 + $0xf0c] ss:$16 sps:$4 sm:$0xff]  }
 0x1ab   :  { %6905 = vmatpush1.bf16.msra.mxu0 %v10423_v29  ;;  %7753 = vmatpush1.bf16.msra.mxu1 %v10426_v30  ;;  %v10507_v29 = vld [vmem:[%s14831_s1 + $0xf00] ss:$16 sps:$4 sm:$0xff]   ;;  %v10510_v30 = vld [vmem:[%s14831_s1 + $0xf08] ss:$16 sps:$4 sm:$0xff]  }
 0x1ac   :  { %6906 = vmatprep.subr.bf16.mxu0 %v10431_v31  ;;  %7754 = vmatprep.subr.bf16.mxu1 %v10434_v32  ;;  %v10515_v31 = vld [vmem:[%s14831_s1 + $0xf24] ss:$16 sps:$4 sm:$0xff]   ;;  %v10518_v32 = vld [vmem:[%s14831_s1 + $0xf2c] ss:$16 sps:$4 sm:$0xff]  }
 0x1af   :  { %6907 = vmatpush1.bf16.msra.mxu0 %v10429_v34  ;;  %7755 = vmatpush1.bf16.msra.mxu1 %v10432_v36  ;;  %v10513_v34 = vld [vmem:[%s14831_s1 + $0xf20] ss:$16 sps:$4 sm:$0xff]   ;;  %v10516_v36 = vld [vmem:[%s14831_s1 + $0xf28] ss:$16 sps:$4 sm:$0xff]  }
 0x1b0   :  { %6908 = vmatprep.subr.bf16.mxu0 %v10437_v33  ;;  %7756 = vmatprep.subr.bf16.mxu1 %v10440_v35  ;;  %v10521_v33 = vld [vmem:[%s14831_s1 + $0xf44] ss:$16 sps:$4 sm:$0xff]   ;;  %v10524_v35 = vld [vmem:[%s14831_s1 + $0xf4c] ss:$16 sps:$4 sm:$0xff]  }
 0x1b3   :  { %6909 = vmatpush1.bf16.msra.mxu0 %v10435_v37  ;;  %7757 = vmatpush1.bf16.msra.mxu1 %v10438_v38  ;;  %v10519_v37 = vld [vmem:[%s14831_s1 + $0xf40] ss:$16 sps:$4 sm:$0xff]   ;;  %v10522_v38 = vld [vmem:[%s14831_s1 + $0xf48] ss:$16 sps:$4 sm:$0xff]  }
 0x1b4   :  { %6910 = vmatprep.subr.bf16.mxu0 %v10443_v39  ;;  %7758 = vmatprep.subr.bf16.mxu1 %v10446_v40  ;;  %v10527_v39 = vld [vmem:[%s14831_s1 + $0xf64] ss:$16 sps:$4 sm:$0xff]   ;;  %v10530_v40 = vld [vmem:[%s14831_s1 + $0xf6c] ss:$16 sps:$4 sm:$0xff]  }
 0x1b7   :  { %6911 = vmatpush1.bf16.msra.mxu0 %v10441_v42  ;;  %7759 = vmatpush1.bf16.msra.mxu1 %v10444_v44  ;;  %v10525_v42 = vld [vmem:[%s14831_s1 + $0xf60] ss:$16 sps:$4 sm:$0xff]   ;;  %v10528_v44 = vld [vmem:[%s14831_s1 + $0xf68] ss:$16 sps:$4 sm:$0xff]  }
 0x1b8   :  { %6912 = vmatprep.subr.bf16.mxu0 %v10449_v41  ;;  %7760 = vmatprep.subr.bf16.mxu1 %v10452_v43  ;;  %v10533_v41 = vld [vmem:[%s14831_s1 + $0xf84] ss:$16 sps:$4 sm:$0xff]   ;;  %v10536_v43 = vld [vmem:[%s14831_s1 + $0xf8c] ss:$16 sps:$4 sm:$0xff]  }
 0x1bb   :  { %6913 = vmatpush1.bf16.msra.mxu0 %v10447_v45  ;;  %7761 = vmatpush1.bf16.msra.mxu1 %v10450_v46  ;;  %v10531_v45 = vld [vmem:[%s14831_s1 + $0xf80] ss:$16 sps:$4 sm:$0xff]   ;;  %v10534_v46 = vld [vmem:[%s14831_s1 + $0xf88] ss:$16 sps:$4 sm:$0xff]  }
 0x1bc   :  { %6914 = vmatprep.subr.bf16.mxu0 %v10455_v47  ;;  %7762 = vmatprep.subr.bf16.mxu1 %v10458_v48  ;;  %v10539_v47 = vld [vmem:[%s14831_s1 + $0xfa4] ss:$16 sps:$4 sm:$0xff]   ;;  %v10542_v48 = vld [vmem:[%s14831_s1 + $0xfac] ss:$16 sps:$4 sm:$0xff]  }
 0x1bf   :  { %6915 = vmatpush1.bf16.msra.mxu0 %v10453_v51  ;;  %7763 = vmatpush1.bf16.msra.mxu1 %v10456_v52  ;;  %v10537_v51 = vld [vmem:[%s14831_s1 + $0xfa0] ss:$16 sps:$4 sm:$0xff]   ;;  %v10540_v52 = vld [vmem:[%s14831_s1 + $0xfa8] ss:$16 sps:$4 sm:$0xff]  }
 0x1c0   :  { %6937 = vmatprep.subr.bf16.mxu0 %v10461_v49  ;;  %7785 = vmatprep.subr.bf16.mxu1 %v10464_v50  ;;  %v10545_v49 = vld [vmem:[%s14831_s1 + $0xfc4] ss:$16 sps:$4 sm:$0xff]   ;;  %v10548_v50 = vld [vmem:[%s14831_s1 + $0xfcc] ss:$16 sps:$4 sm:$0xff]  }
 0x1c2   :  { %6917 = vmatmul.mubr.bf16.vlgmr.msra.gmra.mrb[0].mxu0 %v8453_v55  ;;  %7765 = vmatmul.mubr.bf16.vlgmr.msra.gmra.mrb[0].mxu1 %v8453_v55  ;;  %v10551_v55 = vld [vmem:[%s14831_s1 + $0xfe4] ss:$16 sps:$4 sm:$0xff]  }
 0x1c3   :  { %6938 = vmatpush1.bf16.msra.mxu0 %v10459_v56  ;;  %7786 = vmatpush1.bf16.msra.mxu1 %v10462_v59  ;;  %v10554_v56 = vld [vmem:[%s14831_s1 + $0xfec] ss:$16 sps:$4 sm:$0xff]   ;;  %v10549_v59 = vld [vmem:[%s14831_s1 + $0xfe0] ss:$16 sps:$4 sm:$0xff]  }
 0x1c4   :  { %6939 = vmatprep.subr.bf16.mxu0 %v10467_v60  ;;  %7787 = vmatprep.subr.bf16.mxu1 %v10470_v57  ;;  %v10552_v60 = vld [vmem:[%s14831_s1 + $0xfe8] ss:$16 sps:$4 sm:$0xff]   ;;  %v10557_v57 = vld [vmem:[%s14831_s1 + $0x1004] ss:$16 sps:$4 sm:$0xff]  }
 0x1c5   :  { %6926 = vmatprep.mubr.bf16.mxu0 %v8486_v62  ;;  %7774 = vmatprep.mubr.bf16.mxu1 %v8486_v62  ;;  %v71_v62 = vld [vmem:[%s14832_s0 + $0x1b8] sm:$0xff] }
 0x1c7   :  { %6940 = vmatpush1.bf16.msra.mxu0 %v10465_v58  ;;  %7788 = vmatpush1.bf16.msra.mxu1 %v10468_v61  ;;  %v10560_v58 = vld [vmem:[%s14831_s1 + $0x100c] ss:$16 sps:$4 sm:$0xff]  }
 0x1c8   :  { %6941 = vmatprep.subr.bf16.mxu0 %v10473_v63  ;;  %7789 = vmatprep.subr.bf16.mxu1 %v10476_v0  ;;  %v55_v61 = vld [vmem:[%s14832_s0 + $0x138] sm:$0xff]  ;;  %v8455_v63 = vcombine.low %v12858_v1, %v12863_v2  ;;  %v10555_v0 = vld [vmem:[%s14831_s1 + $0x1000] ss:$16 sps:$4 sm:$0xff]  }
 0x1c9   :  { %v10566_v1 = vld [vmem:[%s14831_s1 + $0x102c] ss:$16 sps:$4 sm:$0xff]   ;;  %v10561_v2 = vld [vmem:[%s14831_s1 + $0x1020] ss:$16 sps:$4 sm:$0xff]  }
 0x1ca   :  { %6927 = vmatmul.mubr.bf16.gmra.mrb[4].mxu0 %v8485_v3  ;;  %7775 = vmatmul.mubr.bf16.gmra.mrb[4].mxu1 %v8485_v3  ;;  %v10558_v3 = vld [vmem:[%s14831_s1 + $0x1008] ss:$16 sps:$4 sm:$0xff]  }
 0x1cb   :  { %6942 = vmatpush1.bf16.msra.mxu0 %v10471_v4  ;;  %7790 = vmatpush1.bf16.msra.mxu1 %v10474_v5  ;;  %v10563_v4 = vld [vmem:[%s14831_s1 + $0x1024] ss:$16 sps:$4 sm:$0xff]   ;;  %v10564_v5 = vld [vmem:[%s14831_s1 + $0x1028] ss:$16 sps:$4 sm:$0xff]  }
 0x1cc   :  { %6943 = vmatprep.subr.bf16.mxu0 %v10479_v6  ;;  %7791 = vmatprep.subr.bf16.mxu1 %v10482_v7  ;;  %v8488_v6 = vcombine.high %v55_v61, %v71_v62  ;;  %v10569_v7 = vld [vmem:[%s14831_s1 + $0x1044] ss:$16 sps:$4 sm:$0xff]  }
 0x1cd   :  { %6969 = vmatprep.mubr.bf16.mxu0 %v8456_v8  ;;  %7817 = vmatprep.mubr.bf16.mxu1 %v8456_v8  ;;  %v10572_v8 = vld [vmem:[%s14831_s1 + $0x104c] ss:$16 sps:$4 sm:$0xff]  }
 0x1cf   :  { %6944 = vmatpush1.bf16.msra.mxu0 %v10477_v9  ;;  %7792 = vmatpush1.bf16.msra.mxu1 %v10480_v10  ;;  %v13070_v9 = vld [vmem:[%s14832_s0 + $0x40] sm:$0xff] }
 0x1d0   :  { %6945 = vmatprep.subr.bf16.mxu0 %v10485_v11  ;;  %7793 = vmatprep.subr.bf16.mxu1 %v10488_v12  ;;  %v13075_v10 = vld [vmem:[%s14832_s0 + $0xc0] sm:$0xff]  ;;  %v8487_v11 = vcombine.low %v55_v61, %v71_v62  ;;  %v10642_v62 = vld [vmem:[%s14831_s1 + $0x11c8] ss:$16 sps:$4 sm:$0xff]  }
 0x1d1   :  { %v10567_v12 = vld [vmem:[%s14831_s1 + $0x1040] ss:$16 sps:$4 sm:$0xff]  }
 0x1d2   :  { %v10639_v61 = vld [vmem:[%s14831_s1 + $0x11c0] ss:$16 sps:$4 sm:$0xff]  }
 0x1d3   :  { %6946 = vmatpush1.bf16.msra.mxu0 %v10483_v13  ;;  %7794 = vmatpush1.bf16.msra.mxu1 %v10486_v14  ;;  %v10570_v13 = vld [vmem:[%s14831_s1 + $0x1048] ss:$16 sps:$4 sm:$0xff]   ;;  %v10575_v14 = vld [vmem:[%s14831_s1 + $0x1064] ss:$16 sps:$4 sm:$0xff]  }
 0x1d4   :  { %6947 = vmatprep.subr.bf16.mxu0 %v10491_v15  ;;  %7795 = vmatprep.subr.bf16.mxu1 %v10494_v16  ;;  %v10578_v15 = vld [vmem:[%s14831_s1 + $0x106c] ss:$16 sps:$4 sm:$0xff]   ;;  %v8458_v16 = vcombine.high %v13070_v9, %v13075_v10 }
 0x1d7   :  { %6948 = vmatpush1.bf16.msra.mxu0 %v10489_v17  ;;  %7796 = vmatpush1.bf16.msra.mxu1 %v10492_v18  ;;  %v10573_v17 = vld [vmem:[%s14831_s1 + $0x1060] ss:$16 sps:$4 sm:$0xff]   ;;  %v10576_v18 = vld [vmem:[%s14831_s1 + $0x1068] ss:$16 sps:$4 sm:$0xff]  }
 0x1d8   :  { %6949 = vmatprep.subr.bf16.mxu0 %v10497_v19  ;;  %7797 = vmatprep.subr.bf16.mxu1 %v10500_v20  ;;  %v10581_v19 = vld [vmem:[%s14831_s1 + $0x1084] ss:$16 sps:$4 sm:$0xff]   ;;  %v10584_v20 = vld [vmem:[%s14831_s1 + $0x108c] ss:$16 sps:$4 sm:$0xff]  }
 0x1db   :  { %6950 = vmatpush1.bf16.msra.mxu0 %v10495_v21  ;;  %7798 = vmatpush1.bf16.msra.mxu1 %v10498_v22  ;;  %v10579_v21 = vld [vmem:[%s14831_s1 + $0x1080] ss:$16 sps:$4 sm:$0xff]   ;;  %v10582_v22 = vld [vmem:[%s14831_s1 + $0x1088] ss:$16 sps:$4 sm:$0xff]  }
 0x1dc   :  { %6951 = vmatprep.subr.bf16.mxu0 %v10503_v23  ;;  %7799 = vmatprep.subr.bf16.mxu1 %v10506_v24  ;;  %v10587_v23 = vld [vmem:[%s14831_s1 + $0x10a4] ss:$16 sps:$4 sm:$0xff]   ;;  %v10590_v24 = vld [vmem:[%s14831_s1 + $0x10ac] ss:$16 sps:$4 sm:$0xff]  }
 0x1df   :  { %6952 = vmatpush1.bf16.msra.mxu0 %v10501_v26  ;;  %7800 = vmatpush1.bf16.msra.mxu1 %v10504_v25  ;;  %v10585_v26 = vld [vmem:[%s14831_s1 + $0x10a0] ss:$16 sps:$4 sm:$0xff]   ;;  %v10588_v25 = vld [vmem:[%s14831_s1 + $0x10a8] ss:$16 sps:$4 sm:$0xff]  }
 0x1e0   :  { %6953 = vmatprep.subr.bf16.mxu0 %v10509_v27  ;;  %7801 = vmatprep.subr.bf16.mxu1 %v10512_v28  ;;  %v10593_v27 = vld [vmem:[%s14831_s1 + $0x10c4] ss:$16 sps:$4 sm:$0xff]   ;;  %v10596_v28 = vld [vmem:[%s14831_s1 + $0x10cc] ss:$16 sps:$4 sm:$0xff]  }
 0x1e3   :  { %6954 = vmatpush1.bf16.msra.mxu0 %v10507_v29  ;;  %7802 = vmatpush1.bf16.msra.mxu1 %v10510_v30  ;;  %v10591_v29 = vld [vmem:[%s14831_s1 + $0x10c0] ss:$16 sps:$4 sm:$0xff]   ;;  %v10594_v30 = vld [vmem:[%s14831_s1 + $0x10c8] ss:$16 sps:$4 sm:$0xff]  }
 0x1e4   :  { %6955 = vmatprep.subr.bf16.mxu0 %v10515_v31  ;;  %7803 = vmatprep.subr.bf16.mxu1 %v10518_v32  ;;  %v10599_v31 = vld [vmem:[%s14831_s1 + $0x10e4] ss:$16 sps:$4 sm:$0xff]   ;;  %v10602_v32 = vld [vmem:[%s14831_s1 + $0x10ec] ss:$16 sps:$4 sm:$0xff]  }
 0x1e7   :  { %6956 = vmatpush1.bf16.msra.mxu0 %v10513_v34  ;;  %7804 = vmatpush1.bf16.msra.mxu1 %v10516_v36  ;;  %v10597_v34 = vld [vmem:[%s14831_s1 + $0x10e0] ss:$16 sps:$4 sm:$0xff]   ;;  %v10600_v36 = vld [vmem:[%s14831_s1 + $0x10e8] ss:$16 sps:$4 sm:$0xff]  }
 0x1e8   :  { %6957 = vmatprep.subr.bf16.mxu0 %v10521_v33  ;;  %7805 = vmatprep.subr.bf16.mxu1 %v10524_v35  ;;  %v10605_v33 = vld [vmem:[%s14831_s1 + $0x1104] ss:$16 sps:$4 sm:$0xff]   ;;  %v10608_v35 = vld [vmem:[%s14831_s1 + $0x110c] ss:$16 sps:$4 sm:$0xff]  }
 0x1eb   :  { %6958 = vmatpush1.bf16.msra.mxu0 %v10519_v37  ;;  %7806 = vmatpush1.bf16.msra.mxu1 %v10522_v38  ;;  %v10603_v37 = vld [vmem:[%s14831_s1 + $0x1100] ss:$16 sps:$4 sm:$0xff]   ;;  %v10606_v38 = vld [vmem:[%s14831_s1 + $0x1108] ss:$16 sps:$4 sm:$0xff]  }
 0x1ec   :  { %6959 = vmatprep.subr.bf16.mxu0 %v10527_v39  ;;  %7807 = vmatprep.subr.bf16.mxu1 %v10530_v40  ;;  %v10611_v39 = vld [vmem:[%s14831_s1 + $0x1124] ss:$16 sps:$4 sm:$0xff]   ;;  %v10614_v40 = vld [vmem:[%s14831_s1 + $0x112c] ss:$16 sps:$4 sm:$0xff]  }
 0x1ef   :  { %6960 = vmatpush1.bf16.msra.mxu0 %v10525_v42  ;;  %7808 = vmatpush1.bf16.msra.mxu1 %v10528_v44  ;;  %v10609_v42 = vld [vmem:[%s14831_s1 + $0x1120] ss:$16 sps:$4 sm:$0xff]   ;;  %v10612_v44 = vld [vmem:[%s14831_s1 + $0x1128] ss:$16 sps:$4 sm:$0xff]  }
 0x1f0   :  { %6961 = vmatprep.subr.bf16.mxu0 %v10533_v41  ;;  %7809 = vmatprep.subr.bf16.mxu1 %v10536_v43  ;;  %v10617_v41 = vld [vmem:[%s14831_s1 + $0x1144] ss:$16 sps:$4 sm:$0xff]   ;;  %v10620_v43 = vld [vmem:[%s14831_s1 + $0x114c] ss:$16 sps:$4 sm:$0xff]  }
 0x1f3   :  { %6962 = vmatpush1.bf16.msra.mxu0 %v10531_v45  ;;  %7810 = vmatpush1.bf16.msra.mxu1 %v10534_v46  ;;  %v10615_v45 = vld [vmem:[%s14831_s1 + $0x1140] ss:$16 sps:$4 sm:$0xff]   ;;  %v10618_v46 = vld [vmem:[%s14831_s1 + $0x1148] ss:$16 sps:$4 sm:$0xff]  }
 0x1f4   :  { %6963 = vmatprep.subr.bf16.mxu0 %v10539_v47  ;;  %7811 = vmatprep.subr.bf16.mxu1 %v10542_v48  ;;  %v10623_v47 = vld [vmem:[%s14831_s1 + $0x1164] ss:$16 sps:$4 sm:$0xff]   ;;  %v10626_v48 = vld [vmem:[%s14831_s1 + $0x116c] ss:$16 sps:$4 sm:$0xff]  }
 0x1f7   :  { %6964 = vmatpush1.bf16.msra.mxu0 %v10537_v51  ;;  %7812 = vmatpush1.bf16.msra.mxu1 %v10540_v52  ;;  %v10621_v51 = vld [vmem:[%s14831_s1 + $0x1160] ss:$16 sps:$4 sm:$0xff]   ;;  %v10624_v52 = vld [vmem:[%s14831_s1 + $0x1168] ss:$16 sps:$4 sm:$0xff]  }
 0x1f8   :  { %6965 = vmatprep.subr.bf16.mxu0 %v10545_v49  ;;  %7813 = vmatprep.subr.bf16.mxu1 %v10548_v50  ;;  %v10629_v49 = vld [vmem:[%s14831_s1 + $0x1184] ss:$16 sps:$4 sm:$0xff]   ;;  %v10632_v50 = vld [vmem:[%s14831_s1 + $0x118c] ss:$16 sps:$4 sm:$0xff]  }
 0x1fb   :  { %6966 = vmatpush1.bf16.msra.mxu0 %v10543_v53  ;;  %7814 = vmatpush1.bf16.msra.mxu1 %v10546_v54  ;;  %v10627_v53 = vld [vmem:[%s14831_s1 + $0x1180] ss:$16 sps:$4 sm:$0xff]   ;;  %v10630_v54 = vld [vmem:[%s14831_s1 + $0x1188] ss:$16 sps:$4 sm:$0xff]  }
 0x1fc   :  { %6967 = vmatprep.subr.bf16.mxu0 %v10551_v55  ;;  %7815 = vmatprep.subr.bf16.mxu1 %v10554_v56  ;;  %v10635_v55 = vld [vmem:[%s14831_s1 + $0x11a4] ss:$16 sps:$4 sm:$0xff]   ;;  %v10638_v56 = vld [vmem:[%s14831_s1 + $0x11ac] ss:$16 sps:$4 sm:$0xff]  }
 0x1ff   :  { %6968 = vmatpush1.bf16.msra.mxu0 %v10549_v59  ;;  %7816 = vmatpush1.bf16.msra.mxu1 %v10552_v60  ;;  %v10633_v59 = vld [vmem:[%s14831_s1 + $0x11a0] ss:$16 sps:$4 sm:$0xff]   ;;  %v10636_v60 = vld [vmem:[%s14831_s1 + $0x11a8] ss:$16 sps:$4 sm:$0xff]  }
 0x200   :  { %6990 = vmatprep.subr.bf16.mxu0 %v10557_v57  ;;  %7838 = vmatprep.subr.bf16.mxu1 %v10560_v58  ;;  %v10641_v57 = vld [vmem:[%s14831_s1 + $0x11c4] ss:$16 sps:$4 sm:$0xff]   ;;  %v10644_v58 = vld [vmem:[%s14831_s1 + $0x11cc] ss:$16 sps:$4 sm:$0xff]  }
 0x202   :  { %6970 = vmatmul.mubr.bf16.vlgmr.msra.gmra.mrb[0].mxu0 %v8455_v63  ;;  %7818 = vmatmul.mubr.bf16.vlgmr.msra.gmra.mrb[0].mxu1 %v8455_v63  ;;  %v10647_v63 = vld [vmem:[%s14831_s1 + $0x11e4] ss:$16 sps:$4 sm:$0xff]  }
 0x203   :  { %6991 = vmatpush1.bf16.msra.mxu0 %v10555_v0  ;;  %7839 = vmatpush1.bf16.msra.mxu1 %v10558_v3  ;;  %v10650_v0 = vld [vmem:[%s14831_s1 + $0x11ec] ss:$16 sps:$4 sm:$0xff]   ;;  %v10645_v3 = vld [vmem:[%s14831_s1 + $0x11e0] ss:$16 sps:$4 sm:$0xff]  }
 0x204   :  { %6992 = vmatprep.subr.bf16.mxu0 %v10563_v4  ;;  %7840 = vmatprep.subr.bf16.mxu1 %v10566_v1  ;;  %v10648_v4 = vld [vmem:[%s14831_s1 + $0x11e8] ss:$16 sps:$4 sm:$0xff]   ;;  %v10653_v1 = vld [vmem:[%s14831_s1 + $0x1204] ss:$16 sps:$4 sm:$0xff]  }
 0x205   :  { %6979 = vmatprep.mubr.bf16.mxu0 %v8488_v6  ;;  %7827 = vmatprep.mubr.bf16.mxu1 %v8488_v6  ;;  %v72_v6 = vld [vmem:[%s14832_s0 + $0x1c0] sm:$0xff] }
 0x207   :  { %6993 = vmatpush1.bf16.msra.mxu0 %v10561_v2  ;;  %7841 = vmatpush1.bf16.msra.mxu1 %v10564_v5  ;;  %v10656_v2 = vld [vmem:[%s14831_s1 + $0x120c] ss:$16 sps:$4 sm:$0xff]   ;;  %v56_v5 = vld [vmem:[%s14832_s0 + $0x140] sm:$0xff] }
 0x208   :  { %6994 = vmatprep.subr.bf16.mxu0 %v10569_v7  ;;  %7842 = vmatprep.subr.bf16.mxu1 %v10572_v8  ;;  %v8457_v7 = vcombine.low %v13070_v9, %v13075_v10  ;;  %v10651_v8 = vld [vmem:[%s14831_s1 + $0x1200] ss:$16 sps:$4 sm:$0xff]   ;;  %v10662_v9 = vld [vmem:[%s14831_s1 + $0x122c] ss:$16 sps:$4 sm:$0xff]  }
 0x209   :  { %v10657_v10 = vld [vmem:[%s14831_s1 + $0x1220] ss:$16 sps:$4 sm:$0xff]  }
 0x20a   :  { %6980 = vmatmul.mubr.bf16.gmra.mrb[4].mxu0 %v8487_v11  ;;  %7828 = vmatmul.mubr.bf16.gmra.mrb[4].mxu1 %v8487_v11  ;;  %v10654_v11 = vld [vmem:[%s14831_s1 + $0x1208] ss:$16 sps:$4 sm:$0xff]  }
 0x20b   :  { %6995 = vmatpush1.bf16.msra.mxu0 %v10567_v12  ;;  %7843 = vmatpush1.bf16.msra.mxu1 %v10570_v13  ;;  %v10659_v12 = vld [vmem:[%s14831_s1 + $0x1224] ss:$16 sps:$4 sm:$0xff]   ;;  %v10660_v13 = vld [vmem:[%s14831_s1 + $0x1228] ss:$16 sps:$4 sm:$0xff]  }
 0x20c   :  { %6996 = vmatprep.subr.bf16.mxu0 %v10575_v14  ;;  %7844 = vmatprep.subr.bf16.mxu1 %v10578_v15  ;;  %v8490_v14 = vcombine.high %v56_v5, %v72_v6  ;;  %v10665_v15 = vld [vmem:[%s14831_s1 + $0x1244] ss:$16 sps:$4 sm:$0xff]  }
 0x20d   :  { %7022 = vmatprep.mubr.bf16.mxu0 %v8458_v16  ;;  %7870 = vmatprep.mubr.bf16.mxu1 %v8458_v16  ;;  %v10668_v16 = vld [vmem:[%s14831_s1 + $0x124c] ss:$16 sps:$4 sm:$0xff]  }
 0x20f   :  { %6997 = vmatpush1.bf16.msra.mxu0 %v10573_v17  ;;  %7845 = vmatpush1.bf16.msra.mxu1 %v10576_v18  ;;  %v13282_v17 = vld [vmem:[%s14832_s0 + $0x48] sm:$0xff] }
 0x210   :  { %6998 = vmatprep.subr.bf16.mxu0 %v10581_v19  ;;  %7846 = vmatprep.subr.bf16.mxu1 %v10584_v20  ;;  %v13287_v18 = vld [vmem:[%s14832_s0 + $0xc8] sm:$0xff]  ;;  %v8489_v19 = vcombine.low %v56_v5, %v72_v6  ;;  %v10663_v20 = vld [vmem:[%s14831_s1 + $0x1240] ss:$16 sps:$4 sm:$0xff]  }
 0x211   :  { %v10735_v5 = vld [vmem:[%s14831_s1 + $0x13c0] ss:$16 sps:$4 sm:$0xff]   ;;  %v10738_v6 = vld [vmem:[%s14831_s1 + $0x13c8] ss:$16 sps:$4 sm:$0xff]  }
 0x213   :  { %6999 = vmatpush1.bf16.msra.mxu0 %v10579_v21  ;;  %7847 = vmatpush1.bf16.msra.mxu1 %v10582_v22  ;;  %v10666_v21 = vld [vmem:[%s14831_s1 + $0x1248] ss:$16 sps:$4 sm:$0xff]   ;;  %v10671_v22 = vld [vmem:[%s14831_s1 + $0x1264] ss:$16 sps:$4 sm:$0xff]  }
 0x214   :  { %7000 = vmatprep.subr.bf16.mxu0 %v10587_v23  ;;  %7848 = vmatprep.subr.bf16.mxu1 %v10590_v24  ;;  %v10674_v23 = vld [vmem:[%s14831_s1 + $0x126c] ss:$16 sps:$4 sm:$0xff]   ;;  %v8460_v24 = vcombine.high %v13282_v17, %v13287_v18 }
 0x217   :  { %7001 = vmatpush1.bf16.msra.mxu0 %v10585_v26  ;;  %7849 = vmatpush1.bf16.msra.mxu1 %v10588_v25  ;;  %v10669_v26 = vld [vmem:[%s14831_s1 + $0x1260] ss:$16 sps:$4 sm:$0xff]   ;;  %v10672_v25 = vld [vmem:[%s14831_s1 + $0x1268] ss:$16 sps:$4 sm:$0xff]  }
 0x218   :  { %7002 = vmatprep.subr.bf16.mxu0 %v10593_v27  ;;  %7850 = vmatprep.subr.bf16.mxu1 %v10596_v28  ;;  %v10677_v27 = vld [vmem:[%s14831_s1 + $0x1284] ss:$16 sps:$4 sm:$0xff]   ;;  %v10680_v28 = vld [vmem:[%s14831_s1 + $0x128c] ss:$16 sps:$4 sm:$0xff]  }
 0x21b   :  { %7003 = vmatpush1.bf16.msra.mxu0 %v10591_v29  ;;  %7851 = vmatpush1.bf16.msra.mxu1 %v10594_v30  ;;  %v10675_v29 = vld [vmem:[%s14831_s1 + $0x1280] ss:$16 sps:$4 sm:$0xff]   ;;  %v10678_v30 = vld [vmem:[%s14831_s1 + $0x1288] ss:$16 sps:$4 sm:$0xff]  }
 0x21c   :  { %7004 = vmatprep.subr.bf16.mxu0 %v10599_v31  ;;  %7852 = vmatprep.subr.bf16.mxu1 %v10602_v32  ;;  %v10683_v31 = vld [vmem:[%s14831_s1 + $0x12a4] ss:$16 sps:$4 sm:$0xff]   ;;  %v10686_v32 = vld [vmem:[%s14831_s1 + $0x12ac] ss:$16 sps:$4 sm:$0xff]  }
 0x21f   :  { %7005 = vmatpush1.bf16.msra.mxu0 %v10597_v34  ;;  %7853 = vmatpush1.bf16.msra.mxu1 %v10600_v36  ;;  %v10681_v34 = vld [vmem:[%s14831_s1 + $0x12a0] ss:$16 sps:$4 sm:$0xff]   ;;  %v10684_v36 = vld [vmem:[%s14831_s1 + $0x12a8] ss:$16 sps:$4 sm:$0xff]  }
 0x220   :  { %7006 = vmatprep.subr.bf16.mxu0 %v10605_v33  ;;  %7854 = vmatprep.subr.bf16.mxu1 %v10608_v35  ;;  %v10689_v33 = vld [vmem:[%s14831_s1 + $0x12c4] ss:$16 sps:$4 sm:$0xff]   ;;  %v10692_v35 = vld [vmem:[%s14831_s1 + $0x12cc] ss:$16 sps:$4 sm:$0xff]  }
 0x223   :  { %7007 = vmatpush1.bf16.msra.mxu0 %v10603_v37  ;;  %7855 = vmatpush1.bf16.msra.mxu1 %v10606_v38  ;;  %v10687_v37 = vld [vmem:[%s14831_s1 + $0x12c0] ss:$16 sps:$4 sm:$0xff]   ;;  %v10690_v38 = vld [vmem:[%s14831_s1 + $0x12c8] ss:$16 sps:$4 sm:$0xff]  }
 0x224   :  { %7008 = vmatprep.subr.bf16.mxu0 %v10611_v39  ;;  %7856 = vmatprep.subr.bf16.mxu1 %v10614_v40  ;;  %v10695_v39 = vld [vmem:[%s14831_s1 + $0x12e4] ss:$16 sps:$4 sm:$0xff]   ;;  %v10698_v40 = vld [vmem:[%s14831_s1 + $0x12ec] ss:$16 sps:$4 sm:$0xff]  }
 0x227   :  { %7009 = vmatpush1.bf16.msra.mxu0 %v10609_v42  ;;  %7857 = vmatpush1.bf16.msra.mxu1 %v10612_v44  ;;  %v10693_v42 = vld [vmem:[%s14831_s1 + $0x12e0] ss:$16 sps:$4 sm:$0xff]   ;;  %v10696_v44 = vld [vmem:[%s14831_s1 + $0x12e8] ss:$16 sps:$4 sm:$0xff]  }
 0x228   :  { %7010 = vmatprep.subr.bf16.mxu0 %v10617_v41  ;;  %7858 = vmatprep.subr.bf16.mxu1 %v10620_v43  ;;  %v10701_v41 = vld [vmem:[%s14831_s1 + $0x1304] ss:$16 sps:$4 sm:$0xff]   ;;  %v10704_v43 = vld [vmem:[%s14831_s1 + $0x130c] ss:$16 sps:$4 sm:$0xff]  }
 0x22b   :  { %7011 = vmatpush1.bf16.msra.mxu0 %v10615_v45  ;;  %7859 = vmatpush1.bf16.msra.mxu1 %v10618_v46  ;;  %v10699_v45 = vld [vmem:[%s14831_s1 + $0x1300] ss:$16 sps:$4 sm:$0xff]   ;;  %v10702_v46 = vld [vmem:[%s14831_s1 + $0x1308] ss:$16 sps:$4 sm:$0xff]  }
 0x22c   :  { %7012 = vmatprep.subr.bf16.mxu0 %v10623_v47  ;;  %7860 = vmatprep.subr.bf16.mxu1 %v10626_v48  ;;  %v10707_v47 = vld [vmem:[%s14831_s1 + $0x1324] ss:$16 sps:$4 sm:$0xff]   ;;  %v10710_v48 = vld [vmem:[%s14831_s1 + $0x132c] ss:$16 sps:$4 sm:$0xff]  }
 0x22f   :  { %7013 = vmatpush1.bf16.msra.mxu0 %v10621_v51  ;;  %7861 = vmatpush1.bf16.msra.mxu1 %v10624_v52  ;;  %v10705_v51 = vld [vmem:[%s14831_s1 + $0x1320] ss:$16 sps:$4 sm:$0xff]   ;;  %v10708_v52 = vld [vmem:[%s14831_s1 + $0x1328] ss:$16 sps:$4 sm:$0xff]  }
 0x230   :  { %7014 = vmatprep.subr.bf16.mxu0 %v10629_v49  ;;  %7862 = vmatprep.subr.bf16.mxu1 %v10632_v50  ;;  %v10713_v49 = vld [vmem:[%s14831_s1 + $0x1344] ss:$16 sps:$4 sm:$0xff]   ;;  %v10716_v50 = vld [vmem:[%s14831_s1 + $0x134c] ss:$16 sps:$4 sm:$0xff]  }
 0x233   :  { %7015 = vmatpush1.bf16.msra.mxu0 %v10627_v53  ;;  %7863 = vmatpush1.bf16.msra.mxu1 %v10630_v54  ;;  %v10711_v53 = vld [vmem:[%s14831_s1 + $0x1340] ss:$16 sps:$4 sm:$0xff]   ;;  %v10714_v54 = vld [vmem:[%s14831_s1 + $0x1348] ss:$16 sps:$4 sm:$0xff]  }
 0x234   :  { %7016 = vmatprep.subr.bf16.mxu0 %v10635_v55  ;;  %7864 = vmatprep.subr.bf16.mxu1 %v10638_v56  ;;  %v10719_v55 = vld [vmem:[%s14831_s1 + $0x1364] ss:$16 sps:$4 sm:$0xff]   ;;  %v10722_v56 = vld [vmem:[%s14831_s1 + $0x136c] ss:$16 sps:$4 sm:$0xff]  }
 0x237   :  { %7017 = vmatpush1.bf16.msra.mxu0 %v10633_v59  ;;  %7865 = vmatpush1.bf16.msra.mxu1 %v10636_v60  ;;  %v10717_v59 = vld [vmem:[%s14831_s1 + $0x1360] ss:$16 sps:$4 sm:$0xff]   ;;  %v10720_v60 = vld [vmem:[%s14831_s1 + $0x1368] ss:$16 sps:$4 sm:$0xff]  }
 0x238   :  { %7018 = vmatprep.subr.bf16.mxu0 %v10641_v57  ;;  %7866 = vmatprep.subr.bf16.mxu1 %v10644_v58  ;;  %v10725_v57 = vld [vmem:[%s14831_s1 + $0x1384] ss:$16 sps:$4 sm:$0xff]   ;;  %v10728_v58 = vld [vmem:[%s14831_s1 + $0x138c] ss:$16 sps:$4 sm:$0xff]  }
 0x23b   :  { %7019 = vmatpush1.bf16.msra.mxu0 %v10639_v61  ;;  %7867 = vmatpush1.bf16.msra.mxu1 %v10642_v62  ;;  %v10723_v61 = vld [vmem:[%s14831_s1 + $0x1380] ss:$16 sps:$4 sm:$0xff]   ;;  %v10726_v62 = vld [vmem:[%s14831_s1 + $0x1388] ss:$16 sps:$4 sm:$0xff]  }
 0x23c   :  { %7020 = vmatprep.subr.bf16.mxu0 %v10647_v63  ;;  %7868 = vmatprep.subr.bf16.mxu1 %v10650_v0  ;;  %v10731_v63 = vld [vmem:[%s14831_s1 + $0x13a4] ss:$16 sps:$4 sm:$0xff]   ;;  %v10734_v0 = vld [vmem:[%s14831_s1 + $0x13ac] ss:$16 sps:$4 sm:$0xff]  }
 0x23f   :  { %7021 = vmatpush1.bf16.msra.mxu0 %v10645_v3  ;;  %7869 = vmatpush1.bf16.msra.mxu1 %v10648_v4  ;;  %v10729_v3 = vld [vmem:[%s14831_s1 + $0x13a0] ss:$16 sps:$4 sm:$0xff]   ;;  %v10732_v4 = vld [vmem:[%s14831_s1 + $0x13a8] ss:$16 sps:$4 sm:$0xff]  }
 0x240   :  { %7043 = vmatprep.subr.bf16.mxu0 %v10653_v1  ;;  %7891 = vmatprep.subr.bf16.mxu1 %v10656_v2  ;;  %v10737_v1 = vld [vmem:[%s14831_s1 + $0x13c4] ss:$16 sps:$4 sm:$0xff]   ;;  %v10740_v2 = vld [vmem:[%s14831_s1 + $0x13cc] ss:$16 sps:$4 sm:$0xff]  }
 0x242   :  { %7023 = vmatmul.mubr.bf16.vlgmr.msra.gmra.mrb[0].mxu0 %v8457_v7  ;;  %7871 = vmatmul.mubr.bf16.vlgmr.msra.gmra.mrb[0].mxu1 %v8457_v7  ;;  %v10743_v7 = vld [vmem:[%s14831_s1 + $0x13e4] ss:$16 sps:$4 sm:$0xff]  }
 0x243   :  { %7044 = vmatpush1.bf16.msra.mxu0 %v10651_v8  ;;  %7892 = vmatpush1.bf16.msra.mxu1 %v10654_v11  ;;  %v10746_v8 = vld [vmem:[%s14831_s1 + $0x13ec] ss:$16 sps:$4 sm:$0xff]   ;;  %v10741_v11 = vld [vmem:[%s14831_s1 + $0x13e0] ss:$16 sps:$4 sm:$0xff]  }
 0x244   :  { %7045 = vmatprep.subr.bf16.mxu0 %v10659_v12  ;;  %7893 = vmatprep.subr.bf16.mxu1 %v10662_v9  ;;  %v10744_v12 = vld [vmem:[%s14831_s1 + $0x13e8] ss:$16 sps:$4 sm:$0xff]   ;;  %v10749_v9 = vld [vmem:[%s14831_s1 + $0x1404] ss:$16 sps:$4 sm:$0xff]  }
 0x245   :  { %7032 = vmatprep.mubr.bf16.mxu0 %v8490_v14  ;;  %7880 = vmatprep.mubr.bf16.mxu1 %v8490_v14  ;;  %v57_v14 = vld [vmem:[%s14832_s0 + $0x148] sm:$0xff] }
 0x247   :  { %7046 = vmatpush1.bf16.msra.mxu0 %v10657_v10  ;;  %7894 = vmatpush1.bf16.msra.mxu1 %v10660_v13  ;;  %v10752_v10 = vld [vmem:[%s14831_s1 + $0x140c] ss:$16 sps:$4 sm:$0xff]   ;;  %v8459_v13 = vcombine.low %v13282_v17, %v13287_v18  ;;  %v10755_v17 = vld [vmem:[%s14831_s1 + $0x1424] ss:$16 sps:$4 sm:$0xff]  }
 0x248   :  { %7047 = vmatprep.subr.bf16.mxu0 %v10665_v15  ;;  %7895 = vmatprep.subr.bf16.mxu1 %v10668_v16  ;;  %v73_v15 = vld [vmem:[%s14832_s0 + $0x1c8] sm:$0xff]  ;;  %v10747_v16 = vld [vmem:[%s14831_s1 + $0x1400] ss:$16 sps:$4 sm:$0xff]  }
 0x249   :  { %v10758_v18 = vld [vmem:[%s14831_s1 + $0x142c] ss:$16 sps:$4 sm:$0xff]  }
 0x24a   :  { %7033 = vmatmul.mubr.bf16.gmra.mrb[4].mxu0 %v8489_v19  ;;  %7881 = vmatmul.mubr.bf16.gmra.mrb[4].mxu1 %v8489_v19  ;;  %v10750_v19 = vld [vmem:[%s14831_s1 + $0x1408] ss:$16 sps:$4 sm:$0xff]  }
 0x24b   :  { %7048 = vmatpush1.bf16.msra.mxu0 %v10663_v20  ;;  %7896 = vmatpush1.bf16.msra.mxu1 %v10666_v21  ;;  %v8492_v20 = vcombine.high %v57_v14, %v73_v15  ;;  %v10753_v21 = vld [vmem:[%s14831_s1 + $0x1420] ss:$16 sps:$4 sm:$0xff]  }
 0x24c   :  { %7049 = vmatprep.subr.bf16.mxu0 %v10671_v22  ;;  %7897 = vmatprep.subr.bf16.mxu1 %v10674_v23  ;;  %v10756_v22 = vld [vmem:[%s14831_s1 + $0x1428] ss:$16 sps:$4 sm:$0xff]   ;;  %v10761_v23 = vld [vmem:[%s14831_s1 + $0x1444] ss:$16 sps:$4 sm:$0xff]  }
 0x24d   :  { %7075 = vmatprep.mubr.bf16.mxu0 %v8460_v24  ;;  %7923 = vmatprep.mubr.bf16.mxu1 %v8460_v24  ;;  %v10764_v24 = vld [vmem:[%s14831_s1 + $0x144c] ss:$16 sps:$4 sm:$0xff]  }
 0x24f   :  { %7050 = vmatpush1.bf16.msra.mxu0 %v10669_v26  ;;  %7898 = vmatpush1.bf16.msra.mxu1 %v10672_v25  ;;  %v8491_v26 = vcombine.low %v57_v14, %v73_v15  ;;  %v13494_v25 = vld [vmem:[%s14832_s0 + $0x50] sm:$0xff]  ;;  %v10834_v14 = vld [vmem:[%s14831_s1 + $0x15c8] ss:$16 sps:$4 sm:$0xff]  }
 0x250   :  { %7051 = vmatprep.subr.bf16.mxu0 %v10677_v27  ;;  %7899 = vmatprep.subr.bf16.mxu1 %v10680_v28  ;;  %v13499_v27 = vld [vmem:[%s14832_s0 + $0xd0] sm:$0xff] }
 0x251   :  { %v10759_v28 = vld [vmem:[%s14831_s1 + $0x1440] ss:$16 sps:$4 sm:$0xff]   ;;  %v10839_v15 = vld [vmem:[%s14831_s1 + $0x15e4] ss:$16 sps:$4 sm:$0xff]  }
 0x253   :  { %7052 = vmatpush1.bf16.msra.mxu0 %v10675_v29  ;;  %7900 = vmatpush1.bf16.msra.mxu1 %v10678_v30  ;;  %v10762_v29 = vld [vmem:[%s14831_s1 + $0x1448] ss:$16 sps:$4 sm:$0xff]   ;;  %v10767_v30 = vld [vmem:[%s14831_s1 + $0x1464] ss:$16 sps:$4 sm:$0xff]  }
 0x254   :  { %7053 = vmatprep.subr.bf16.mxu0 %v10683_v31  ;;  %7901 = vmatprep.subr.bf16.mxu1 %v10686_v32  ;;  %v10770_v31 = vld [vmem:[%s14831_s1 + $0x146c] ss:$16 sps:$4 sm:$0xff]   ;;  %v8462_v32 = vcombine.high %v13494_v25, %v13499_v27 }
 0x257   :  { %7054 = vmatpush1.bf16.msra.mxu0 %v10681_v34  ;;  %7902 = vmatpush1.bf16.msra.mxu1 %v10684_v36  ;;  %v10765_v34 = vld [vmem:[%s14831_s1 + $0x1460] ss:$16 sps:$4 sm:$0xff]   ;;  %v10768_v36 = vld [vmem:[%s14831_s1 + $0x1468] ss:$16 sps:$4 sm:$0xff]  }
 0x258   :  { %7055 = vmatprep.subr.bf16.mxu0 %v10689_v33  ;;  %7903 = vmatprep.subr.bf16.mxu1 %v10692_v35  ;;  %v10773_v33 = vld [vmem:[%s14831_s1 + $0x1484] ss:$16 sps:$4 sm:$0xff]   ;;  %v10776_v35 = vld [vmem:[%s14831_s1 + $0x148c] ss:$16 sps:$4 sm:$0xff]  }
 0x25b   :  { %7056 = vmatpush1.bf16.msra.mxu0 %v10687_v37  ;;  %7904 = vmatpush1.bf16.msra.mxu1 %v10690_v38  ;;  %v10771_v37 = vld [vmem:[%s14831_s1 + $0x1480] ss:$16 sps:$4 sm:$0xff]   ;;  %v10774_v38 = vld [vmem:[%s14831_s1 + $0x1488] ss:$16 sps:$4 sm:$0xff]  }
 0x25c   :  { %7057 = vmatprep.subr.bf16.mxu0 %v10695_v39  ;;  %7905 = vmatprep.subr.bf16.mxu1 %v10698_v40  ;;  %v10779_v39 = vld [vmem:[%s14831_s1 + $0x14a4] ss:$16 sps:$4 sm:$0xff]   ;;  %v10782_v40 = vld [vmem:[%s14831_s1 + $0x14ac] ss:$16 sps:$4 sm:$0xff]  }
 0x25f   :  { %7058 = vmatpush1.bf16.msra.mxu0 %v10693_v42  ;;  %7906 = vmatpush1.bf16.msra.mxu1 %v10696_v44  ;;  %v10777_v42 = vld [vmem:[%s14831_s1 + $0x14a0] ss:$16 sps:$4 sm:$0xff]   ;;  %v10780_v44 = vld [vmem:[%s14831_s1 + $0x14a8] ss:$16 sps:$4 sm:$0xff]  }
 0x260   :  { %7059 = vmatprep.subr.bf16.mxu0 %v10701_v41  ;;  %7907 = vmatprep.subr.bf16.mxu1 %v10704_v43  ;;  %v10785_v41 = vld [vmem:[%s14831_s1 + $0x14c4] ss:$16 sps:$4 sm:$0xff]   ;;  %v10788_v43 = vld [vmem:[%s14831_s1 + $0x14cc] ss:$16 sps:$4 sm:$0xff]  }
 0x263   :  { %7060 = vmatpush1.bf16.msra.mxu0 %v10699_v45  ;;  %7908 = vmatpush1.bf16.msra.mxu1 %v10702_v46  ;;  %v10783_v45 = vld [vmem:[%s14831_s1 + $0x14c0] ss:$16 sps:$4 sm:$0xff]   ;;  %v10786_v46 = vld [vmem:[%s14831_s1 + $0x14c8] ss:$16 sps:$4 sm:$0xff]  }
 0x264   :  { %7061 = vmatprep.subr.bf16.mxu0 %v10707_v47  ;;  %7909 = vmatprep.subr.bf16.mxu1 %v10710_v48  ;;  %v10791_v47 = vld [vmem:[%s14831_s1 + $0x14e4] ss:$16 sps:$4 sm:$0xff]   ;;  %v10794_v48 = vld [vmem:[%s14831_s1 + $0x14ec] ss:$16 sps:$4 sm:$0xff]  }
 0x267   :  { %7062 = vmatpush1.bf16.msra.mxu0 %v10705_v51  ;;  %7910 = vmatpush1.bf16.msra.mxu1 %v10708_v52  ;;  %v10789_v51 = vld [vmem:[%s14831_s1 + $0x14e0] ss:$16 sps:$4 sm:$0xff]   ;;  %v10792_v52 = vld [vmem:[%s14831_s1 + $0x14e8] ss:$16 sps:$4 sm:$0xff]  }
 0x268   :  { %7063 = vmatprep.subr.bf16.mxu0 %v10713_v49  ;;  %7911 = vmatprep.subr.bf16.mxu1 %v10716_v50  ;;  %v10797_v49 = vld [vmem:[%s14831_s1 + $0x1504] ss:$16 sps:$4 sm:$0xff]   ;;  %v10800_v50 = vld [vmem:[%s14831_s1 + $0x150c] ss:$16 sps:$4 sm:$0xff]  }
 0x26b   :  { %7064 = vmatpush1.bf16.msra.mxu0 %v10711_v53  ;;  %7912 = vmatpush1.bf16.msra.mxu1 %v10714_v54  ;;  %v10795_v53 = vld [vmem:[%s14831_s1 + $0x1500] ss:$16 sps:$4 sm:$0xff]   ;;  %v10798_v54 = vld [vmem:[%s14831_s1 + $0x1508] ss:$16 sps:$4 sm:$0xff]  }
 0x26c   :  { %7065 = vmatprep.subr.bf16.mxu0 %v10719_v55  ;;  %7913 = vmatprep.subr.bf16.mxu1 %v10722_v56  ;;  %v10803_v55 = vld [vmem:[%s14831_s1 + $0x1524] ss:$16 sps:$4 sm:$0xff]   ;;  %v10806_v56 = vld [vmem:[%s14831_s1 + $0x152c] ss:$16 sps:$4 sm:$0xff]  }
 0x26f   :  { %7066 = vmatpush1.bf16.msra.mxu0 %v10717_v59  ;;  %7914 = vmatpush1.bf16.msra.mxu1 %v10720_v60  ;;  %v10801_v59 = vld [vmem:[%s14831_s1 + $0x1520] ss:$16 sps:$4 sm:$0xff]   ;;  %v10804_v60 = vld [vmem:[%s14831_s1 + $0x1528] ss:$16 sps:$4 sm:$0xff]  }
 0x270   :  { %7067 = vmatprep.subr.bf16.mxu0 %v10725_v57  ;;  %7915 = vmatprep.subr.bf16.mxu1 %v10728_v58  ;;  %v10809_v57 = vld [vmem:[%s14831_s1 + $0x1544] ss:$16 sps:$4 sm:$0xff]   ;;  %v10812_v58 = vld [vmem:[%s14831_s1 + $0x154c] ss:$16 sps:$4 sm:$0xff]  }
 0x273   :  { %7068 = vmatpush1.bf16.msra.mxu0 %v10723_v61  ;;  %7916 = vmatpush1.bf16.msra.mxu1 %v10726_v62  ;;  %v10807_v61 = vld [vmem:[%s14831_s1 + $0x1540] ss:$16 sps:$4 sm:$0xff]   ;;  %v10810_v62 = vld [vmem:[%s14831_s1 + $0x1548] ss:$16 sps:$4 sm:$0xff]  }
 0x274   :  { %7069 = vmatprep.subr.bf16.mxu0 %v10731_v63  ;;  %7917 = vmatprep.subr.bf16.mxu1 %v10734_v0  ;;  %v10815_v63 = vld [vmem:[%s14831_s1 + $0x1564] ss:$16 sps:$4 sm:$0xff]   ;;  %v10818_v0 = vld [vmem:[%s14831_s1 + $0x156c] ss:$16 sps:$4 sm:$0xff]  }
 0x277   :  { %7070 = vmatpush1.bf16.msra.mxu0 %v10729_v3  ;;  %7918 = vmatpush1.bf16.msra.mxu1 %v10732_v4  ;;  %v10813_v3 = vld [vmem:[%s14831_s1 + $0x1560] ss:$16 sps:$4 sm:$0xff]   ;;  %v10816_v4 = vld [vmem:[%s14831_s1 + $0x1568] ss:$16 sps:$4 sm:$0xff]  }
 0x278   :  { %7071 = vmatprep.subr.bf16.mxu0 %v10737_v1  ;;  %7919 = vmatprep.subr.bf16.mxu1 %v10740_v2  ;;  %v10821_v1 = vld [vmem:[%s14831_s1 + $0x1584] ss:$16 sps:$4 sm:$0xff]   ;;  %v10824_v2 = vld [vmem:[%s14831_s1 + $0x158c] ss:$16 sps:$4 sm:$0xff]  }
 0x27b   :  { %7072 = vmatpush1.bf16.msra.mxu0 %v10735_v5  ;;  %7920 = vmatpush1.bf16.msra.mxu1 %v10738_v6  ;;  %v10819_v5 = vld [vmem:[%s14831_s1 + $0x1580] ss:$16 sps:$4 sm:$0xff]   ;;  %v10822_v6 = vld [vmem:[%s14831_s1 + $0x1588] ss:$16 sps:$4 sm:$0xff]  }
 0x27c   :  { %7073 = vmatprep.subr.bf16.mxu0 %v10743_v7  ;;  %7921 = vmatprep.subr.bf16.mxu1 %v10746_v8  ;;  %v10827_v7 = vld [vmem:[%s14831_s1 + $0x15a4] ss:$16 sps:$4 sm:$0xff]   ;;  %v10830_v8 = vld [vmem:[%s14831_s1 + $0x15ac] ss:$16 sps:$4 sm:$0xff]  }
 0x27f   :  { %7074 = vmatpush1.bf16.msra.mxu0 %v10741_v11  ;;  %7922 = vmatpush1.bf16.msra.mxu1 %v10744_v12  ;;  %v10825_v11 = vld [vmem:[%s14831_s1 + $0x15a0] ss:$16 sps:$4 sm:$0xff]   ;;  %v10828_v12 = vld [vmem:[%s14831_s1 + $0x15a8] ss:$16 sps:$4 sm:$0xff]  }
 0x280   :  { %7096 = vmatprep.subr.bf16.mxu0 %v10749_v9  ;;  %7944 = vmatprep.subr.bf16.mxu1 %v10752_v10  ;;  %v10833_v9 = vld [vmem:[%s14831_s1 + $0x15c4] ss:$16 sps:$4 sm:$0xff]   ;;  %v10836_v10 = vld [vmem:[%s14831_s1 + $0x15cc] ss:$16 sps:$4 sm:$0xff]  }
 0x282   :  { %7076 = vmatmul.mubr.bf16.vlgmr.msra.gmra.mrb[0].mxu0 %v8459_v13  ;;  %7924 = vmatmul.mubr.bf16.vlgmr.msra.gmra.mrb[0].mxu1 %v8459_v13  ;;  %v10831_v13 = vld [vmem:[%s14831_s1 + $0x15c0] ss:$16 sps:$4 sm:$0xff]  }
 0x283   :  { %7097 = vmatpush1.bf16.msra.mxu0 %v10747_v16  ;;  %7945 = vmatpush1.bf16.msra.mxu1 %v10750_v19  ;;  %v10842_v16 = vld [vmem:[%s14831_s1 + $0x15ec] ss:$16 sps:$4 sm:$0xff]   ;;  %v10837_v19 = vld [vmem:[%s14831_s1 + $0x15e0] ss:$16 sps:$4 sm:$0xff]  }
 0x284   :  { %7098 = vmatprep.subr.bf16.mxu0 %v10755_v17  ;;  %7946 = vmatprep.subr.bf16.mxu1 %v10758_v18  ;;  %v10840_v17 = vld [vmem:[%s14831_s1 + $0x15e8] ss:$16 sps:$4 sm:$0xff]   ;;  %v10845_v18 = vld [vmem:[%s14831_s1 + $0x1604] ss:$16 sps:$4 sm:$0xff]  }
 0x285   :  { %7085 = vmatprep.mubr.bf16.mxu0 %v8492_v20  ;;  %7933 = vmatprep.mubr.bf16.mxu1 %v8492_v20  ;;  %v10848_v20 = vld [vmem:[%s14831_s1 + $0x160c] ss:$16 sps:$4 sm:$0xff]  }
 0x287   :  { %7099 = vmatpush1.bf16.msra.mxu0 %v10753_v21  ;;  %7947 = vmatpush1.bf16.msra.mxu1 %v10756_v22  ;;  %v8461_v21 = vcombine.low %v13494_v25, %v13499_v27  ;;  %v58_v22 = vld [vmem:[%s14832_s0 + $0x150] sm:$0xff]  ;;  %v10854_v27 = vld [vmem:[%s14831_s1 + $0x162c] ss:$16 sps:$4 sm:$0xff]  }
 0x288   :  { %7100 = vmatprep.subr.bf16.mxu0 %v10761_v23  ;;  %7948 = vmatprep.subr.bf16.mxu1 %v10764_v24  ;;  %v74_v23 = vld [vmem:[%s14832_s0 + $0x1d0] sm:$0xff] }
 0x289   :  { %v10843_v24 = vld [vmem:[%s14831_s1 + $0x1600] ss:$16 sps:$4 sm:$0xff]   ;;  %v10851_v25 = vld [vmem:[%s14831_s1 + $0x1624] ss:$16 sps:$4 sm:$0xff]  }
 0x28a   :  { %7086 = vmatmul.mubr.bf16.gmra.mrb[4].mxu0 %v8491_v26  ;;  %7934 = vmatmul.mubr.bf16.gmra.mrb[4].mxu1 %v8491_v26  ;;  %v10846_v26 = vld [vmem:[%s14831_s1 + $0x1608] ss:$16 sps:$4 sm:$0xff]  }
 0x28b   :  { %7101 = vmatpush1.bf16.msra.mxu0 %v10759_v28  ;;  %7949 = vmatpush1.bf16.msra.mxu1 %v10762_v29  ;;  %v8494_v28 = vcombine.high %v58_v22, %v74_v23  ;;  %v10849_v29 = vld [vmem:[%s14831_s1 + $0x1620] ss:$16 sps:$4 sm:$0xff]  }
 0x28c   :  { %7102 = vmatprep.subr.bf16.mxu0 %v10767_v30  ;;  %7950 = vmatprep.subr.bf16.mxu1 %v10770_v31  ;;  %v10852_v30 = vld [vmem:[%s14831_s1 + $0x1628] ss:$16 sps:$4 sm:$0xff]   ;;  %v10857_v31 = vld [vmem:[%s14831_s1 + $0x1644] ss:$16 sps:$4 sm:$0xff]  }
 0x28d   :  { %7128 = vmatprep.mubr.bf16.mxu0 %v8462_v32  ;;  %7976 = vmatprep.mubr.bf16.mxu1 %v8462_v32  ;;  %v10860_v32 = vld [vmem:[%s14831_s1 + $0x164c] ss:$16 sps:$4 sm:$0xff]  }
 0x28f   :  { %7103 = vmatpush1.bf16.msra.mxu0 %v10765_v34  ;;  %7951 = vmatpush1.bf16.msra.mxu1 %v10768_v36  ;;  %v8493_v34 = vcombine.low %v58_v22, %v74_v23  ;;  %v13706_v36 = vld [vmem:[%s14832_s0 + $0x58] sm:$0xff]  ;;  %v10935_v23 = vld [vmem:[%s14831_s1 + $0x17e4] ss:$16 sps:$4 sm:$0xff]  }
 0x290   :  { %7104 = vmatprep.subr.bf16.mxu0 %v10773_v33  ;;  %7952 = vmatprep.subr.bf16.mxu1 %v10776_v35  ;;  %v13711_v33 = vld [vmem:[%s14832_s0 + $0xd8] sm:$0xff]  ;;  %v10855_v35 = vld [vmem:[%s14831_s1 + $0x1640] ss:$16 sps:$4 sm:$0xff]  }
 0x291   :  { %v10930_v22 = vld [vmem:[%s14831_s1 + $0x17c8] ss:$16 sps:$4 sm:$0xff]  }
 0x293   :  { %7105 = vmatpush1.bf16.msra.mxu0 %v10771_v37  ;;  %7953 = vmatpush1.bf16.msra.mxu1 %v10774_v38  ;;  %v10858_v37 = vld [vmem:[%s14831_s1 + $0x1648] ss:$16 sps:$4 sm:$0xff]   ;;  %v10863_v38 = vld [vmem:[%s14831_s1 + $0x1664] ss:$16 sps:$4 sm:$0xff]  }
 0x294   :  { %7106 = vmatprep.subr.bf16.mxu0 %v10779_v39  ;;  %7954 = vmatprep.subr.bf16.mxu1 %v10782_v40  ;;  %v10866_v39 = vld [vmem:[%s14831_s1 + $0x166c] ss:$16 sps:$4 sm:$0xff]   ;;  %v8464_v40 = vcombine.high %v13706_v36, %v13711_v33 }
 0x297   :  { %7107 = vmatpush1.bf16.msra.mxu0 %v10777_v42  ;;  %7955 = vmatpush1.bf16.msra.mxu1 %v10780_v44  ;;  %v10861_v42 = vld [vmem:[%s14831_s1 + $0x1660] ss:$16 sps:$4 sm:$0xff]   ;;  %v10864_v44 = vld [vmem:[%s14831_s1 + $0x1668] ss:$16 sps:$4 sm:$0xff]  }
 0x298   :  { %7108 = vmatprep.subr.bf16.mxu0 %v10785_v41  ;;  %7956 = vmatprep.subr.bf16.mxu1 %v10788_v43  ;;  %v10869_v41 = vld [vmem:[%s14831_s1 + $0x1684] ss:$16 sps:$4 sm:$0xff]   ;;  %v10872_v43 = vld [vmem:[%s14831_s1 + $0x168c] ss:$16 sps:$4 sm:$0xff]  }
 0x29b   :  { %7109 = vmatpush1.bf16.msra.mxu0 %v10783_v45  ;;  %7957 = vmatpush1.bf16.msra.mxu1 %v10786_v46  ;;  %v10867_v45 = vld [vmem:[%s14831_s1 + $0x1680] ss:$16 sps:$4 sm:$0xff]   ;;  %v10870_v46 = vld [vmem:[%s14831_s1 + $0x1688] ss:$16 sps:$4 sm:$0xff]  }
 0x29c   :  { %7110 = vmatprep.subr.bf16.mxu0 %v10791_v47  ;;  %7958 = vmatprep.subr.bf16.mxu1 %v10794_v48  ;;  %v10875_v47 = vld [vmem:[%s14831_s1 + $0x16a4] ss:$16 sps:$4 sm:$0xff]   ;;  %v10878_v48 = vld [vmem:[%s14831_s1 + $0x16ac] ss:$16 sps:$4 sm:$0xff]  }
 0x29f   :  { %7111 = vmatpush1.bf16.msra.mxu0 %v10789_v51  ;;  %7959 = vmatpush1.bf16.msra.mxu1 %v10792_v52  ;;  %v10873_v51 = vld [vmem:[%s14831_s1 + $0x16a0] ss:$16 sps:$4 sm:$0xff]   ;;  %v10876_v52 = vld [vmem:[%s14831_s1 + $0x16a8] ss:$16 sps:$4 sm:$0xff]  }
 0x2a0   :  { %7112 = vmatprep.subr.bf16.mxu0 %v10797_v49  ;;  %7960 = vmatprep.subr.bf16.mxu1 %v10800_v50  ;;  %v10881_v49 = vld [vmem:[%s14831_s1 + $0x16c4] ss:$16 sps:$4 sm:$0xff]   ;;  %v10884_v50 = vld [vmem:[%s14831_s1 + $0x16cc] ss:$16 sps:$4 sm:$0xff]  }
 0x2a3   :  { %7113 = vmatpush1.bf16.msra.mxu0 %v10795_v53  ;;  %7961 = vmatpush1.bf16.msra.mxu1 %v10798_v54  ;;  %v10879_v53 = vld [vmem:[%s14831_s1 + $0x16c0] ss:$16 sps:$4 sm:$0xff]   ;;  %v10882_v54 = vld [vmem:[%s14831_s1 + $0x16c8] ss:$16 sps:$4 sm:$0xff]  }
 0x2a4   :  { %7114 = vmatprep.subr.bf16.mxu0 %v10803_v55  ;;  %7962 = vmatprep.subr.bf16.mxu1 %v10806_v56  ;;  %v10887_v55 = vld [vmem:[%s14831_s1 + $0x16e4] ss:$16 sps:$4 sm:$0xff]   ;;  %v10890_v56 = vld [vmem:[%s14831_s1 + $0x16ec] ss:$16 sps:$4 sm:$0xff]  }
 0x2a7   :  { %7115 = vmatpush1.bf16.msra.mxu0 %v10801_v59  ;;  %7963 = vmatpush1.bf16.msra.mxu1 %v10804_v60  ;;  %v10885_v59 = vld [vmem:[%s14831_s1 + $0x16e0] ss:$16 sps:$4 sm:$0xff]   ;;  %v10888_v60 = vld [vmem:[%s14831_s1 + $0x16e8] ss:$16 sps:$4 sm:$0xff]  }
 0x2a8   :  { %7116 = vmatprep.subr.bf16.mxu0 %v10809_v57  ;;  %7964 = vmatprep.subr.bf16.mxu1 %v10812_v58  ;;  %v10893_v57 = vld [vmem:[%s14831_s1 + $0x1704] ss:$16 sps:$4 sm:$0xff]   ;;  %v10896_v58 = vld [vmem:[%s14831_s1 + $0x170c] ss:$16 sps:$4 sm:$0xff]  }
 0x2ab   :  { %7117 = vmatpush1.bf16.msra.mxu0 %v10807_v61  ;;  %7965 = vmatpush1.bf16.msra.mxu1 %v10810_v62  ;;  %v10891_v61 = vld [vmem:[%s14831_s1 + $0x1700] ss:$16 sps:$4 sm:$0xff]   ;;  %v10894_v62 = vld [vmem:[%s14831_s1 + $0x1708] ss:$16 sps:$4 sm:$0xff]  }
 0x2ac   :  { %7118 = vmatprep.subr.bf16.mxu0 %v10815_v63  ;;  %7966 = vmatprep.subr.bf16.mxu1 %v10818_v0  ;;  %v10899_v63 = vld [vmem:[%s14831_s1 + $0x1724] ss:$16 sps:$4 sm:$0xff]   ;;  %v10902_v0 = vld [vmem:[%s14831_s1 + $0x172c] ss:$16 sps:$4 sm:$0xff]  }
 0x2af   :  { %7119 = vmatpush1.bf16.msra.mxu0 %v10813_v3  ;;  %7967 = vmatpush1.bf16.msra.mxu1 %v10816_v4  ;;  %v10897_v3 = vld [vmem:[%s14831_s1 + $0x1720] ss:$16 sps:$4 sm:$0xff]   ;;  %v10900_v4 = vld [vmem:[%s14831_s1 + $0x1728] ss:$16 sps:$4 sm:$0xff]  }
 0x2b0   :  { %7120 = vmatprep.subr.bf16.mxu0 %v10821_v1  ;;  %7968 = vmatprep.subr.bf16.mxu1 %v10824_v2  ;;  %v10905_v1 = vld [vmem:[%s14831_s1 + $0x1744] ss:$16 sps:$4 sm:$0xff]   ;;  %v10908_v2 = vld [vmem:[%s14831_s1 + $0x174c] ss:$16 sps:$4 sm:$0xff]  }
 0x2b3   :  { %7121 = vmatpush1.bf16.msra.mxu0 %v10819_v5  ;;  %7969 = vmatpush1.bf16.msra.mxu1 %v10822_v6  ;;  %v10903_v5 = vld [vmem:[%s14831_s1 + $0x1740] ss:$16 sps:$4 sm:$0xff]   ;;  %v10906_v6 = vld [vmem:[%s14831_s1 + $0x1748] ss:$16 sps:$4 sm:$0xff]  }
 0x2b4   :  { %7122 = vmatprep.subr.bf16.mxu0 %v10827_v7  ;;  %7970 = vmatprep.subr.bf16.mxu1 %v10830_v8  ;;  %v10911_v7 = vld [vmem:[%s14831_s1 + $0x1764] ss:$16 sps:$4 sm:$0xff]   ;;  %v10914_v8 = vld [vmem:[%s14831_s1 + $0x176c] ss:$16 sps:$4 sm:$0xff]  }
 0x2b7   :  { %7123 = vmatpush1.bf16.msra.mxu0 %v10825_v11  ;;  %7971 = vmatpush1.bf16.msra.mxu1 %v10828_v12  ;;  %v10909_v11 = vld [vmem:[%s14831_s1 + $0x1760] ss:$16 sps:$4 sm:$0xff]   ;;  %v10912_v12 = vld [vmem:[%s14831_s1 + $0x1768] ss:$16 sps:$4 sm:$0xff]  }
 0x2b8   :  { %7124 = vmatprep.subr.bf16.mxu0 %v10833_v9  ;;  %7972 = vmatprep.subr.bf16.mxu1 %v10836_v10  ;;  %v10917_v9 = vld [vmem:[%s14831_s1 + $0x1784] ss:$16 sps:$4 sm:$0xff]   ;;  %v10920_v10 = vld [vmem:[%s14831_s1 + $0x178c] ss:$16 sps:$4 sm:$0xff]  }
 0x2bb   :  { %7125 = vmatpush1.bf16.msra.mxu0 %v10831_v13  ;;  %7973 = vmatpush1.bf16.msra.mxu1 %v10834_v14  ;;  %v10915_v13 = vld [vmem:[%s14831_s1 + $0x1780] ss:$16 sps:$4 sm:$0xff]   ;;  %v10918_v14 = vld [vmem:[%s14831_s1 + $0x1788] ss:$16 sps:$4 sm:$0xff]  }
 0x2bc   :  { %7126 = vmatprep.subr.bf16.mxu0 %v10839_v15  ;;  %7974 = vmatprep.subr.bf16.mxu1 %v10842_v16  ;;  %v10923_v15 = vld [vmem:[%s14831_s1 + $0x17a4] ss:$16 sps:$4 sm:$0xff]   ;;  %v10926_v16 = vld [vmem:[%s14831_s1 + $0x17ac] ss:$16 sps:$4 sm:$0xff]  }
 0x2bf   :  { %7127 = vmatpush1.bf16.msra.mxu0 %v10837_v19  ;;  %7975 = vmatpush1.bf16.msra.mxu1 %v10840_v17  ;;  %v10921_v19 = vld [vmem:[%s14831_s1 + $0x17a0] ss:$16 sps:$4 sm:$0xff]   ;;  %v10924_v17 = vld [vmem:[%s14831_s1 + $0x17a8] ss:$16 sps:$4 sm:$0xff]  }
 0x2c0   :  { %7149 = vmatprep.subr.bf16.mxu0 %v10845_v18  ;;  %7997 = vmatprep.subr.bf16.mxu1 %v10848_v20  ;;  %v10929_v18 = vld [vmem:[%s14831_s1 + $0x17c4] ss:$16 sps:$4 sm:$0xff]   ;;  %v10932_v20 = vld [vmem:[%s14831_s1 + $0x17cc] ss:$16 sps:$4 sm:$0xff]  }
 0x2c2   :  { %7129 = vmatmul.mubr.bf16.vlgmr.msra.gmra.mrb[0].mxu0 %v8461_v21  ;;  %7977 = vmatmul.mubr.bf16.vlgmr.msra.gmra.mrb[0].mxu1 %v8461_v21  ;;  %v10927_v21 = vld [vmem:[%s14831_s1 + $0x17c0] ss:$16 sps:$4 sm:$0xff]  }
 0x2c3   :  { %7150 = vmatpush1.bf16.msra.mxu0 %v10843_v24  ;;  %7998 = vmatpush1.bf16.msra.mxu1 %v10846_v26  ;;  %v10938_v24 = vld [vmem:[%s14831_s1 + $0x17ec] ss:$16 sps:$4 sm:$0xff]   ;;  %v10933_v26 = vld [vmem:[%s14831_s1 + $0x17e0] ss:$16 sps:$4 sm:$0xff]  }
 0x2c4   :  { %7151 = vmatprep.subr.bf16.mxu0 %v10851_v25  ;;  %7999 = vmatprep.subr.bf16.mxu1 %v10854_v27  ;;  %v10936_v25 = vld [vmem:[%s14831_s1 + $0x17e8] ss:$16 sps:$4 sm:$0xff]   ;;  %v10941_v27 = vld [vmem:[%s14831_s1 + $0x1804] ss:$16 sps:$4 sm:$0xff]  }
 0x2c5   :  { %7138 = vmatprep.mubr.bf16.mxu0 %v8494_v28  ;;  %7986 = vmatprep.mubr.bf16.mxu1 %v8494_v28  ;;  %v10944_v28 = vld [vmem:[%s14831_s1 + $0x180c] ss:$16 sps:$4 sm:$0xff]  }
 0x2c7   :  { %7152 = vmatpush1.bf16.msra.mxu0 %v10849_v29  ;;  %8000 = vmatpush1.bf16.msra.mxu1 %v10852_v30  ;;  %v8463_v29 = vcombine.low %v13706_v36, %v13711_v33  ;;  %v59_v30 = vld [vmem:[%s14832_s0 + $0x158] sm:$0xff]  ;;  %v10947_v36 = vld [vmem:[%s14831_s1 + $0x1824] ss:$16 sps:$4 sm:$0xff]  }
 0x2c8   :  { %7153 = vmatprep.subr.bf16.mxu0 %v10857_v31  ;;  %8001 = vmatprep.subr.bf16.mxu1 %v10860_v32  ;;  %v75_v31 = vld [vmem:[%s14832_s0 + $0x1d8] sm:$0xff]  ;;  %v10939_v32 = vld [vmem:[%s14831_s1 + $0x1800] ss:$16 sps:$4 sm:$0xff]  }
 0x2c9   :  { %v10950_v33 = vld [vmem:[%s14831_s1 + $0x182c] ss:$16 sps:$4 sm:$0xff]  }
 0x2ca   :  { %7139 = vmatmul.mubr.bf16.gmra.mrb[4].mxu0 %v8493_v34  ;;  %7987 = vmatmul.mubr.bf16.gmra.mrb[4].mxu1 %v8493_v34  ;;  %v10942_v34 = vld [vmem:[%s14831_s1 + $0x1808] ss:$16 sps:$4 sm:$0xff]  }
 0x2cb   :  { %7154 = vmatpush1.bf16.msra.mxu0 %v10855_v35  ;;  %8002 = vmatpush1.bf16.msra.mxu1 %v10858_v37  ;;  %v8496_v35 = vcombine.high %v59_v30, %v75_v31  ;;  %v10945_v37 = vld [vmem:[%s14831_s1 + $0x1820] ss:$16 sps:$4 sm:$0xff]  }
 0x2cc   :  { %7155 = vmatprep.subr.bf16.mxu0 %v10863_v38  ;;  %8003 = vmatprep.subr.bf16.mxu1 %v10866_v39  ;;  %v10948_v38 = vld [vmem:[%s14831_s1 + $0x1828] ss:$16 sps:$4 sm:$0xff]   ;;  %v10953_v39 = vld [vmem:[%s14831_s1 + $0x1844] ss:$16 sps:$4 sm:$0xff]  }
 0x2cd   :  { %7181 = vmatprep.mubr.bf16.mxu0 %v8464_v40  ;;  %8029 = vmatprep.mubr.bf16.mxu1 %v8464_v40  ;;  %v10956_v40 = vld [vmem:[%s14831_s1 + $0x184c] ss:$16 sps:$4 sm:$0xff]  }
 0x2cf   :  { %7156 = vmatpush1.bf16.msra.mxu0 %v10861_v42  ;;  %8004 = vmatpush1.bf16.msra.mxu1 %v10864_v44  ;;  %v8495_v42 = vcombine.low %v59_v30, %v75_v31  ;;  %v13918_v44 = vld [vmem:[%s14832_s0 + $0x60] sm:$0xff]  ;;  %v11026_v30 = vld [vmem:[%s14831_s1 + $0x19c8] ss:$16 sps:$4 sm:$0xff]  }
 0x2d0   :  { %7157 = vmatprep.subr.bf16.mxu0 %v10869_v41  ;;  %8005 = vmatprep.subr.bf16.mxu1 %v10872_v43  ;;  %v13923_v41 = vld [vmem:[%s14832_s0 + $0xe0] sm:$0xff] }
 0x2d1   :  { %v10951_v43 = vld [vmem:[%s14831_s1 + $0x1840] ss:$16 sps:$4 sm:$0xff]   ;;  %v11031_v31 = vld [vmem:[%s14831_s1 + $0x19e4] ss:$16 sps:$4 sm:$0xff]  }
 0x2d3   :  { %7158 = vmatpush1.bf16.msra.mxu0 %v10867_v45  ;;  %8006 = vmatpush1.bf16.msra.mxu1 %v10870_v46  ;;  %v10954_v45 = vld [vmem:[%s14831_s1 + $0x1848] ss:$16 sps:$4 sm:$0xff]   ;;  %v10959_v46 = vld [vmem:[%s14831_s1 + $0x1864] ss:$16 sps:$4 sm:$0xff]  }
 0x2d4   :  { %7159 = vmatprep.subr.bf16.mxu0 %v10875_v47  ;;  %8007 = vmatprep.subr.bf16.mxu1 %v10878_v48  ;;  %v10962_v47 = vld [vmem:[%s14831_s1 + $0x186c] ss:$16 sps:$4 sm:$0xff]   ;;  %v8466_v48 = vcombine.high %v13918_v44, %v13923_v41 }
 0x2d7   :  { %7160 = vmatpush1.bf16.msra.mxu0 %v10873_v51  ;;  %8008 = vmatpush1.bf16.msra.mxu1 %v10876_v52  ;;  %v10957_v51 = vld [vmem:[%s14831_s1 + $0x1860] ss:$16 sps:$4 sm:$0xff]   ;;  %v10960_v52 = vld [vmem:[%s14831_s1 + $0x1868] ss:$16 sps:$4 sm:$0xff]  }
 0x2d8   :  { %7161 = vmatprep.subr.bf16.mxu0 %v10881_v49  ;;  %8009 = vmatprep.subr.bf16.mxu1 %v10884_v50  ;;  %v10965_v49 = vld [vmem:[%s14831_s1 + $0x1884] ss:$16 sps:$4 sm:$0xff]   ;;  %v10968_v50 = vld [vmem:[%s14831_s1 + $0x188c] ss:$16 sps:$4 sm:$0xff]  }
 0x2db   :  { %7162 = vmatpush1.bf16.msra.mxu0 %v10879_v53  ;;  %8010 = vmatpush1.bf16.msra.mxu1 %v10882_v54  ;;  %v10963_v53 = vld [vmem:[%s14831_s1 + $0x1880] ss:$16 sps:$4 sm:$0xff]   ;;  %v10966_v54 = vld [vmem:[%s14831_s1 + $0x1888] ss:$16 sps:$4 sm:$0xff]  }
 0x2dc   :  { %7163 = vmatprep.subr.bf16.mxu0 %v10887_v55  ;;  %8011 = vmatprep.subr.bf16.mxu1 %v10890_v56  ;;  %v10971_v55 = vld [vmem:[%s14831_s1 + $0x18a4] ss:$16 sps:$4 sm:$0xff]   ;;  %v10974_v56 = vld [vmem:[%s14831_s1 + $0x18ac] ss:$16 sps:$4 sm:$0xff]  }
 0x2df   :  { %7164 = vmatpush1.bf16.msra.mxu0 %v10885_v59  ;;  %8012 = vmatpush1.bf16.msra.mxu1 %v10888_v60  ;;  %v10969_v59 = vld [vmem:[%s14831_s1 + $0x18a0] ss:$16 sps:$4 sm:$0xff]   ;;  %v10972_v60 = vld [vmem:[%s14831_s1 + $0x18a8] ss:$16 sps:$4 sm:$0xff]  }
 0x2e0   :  { %7165 = vmatprep.subr.bf16.mxu0 %v10893_v57  ;;  %8013 = vmatprep.subr.bf16.mxu1 %v10896_v58  ;;  %v10977_v57 = vld [vmem:[%s14831_s1 + $0x18c4] ss:$16 sps:$4 sm:$0xff]   ;;  %v10980_v58 = vld [vmem:[%s14831_s1 + $0x18cc] ss:$16 sps:$4 sm:$0xff]  }
 0x2e3   :  { %7166 = vmatpush1.bf16.msra.mxu0 %v10891_v61  ;;  %8014 = vmatpush1.bf16.msra.mxu1 %v10894_v62  ;;  %v10975_v61 = vld [vmem:[%s14831_s1 + $0x18c0] ss:$16 sps:$4 sm:$0xff]   ;;  %v10978_v62 = vld [vmem:[%s14831_s1 + $0x18c8] ss:$16 sps:$4 sm:$0xff]  }
 0x2e4   :  { %7167 = vmatprep.subr.bf16.mxu0 %v10899_v63  ;;  %8015 = vmatprep.subr.bf16.mxu1 %v10902_v0  ;;  %v10983_v63 = vld [vmem:[%s14831_s1 + $0x18e4] ss:$16 sps:$4 sm:$0xff]   ;;  %v10986_v0 = vld [vmem:[%s14831_s1 + $0x18ec] ss:$16 sps:$4 sm:$0xff]  }
 0x2e7   :  { %7168 = vmatpush1.bf16.msra.mxu0 %v10897_v3  ;;  %8016 = vmatpush1.bf16.msra.mxu1 %v10900_v4  ;;  %v10981_v3 = vld [vmem:[%s14831_s1 + $0x18e0] ss:$16 sps:$4 sm:$0xff]   ;;  %v10984_v4 = vld [vmem:[%s14831_s1 + $0x18e8] ss:$16 sps:$4 sm:$0xff]  }
 0x2e8   :  { %7169 = vmatprep.subr.bf16.mxu0 %v10905_v1  ;;  %8017 = vmatprep.subr.bf16.mxu1 %v10908_v2  ;;  %v10989_v1 = vld [vmem:[%s14831_s1 + $0x1904] ss:$16 sps:$4 sm:$0xff]   ;;  %v10992_v2 = vld [vmem:[%s14831_s1 + $0x190c] ss:$16 sps:$4 sm:$0xff]  }
 0x2eb   :  { %7170 = vmatpush1.bf16.msra.mxu0 %v10903_v5  ;;  %8018 = vmatpush1.bf16.msra.mxu1 %v10906_v6  ;;  %v10987_v5 = vld [vmem:[%s14831_s1 + $0x1900] ss:$16 sps:$4 sm:$0xff]   ;;  %v10990_v6 = vld [vmem:[%s14831_s1 + $0x1908] ss:$16 sps:$4 sm:$0xff]  }
 0x2ec   :  { %7171 = vmatprep.subr.bf16.mxu0 %v10911_v7  ;;  %8019 = vmatprep.subr.bf16.mxu1 %v10914_v8  ;;  %v10995_v7 = vld [vmem:[%s14831_s1 + $0x1924] ss:$16 sps:$4 sm:$0xff]   ;;  %v10998_v8 = vld [vmem:[%s14831_s1 + $0x192c] ss:$16 sps:$4 sm:$0xff]  }
 0x2ef   :  { %7172 = vmatpush1.bf16.msra.mxu0 %v10909_v11  ;;  %8020 = vmatpush1.bf16.msra.mxu1 %v10912_v12  ;;  %v10993_v11 = vld [vmem:[%s14831_s1 + $0x1920] ss:$16 sps:$4 sm:$0xff]   ;;  %v10996_v12 = vld [vmem:[%s14831_s1 + $0x1928] ss:$16 sps:$4 sm:$0xff]  }
 0x2f0   :  { %7173 = vmatprep.subr.bf16.mxu0 %v10917_v9  ;;  %8021 = vmatprep.subr.bf16.mxu1 %v10920_v10  ;;  %v11001_v9 = vld [vmem:[%s14831_s1 + $0x1944] ss:$16 sps:$4 sm:$0xff]   ;;  %v11004_v10 = vld [vmem:[%s14831_s1 + $0x194c] ss:$16 sps:$4 sm:$0xff]  }
 0x2f3   :  { %7174 = vmatpush1.bf16.msra.mxu0 %v10915_v13  ;;  %8022 = vmatpush1.bf16.msra.mxu1 %v10918_v14  ;;  %v10999_v13 = vld [vmem:[%s14831_s1 + $0x1940] ss:$16 sps:$4 sm:$0xff]   ;;  %v11002_v14 = vld [vmem:[%s14831_s1 + $0x1948] ss:$16 sps:$4 sm:$0xff]  }
 0x2f4   :  { %7175 = vmatprep.subr.bf16.mxu0 %v10923_v15  ;;  %8023 = vmatprep.subr.bf16.mxu1 %v10926_v16  ;;  %v11007_v15 = vld [vmem:[%s14831_s1 + $0x1964] ss:$16 sps:$4 sm:$0xff]   ;;  %v11010_v16 = vld [vmem:[%s14831_s1 + $0x196c] ss:$16 sps:$4 sm:$0xff]  }
 0x2f7   :  { %7176 = vmatpush1.bf16.msra.mxu0 %v10921_v19  ;;  %8024 = vmatpush1.bf16.msra.mxu1 %v10924_v17  ;;  %v11005_v19 = vld [vmem:[%s14831_s1 + $0x1960] ss:$16 sps:$4 sm:$0xff]   ;;  %v11008_v17 = vld [vmem:[%s14831_s1 + $0x1968] ss:$16 sps:$4 sm:$0xff]  }
 0x2f8   :  { %7177 = vmatprep.subr.bf16.mxu0 %v10929_v18  ;;  %8025 = vmatprep.subr.bf16.mxu1 %v10932_v20  ;;  %v11013_v18 = vld [vmem:[%s14831_s1 + $0x1984] ss:$16 sps:$4 sm:$0xff]   ;;  %v11016_v20 = vld [vmem:[%s14831_s1 + $0x198c] ss:$16 sps:$4 sm:$0xff]  }
 0x2fb   :  { %7178 = vmatpush1.bf16.msra.mxu0 %v10927_v21  ;;  %8026 = vmatpush1.bf16.msra.mxu1 %v10930_v22  ;;  %v11011_v21 = vld [vmem:[%s14831_s1 + $0x1980] ss:$16 sps:$4 sm:$0xff]   ;;  %v11014_v22 = vld [vmem:[%s14831_s1 + $0x1988] ss:$16 sps:$4 sm:$0xff]  }
 0x2fc   :  { %7179 = vmatprep.subr.bf16.mxu0 %v10935_v23  ;;  %8027 = vmatprep.subr.bf16.mxu1 %v10938_v24  ;;  %v11019_v23 = vld [vmem:[%s14831_s1 + $0x19a4] ss:$16 sps:$4 sm:$0xff]   ;;  %v11022_v24 = vld [vmem:[%s14831_s1 + $0x19ac] ss:$16 sps:$4 sm:$0xff]  }
 0x2ff   :  { %7180 = vmatpush1.bf16.msra.mxu0 %v10933_v26  ;;  %8028 = vmatpush1.bf16.msra.mxu1 %v10936_v25  ;;  %v11017_v26 = vld [vmem:[%s14831_s1 + $0x19a0] ss:$16 sps:$4 sm:$0xff]   ;;  %v11020_v25 = vld [vmem:[%s14831_s1 + $0x19a8] ss:$16 sps:$4 sm:$0xff]  }
 0x300   :  { %7202 = vmatprep.subr.bf16.mxu0 %v10941_v27  ;;  %8050 = vmatprep.subr.bf16.mxu1 %v10944_v28  ;;  %v11025_v27 = vld [vmem:[%s14831_s1 + $0x19c4] ss:$16 sps:$4 sm:$0xff]   ;;  %v11028_v28 = vld [vmem:[%s14831_s1 + $0x19cc] ss:$16 sps:$4 sm:$0xff]  }
 0x302   :  { %7182 = vmatmul.mubr.bf16.vlgmr.msra.gmra.mrb[0].mxu0 %v8463_v29  ;;  %8030 = vmatmul.mubr.bf16.vlgmr.msra.gmra.mrb[0].mxu1 %v8463_v29  ;;  %v11023_v29 = vld [vmem:[%s14831_s1 + $0x19c0] ss:$16 sps:$4 sm:$0xff]  }
 0x303   :  { %7203 = vmatpush1.bf16.msra.mxu0 %v10939_v32  ;;  %8051 = vmatpush1.bf16.msra.mxu1 %v10942_v34  ;;  %v11034_v32 = vld [vmem:[%s14831_s1 + $0x19ec] ss:$16 sps:$4 sm:$0xff]   ;;  %v11029_v34 = vld [vmem:[%s14831_s1 + $0x19e0] ss:$16 sps:$4 sm:$0xff]  }
 0x304   :  { %7204 = vmatprep.subr.bf16.mxu0 %v10947_v36  ;;  %8052 = vmatprep.subr.bf16.mxu1 %v10950_v33  ;;  %v11032_v36 = vld [vmem:[%s14831_s1 + $0x19e8] ss:$16 sps:$4 sm:$0xff]   ;;  %v11037_v33 = vld [vmem:[%s14831_s1 + $0x1a04] ss:$16 sps:$4 sm:$0xff]  }
 0x305   :  { %7191 = vmatprep.mubr.bf16.mxu0 %v8496_v35  ;;  %8039 = vmatprep.mubr.bf16.mxu1 %v8496_v35  ;;  %v11040_v35 = vld [vmem:[%s14831_s1 + $0x1a0c] ss:$16 sps:$4 sm:$0xff]  }
 0x307   :  { %7205 = vmatpush1.bf16.msra.mxu0 %v10945_v37  ;;  %8053 = vmatpush1.bf16.msra.mxu1 %v10948_v38  ;;  %v8465_v37 = vcombine.low %v13918_v44, %v13923_v41  ;;  %v60_v38 = vld [vmem:[%s14832_s0 + $0x160] sm:$0xff]  ;;  %v11046_v41 = vld [vmem:[%s14831_s1 + $0x1a2c] ss:$16 sps:$4 sm:$0xff]  }
 0x308   :  { %7206 = vmatprep.subr.bf16.mxu0 %v10953_v39  ;;  %8054 = vmatprep.subr.bf16.mxu1 %v10956_v40  ;;  %v76_v39 = vld [vmem:[%s14832_s0 + $0x1e0] sm:$0xff] }
 0x309   :  { %v11035_v40 = vld [vmem:[%s14831_s1 + $0x1a00] ss:$16 sps:$4 sm:$0xff]   ;;  %v11043_v44 = vld [vmem:[%s14831_s1 + $0x1a24] ss:$16 sps:$4 sm:$0xff]  }
 0x30a   :  { %7192 = vmatmul.mubr.bf16.gmra.mrb[4].mxu0 %v8495_v42  ;;  %8040 = vmatmul.mubr.bf16.gmra.mrb[4].mxu1 %v8495_v42  ;;  %v11038_v42 = vld [vmem:[%s14831_s1 + $0x1a08] ss:$16 sps:$4 sm:$0xff]  }
 0x30b   :  { %7207 = vmatpush1.bf16.msra.mxu0 %v10951_v43  ;;  %8055 = vmatpush1.bf16.msra.mxu1 %v10954_v45  ;;  %v8498_v43 = vcombine.high %v60_v38, %v76_v39  ;;  %v11041_v45 = vld [vmem:[%s14831_s1 + $0x1a20] ss:$16 sps:$4 sm:$0xff]  }
 0x30c   :  { %7208 = vmatprep.subr.bf16.mxu0 %v10959_v46  ;;  %8056 = vmatprep.subr.bf16.mxu1 %v10962_v47  ;;  %v11044_v46 = vld [vmem:[%s14831_s1 + $0x1a28] ss:$16 sps:$4 sm:$0xff]   ;;  %v11049_v47 = vld [vmem:[%s14831_s1 + $0x1a44] ss:$16 sps:$4 sm:$0xff]  }
 0x30d   :  { %7234 = vmatprep.mubr.bf16.mxu0 %v8466_v48  ;;  %8082 = vmatprep.mubr.bf16.mxu1 %v8466_v48  ;;  %v11052_v48 = vld [vmem:[%s14831_s1 + $0x1a4c] ss:$16 sps:$4 sm:$0xff]  }
 0x30f   :  { %7209 = vmatpush1.bf16.msra.mxu0 %v10957_v51  ;;  %8057 = vmatpush1.bf16.msra.mxu1 %v10960_v52  ;;  %v8497_v51 = vcombine.low %v60_v38, %v76_v39  ;;  %v14130_v52 = vld [vmem:[%s14832_s0 + $0x68] sm:$0xff]  ;;  %v11127_v39 = vld [vmem:[%s14831_s1 + $0x1be4] ss:$16 sps:$4 sm:$0xff]  }
 0x310   :  { %7210 = vmatprep.subr.bf16.mxu0 %v10965_v49  ;;  %8058 = vmatprep.subr.bf16.mxu1 %v10968_v50  ;;  %v14135_v49 = vld [vmem:[%s14832_s0 + $0xe8] sm:$0xff]  ;;  %v11047_v50 = vld [vmem:[%s14831_s1 + $0x1a40] ss:$16 sps:$4 sm:$0xff]  }
 0x311   :  { %v11122_v38 = vld [vmem:[%s14831_s1 + $0x1bc8] ss:$16 sps:$4 sm:$0xff]  }
 0x313   :  { %7211 = vmatpush1.bf16.msra.mxu0 %v10963_v53  ;;  %8059 = vmatpush1.bf16.msra.mxu1 %v10966_v54  ;;  %v11050_v53 = vld [vmem:[%s14831_s1 + $0x1a48] ss:$16 sps:$4 sm:$0xff]   ;;  %v11055_v54 = vld [vmem:[%s14831_s1 + $0x1a64] ss:$16 sps:$4 sm:$0xff]  }
 0x314   :  { %7212 = vmatprep.subr.bf16.mxu0 %v10971_v55  ;;  %8060 = vmatprep.subr.bf16.mxu1 %v10974_v56  ;;  %v11058_v55 = vld [vmem:[%s14831_s1 + $0x1a6c] ss:$16 sps:$4 sm:$0xff]   ;;  %v8468_v56 = vcombine.high %v14130_v52, %v14135_v49 }
 0x317   :  { %7213 = vmatpush1.bf16.msra.mxu0 %v10969_v59  ;;  %8061 = vmatpush1.bf16.msra.mxu1 %v10972_v60  ;;  %v11053_v59 = vld [vmem:[%s14831_s1 + $0x1a60] ss:$16 sps:$4 sm:$0xff]   ;;  %v11056_v60 = vld [vmem:[%s14831_s1 + $0x1a68] ss:$16 sps:$4 sm:$0xff]  }
 0x318   :  { %7214 = vmatprep.subr.bf16.mxu0 %v10977_v57  ;;  %8062 = vmatprep.subr.bf16.mxu1 %v10980_v58  ;;  %v11061_v57 = vld [vmem:[%s14831_s1 + $0x1a84] ss:$16 sps:$4 sm:$0xff]   ;;  %v11064_v58 = vld [vmem:[%s14831_s1 + $0x1a8c] ss:$16 sps:$4 sm:$0xff]  }
 0x31b   :  { %7215 = vmatpush1.bf16.msra.mxu0 %v10975_v61  ;;  %8063 = vmatpush1.bf16.msra.mxu1 %v10978_v62  ;;  %v11059_v61 = vld [vmem:[%s14831_s1 + $0x1a80] ss:$16 sps:$4 sm:$0xff]   ;;  %v11062_v62 = vld [vmem:[%s14831_s1 + $0x1a88] ss:$16 sps:$4 sm:$0xff]  }
 0x31c   :  { %7216 = vmatprep.subr.bf16.mxu0 %v10983_v63  ;;  %8064 = vmatprep.subr.bf16.mxu1 %v10986_v0  ;;  %v11067_v63 = vld [vmem:[%s14831_s1 + $0x1aa4] ss:$16 sps:$4 sm:$0xff]   ;;  %v11070_v0 = vld [vmem:[%s14831_s1 + $0x1aac] ss:$16 sps:$4 sm:$0xff]  }
 0x31f   :  { %7217 = vmatpush1.bf16.msra.mxu0 %v10981_v3  ;;  %8065 = vmatpush1.bf16.msra.mxu1 %v10984_v4  ;;  %v11065_v3 = vld [vmem:[%s14831_s1 + $0x1aa0] ss:$16 sps:$4 sm:$0xff]   ;;  %v11068_v4 = vld [vmem:[%s14831_s1 + $0x1aa8] ss:$16 sps:$4 sm:$0xff]  }
 0x320   :  { %7218 = vmatprep.subr.bf16.mxu0 %v10989_v1  ;;  %8066 = vmatprep.subr.bf16.mxu1 %v10992_v2  ;;  %v11073_v1 = vld [vmem:[%s14831_s1 + $0x1ac4] ss:$16 sps:$4 sm:$0xff]   ;;  %v11076_v2 = vld [vmem:[%s14831_s1 + $0x1acc] ss:$16 sps:$4 sm:$0xff]  }
 0x323   :  { %7219 = vmatpush1.bf16.msra.mxu0 %v10987_v5  ;;  %8067 = vmatpush1.bf16.msra.mxu1 %v10990_v6  ;;  %v11071_v5 = vld [vmem:[%s14831_s1 + $0x1ac0] ss:$16 sps:$4 sm:$0xff]   ;;  %v11074_v6 = vld [vmem:[%s14831_s1 + $0x1ac8] ss:$16 sps:$4 sm:$0xff]  }
 0x324   :  { %7220 = vmatprep.subr.bf16.mxu0 %v10995_v7  ;;  %8068 = vmatprep.subr.bf16.mxu1 %v10998_v8  ;;  %v11079_v7 = vld [vmem:[%s14831_s1 + $0x1ae4] ss:$16 sps:$4 sm:$0xff]   ;;  %v11082_v8 = vld [vmem:[%s14831_s1 + $0x1aec] ss:$16 sps:$4 sm:$0xff]  }
 0x327   :  { %7221 = vmatpush1.bf16.msra.mxu0 %v10993_v11  ;;  %8069 = vmatpush1.bf16.msra.mxu1 %v10996_v12  ;;  %v11077_v11 = vld [vmem:[%s14831_s1 + $0x1ae0] ss:$16 sps:$4 sm:$0xff]   ;;  %v11080_v12 = vld [vmem:[%s14831_s1 + $0x1ae8] ss:$16 sps:$4 sm:$0xff]  }
 0x328   :  { %7222 = vmatprep.subr.bf16.mxu0 %v11001_v9  ;;  %8070 = vmatprep.subr.bf16.mxu1 %v11004_v10  ;;  %v11085_v9 = vld [vmem:[%s14831_s1 + $0x1b04] ss:$16 sps:$4 sm:$0xff]   ;;  %v11088_v10 = vld [vmem:[%s14831_s1 + $0x1b0c] ss:$16 sps:$4 sm:$0xff]  }
 0x32b   :  { %7223 = vmatpush1.bf16.msra.mxu0 %v10999_v13  ;;  %8071 = vmatpush1.bf16.msra.mxu1 %v11002_v14  ;;  %v11083_v13 = vld [vmem:[%s14831_s1 + $0x1b00] ss:$16 sps:$4 sm:$0xff]   ;;  %v11086_v14 = vld [vmem:[%s14831_s1 + $0x1b08] ss:$16 sps:$4 sm:$0xff]  }
 0x32c   :  { %7224 = vmatprep.subr.bf16.mxu0 %v11007_v15  ;;  %8072 = vmatprep.subr.bf16.mxu1 %v11010_v16  ;;  %v11091_v15 = vld [vmem:[%s14831_s1 + $0x1b24] ss:$16 sps:$4 sm:$0xff]   ;;  %v11094_v16 = vld [vmem:[%s14831_s1 + $0x1b2c] ss:$16 sps:$4 sm:$0xff]  }
 0x32f   :  { %7225 = vmatpush1.bf16.msra.mxu0 %v11005_v19  ;;  %8073 = vmatpush1.bf16.msra.mxu1 %v11008_v17  ;;  %v11089_v19 = vld [vmem:[%s14831_s1 + $0x1b20] ss:$16 sps:$4 sm:$0xff]   ;;  %v11092_v17 = vld [vmem:[%s14831_s1 + $0x1b28] ss:$16 sps:$4 sm:$0xff]  }
 0x330   :  { %7226 = vmatprep.subr.bf16.mxu0 %v11013_v18  ;;  %8074 = vmatprep.subr.bf16.mxu1 %v11016_v20  ;;  %v11097_v18 = vld [vmem:[%s14831_s1 + $0x1b44] ss:$16 sps:$4 sm:$0xff]   ;;  %v11100_v20 = vld [vmem:[%s14831_s1 + $0x1b4c] ss:$16 sps:$4 sm:$0xff]  }
 0x333   :  { %7227 = vmatpush1.bf16.msra.mxu0 %v11011_v21  ;;  %8075 = vmatpush1.bf16.msra.mxu1 %v11014_v22  ;;  %v11095_v21 = vld [vmem:[%s14831_s1 + $0x1b40] ss:$16 sps:$4 sm:$0xff]   ;;  %v11098_v22 = vld [vmem:[%s14831_s1 + $0x1b48] ss:$16 sps:$4 sm:$0xff]  }
 0x334   :  { %7228 = vmatprep.subr.bf16.mxu0 %v11019_v23  ;;  %8076 = vmatprep.subr.bf16.mxu1 %v11022_v24  ;;  %v11103_v23 = vld [vmem:[%s14831_s1 + $0x1b64] ss:$16 sps:$4 sm:$0xff]   ;;  %v11106_v24 = vld [vmem:[%s14831_s1 + $0x1b6c] ss:$16 sps:$4 sm:$0xff]  }
 0x337   :  { %7229 = vmatpush1.bf16.msra.mxu0 %v11017_v26  ;;  %8077 = vmatpush1.bf16.msra.mxu1 %v11020_v25  ;;  %v11101_v26 = vld [vmem:[%s14831_s1 + $0x1b60] ss:$16 sps:$4 sm:$0xff]   ;;  %v11104_v25 = vld [vmem:[%s14831_s1 + $0x1b68] ss:$16 sps:$4 sm:$0xff]  }
 0x338   :  { %7230 = vmatprep.subr.bf16.mxu0 %v11025_v27  ;;  %8078 = vmatprep.subr.bf16.mxu1 %v11028_v28  ;;  %v11109_v27 = vld [vmem:[%s14831_s1 + $0x1b84] ss:$16 sps:$4 sm:$0xff]   ;;  %v11112_v28 = vld [vmem:[%s14831_s1 + $0x1b8c] ss:$16 sps:$4 sm:$0xff]  }
 0x33b   :  { %7231 = vmatpush1.bf16.msra.mxu0 %v11023_v29  ;;  %8079 = vmatpush1.bf16.msra.mxu1 %v11026_v30  ;;  %v11107_v29 = vld [vmem:[%s14831_s1 + $0x1b80] ss:$16 sps:$4 sm:$0xff]   ;;  %v11110_v30 = vld [vmem:[%s14831_s1 + $0x1b88] ss:$16 sps:$4 sm:$0xff]  }
 0x33c   :  { %7232 = vmatprep.subr.bf16.mxu0 %v11031_v31  ;;  %8080 = vmatprep.subr.bf16.mxu1 %v11034_v32  ;;  %v11115_v31 = vld [vmem:[%s14831_s1 + $0x1ba4] ss:$16 sps:$4 sm:$0xff]   ;;  %v11118_v32 = vld [vmem:[%s14831_s1 + $0x1bac] ss:$16 sps:$4 sm:$0xff]  }
 0x33f   :  { %7233 = vmatpush1.bf16.msra.mxu0 %v11029_v34  ;;  %8081 = vmatpush1.bf16.msra.mxu1 %v11032_v36  ;;  %v11113_v34 = vld [vmem:[%s14831_s1 + $0x1ba0] ss:$16 sps:$4 sm:$0xff]   ;;  %v11116_v36 = vld [vmem:[%s14831_s1 + $0x1ba8] ss:$16 sps:$4 sm:$0xff]  }
 0x340   :  { %7255 = vmatprep.subr.bf16.mxu0 %v11037_v33  ;;  %8103 = vmatprep.subr.bf16.mxu1 %v11040_v35  ;;  %v11121_v33 = vld [vmem:[%s14831_s1 + $0x1bc4] ss:$16 sps:$4 sm:$0xff]   ;;  %v11124_v35 = vld [vmem:[%s14831_s1 + $0x1bcc] ss:$16 sps:$4 sm:$0xff]  }
 0x342   :  { %7235 = vmatmul.mubr.bf16.vlgmr.msra.gmra.mrb[0].mxu0 %v8465_v37  ;;  %8083 = vmatmul.mubr.bf16.vlgmr.msra.gmra.mrb[0].mxu1 %v8465_v37  ;;  %v11119_v37 = vld [vmem:[%s14831_s1 + $0x1bc0] ss:$16 sps:$4 sm:$0xff]  }
 0x343   :  { %7256 = vmatpush1.bf16.msra.mxu0 %v11035_v40  ;;  %8104 = vmatpush1.bf16.msra.mxu1 %v11038_v42  ;;  %v11130_v40 = vld [vmem:[%s14831_s1 + $0x1bec] ss:$16 sps:$4 sm:$0xff]   ;;  %v11125_v42 = vld [vmem:[%s14831_s1 + $0x1be0] ss:$16 sps:$4 sm:$0xff]  }
 0x344   :  { %7257 = vmatprep.subr.bf16.mxu0 %v11043_v44  ;;  %8105 = vmatprep.subr.bf16.mxu1 %v11046_v41  ;;  %v11128_v44 = vld [vmem:[%s14831_s1 + $0x1be8] ss:$16 sps:$4 sm:$0xff]   ;;  %v11133_v41 = vld [vmem:[%s14831_s1 + $0x1c04] ss:$16 sps:$4 sm:$0xff]  }
 0x345   :  { %7244 = vmatprep.mubr.bf16.mxu0 %v8498_v43  ;;  %8092 = vmatprep.mubr.bf16.mxu1 %v8498_v43  ;;  %v11136_v43 = vld [vmem:[%s14831_s1 + $0x1c0c] ss:$16 sps:$4 sm:$0xff]  }
 0x347   :  { %7258 = vmatpush1.bf16.msra.mxu0 %v11041_v45  ;;  %8106 = vmatpush1.bf16.msra.mxu1 %v11044_v46  ;;  %v8467_v45 = vcombine.low %v14130_v52, %v14135_v49  ;;  %v61_v46 = vld [vmem:[%s14832_s0 + $0x168] sm:$0xff]  ;;  %v11139_v52 = vld [vmem:[%s14831_s1 + $0x1c24] ss:$16 sps:$4 sm:$0xff]  }
 0x348   :  { %7259 = vmatprep.subr.bf16.mxu0 %v11049_v47  ;;  %8107 = vmatprep.subr.bf16.mxu1 %v11052_v48  ;;  %v77_v47 = vld [vmem:[%s14832_s0 + $0x1e8] sm:$0xff]  ;;  %v11131_v48 = vld [vmem:[%s14831_s1 + $0x1c00] ss:$16 sps:$4 sm:$0xff]  }
 0x349   :  { %v11142_v49 = vld [vmem:[%s14831_s1 + $0x1c2c] ss:$16 sps:$4 sm:$0xff]  }
 0x34a   :  { %7245 = vmatmul.mubr.bf16.gmra.mrb[4].mxu0 %v8497_v51  ;;  %8093 = vmatmul.mubr.bf16.gmra.mrb[4].mxu1 %v8497_v51  ;;  %v11134_v51 = vld [vmem:[%s14831_s1 + $0x1c08] ss:$16 sps:$4 sm:$0xff]  }
 0x34b   :  { %7260 = vmatpush1.bf16.msra.mxu0 %v11047_v50  ;;  %8108 = vmatpush1.bf16.msra.mxu1 %v11050_v53  ;;  %v8500_v50 = vcombine.high %v61_v46, %v77_v47  ;;  %v11137_v53 = vld [vmem:[%s14831_s1 + $0x1c20] ss:$16 sps:$4 sm:$0xff]  }
 0x34c   :  { %7261 = vmatprep.subr.bf16.mxu0 %v11055_v54  ;;  %8109 = vmatprep.subr.bf16.mxu1 %v11058_v55  ;;  %v11140_v54 = vld [vmem:[%s14831_s1 + $0x1c28] ss:$16 sps:$4 sm:$0xff]   ;;  %v11145_v55 = vld [vmem:[%s14831_s1 + $0x1c44] ss:$16 sps:$4 sm:$0xff]  }
 0x34d   :  { %7287 = vmatprep.mubr.bf16.mxu0 %v8468_v56  ;;  %8135 = vmatprep.mubr.bf16.mxu1 %v8468_v56  ;;  %v11148_v56 = vld [vmem:[%s14831_s1 + $0x1c4c] ss:$16 sps:$4 sm:$0xff]  }
 0x34f   :  { %7262 = vmatpush1.bf16.msra.mxu0 %v11053_v59  ;;  %8110 = vmatpush1.bf16.msra.mxu1 %v11056_v60  ;;  %v8499_v59 = vcombine.low %v61_v46, %v77_v47  ;;  %v14342_v60 = vld [vmem:[%s14832_s0 + $0x70] sm:$0xff]  ;;  %v11218_v46 = vld [vmem:[%s14831_s1 + $0x1dc8] ss:$16 sps:$4 sm:$0xff]  }
 0x350   :  { %7263 = vmatprep.subr.bf16.mxu0 %v11061_v57  ;;  %8111 = vmatprep.subr.bf16.mxu1 %v11064_v58  ;;  %v14347_v57 = vld [vmem:[%s14832_s0 + $0xf0] sm:$0xff] }
 0x351   :  { %v11143_v58 = vld [vmem:[%s14831_s1 + $0x1c40] ss:$16 sps:$4 sm:$0xff]   ;;  %v11223_v47 = vld [vmem:[%s14831_s1 + $0x1de4] ss:$16 sps:$4 sm:$0xff]  }
 0x353   :  { %7264 = vmatpush1.bf16.msra.mxu0 %v11059_v61  ;;  %8112 = vmatpush1.bf16.msra.mxu1 %v11062_v62  ;;  %v11146_v61 = vld [vmem:[%s14831_s1 + $0x1c48] ss:$16 sps:$4 sm:$0xff]   ;;  %v11151_v62 = vld [vmem:[%s14831_s1 + $0x1c64] ss:$16 sps:$4 sm:$0xff]  }
 0x354   :  { %7265 = vmatprep.subr.bf16.mxu0 %v11067_v63  ;;  %8113 = vmatprep.subr.bf16.mxu1 %v11070_v0  ;;  %v11154_v63 = vld [vmem:[%s14831_s1 + $0x1c6c] ss:$16 sps:$4 sm:$0xff]   ;;  %v8470_v0 = vcombine.high %v14342_v60, %v14347_v57 }
 0x357   :  { %7266 = vmatpush1.bf16.msra.mxu0 %v11065_v3  ;;  %8114 = vmatpush1.bf16.msra.mxu1 %v11068_v4  ;;  %v11149_v3 = vld [vmem:[%s14831_s1 + $0x1c60] ss:$16 sps:$4 sm:$0xff]   ;;  %v11152_v4 = vld [vmem:[%s14831_s1 + $0x1c68] ss:$16 sps:$4 sm:$0xff]  }
 0x358   :  { %7267 = vmatprep.subr.bf16.mxu0 %v11073_v1  ;;  %8115 = vmatprep.subr.bf16.mxu1 %v11076_v2  ;;  %v11157_v1 = vld [vmem:[%s14831_s1 + $0x1c84] ss:$16 sps:$4 sm:$0xff]   ;;  %v11160_v2 = vld [vmem:[%s14831_s1 + $0x1c8c] ss:$16 sps:$4 sm:$0xff]  }
 0x35b   :  { %7268 = vmatpush1.bf16.msra.mxu0 %v11071_v5  ;;  %8116 = vmatpush1.bf16.msra.mxu1 %v11074_v6  ;;  %v11155_v5 = vld [vmem:[%s14831_s1 + $0x1c80] ss:$16 sps:$4 sm:$0xff]   ;;  %v11158_v6 = vld [vmem:[%s14831_s1 + $0x1c88] ss:$16 sps:$4 sm:$0xff]  }
 0x35c   :  { %7269 = vmatprep.subr.bf16.mxu0 %v11079_v7  ;;  %8117 = vmatprep.subr.bf16.mxu1 %v11082_v8  ;;  %v11163_v7 = vld [vmem:[%s14831_s1 + $0x1ca4] ss:$16 sps:$4 sm:$0xff]   ;;  %v11166_v8 = vld [vmem:[%s14831_s1 + $0x1cac] ss:$16 sps:$4 sm:$0xff]  }
 0x35f   :  { %7270 = vmatpush1.bf16.msra.mxu0 %v11077_v11  ;;  %8118 = vmatpush1.bf16.msra.mxu1 %v11080_v12  ;;  %v11161_v11 = vld [vmem:[%s14831_s1 + $0x1ca0] ss:$16 sps:$4 sm:$0xff]   ;;  %v11164_v12 = vld [vmem:[%s14831_s1 + $0x1ca8] ss:$16 sps:$4 sm:$0xff]  }
 0x360   :  { %7271 = vmatprep.subr.bf16.mxu0 %v11085_v9  ;;  %8119 = vmatprep.subr.bf16.mxu1 %v11088_v10  ;;  %v11169_v9 = vld [vmem:[%s14831_s1 + $0x1cc4] ss:$16 sps:$4 sm:$0xff]   ;;  %v11172_v10 = vld [vmem:[%s14831_s1 + $0x1ccc] ss:$16 sps:$4 sm:$0xff]  }
 0x363   :  { %7272 = vmatpush1.bf16.msra.mxu0 %v11083_v13  ;;  %8120 = vmatpush1.bf16.msra.mxu1 %v11086_v14  ;;  %v11167_v13 = vld [vmem:[%s14831_s1 + $0x1cc0] ss:$16 sps:$4 sm:$0xff]   ;;  %v11170_v14 = vld [vmem:[%s14831_s1 + $0x1cc8] ss:$16 sps:$4 sm:$0xff]  }
 0x364   :  { %7273 = vmatprep.subr.bf16.mxu0 %v11091_v15  ;;  %8121 = vmatprep.subr.bf16.mxu1 %v11094_v16  ;;  %v11175_v15 = vld [vmem:[%s14831_s1 + $0x1ce4] ss:$16 sps:$4 sm:$0xff]   ;;  %v11178_v16 = vld [vmem:[%s14831_s1 + $0x1cec] ss:$16 sps:$4 sm:$0xff]  }
 0x367   :  { %7274 = vmatpush1.bf16.msra.mxu0 %v11089_v19  ;;  %8122 = vmatpush1.bf16.msra.mxu1 %v11092_v17  ;;  %v11173_v19 = vld [vmem:[%s14831_s1 + $0x1ce0] ss:$16 sps:$4 sm:$0xff]   ;;  %v11176_v17 = vld [vmem:[%s14831_s1 + $0x1ce8] ss:$16 sps:$4 sm:$0xff]  }
 0x368   :  { %7275 = vmatprep.subr.bf16.mxu0 %v11097_v18  ;;  %8123 = vmatprep.subr.bf16.mxu1 %v11100_v20  ;;  %v11181_v18 = vld [vmem:[%s14831_s1 + $0x1d04] ss:$16 sps:$4 sm:$0xff]   ;;  %v11184_v20 = vld [vmem:[%s14831_s1 + $0x1d0c] ss:$16 sps:$4 sm:$0xff]  }
 0x36b   :  { %7276 = vmatpush1.bf16.msra.mxu0 %v11095_v21  ;;  %8124 = vmatpush1.bf16.msra.mxu1 %v11098_v22  ;;  %v11179_v21 = vld [vmem:[%s14831_s1 + $0x1d00] ss:$16 sps:$4 sm:$0xff]   ;;  %v11182_v22 = vld [vmem:[%s14831_s1 + $0x1d08] ss:$16 sps:$4 sm:$0xff]  }
 0x36c   :  { %7277 = vmatprep.subr.bf16.mxu0 %v11103_v23  ;;  %8125 = vmatprep.subr.bf16.mxu1 %v11106_v24  ;;  %v11187_v23 = vld [vmem:[%s14831_s1 + $0x1d24] ss:$16 sps:$4 sm:$0xff]   ;;  %v11190_v24 = vld [vmem:[%s14831_s1 + $0x1d2c] ss:$16 sps:$4 sm:$0xff]  }
 0x36f   :  { %7278 = vmatpush1.bf16.msra.mxu0 %v11101_v26  ;;  %8126 = vmatpush1.bf16.msra.mxu1 %v11104_v25  ;;  %v11185_v26 = vld [vmem:[%s14831_s1 + $0x1d20] ss:$16 sps:$4 sm:$0xff]   ;;  %v11188_v25 = vld [vmem:[%s14831_s1 + $0x1d28] ss:$16 sps:$4 sm:$0xff]  }
 0x370   :  { %7279 = vmatprep.subr.bf16.mxu0 %v11109_v27  ;;  %8127 = vmatprep.subr.bf16.mxu1 %v11112_v28  ;;  %v11193_v27 = vld [vmem:[%s14831_s1 + $0x1d44] ss:$16 sps:$4 sm:$0xff]   ;;  %v11196_v28 = vld [vmem:[%s14831_s1 + $0x1d4c] ss:$16 sps:$4 sm:$0xff]  }
 0x373   :  { %7280 = vmatpush1.bf16.msra.mxu0 %v11107_v29  ;;  %8128 = vmatpush1.bf16.msra.mxu1 %v11110_v30  ;;  %v11191_v29 = vld [vmem:[%s14831_s1 + $0x1d40] ss:$16 sps:$4 sm:$0xff]   ;;  %v11194_v30 = vld [vmem:[%s14831_s1 + $0x1d48] ss:$16 sps:$4 sm:$0xff]  }
 0x374   :  { %7281 = vmatprep.subr.bf16.mxu0 %v11115_v31  ;;  %8129 = vmatprep.subr.bf16.mxu1 %v11118_v32  ;;  %v11199_v31 = vld [vmem:[%s14831_s1 + $0x1d64] ss:$16 sps:$4 sm:$0xff]   ;;  %v11202_v32 = vld [vmem:[%s14831_s1 + $0x1d6c] ss:$16 sps:$4 sm:$0xff]  }
 0x377   :  { %7282 = vmatpush1.bf16.msra.mxu0 %v11113_v34  ;;  %8130 = vmatpush1.bf16.msra.mxu1 %v11116_v36  ;;  %v11197_v34 = vld [vmem:[%s14831_s1 + $0x1d60] ss:$16 sps:$4 sm:$0xff]   ;;  %v11200_v36 = vld [vmem:[%s14831_s1 + $0x1d68] ss:$16 sps:$4 sm:$0xff]  }
 0x378   :  { %7283 = vmatprep.subr.bf16.mxu0 %v11121_v33  ;;  %8131 = vmatprep.subr.bf16.mxu1 %v11124_v35  ;;  %v11205_v33 = vld [vmem:[%s14831_s1 + $0x1d84] ss:$16 sps:$4 sm:$0xff]   ;;  %v11208_v35 = vld [vmem:[%s14831_s1 + $0x1d8c] ss:$16 sps:$4 sm:$0xff]  }
 0x37b   :  { %7284 = vmatpush1.bf16.msra.mxu0 %v11119_v37  ;;  %8132 = vmatpush1.bf16.msra.mxu1 %v11122_v38  ;;  %v11203_v37 = vld [vmem:[%s14831_s1 + $0x1d80] ss:$16 sps:$4 sm:$0xff]   ;;  %v11206_v38 = vld [vmem:[%s14831_s1 + $0x1d88] ss:$16 sps:$4 sm:$0xff]  }
 0x37c   :  { %7285 = vmatprep.subr.bf16.mxu0 %v11127_v39  ;;  %8133 = vmatprep.subr.bf16.mxu1 %v11130_v40  ;;  %v11211_v39 = vld [vmem:[%s14831_s1 + $0x1da4] ss:$16 sps:$4 sm:$0xff]   ;;  %v11214_v40 = vld [vmem:[%s14831_s1 + $0x1dac] ss:$16 sps:$4 sm:$0xff]  }
 0x37f   :  { %7286 = vmatpush1.bf16.msra.mxu0 %v11125_v42  ;;  %8134 = vmatpush1.bf16.msra.mxu1 %v11128_v44  ;;  %v11209_v42 = vld [vmem:[%s14831_s1 + $0x1da0] ss:$16 sps:$4 sm:$0xff]   ;;  %v11212_v44 = vld [vmem:[%s14831_s1 + $0x1da8] ss:$16 sps:$4 sm:$0xff]  }
 0x380   :  { %7308 = vmatprep.subr.bf16.mxu0 %v11133_v41  ;;  %8156 = vmatprep.subr.bf16.mxu1 %v11136_v43  ;;  %v11217_v41 = vld [vmem:[%s14831_s1 + $0x1dc4] ss:$16 sps:$4 sm:$0xff]   ;;  %v11220_v43 = vld [vmem:[%s14831_s1 + $0x1dcc] ss:$16 sps:$4 sm:$0xff]  }
 0x382   :  { %7288 = vmatmul.mubr.bf16.vlgmr.msra.gmra.mrb[0].mxu0 %v8467_v45  ;;  %8136 = vmatmul.mubr.bf16.vlgmr.msra.gmra.mrb[0].mxu1 %v8467_v45  ;;  %v11215_v45 = vld [vmem:[%s14831_s1 + $0x1dc0] ss:$16 sps:$4 sm:$0xff]  }
 0x383   :  { %7309 = vmatpush1.bf16.msra.mxu0 %v11131_v48  ;;  %8157 = vmatpush1.bf16.msra.mxu1 %v11134_v51  ;;  %v11226_v48 = vld [vmem:[%s14831_s1 + $0x1dec] ss:$16 sps:$4 sm:$0xff]   ;;  %v11221_v51 = vld [vmem:[%s14831_s1 + $0x1de0] ss:$16 sps:$4 sm:$0xff]  }
 0x384   :  { %7310 = vmatprep.subr.bf16.mxu0 %v11139_v52  ;;  %8158 = vmatprep.subr.bf16.mxu1 %v11142_v49  ;;  %v11224_v52 = vld [vmem:[%s14831_s1 + $0x1de8] ss:$16 sps:$4 sm:$0xff]   ;;  %v11229_v49 = vld [vmem:[%s14831_s1 + $0x1e04] ss:$16 sps:$4 sm:$0xff]  }
 0x385   :  { %7297 = vmatprep.mubr.bf16.mxu0 %v8500_v50  ;;  %8145 = vmatprep.mubr.bf16.mxu1 %v8500_v50  ;;  %v11232_v50 = vld [vmem:[%s14831_s1 + $0x1e0c] ss:$16 sps:$4 sm:$0xff]  }
 0x387   :  { %7311 = vmatpush1.bf16.msra.mxu0 %v11137_v53  ;;  %8159 = vmatpush1.bf16.msra.mxu1 %v11140_v54  ;;  %v8469_v53 = vcombine.low %v14342_v60, %v14347_v57  ;;  %v62_v54 = vld [vmem:[%s14832_s0 + $0x170] sm:$0xff]  ;;  %v11238_v57 = vld [vmem:[%s14831_s1 + $0x1e2c] ss:$16 sps:$4 sm:$0xff]  }
 0x388   :  { %7312 = vmatprep.subr.bf16.mxu0 %v11145_v55  ;;  %8160 = vmatprep.subr.bf16.mxu1 %v11148_v56  ;;  %v78_v55 = vld [vmem:[%s14832_s0 + $0x1f0] sm:$0xff] }
 0x389   :  { %v11227_v56 = vld [vmem:[%s14831_s1 + $0x1e00] ss:$16 sps:$4 sm:$0xff]   ;;  %v11235_v60 = vld [vmem:[%s14831_s1 + $0x1e24] ss:$16 sps:$4 sm:$0xff]  }
 0x38a   :  { %7298 = vmatmul.mubr.bf16.gmra.mrb[4].mxu0 %v8499_v59  ;;  %8146 = vmatmul.mubr.bf16.gmra.mrb[4].mxu1 %v8499_v59  ;;  %v11230_v59 = vld [vmem:[%s14831_s1 + $0x1e08] ss:$16 sps:$4 sm:$0xff]  }
 0x38b   :  { %7313 = vmatpush1.bf16.msra.mxu0 %v11143_v58  ;;  %8161 = vmatpush1.bf16.msra.mxu1 %v11146_v61  ;;  %v8502_v58 = vcombine.high %v62_v54, %v78_v55  ;;  %v11233_v61 = vld [vmem:[%s14831_s1 + $0x1e20] ss:$16 sps:$4 sm:$0xff]  }
 0x38c   :  { %7314 = vmatprep.subr.bf16.mxu0 %v11151_v62  ;;  %8162 = vmatprep.subr.bf16.mxu1 %v11154_v63  ;;  %v11236_v62 = vld [vmem:[%s14831_s1 + $0x1e28] ss:$16 sps:$4 sm:$0xff]   ;;  %v11241_v63 = vld [vmem:[%s14831_s1 + $0x1e44] ss:$16 sps:$4 sm:$0xff]  }
 0x38d   :  { %7340 = vmatprep.mubr.bf16.mxu0 %v8470_v0  ;;  %8188 = vmatprep.mubr.bf16.mxu1 %v8470_v0  ;;  %v11244_v0 = vld [vmem:[%s14831_s1 + $0x1e4c] ss:$16 sps:$4 sm:$0xff]  }
 0x38f   :  { %7315 = vmatpush1.bf16.msra.mxu0 %v11149_v3  ;;  %8163 = vmatpush1.bf16.msra.mxu1 %v11152_v4  ;;  %v8501_v3 = vcombine.low %v62_v54, %v78_v55  ;;  %v14554_v4 = vld [vmem:[%s14832_s0 + $0x78] sm:$0xff]  ;;  %v11319_v55 = vld [vmem:[%s14831_s1 + $0x1fe4] ss:$16 sps:$4 sm:$0xff]  }
 0x390   :  { %7316 = vmatprep.subr.bf16.mxu0 %v11157_v1  ;;  %8164 = vmatprep.subr.bf16.mxu1 %v11160_v2  ;;  %v14559_v1 = vld [vmem:[%s14832_s0 + $0xf8] sm:$0xff]  ;;  %v11239_v2 = vld [vmem:[%s14831_s1 + $0x1e40] ss:$16 sps:$4 sm:$0xff]  }
 0x391   :  { %v11314_v54 = vld [vmem:[%s14831_s1 + $0x1fc8] ss:$16 sps:$4 sm:$0xff]  }
 0x393   :  { %7317 = vmatpush1.bf16.msra.mxu0 %v11155_v5  ;;  %8165 = vmatpush1.bf16.msra.mxu1 %v11158_v6  ;;  %v11242_v5 = vld [vmem:[%s14831_s1 + $0x1e48] ss:$16 sps:$4 sm:$0xff]   ;;  %v11247_v6 = vld [vmem:[%s14831_s1 + $0x1e64] ss:$16 sps:$4 sm:$0xff]  }
 0x394   :  { %7318 = vmatprep.subr.bf16.mxu0 %v11163_v7  ;;  %8166 = vmatprep.subr.bf16.mxu1 %v11166_v8  ;;  %v11250_v7 = vld [vmem:[%s14831_s1 + $0x1e6c] ss:$16 sps:$4 sm:$0xff]   ;;  %v8472_v8 = vcombine.high %v14554_v4, %v14559_v1 }
 0x397   :  { %7319 = vmatpush1.bf16.msra.mxu0 %v11161_v11  ;;  %8167 = vmatpush1.bf16.msra.mxu1 %v11164_v12  ;;  %v11245_v11 = vld [vmem:[%s14831_s1 + $0x1e60] ss:$16 sps:$4 sm:$0xff]   ;;  %v11248_v12 = vld [vmem:[%s14831_s1 + $0x1e68] ss:$16 sps:$4 sm:$0xff]  }
 0x398   :  { %7320 = vmatprep.subr.bf16.mxu0 %v11169_v9  ;;  %8168 = vmatprep.subr.bf16.mxu1 %v11172_v10  ;;  %v11253_v9 = vld [vmem:[%s14831_s1 + $0x1e84] ss:$16 sps:$4 sm:$0xff]   ;;  %v11256_v10 = vld [vmem:[%s14831_s1 + $0x1e8c] ss:$16 sps:$4 sm:$0xff]  }
 0x39b   :  { %7321 = vmatpush1.bf16.msra.mxu0 %v11167_v13  ;;  %8169 = vmatpush1.bf16.msra.mxu1 %v11170_v14  ;;  %v11251_v13 = vld [vmem:[%s14831_s1 + $0x1e80] ss:$16 sps:$4 sm:$0xff]   ;;  %v11254_v14 = vld [vmem:[%s14831_s1 + $0x1e88] ss:$16 sps:$4 sm:$0xff]  }
 0x39c   :  { %7322 = vmatprep.subr.bf16.mxu0 %v11175_v15  ;;  %8170 = vmatprep.subr.bf16.mxu1 %v11178_v16  ;;  %v11259_v15 = vld [vmem:[%s14831_s1 + $0x1ea4] ss:$16 sps:$4 sm:$0xff]   ;;  %v11262_v16 = vld [vmem:[%s14831_s1 + $0x1eac] ss:$16 sps:$4 sm:$0xff]  }
 0x39f   :  { %7323 = vmatpush1.bf16.msra.mxu0 %v11173_v19  ;;  %8171 = vmatpush1.bf16.msra.mxu1 %v11176_v17  ;;  %v11257_v19 = vld [vmem:[%s14831_s1 + $0x1ea0] ss:$16 sps:$4 sm:$0xff]   ;;  %v11260_v17 = vld [vmem:[%s14831_s1 + $0x1ea8] ss:$16 sps:$4 sm:$0xff]  }
 0x3a0   :  { %7324 = vmatprep.subr.bf16.mxu0 %v11181_v18  ;;  %8172 = vmatprep.subr.bf16.mxu1 %v11184_v20  ;;  %v11265_v18 = vld [vmem:[%s14831_s1 + $0x1ec4] ss:$16 sps:$4 sm:$0xff]   ;;  %v11268_v20 = vld [vmem:[%s14831_s1 + $0x1ecc] ss:$16 sps:$4 sm:$0xff]  }
 0x3a3   :  { %7325 = vmatpush1.bf16.msra.mxu0 %v11179_v21  ;;  %8173 = vmatpush1.bf16.msra.mxu1 %v11182_v22  ;;  %v11263_v21 = vld [vmem:[%s14831_s1 + $0x1ec0] ss:$16 sps:$4 sm:$0xff]   ;;  %v11266_v22 = vld [vmem:[%s14831_s1 + $0x1ec8] ss:$16 sps:$4 sm:$0xff]  }
 0x3a4   :  { %7326 = vmatprep.subr.bf16.mxu0 %v11187_v23  ;;  %8174 = vmatprep.subr.bf16.mxu1 %v11190_v24  ;;  %v11271_v23 = vld [vmem:[%s14831_s1 + $0x1ee4] ss:$16 sps:$4 sm:$0xff]   ;;  %v11274_v24 = vld [vmem:[%s14831_s1 + $0x1eec] ss:$16 sps:$4 sm:$0xff]  }
 0x3a7   :  { %7327 = vmatpush1.bf16.msra.mxu0 %v11185_v26  ;;  %8175 = vmatpush1.bf16.msra.mxu1 %v11188_v25  ;;  %v11269_v26 = vld [vmem:[%s14831_s1 + $0x1ee0] ss:$16 sps:$4 sm:$0xff]   ;;  %v11272_v25 = vld [vmem:[%s14831_s1 + $0x1ee8] ss:$16 sps:$4 sm:$0xff]  }
 0x3a8   :  { %7328 = vmatprep.subr.bf16.mxu0 %v11193_v27  ;;  %8176 = vmatprep.subr.bf16.mxu1 %v11196_v28  ;;  %v11277_v27 = vld [vmem:[%s14831_s1 + $0x1f04] ss:$16 sps:$4 sm:$0xff]   ;;  %v11280_v28 = vld [vmem:[%s14831_s1 + $0x1f0c] ss:$16 sps:$4 sm:$0xff]  }
 0x3ab   :  { %7329 = vmatpush1.bf16.msra.mxu0 %v11191_v29  ;;  %8177 = vmatpush1.bf16.msra.mxu1 %v11194_v30  ;;  %v11275_v29 = vld [vmem:[%s14831_s1 + $0x1f00] ss:$16 sps:$4 sm:$0xff]   ;;  %v11278_v30 = vld [vmem:[%s14831_s1 + $0x1f08] ss:$16 sps:$4 sm:$0xff]  }
 0x3ac   :  { %7330 = vmatprep.subr.bf16.mxu0 %v11199_v31  ;;  %8178 = vmatprep.subr.bf16.mxu1 %v11202_v32  ;;  %v11283_v31 = vld [vmem:[%s14831_s1 + $0x1f24] ss:$16 sps:$4 sm:$0xff]   ;;  %v11286_v32 = vld [vmem:[%s14831_s1 + $0x1f2c] ss:$16 sps:$4 sm:$0xff]  }
 0x3af   :  { %7331 = vmatpush1.bf16.msra.mxu0 %v11197_v34  ;;  %8179 = vmatpush1.bf16.msra.mxu1 %v11200_v36  ;;  %v11281_v34 = vld [vmem:[%s14831_s1 + $0x1f20] ss:$16 sps:$4 sm:$0xff]   ;;  %v11284_v36 = vld [vmem:[%s14831_s1 + $0x1f28] ss:$16 sps:$4 sm:$0xff]  }
 0x3b0   :  { %7332 = vmatprep.subr.bf16.mxu0 %v11205_v33  ;;  %8180 = vmatprep.subr.bf16.mxu1 %v11208_v35  ;;  %v11289_v33 = vld [vmem:[%s14831_s1 + $0x1f44] ss:$16 sps:$4 sm:$0xff]   ;;  %v11292_v35 = vld [vmem:[%s14831_s1 + $0x1f4c] ss:$16 sps:$4 sm:$0xff]  }
 0x3b3   :  { %7333 = vmatpush1.bf16.msra.mxu0 %v11203_v37  ;;  %8181 = vmatpush1.bf16.msra.mxu1 %v11206_v38  ;;  %v11287_v37 = vld [vmem:[%s14831_s1 + $0x1f40] ss:$16 sps:$4 sm:$0xff]   ;;  %v11290_v38 = vld [vmem:[%s14831_s1 + $0x1f48] ss:$16 sps:$4 sm:$0xff]  }
 0x3b4   :  { %7334 = vmatprep.subr.bf16.mxu0 %v11211_v39  ;;  %8182 = vmatprep.subr.bf16.mxu1 %v11214_v40  ;;  %v11295_v39 = vld [vmem:[%s14831_s1 + $0x1f64] ss:$16 sps:$4 sm:$0xff]   ;;  %v11298_v40 = vld [vmem:[%s14831_s1 + $0x1f6c] ss:$16 sps:$4 sm:$0xff]  }
 0x3b7   :  { %7335 = vmatpush1.bf16.msra.mxu0 %v11209_v42  ;;  %8183 = vmatpush1.bf16.msra.mxu1 %v11212_v44  ;;  %v11293_v42 = vld [vmem:[%s14831_s1 + $0x1f60] ss:$16 sps:$4 sm:$0xff]   ;;  %v11296_v44 = vld [vmem:[%s14831_s1 + $0x1f68] ss:$16 sps:$4 sm:$0xff]  }
 0x3b8   :  { %7336 = vmatprep.subr.bf16.mxu0 %v11217_v41  ;;  %8184 = vmatprep.subr.bf16.mxu1 %v11220_v43  ;;  %v11301_v41 = vld [vmem:[%s14831_s1 + $0x1f84] ss:$16 sps:$4 sm:$0xff]   ;;  %v11304_v43 = vld [vmem:[%s14831_s1 + $0x1f8c] ss:$16 sps:$4 sm:$0xff]  }
 0x3bb   :  { %7337 = vmatpush1.bf16.msra.mxu0 %v11215_v45  ;;  %8185 = vmatpush1.bf16.msra.mxu1 %v11218_v46  ;;  %v11299_v45 = vld [vmem:[%s14831_s1 + $0x1f80] ss:$16 sps:$4 sm:$0xff]   ;;  %v11302_v46 = vld [vmem:[%s14831_s1 + $0x1f88] ss:$16 sps:$4 sm:$0xff]  }
 0x3bc   :  { %7338 = vmatprep.subr.bf16.mxu0 %v11223_v47  ;;  %8186 = vmatprep.subr.bf16.mxu1 %v11226_v48  ;;  %v11307_v47 = vld [vmem:[%s14831_s1 + $0x1fa4] ss:$16 sps:$4 sm:$0xff]   ;;  %v11310_v48 = vld [vmem:[%s14831_s1 + $0x1fac] ss:$16 sps:$4 sm:$0xff]  }
 0x3bf   :  { %7339 = vmatpush1.bf16.msra.mxu0 %v11221_v51  ;;  %8187 = vmatpush1.bf16.msra.mxu1 %v11224_v52  ;;  %v11305_v51 = vld [vmem:[%s14831_s1 + $0x1fa0] ss:$16 sps:$4 sm:$0xff]   ;;  %v11308_v52 = vld [vmem:[%s14831_s1 + $0x1fa8] ss:$16 sps:$4 sm:$0xff]  }
 0x3c0   :  { %7361 = vmatprep.subr.bf16.mxu0 %v11229_v49  ;;  %8209 = vmatprep.subr.bf16.mxu1 %v11232_v50  ;;  %v11313_v49 = vld [vmem:[%s14831_s1 + $0x1fc4] ss:$16 sps:$4 sm:$0xff]   ;;  %v11316_v50 = vld [vmem:[%s14831_s1 + $0x1fcc] ss:$16 sps:$4 sm:$0xff]  }
 0x3c2   :  { %7341 = vmatmul.mubr.bf16.vlgmr.msra.gmra.mrb[0].mxu0 %v8469_v53  ;;  %8189 = vmatmul.mubr.bf16.vlgmr.msra.gmra.mrb[0].mxu1 %v8469_v53  ;;  %v11311_v53 = vld [vmem:[%s14831_s1 + $0x1fc0] ss:$16 sps:$4 sm:$0xff]  }
 0x3c3   :  { %7362 = vmatpush1.bf16.msra.mxu0 %v11227_v56  ;;  %8210 = vmatpush1.bf16.msra.mxu1 %v11230_v59  ;;  %v11322_v56 = vld [vmem:[%s14831_s1 + $0x1fec] ss:$16 sps:$4 sm:$0xff]   ;;  %v11317_v59 = vld [vmem:[%s14831_s1 + $0x1fe0] ss:$16 sps:$4 sm:$0xff]  }
 0x3c4   :  { %7363 = vmatprep.subr.bf16.mxu0 %v11235_v60  ;;  %8211 = vmatprep.subr.bf16.mxu1 %v11238_v57  ;;  %v11320_v60 = vld [vmem:[%s14831_s1 + $0x1fe8] ss:$16 sps:$4 sm:$0xff]  }
 0x3c5   :  { %7350 = vmatprep.mubr.bf16.mxu0 %v8502_v58  ;;  %8198 = vmatprep.mubr.bf16.mxu1 %v8502_v58  ;;  %v63_v57 = vld [vmem:[%s14832_s0 + $0x178] sm:$0xff] }
 0x3c6   :  { %v79_v58 = vld [vmem:[%s14832_s0 + $0x1f8] sm:$0xff] }
 0x3c7   :  { %7364 = vmatpush1.bf16.msra.mxu0 %v11233_v61  ;;  %8212 = vmatpush1.bf16.msra.mxu1 %v11236_v62  ;;  %v8471_v61 = vcombine.low %v14554_v4, %v14559_v1  ;;  %v8504_v62 = vcombine.high %v63_v57, %v79_v58  ;;  %v1104_v4 = vld [vmem:[%s14833_s2] sm:$0xf] }
 0x3c8   :  { %7365 = vmatprep.subr.bf16.mxu0 %v11241_v63  ;;  %8213 = vmatprep.subr.bf16.mxu1 %v11244_v0  ;;  %v8503_v63 = vcombine.low %v63_v57, %v79_v58  ;;  %v1106_v0 = vlaneseq }
 0x3ca   :  { %7351 = vmatmul.mubr.bf16.gmra.mrb[4].mxu0 %v8501_v3  ;;  %8199 = vmatmul.mubr.bf16.gmra.mrb[4].mxu1 %v8501_v3  ;;  %v14734_v3 = vshrl.u32 %v1106_v0, 7  ;;  %vm8329_vm0 = vcmp.lt.s32.totalorder %v1106_v0, 512 }
 0x3cb   :  { %7366 = vmatpush1.bf16.msra.mxu0 %v11239_v2  ;;  %8214 = vmatpush1.bf16.msra.mxu1 %v11242_v5 }
 0x3cc   :  { %7367 = vmatprep.subr.bf16.mxu0 %v11247_v6  ;;  %8215 = vmatprep.subr.bf16.mxu1 %v11250_v7  ;;  %v1108_v2 = vsub.s32 0, %v14734_v3  ;;  %v1116_v5 = vsub.s32 2, %v14734_v3  ;;  %v1112_v1 = vsub.s32 1, %v14734_v3  ;;  %v1120_v6 = vsub.s32 3, %v14734_v3 }
 0x3cd   :  { %7393 = vmatprep.mubr.bf16.mxu0 %v8472_v8  ;;  %8241 = vmatprep.mubr.bf16.mxu1 %v8472_v8 }
 0x3ce   :  { %v14743_v7 = vrot.slane %v1104_v4, %v1108_v2  ;;  %v14745_v8 = vrot.slane %v1104_v4, %v1116_v5 }
 0x3cf   :  { %7368 = vmatpush1.bf16.msra.mxu0 %v11245_v11  ;;  %8216 = vmatpush1.bf16.msra.mxu1 %v11248_v12  ;;  %v14747_v11 = vrot.slane %v1104_v4, %v1112_v1  ;;  %v14749_v12 = vrot.slane %v1104_v4, %v1120_v6 }
 0x3d0   :  { %7369 = vmatprep.subr.bf16.mxu0 %v11253_v9  ;;  %8217 = vmatprep.subr.bf16.mxu1 %v11256_v10  ;;  %v11323_v9 = vmov 1966171168  }
 0x3d1   :  { %v8305_v10 = vunpack.c.l.s4 %v11323_v9 }
 0x3d3   :  { %7370 = vmatpush1.bf16.msra.mxu0 %v11251_v13  ;;  %8218 = vmatpush1.bf16.msra.mxu1 %v11254_v14 }
 0x3d4   :  { %7371 = vmatprep.subr.bf16.mxu0 %v11259_v15  ;;  %8219 = vmatprep.subr.bf16.mxu1 %v11262_v16 }
 0x3d7   :  { %7372 = vmatpush1.bf16.msra.mxu0 %v11257_v19  ;;  %8220 = vmatpush1.bf16.msra.mxu1 %v11260_v17 }
 0x3d8   :  { %7373 = vmatprep.subr.bf16.mxu0 %v11265_v18  ;;  %8221 = vmatprep.subr.bf16.mxu1 %v11268_v20 }
 0x3db   :  { %7374 = vmatpush1.bf16.msra.mxu0 %v11263_v21  ;;  %8222 = vmatpush1.bf16.msra.mxu1 %v11266_v22 }
 0x3dc   :  { %7375 = vmatprep.subr.bf16.mxu0 %v11271_v23  ;;  %8223 = vmatprep.subr.bf16.mxu1 %v11274_v24  ;;  %v8306_v23 = vunpack.c.0.s8 %v8305_v10 }
 0x3df   :  { %7376 = vmatpush1.bf16.msra.mxu0 %v11269_v26  ;;  %8224 = vmatpush1.bf16.msra.mxu1 %v11272_v25 }
 0x3e0   :  { %7377 = vmatprep.subr.bf16.mxu0 %v11277_v27  ;;  %8225 = vmatprep.subr.bf16.mxu1 %v11280_v28 }
 0x3e3   :  { %7378 = vmatpush1.bf16.msra.mxu0 %v11275_v29  ;;  %8226 = vmatpush1.bf16.msra.mxu1 %v11278_v30 }
 0x3e4   :  { %7379 = vmatprep.subr.bf16.mxu0 %v11283_v31  ;;  %8227 = vmatprep.subr.bf16.mxu1 %v11286_v32 }
 0x3e7   :  { %7380 = vmatpush1.bf16.msra.mxu0 %v11281_v34  ;;  %8228 = vmatpush1.bf16.msra.mxu1 %v11284_v36 }
 0x3e8   :  { %7381 = vmatprep.subr.bf16.mxu0 %v11289_v33  ;;  %8229 = vmatprep.subr.bf16.mxu1 %v11292_v35 }
 0x3eb   :  { %7382 = vmatpush1.bf16.msra.mxu0 %v11287_v37  ;;  %8230 = vmatpush1.bf16.msra.mxu1 %v11290_v38 }
 0x3ec   :  { %7383 = vmatprep.subr.bf16.mxu0 %v11295_v39  ;;  %8231 = vmatprep.subr.bf16.mxu1 %v11298_v40 }
 0x3ef   :  { %7384 = vmatpush1.bf16.msra.mxu0 %v11293_v42  ;;  %8232 = vmatpush1.bf16.msra.mxu1 %v11296_v44 }
 0x3f0   :  { %7385 = vmatprep.subr.bf16.mxu0 %v11301_v41  ;;  %8233 = vmatprep.subr.bf16.mxu1 %v11304_v43 }
 0x3f3   :  { %7386 = vmatpush1.bf16.msra.mxu0 %v11299_v45  ;;  %8234 = vmatpush1.bf16.msra.mxu1 %v11302_v46 }
 0x3f4   :  { %7387 = vmatprep.subr.bf16.mxu0 %v11307_v47  ;;  %8235 = vmatprep.subr.bf16.mxu1 %v11310_v48 }
 0x3f7   :  { %7388 = vmatpush1.bf16.msra.mxu0 %v11305_v51  ;;  %8236 = vmatpush1.bf16.msra.mxu1 %v11308_v52 }
 0x3f8   :  { %7389 = vmatprep.subr.bf16.mxu0 %v11313_v49  ;;  %8237 = vmatprep.subr.bf16.mxu1 %v11316_v50 }
 0x3fb   :  { %7390 = vmatpush1.bf16.msra.mxu0 %v11311_v53  ;;  %8238 = vmatpush1.bf16.msra.mxu1 %v11314_v54 }
 0x3fc   :  { %7391 = vmatprep.subr.bf16.mxu0 %v11319_v55  ;;  %8239 = vmatprep.subr.bf16.mxu1 %v11322_v56  ;;  %v14788_v56 = vsub.s32 %v8306_v23, %v14734_v3 }
 0x3ff   :  { %7392 = vmatpush1.bf16.msra.mxu0 %v11317_v59  ;;  %8240 = vmatpush1.bf16.msra.mxu1 %v11320_v60 }
 0x402   :  { %7394 = vmatmul.mubr.bf16.vlgmr.msra.gmra.mrb[0].mxu0 %v8471_v61  ;;  %8242 = vmatmul.mubr.bf16.vlgmr.msra.gmra.mrb[0].mxu1 %v8471_v61 }
 0x403   :  { %7403 = vmatprep.mubr.bf16.mxu0 %v8504_v62  ;;  %8251 = vmatprep.mubr.bf16.mxu1 %v8504_v62 }
 0x40a   :  { %7404 = vmatmul.mubr.bf16.gmra.mrb[4].mxu0 %v8503_v63  ;;  %8252 = vmatmul.mubr.bf16.gmra.mrb[4].mxu1 %v8503_v63 }
 0x4d5   :  { %v7395_v13 = vpop.f32.mrb[0].mxu0  ;;  %v8243_v14 = vpop.f32.mrb[0].mxu1 }
 0x4d6   :  { %v9530_v15 = vadd.f32 %v7395_v13, %v14743_v7  ;;  %v9538_v16 = vadd.f32 %v8243_v14, %v14745_v8  ;;  %v7397_v19 = vpop.f32.mrb[1].mxu0  ;;  %v8245_v17 = vpop.f32.mrb[1].mxu1 }
 0x4d7   :  { %v9531_v18 = vadd.f32 %v7397_v19, %v14747_v11  ;;  %v9539_v20 = vadd.f32 %v8245_v17, %v14749_v12  ;;  %v7399_v21 = vpop.f32.mrb[2].mxu0  ;;  %v8247_v22 = vpop.f32.mrb[2].mxu1 }
 0x4d8   :  { %v8333_v24 = vmul.f32 %v9530_v15, %v9530_v15  ;;  %8417 = vst [vmem:[%s14834_s3] sm:$0xff] %v9530_v15  ;;  %v8335_v26 = vmul.f32 %v9538_v16, %v9538_v16  ;;  %8419 = vst [vmem:[%s14834_s3 + $0x10] sm:$0xff] %v9538_v16  ;;  %v9532_v25 = vadd.f32 %v7399_v21, %v14743_v7  ;;  %v7401_v28 = vpop.f32.mrb[3].mxu0  ;;  %v8249_v29 = vpop.f32.mrb[3].mxu1 }
 0x4d9   :  { %v9540_v27 = vadd.f32 %v8247_v22, %v14745_v8  ;;  %v8334_v30 = vmul.f32 %v9531_v18, %v9531_v18  ;;  %8418 = vst [vmem:[%s14834_s3 + $0x8] sm:$0xff] %v9531_v18  ;;  %v8336_v31 = vmul.f32 %v9539_v20, %v9539_v20  ;;  %8420 = vst [vmem:[%s14834_s3 + $0x18] sm:$0xff] %v9539_v20 }
 0x4da   :  { %v9533_v32 = vadd.f32 %v7401_v28, %v14747_v11  ;;  %v9541_v34 = vadd.f32 %v8249_v29, %v14749_v12  ;;  %v8262_v36 = vadd.f32 %v9532_v25, %v9530_v15  ;;  %v8337_v33 = vmul.f32 %v9532_v25, %v9532_v25  ;;  %8421 = vst [vmem:[%s14834_s3 + $0x20] sm:$0xff] %v9532_v25 }
 0x4db   :  { %v8280_v35 = vadd.f32 %v9540_v27, %v9538_v16  ;;  %v8339_v37 = vmul.f32 %v9540_v27, %v9540_v27  ;;  %8423 = vst [vmem:[%s14834_s3 + $0x30] sm:$0xff] %v9540_v27 }
 0x4dc   :  { %v8271_v38 = vadd.f32 %v9533_v32, %v9531_v18  ;;  %v8338_v39 = vmul.f32 %v9533_v32, %v9533_v32  ;;  %8422 = vst [vmem:[%s14834_s3 + $0x28] sm:$0xff] %v9533_v32  ;;  %v8289_v40 = vadd.f32 %v9541_v34, %v9539_v20  ;;  %v8340_v42 = vmul.f32 %v9541_v34, %v9541_v34 }
 0x4dd   :  { %8424 = vst [vmem:[%s14834_s3 + $0x38] sm:$0xff] %v9541_v34  ;;  %v8349_v44 = vadd.f32 %v8337_v33, %v8333_v24  ;;  %v8367_v41 = vadd.f32 %v8339_v37, %v8335_v26  ;;  %v7405_v46 = vpop.f32.mrb[4].mxu0  ;;  %v8253_v47 = vpop.f32.mrb[4].mxu1 }
 0x4de   :  { %v8358_v43 = vadd.f32 %v8338_v39, %v8334_v30  ;;  %v8376_v45 = vadd.f32 %v8340_v42, %v8336_v31  ;;  %v9534_v48 = vadd.f32 %v7405_v46, %v14743_v7  ;;  %v9542_v51 = vadd.f32 %v8253_v47, %v14745_v8  ;;  %v7407_v52 = vpop.f32.mrb[5].mxu0  ;;  %v8255_v49 = vpop.f32.mrb[5].mxu1 }
 0x4df   :  { %v9535_v50 = vadd.f32 %v7407_v52, %v14747_v11  ;;  %v9543_v53 = vadd.f32 %v8255_v49, %v14749_v12  ;;  %v7409_v54 = vpop.f32.mrb[6].mxu0  ;;  %v8257_v55 = vpop.f32.mrb[6].mxu1 }
 0x4e0   :  { %v8263_v59 = vadd.f32 %v9534_v48, %v8262_v36  ;;  %v8341_v60 = vmul.f32 %v9534_v48, %v9534_v48  ;;  %8425 = vst [vmem:[%s14834_s3 + $0x40] sm:$0xff] %v9534_v48  ;;  %v8281_v57 = vadd.f32 %v9542_v51, %v8280_v35  ;;  %v8343_v58 = vmul.f32 %v9542_v51, %v9542_v51  ;;  %v7411_v61 = vpop.f32.mrb[7].mxu0  ;;  %v8259_v62 = vpop.f32.mrb[7].mxu1 }
 0x4e1   :  { %8427 = vst [vmem:[%s14834_s3 + $0x50] sm:$0xff] %v9542_v51  ;;  %v8272_v63 = vadd.f32 %v9535_v50, %v8271_v38  ;;  %v8342_v2 = vmul.f32 %v9535_v50, %v9535_v50  ;;  %8426 = vst [vmem:[%s14834_s3 + $0x48] sm:$0xff] %v9535_v50  ;;  %v8290_v3 = vadd.f32 %v9543_v53, %v8289_v40 }
 0x4e2   :  { %v8344_v5 = vmul.f32 %v9543_v53, %v9543_v53  ;;  %8428 = vst [vmem:[%s14834_s3 + $0x58] sm:$0xff] %v9543_v53  ;;  %v8350_v4 = vadd.f32 %v8349_v44, %v8341_v60  ;;  %v8368_v1 = vadd.f32 %v8367_v41, %v8343_v58  ;;  %v9536_v6 = vadd.f32 %v7409_v54, %v14743_v7 }
 0x4e3   :  { %v9544_v9 = vadd.f32 %v8257_v55, %v14745_v8  ;;  %v8359_v10 = vadd.f32 %v8358_v43, %v8342_v2  ;;  %v9537_v14 = vadd.f32 %v7411_v61, %v14747_v11  ;;  %v9545_v15 = vadd.f32 %v8259_v62, %v14749_v12 }
 0x4e4   :  { %v8377_v13 = vadd.f32 %v8376_v45, %v8344_v5  ;;  %v8264_v16 = vadd.f32 %v9536_v6, %v8263_v59  ;;  %v8345_v19 = vmul.f32 %v9536_v6, %v9536_v6  ;;  %8429 = vst [vmem:[%s14834_s3 + $0x60] sm:$0xff] %v9536_v6 }
 0x4e5   :  { %v8282_v17 = vadd.f32 %v9544_v9, %v8281_v57  ;;  %v8347_v18 = vmul.f32 %v9544_v9, %v9544_v9  ;;  %8431 = vst [vmem:[%s14834_s3 + $0x70] sm:$0xff] %v9544_v9  ;;  %v8273_v7 = vadd.f32 %v9537_v14, %v8272_v63  ;;  %v8346_v8 = vmul.f32 %v9537_v14, %v9537_v14 }
 0x4e6   :  { %8430 = vst [vmem:[%s14834_s3 + $0x68] sm:$0xff] %v9537_v14  ;;  %v8291_v11 = vadd.f32 %v9545_v15, %v8290_v3  ;;  %v8348_v12 = vmul.f32 %v9545_v15, %v9545_v15  ;;  %8432 = vst [vmem:[%s14834_s3 + $0x78] sm:$0xff] %v9545_v15  ;;  %v8265_v20 = vrot.slane %v8264_v16, 4  ;;  %v8351_v21 = vadd.f32 %v8350_v4, %v8345_v19 }
 0x4e7   :  { %v8283_v22 = vrot.slane %v8282_v17, 4  ;;  %v8369_v23 = vadd.f32 %v8368_v1, %v8347_v18  ;;  %v8274_v24 = vrot.slane %v8273_v7, 4  ;;  %v8360_v26 = vadd.f32 %v8359_v10, %v8346_v8 }
 0x4e8   :  { %v8292_v25 = vrot.slane %v8291_v11, 4  ;;  %v8378_v27 = vadd.f32 %v8377_v13, %v8348_v12  ;;  %v8266_v28 = vadd.f32 %v8265_v20, %v8264_v16  ;;  %v8352_v29 = vrot.slane %v8351_v21, 4 }
 0x4e9   :  { %v8284_v30 = vadd.f32 %v8283_v22, %v8282_v17  ;;  %v8370_v31 = vrot.slane %v8369_v23, 4  ;;  %v8275_v32 = vadd.f32 %v8274_v24, %v8273_v7  ;;  %v8361_v34 = vrot.slane %v8360_v26, 4 }
 0x4ea   :  { %v8293_v36 = vadd.f32 %v8292_v25, %v8291_v11  ;;  %v8379_v33 = vrot.slane %v8378_v27, 4  ;;  %v8267_v35 = vrot.slane %v8266_v28, 2  ;;  %v8353_v37 = vadd.f32 %v8352_v29, %v8351_v21 }
 0x4eb   :  { %v8285_v38 = vrot.slane %v8284_v30, 2  ;;  %v8371_v39 = vadd.f32 %v8370_v31, %v8369_v23  ;;  %v8276_v40 = vrot.slane %v8275_v32, 2  ;;  %v8362_v42 = vadd.f32 %v8361_v34, %v8360_v26 }
 0x4ec   :  { %v8294_v44 = vrot.slane %v8293_v36, 2  ;;  %v8380_v41 = vadd.f32 %v8379_v33, %v8378_v27  ;;  %v8268_v43 = vadd.f32 %v8267_v35, %v8266_v28  ;;  %v8354_v45 = vrot.slane %v8353_v37, 2 }
 0x4ed   :  { %v8286_v46 = vadd.f32 %v8285_v38, %v8284_v30  ;;  %v8372_v47 = vrot.slane %v8371_v39, 2  ;;  %v8277_v48 = vadd.f32 %v8276_v40, %v8275_v32  ;;  %v8363_v51 = vrot.slane %v8362_v42, 2 }
 0x4ee   :  { %v8295_v52 = vadd.f32 %v8294_v44, %v8293_v36  ;;  %v8381_v49 = vrot.slane %v8380_v41, 2  ;;  %v8269_v50 = vrot.slane %v8268_v43, 1  ;;  %v8355_v53 = vadd.f32 %v8354_v45, %v8353_v37 }
 0x4ef   :  { %v8287_v54 = vrot.slane %v8286_v46, 1  ;;  %v8373_v55 = vadd.f32 %v8372_v47, %v8371_v39  ;;  %v8278_v59 = vrot.slane %v8277_v48, 1  ;;  %v8364_v60 = vadd.f32 %v8363_v51, %v8362_v42 }
 0x4f0   :  { %v8296_v57 = vrot.slane %v8295_v52, 1  ;;  %v8382_v58 = vadd.f32 %v8381_v49, %v8380_v41  ;;  %v8270_v61 = vadd.f32 %v8269_v50, %v8268_v43  ;;  %v8356_v62 = vrot.slane %v8355_v53, 1 }
 0x4f1   :  { %v8288_v63 = vadd.f32 %v8287_v54, %v8286_v46  ;;  %v8374_v2 = vrot.slane %v8373_v55, 1  ;;  %v8279_v3 = vadd.f32 %v8278_v59, %v8277_v48  ;;  %v8365_v5 = vrot.slane %v8364_v60, 1 }
 0x4f2   :  { %v8297_v4 = vadd.f32 %v8296_v57, %v8295_v52  ;;  %v8383_v1 = vrot.slane %v8382_v58, 1  ;;  %v8357_v6 = vadd.f32 %v8356_v62, %v8355_v53 }
 0x4f3   :  { %v8375_v9 = vadd.f32 %v8374_v2, %v8373_v55  ;;  %v8302_v10 = vcombine.low %v8270_v61, %v8279_v3  ;;  %v8366_v13 = vadd.f32 %v8365_v5, %v8364_v60 }
 0x4f4   :  { %v8303_v14 = vcombine.low %v8288_v63, %v8297_v4  ;;  %v8384_v15 = vadd.f32 %v8383_v1, %v8382_v58 }
 0x4f5   :  { %v8310_v16 = vrot.slane %v8302_v10, %v14788_v56  ;;  %v8389_v19 = vcombine.low %v8357_v6, %v8366_v13 }
 0x4f6   :  { %v8317_v17 = vrot.slane %v8303_v14, %v14788_v56  ;;  %v8390_v18 = vcombine.low %v8375_v9, %v8384_v15 }
 0x4f7   :  { %v8397_v7 = vrot.slane %v8389_v19, %v14788_v56 }
 0x4f8   :  { %v8318_v8 = vcombine.low %v8310_v16, %v8317_v17  ;;  %v8404_v11 = vrot.slane %v8390_v18, %v14788_v56 }
 0x4fa   :  { %v8325_v12 = vrot.slane %v8318_v8, %v14788_v56  ;;  %v8405_v20 = vcombine.low %v8397_v7, %v8404_v11 }
 0x4fc   :  { %8331 = vst.msk [vmem:[%s14835_s4] ss:$8 sm:$0xf] %vm8329_vm0, %v8325_v12  ;;  %v8412_v21 = vrot.slane %v8405_v20, %v14788_v56 }
 0x4fe   :  { %9529 = vst.msk [vmem:[%s14835_s4 + $0x1] ss:$8 sm:$0xf] %vm8329_vm0, %v8412_v21 }

// kernel: discriminator_forward.9
= control target key start
LH: loop header
LB: loop body
LE: loop exit
PB: predicated region body
PF: predicated region fallthrough
CT: control target
= control target key end

     0   :  { %s9418_s1 = inlined_call_operand.vmem [shape: bf16[8192,128], index: 1, kind: input, shape index: {}]   ;;  %s9419_s0 = inlined_call_operand.vmem [shape: bf16[16,8192], index: 0, kind: input, shape index: {}]   ;;  %s9420_s2 = inlined_call_operand.vmem [shape: f32[1,128], index: 2, kind: input, shape index: {}]   ;;  %s9421_s3 = inlined_call_operand.vmem [shape: f32[16,128], index: 3, kind: output, shape index: {}]  }
   0x1   :  { %v7101_v0 = vld [vmem:[%s9418_s1 + $0x40] sm:$0xff]   ;;  %v7105_v4 = vld [vmem:[%s9418_s1 + $0x48] sm:$0xff]   ;;  %v7109_v8 = vld [vmem:[%s9418_s1 + $0x50] sm:$0xff]  }
   0x2   :  { %v7102_v1 = vld [vmem:[%s9418_s1 + $0xc0] sm:$0xff]   ;;  %6397 = vmatprep.subr.bf16.mxu0 %v7101_v0  ;;  %v7106_v5 = vld [vmem:[%s9418_s1 + $0xc8] sm:$0xff]   ;;  %v7110_v9 = vld [vmem:[%s9418_s1 + $0xd0] sm:$0xff]  }
   0x3   :  { %v7103_v2 = vld [vmem:[%s9418_s1] sm:$0xff]   ;;  %6419 = vmatprep.subr.bf16.mxu1 %v7102_v1  ;;  %v7107_v6 = vld [vmem:[%s9418_s1 + $0x8] sm:$0xff]   ;;  %v7111_v10 = vld [vmem:[%s9418_s1 + $0x10] sm:$0xff]  }
   0x4   :  { %v7104_v3 = vld [vmem:[%s9418_s1 + $0x80] sm:$0xff]   ;;  %6398 = vmatpush3.bf16.msra.mxu0 %v7103_v2  ;;  %v7108_v7 = vld [vmem:[%s9418_s1 + $0x88] sm:$0xff]   ;;  %v7112_v11 = vld [vmem:[%s9418_s1 + $0x90] sm:$0xff]  }
   0x5   :  { %6420 = vmatpush3.bf16.msra.mxu1 %v7104_v3  ;;  %6399 = vmatprep.subr.bf16.mxu0 %v7105_v4  ;;  %v7113_v12 = vld [vmem:[%s9418_s1 + $0x58] sm:$0xff]   ;;  %v7117_v16 = vld [vmem:[%s9418_s1 + $0x60] sm:$0xff]   ;;  %v7121_v20 = vld [vmem:[%s9418_s1 + $0x68] sm:$0xff]  }
   0x6   :  { %6421 = vmatprep.subr.bf16.mxu1 %v7106_v5  ;;  %v7114_v13 = vld [vmem:[%s9418_s1 + $0xd8] sm:$0xff]   ;;  %v7118_v17 = vld [vmem:[%s9418_s1 + $0xe0] sm:$0xff]   ;;  %v7122_v21 = vld [vmem:[%s9418_s1 + $0xe8] sm:$0xff]  }
   0x7   :  { %v7115_v14 = vld [vmem:[%s9418_s1 + $0x18] sm:$0xff]   ;;  %v7119_v18 = vld [vmem:[%s9418_s1 + $0x20] sm:$0xff]   ;;  %v7123_v22 = vld [vmem:[%s9418_s1 + $0x28] sm:$0xff]  }
   0x8   :  { %6400 = vmatpush3.bf16.msra.mxu0 %v7107_v6  ;;  %v7116_v15 = vld [vmem:[%s9418_s1 + $0x98] sm:$0xff]   ;;  %v7120_v19 = vld [vmem:[%s9418_s1 + $0xa0] sm:$0xff]   ;;  %v7124_v23 = vld [vmem:[%s9418_s1 + $0xa8] sm:$0xff]  }
   0x9   :  { %6422 = vmatpush3.bf16.msra.mxu1 %v7108_v7  ;;  %6401 = vmatprep.subr.bf16.mxu0 %v7109_v8  ;;  %v7125_v24 = vld [vmem:[%s9418_s1 + $0x70] sm:$0xff]   ;;  %v7129_v28 = vld [vmem:[%s9418_s1 + $0x78] sm:$0xff]   ;;  %v15_v32 = vld [vmem:[%s9419_s0] sm:$0xff] }
   0xa   :  { %6423 = vmatprep.subr.bf16.mxu1 %v7110_v9  ;;  %v7126_v25 = vld [vmem:[%s9418_s1 + $0xf0] sm:$0xff]   ;;  %v7130_v29 = vld [vmem:[%s9418_s1 + $0xf8] sm:$0xff]   ;;  %v47_v33 = vld [vmem:[%s9419_s0 + $0x100] sm:$0xff] }
   0xb   :  { %v7127_v26 = vld [vmem:[%s9418_s1 + $0x30] sm:$0xff]   ;;  %v7131_v30 = vld [vmem:[%s9418_s1 + $0x38] sm:$0xff]   ;;  %v16_v34 = vld [vmem:[%s9419_s0 + $0x8] sm:$0xff]  ;;  %v5821_v35 = vcombine.low %v15_v32, %v47_v33  ;;  %v5822_v36 = vcombine.high %v15_v32, %v47_v33 }
   0xc   :  { %6402 = vmatpush3.bf16.msra.mxu0 %v7111_v10  ;;  %v7128_v27 = vld [vmem:[%s9418_s1 + $0xb0] sm:$0xff]   ;;  %v7132_v31 = vld [vmem:[%s9418_s1 + $0xb8] sm:$0xff]   ;;  %v48_v37 = vld [vmem:[%s9419_s0 + $0x108] sm:$0xff] }
   0xd   :  { %6424 = vmatpush3.bf16.msra.mxu1 %v7112_v11  ;;  %6403 = vmatprep.subr.bf16.mxu0 %v7113_v12  ;;  %v5823_v38 = vcombine.low %v16_v34, %v48_v37  ;;  %v5824_v39 = vcombine.high %v16_v34, %v48_v37  ;;  %v7133_v40 = vld [vmem:[%s9418_s1 + $0x140] sm:$0xff]   ;;  %v7137_v44 = vld [vmem:[%s9418_s1 + $0x148] sm:$0xff]   ;;  %v7141_v48 = vld [vmem:[%s9418_s1 + $0x150] sm:$0xff]  }
   0xe   :  { %6425 = vmatprep.subr.bf16.mxu1 %v7114_v13  ;;  %4534 = vmatprep.mubr.bf16.mxu0 %v5822_v36  ;;  %v7134_v41 = vld [vmem:[%s9418_s1 + $0x1c0] sm:$0xff]   ;;  %v7138_v45 = vld [vmem:[%s9418_s1 + $0x1c8] sm:$0xff]   ;;  %v7142_v49 = vld [vmem:[%s9418_s1 + $0x1d0] sm:$0xff]  }
   0xf   :  { %4575 = vmatprep.mubr.bf16.mxu1 %v5824_v39  ;;  %v7135_v42 = vld [vmem:[%s9418_s1 + $0x100] sm:$0xff]   ;;  %v7139_v46 = vld [vmem:[%s9418_s1 + $0x108] sm:$0xff]   ;;  %v7143_v50 = vld [vmem:[%s9418_s1 + $0x110] sm:$0xff]  }
  0x10   :  { %6404 = vmatpush3.bf16.msra.mxu0 %v7115_v14  ;;  %v7136_v43 = vld [vmem:[%s9418_s1 + $0x180] sm:$0xff]   ;;  %v7140_v47 = vld [vmem:[%s9418_s1 + $0x188] sm:$0xff]   ;;  %v7144_v51 = vld [vmem:[%s9418_s1 + $0x190] sm:$0xff]  }
  0x11   :  { %6426 = vmatpush3.bf16.msra.mxu1 %v7116_v15  ;;  %6405 = vmatprep.subr.bf16.mxu0 %v7117_v16  ;;  %v7145_v52 = vld [vmem:[%s9418_s1 + $0x158] sm:$0xff]   ;;  %v7149_v56 = vld [vmem:[%s9418_s1 + $0x160] sm:$0xff]   ;;  %v7153_v60 = vld [vmem:[%s9418_s1 + $0x168] sm:$0xff]  }
  0x12   :  { %6427 = vmatprep.subr.bf16.mxu1 %v7118_v17  ;;  %v7146_v53 = vld [vmem:[%s9418_s1 + $0x1d8] sm:$0xff]   ;;  %v7150_v57 = vld [vmem:[%s9418_s1 + $0x1e0] sm:$0xff]   ;;  %v7154_v61 = vld [vmem:[%s9418_s1 + $0x1e8] sm:$0xff]  }
  0x13   :  { %v7147_v54 = vld [vmem:[%s9418_s1 + $0x118] sm:$0xff]   ;;  %v7151_v58 = vld [vmem:[%s9418_s1 + $0x120] sm:$0xff]   ;;  %v7155_v62 = vld [vmem:[%s9418_s1 + $0x128] sm:$0xff]  }
  0x14   :  { %6406 = vmatpush3.bf16.msra.mxu0 %v7119_v18  ;;  %v7148_v55 = vld [vmem:[%s9418_s1 + $0x198] sm:$0xff]   ;;  %v7152_v59 = vld [vmem:[%s9418_s1 + $0x1a0] sm:$0xff]   ;;  %v7156_v63 = vld [vmem:[%s9418_s1 + $0x1a8] sm:$0xff]  }
  0x15   :  { %6428 = vmatpush3.bf16.msra.mxu1 %v7120_v19  ;;  %6407 = vmatprep.subr.bf16.mxu0 %v7121_v20  ;;  %v7157_v0 = vld [vmem:[%s9418_s1 + $0x170] sm:$0xff]   ;;  %v7161_v4 = vld [vmem:[%s9418_s1 + $0x178] sm:$0xff]   ;;  %v7165_v16 = vld [vmem:[%s9418_s1 + $0x240] sm:$0xff]  }
  0x16   :  { %6429 = vmatprep.subr.bf16.mxu1 %v7122_v21  ;;  %v7158_v1 = vld [vmem:[%s9418_s1 + $0x1f0] sm:$0xff]   ;;  %v7162_v5 = vld [vmem:[%s9418_s1 + $0x1f8] sm:$0xff]   ;;  %v7166_v17 = vld [vmem:[%s9418_s1 + $0x2c0] sm:$0xff]  }
  0x17   :  { %v7159_v2 = vld [vmem:[%s9418_s1 + $0x130] sm:$0xff]   ;;  %v7163_v6 = vld [vmem:[%s9418_s1 + $0x138] sm:$0xff]   ;;  %v7167_v18 = vld [vmem:[%s9418_s1 + $0x200] sm:$0xff]  }
  0x18   :  { %6408 = vmatpush3.bf16.msra.mxu0 %v7123_v22  ;;  %v7160_v3 = vld [vmem:[%s9418_s1 + $0x1b0] sm:$0xff]   ;;  %v7164_v7 = vld [vmem:[%s9418_s1 + $0x1b8] sm:$0xff]   ;;  %v7168_v19 = vld [vmem:[%s9418_s1 + $0x280] sm:$0xff]  }
  0x19   :  { %6430 = vmatpush3.bf16.msra.mxu1 %v7124_v23  ;;  %6409 = vmatprep.subr.bf16.mxu0 %v7125_v24  ;;  %v17_v8 = vld [vmem:[%s9419_s0 + $0x10] sm:$0xff]  ;;  %v18_v12 = vld [vmem:[%s9419_s0 + $0x18] sm:$0xff]  ;;  %v7169_v20 = vld [vmem:[%s9418_s1 + $0x248] sm:$0xff]  }
  0x1a   :  { %6431 = vmatprep.subr.bf16.mxu1 %v7126_v25  ;;  %v49_v9 = vld [vmem:[%s9419_s0 + $0x110] sm:$0xff]  ;;  %v50_v13 = vld [vmem:[%s9419_s0 + $0x118] sm:$0xff]  ;;  %v7170_v21 = vld [vmem:[%s9418_s1 + $0x2c8] sm:$0xff]  }
  0x1b   :  { %v5825_v10 = vcombine.low %v17_v8, %v49_v9  ;;  %v5826_v11 = vcombine.high %v17_v8, %v49_v9  ;;  %v5827_v14 = vcombine.low %v18_v12, %v50_v13  ;;  %v5828_v15 = vcombine.high %v18_v12, %v50_v13  ;;  %v7171_v22 = vld [vmem:[%s9418_s1 + $0x208] sm:$0xff]   ;;  %v7173_v24 = vld [vmem:[%s9418_s1 + $0x250] sm:$0xff]   ;;  %v7181_v32 = vld [vmem:[%s9418_s1 + $0x260] sm:$0xff]  }
  0x1c   :  { %6410 = vmatpush3.bf16.msra.mxu0 %v7127_v26  ;;  %v7172_v23 = vld [vmem:[%s9418_s1 + $0x288] sm:$0xff]   ;;  %v7174_v25 = vld [vmem:[%s9418_s1 + $0x2d0] sm:$0xff]   ;;  %v7182_v33 = vld [vmem:[%s9418_s1 + $0x2e0] sm:$0xff]  }
  0x1d   :  { %6432 = vmatpush3.bf16.msra.mxu1 %v7128_v27  ;;  %6411 = vmatprep.subr.bf16.mxu0 %v7129_v28  ;;  %v7175_v26 = vld [vmem:[%s9418_s1 + $0x210] sm:$0xff]   ;;  %v7177_v28 = vld [vmem:[%s9418_s1 + $0x258] sm:$0xff]   ;;  %v7183_v34 = vld [vmem:[%s9418_s1 + $0x220] sm:$0xff]  }
  0x1e   :  { %6433 = vmatprep.subr.bf16.mxu1 %v7130_v29  ;;  %v7176_v27 = vld [vmem:[%s9418_s1 + $0x290] sm:$0xff]   ;;  %v7178_v29 = vld [vmem:[%s9418_s1 + $0x2d8] sm:$0xff]   ;;  %v7185_v36 = vld [vmem:[%s9418_s1 + $0x268] sm:$0xff]  }
  0x1f   :  { %v7186_v37 = vld [vmem:[%s9418_s1 + $0x2e8] sm:$0xff]   ;;  %v7213_v8 = vld [vmem:[%s9418_s1 + $0x360] sm:$0xff]  }
  0x20   :  { %6412 = vmatpush3.bf16.msra.mxu0 %v7131_v30  ;;  %v7179_v30 = vld [vmem:[%s9418_s1 + $0x218] sm:$0xff]   ;;  %v7188_v39 = vld [vmem:[%s9418_s1 + $0x2a8] sm:$0xff]   ;;  %v7214_v9 = vld [vmem:[%s9418_s1 + $0x3e0] sm:$0xff]  }
  0x21   :  { %6434 = vmatpush3.bf16.msra.mxu1 %v7132_v31  ;;  %6441 = vmatprep.subr.bf16.mxu0 %v7133_v40  ;;  %v7180_v31 = vld [vmem:[%s9418_s1 + $0x298] sm:$0xff]   ;;  %v7189_v40 = vld [vmem:[%s9418_s1 + $0x270] sm:$0xff]   ;;  %v7217_v12 = vld [vmem:[%s9418_s1 + $0x368] sm:$0xff]  }
  0x22   :  { %6463 = vmatprep.subr.bf16.mxu1 %v7134_v41  ;;  %v7190_v41 = vld [vmem:[%s9418_s1 + $0x2f0] sm:$0xff]   ;;  %v7218_v13 = vld [vmem:[%s9418_s1 + $0x3e8] sm:$0xff]  }
  0x23   :  { %4535 = vmatmul.mubr.bf16.vlgmr.msra.gmra.mrb[0].mxu0 %v5821_v35  ;;  %v7184_v35 = vld [vmem:[%s9418_s1 + $0x2a0] sm:$0xff]  }
  0x24   :  { %4576 = vmatmul.mubr.bf16.vlgmr.msra.gmra.mrb[0].mxu1 %v5823_v38  ;;  %6442 = vmatpush3.bf16.msra.mxu0 %v7135_v42  ;;  %v7187_v38 = vld [vmem:[%s9418_s1 + $0x228] sm:$0xff]   ;;  %v7191_v42 = vld [vmem:[%s9418_s1 + $0x230] sm:$0xff]  }
  0x25   :  { %6464 = vmatpush3.bf16.msra.mxu1 %v7136_v43  ;;  %6443 = vmatprep.subr.bf16.mxu0 %v7137_v44  ;;  %v7192_v43 = vld [vmem:[%s9418_s1 + $0x2b0] sm:$0xff]   ;;  %v7193_v44 = vld [vmem:[%s9418_s1 + $0x278] sm:$0xff]  }
  0x26   :  { %6465 = vmatprep.subr.bf16.mxu1 %v7138_v45  ;;  %4616 = vmatprep.mubr.bf16.mxu0 %v5826_v11  ;;  %v7194_v45 = vld [vmem:[%s9418_s1 + $0x2f8] sm:$0xff]   ;;  %v7216_v11 = vld [vmem:[%s9418_s1 + $0x3a0] sm:$0xff]  }
  0x27   :  { %4657 = vmatprep.mubr.bf16.mxu1 %v5828_v15  ;;  %v7220_v15 = vld [vmem:[%s9418_s1 + $0x3a8] sm:$0xff]  }
  0x28   :  { %6444 = vmatpush3.bf16.msra.mxu0 %v7139_v46  ;;  %v7195_v46 = vld [vmem:[%s9418_s1 + $0x238] sm:$0xff]  }
  0x29   :  { %6466 = vmatpush3.bf16.msra.mxu1 %v7140_v47  ;;  %6445 = vmatprep.subr.bf16.mxu0 %v7141_v48  ;;  %v7196_v47 = vld [vmem:[%s9418_s1 + $0x2b8] sm:$0xff]   ;;  %v19_v48 = vld [vmem:[%s9419_s0 + $0x20] sm:$0xff] }
  0x2a   :  { %6467 = vmatprep.subr.bf16.mxu1 %v7142_v49  ;;  %v51_v49 = vld [vmem:[%s9419_s0 + $0x120] sm:$0xff] }
  0x2c   :  { %6446 = vmatpush3.bf16.msra.mxu0 %v7143_v50  ;;  %v20_v50 = vld [vmem:[%s9419_s0 + $0x28] sm:$0xff] }
  0x2d   :  { %6468 = vmatpush3.bf16.msra.mxu1 %v7144_v51  ;;  %6447 = vmatprep.subr.bf16.mxu0 %v7145_v52  ;;  %v52_v51 = vld [vmem:[%s9419_s0 + $0x128] sm:$0xff]  ;;  %v5829_v52 = vcombine.low %v19_v48, %v51_v49 }
  0x2e   :  { %6469 = vmatprep.subr.bf16.mxu1 %v7146_v53  ;;  %v5830_v53 = vcombine.high %v19_v48, %v51_v49  ;;  %v7245_v48 = vld [vmem:[%s9418_s1 + $0x460] sm:$0xff]  }
  0x2f   :  { %v7246_v49 = vld [vmem:[%s9418_s1 + $0x4e0] sm:$0xff]  }
  0x30   :  { %6448 = vmatpush3.bf16.msra.mxu0 %v7147_v54  ;;  %v5831_v54 = vcombine.low %v20_v50, %v52_v51 }
  0x31   :  { %6470 = vmatpush3.bf16.msra.mxu1 %v7148_v55  ;;  %6449 = vmatprep.subr.bf16.mxu0 %v7149_v56  ;;  %v5832_v55 = vcombine.high %v20_v50, %v52_v51  ;;  %v7197_v56 = vld [vmem:[%s9418_s1 + $0x340] sm:$0xff]  }
  0x32   :  { %6471 = vmatprep.subr.bf16.mxu1 %v7150_v57  ;;  %v7198_v57 = vld [vmem:[%s9418_s1 + $0x3c0] sm:$0xff]  }
  0x33   :  { %v7247_v50 = vld [vmem:[%s9418_s1 + $0x420] sm:$0xff]  }
  0x34   :  { %6450 = vmatpush3.bf16.msra.mxu0 %v7151_v58  ;;  %v7199_v58 = vld [vmem:[%s9418_s1 + $0x300] sm:$0xff]  }
  0x35   :  { %6472 = vmatpush3.bf16.msra.mxu1 %v7152_v59  ;;  %6451 = vmatprep.subr.bf16.mxu0 %v7153_v60  ;;  %v7200_v59 = vld [vmem:[%s9418_s1 + $0x380] sm:$0xff]   ;;  %v7201_v60 = vld [vmem:[%s9418_s1 + $0x348] sm:$0xff]  }
  0x36   :  { %6473 = vmatprep.subr.bf16.mxu1 %v7154_v61  ;;  %v7202_v61 = vld [vmem:[%s9418_s1 + $0x3c8] sm:$0xff]   ;;  %v7248_v51 = vld [vmem:[%s9418_s1 + $0x4a0] sm:$0xff]  }
  0x38   :  { %6452 = vmatpush3.bf16.msra.mxu0 %v7155_v62  ;;  %v7203_v62 = vld [vmem:[%s9418_s1 + $0x308] sm:$0xff]  }
  0x39   :  { %6474 = vmatpush3.bf16.msra.mxu1 %v7156_v63  ;;  %6453 = vmatprep.subr.bf16.mxu0 %v7157_v0  ;;  %v7204_v63 = vld [vmem:[%s9418_s1 + $0x388] sm:$0xff]   ;;  %v7205_v0 = vld [vmem:[%s9418_s1 + $0x350] sm:$0xff]  }
  0x3a   :  { %6475 = vmatprep.subr.bf16.mxu1 %v7158_v1  ;;  %v7206_v1 = vld [vmem:[%s9418_s1 + $0x3d0] sm:$0xff]  }
  0x3c   :  { %6454 = vmatpush3.bf16.msra.mxu0 %v7159_v2  ;;  %v7207_v2 = vld [vmem:[%s9418_s1 + $0x310] sm:$0xff]  }
  0x3d   :  { %6476 = vmatpush3.bf16.msra.mxu1 %v7160_v3  ;;  %6455 = vmatprep.subr.bf16.mxu0 %v7161_v4  ;;  %v7208_v3 = vld [vmem:[%s9418_s1 + $0x390] sm:$0xff]   ;;  %v7209_v4 = vld [vmem:[%s9418_s1 + $0x358] sm:$0xff]  }
  0x3e   :  { %6477 = vmatprep.subr.bf16.mxu1 %v7162_v5  ;;  %v7210_v5 = vld [vmem:[%s9418_s1 + $0x3d8] sm:$0xff]  }
  0x40   :  { %6456 = vmatpush3.bf16.msra.mxu0 %v7163_v6  ;;  %v7211_v6 = vld [vmem:[%s9418_s1 + $0x318] sm:$0xff]  }
  0x41   :  { %6478 = vmatpush3.bf16.msra.mxu1 %v7164_v7  ;;  %6485 = vmatprep.subr.bf16.mxu0 %v7165_v16  ;;  %v7212_v7 = vld [vmem:[%s9418_s1 + $0x398] sm:$0xff]   ;;  %v7221_v16 = vld [vmem:[%s9418_s1 + $0x370] sm:$0xff]  }
  0x42   :  { %6507 = vmatprep.subr.bf16.mxu1 %v7166_v17  ;;  %v7222_v17 = vld [vmem:[%s9418_s1 + $0x3f0] sm:$0xff]  }
  0x43   :  { %4617 = vmatmul.mubr.bf16.vlgmr.msra.gmra.mrb[4].mxu0 %v5825_v10  ;;  %v7215_v10 = vld [vmem:[%s9418_s1 + $0x320] sm:$0xff]  }
  0x44   :  { %4658 = vmatmul.mubr.bf16.vlgmr.msra.gmra.mrb[4].mxu1 %v5827_v14  ;;  %6486 = vmatpush3.bf16.msra.mxu0 %v7167_v18  ;;  %v7219_v14 = vld [vmem:[%s9418_s1 + $0x328] sm:$0xff]   ;;  %v7223_v18 = vld [vmem:[%s9418_s1 + $0x330] sm:$0xff]  }
  0x45   :  { %6508 = vmatpush3.bf16.msra.mxu1 %v7168_v19  ;;  %6487 = vmatprep.subr.bf16.mxu0 %v7169_v20  ;;  %v7224_v19 = vld [vmem:[%s9418_s1 + $0x3b0] sm:$0xff]   ;;  %v7225_v20 = vld [vmem:[%s9418_s1 + $0x378] sm:$0xff]  }
  0x46   :  { %6509 = vmatprep.subr.bf16.mxu1 %v7170_v21  ;;  %4698 = vmatprep.mubr.bf16.mxu0 %v5830_v53  ;;  %v7226_v21 = vld [vmem:[%s9418_s1 + $0x3f8] sm:$0xff]   ;;  %v7250_v53 = vld [vmem:[%s9418_s1 + $0x4e8] sm:$0xff]  }
  0x47   :  { %4739 = vmatprep.mubr.bf16.mxu1 %v5832_v55  ;;  %v7252_v55 = vld [vmem:[%s9418_s1 + $0x4a8] sm:$0xff]  }
  0x48   :  { %6488 = vmatpush3.bf16.msra.mxu0 %v7171_v22  ;;  %v7227_v22 = vld [vmem:[%s9418_s1 + $0x338] sm:$0xff]  }
  0x49   :  { %6510 = vmatpush3.bf16.msra.mxu1 %v7172_v23  ;;  %6489 = vmatprep.subr.bf16.mxu0 %v7173_v24  ;;  %v7228_v23 = vld [vmem:[%s9418_s1 + $0x3b8] sm:$0xff]   ;;  %v21_v24 = vld [vmem:[%s9419_s0 + $0x30] sm:$0xff] }
  0x4a   :  { %6511 = vmatprep.subr.bf16.mxu1 %v7174_v25  ;;  %v53_v25 = vld [vmem:[%s9419_s0 + $0x130] sm:$0xff] }
  0x4c   :  { %6490 = vmatpush3.bf16.msra.mxu0 %v7175_v26  ;;  %v22_v26 = vld [vmem:[%s9419_s0 + $0x38] sm:$0xff] }
  0x4d   :  { %6512 = vmatpush3.bf16.msra.mxu1 %v7176_v27  ;;  %6491 = vmatprep.subr.bf16.mxu0 %v7177_v28  ;;  %v5833_v27 = vcombine.low %v21_v24, %v53_v25  ;;  %v5834_v28 = vcombine.high %v21_v24, %v53_v25  ;;  %v7277_v24 = vld [vmem:[%s9418_s1 + $0x560] sm:$0xff]  }
  0x4e   :  { %6513 = vmatprep.subr.bf16.mxu1 %v7178_v29  ;;  %v54_v29 = vld [vmem:[%s9419_s0 + $0x138] sm:$0xff]  ;;  %v7278_v25 = vld [vmem:[%s9418_s1 + $0x5e0] sm:$0xff]  }
  0x50   :  { %6492 = vmatpush3.bf16.msra.mxu0 %v7179_v30  ;;  %v5835_v30 = vcombine.low %v22_v26, %v54_v29 }
  0x51   :  { %6514 = vmatpush3.bf16.msra.mxu1 %v7180_v31  ;;  %6493 = vmatprep.subr.bf16.mxu0 %v7181_v32  ;;  %v5836_v31 = vcombine.high %v22_v26, %v54_v29  ;;  %v7229_v32 = vld [vmem:[%s9418_s1 + $0x440] sm:$0xff]   ;;  %v7282_v29 = vld [vmem:[%s9418_s1 + $0x5e8] sm:$0xff]  }
  0x52   :  { %6515 = vmatprep.subr.bf16.mxu1 %v7182_v33  ;;  %v7230_v33 = vld [vmem:[%s9418_s1 + $0x4c0] sm:$0xff]  }
  0x53   :  { %v7279_v26 = vld [vmem:[%s9418_s1 + $0x520] sm:$0xff]  }
  0x54   :  { %6494 = vmatpush3.bf16.msra.mxu0 %v7183_v34  ;;  %v7231_v34 = vld [vmem:[%s9418_s1 + $0x400] sm:$0xff]  }
  0x55   :  { %6516 = vmatpush3.bf16.msra.mxu1 %v7184_v35  ;;  %6495 = vmatprep.subr.bf16.mxu0 %v7185_v36  ;;  %v7232_v35 = vld [vmem:[%s9418_s1 + $0x480] sm:$0xff]   ;;  %v7233_v36 = vld [vmem:[%s9418_s1 + $0x448] sm:$0xff]  }
  0x56   :  { %6517 = vmatprep.subr.bf16.mxu1 %v7186_v37  ;;  %v7234_v37 = vld [vmem:[%s9418_s1 + $0x4c8] sm:$0xff]  }
  0x58   :  { %6496 = vmatpush3.bf16.msra.mxu0 %v7187_v38  ;;  %v7235_v38 = vld [vmem:[%s9418_s1 + $0x408] sm:$0xff]  }
  0x59   :  { %6518 = vmatpush3.bf16.msra.mxu1 %v7188_v39  ;;  %6497 = vmatprep.subr.bf16.mxu0 %v7189_v40  ;;  %v7236_v39 = vld [vmem:[%s9418_s1 + $0x488] sm:$0xff]   ;;  %v7237_v40 = vld [vmem:[%s9418_s1 + $0x450] sm:$0xff]  }
  0x5a   :  { %6519 = vmatprep.subr.bf16.mxu1 %v7190_v41  ;;  %v7238_v41 = vld [vmem:[%s9418_s1 + $0x4d0] sm:$0xff]  }
  0x5c   :  { %6498 = vmatpush3.bf16.msra.mxu0 %v7191_v42  ;;  %v7239_v42 = vld [vmem:[%s9418_s1 + $0x410] sm:$0xff]  }
  0x5d   :  { %6520 = vmatpush3.bf16.msra.mxu1 %v7192_v43  ;;  %6499 = vmatprep.subr.bf16.mxu0 %v7193_v44  ;;  %v7240_v43 = vld [vmem:[%s9418_s1 + $0x490] sm:$0xff]   ;;  %v7241_v44 = vld [vmem:[%s9418_s1 + $0x458] sm:$0xff]  }
  0x5e   :  { %6521 = vmatprep.subr.bf16.mxu1 %v7194_v45  ;;  %v7242_v45 = vld [vmem:[%s9418_s1 + $0x4d8] sm:$0xff]  }
  0x60   :  { %6500 = vmatpush3.bf16.msra.mxu0 %v7195_v46  ;;  %v7243_v46 = vld [vmem:[%s9418_s1 + $0x418] sm:$0xff]  }
  0x61   :  { %6522 = vmatpush3.bf16.msra.mxu1 %v7196_v47  ;;  %6529 = vmatprep.subr.bf16.mxu0 %v7197_v56  ;;  %v7244_v47 = vld [vmem:[%s9418_s1 + $0x498] sm:$0xff]   ;;  %v7253_v56 = vld [vmem:[%s9418_s1 + $0x470] sm:$0xff]  }
  0x62   :  { %6551 = vmatprep.subr.bf16.mxu1 %v7198_v57  ;;  %v7254_v57 = vld [vmem:[%s9418_s1 + $0x4f0] sm:$0xff]  }
  0x63   :  { %4699 = vmatmul.mubr.bf16.vlgmr.msra.gmra.mrb[8].mxu0 %v5829_v52  ;;  %v7249_v52 = vld [vmem:[%s9418_s1 + $0x468] sm:$0xff]  }
  0x64   :  { %4740 = vmatmul.mubr.bf16.vlgmr.msra.gmra.mrb[8].mxu1 %v5831_v54  ;;  %6530 = vmatpush3.bf16.msra.mxu0 %v7199_v58  ;;  %v7251_v54 = vld [vmem:[%s9418_s1 + $0x428] sm:$0xff]   ;;  %v7255_v58 = vld [vmem:[%s9418_s1 + $0x430] sm:$0xff]  }
  0x65   :  { %6552 = vmatpush3.bf16.msra.mxu1 %v7200_v59  ;;  %6531 = vmatprep.subr.bf16.mxu0 %v7201_v60  ;;  %v7256_v59 = vld [vmem:[%s9418_s1 + $0x4b0] sm:$0xff]   ;;  %v7257_v60 = vld [vmem:[%s9418_s1 + $0x478] sm:$0xff]  }
  0x66   :  { %6553 = vmatprep.subr.bf16.mxu1 %v7202_v61  ;;  %4780 = vmatprep.mubr.bf16.mxu0 %v5834_v28  ;;  %v7258_v61 = vld [vmem:[%s9418_s1 + $0x4f8] sm:$0xff]   ;;  %v7281_v28 = vld [vmem:[%s9418_s1 + $0x568] sm:$0xff]  }
  0x67   :  { %4821 = vmatprep.mubr.bf16.mxu1 %v5836_v31  ;;  %v7284_v31 = vld [vmem:[%s9418_s1 + $0x5a8] sm:$0xff]  }
  0x68   :  { %6532 = vmatpush3.bf16.msra.mxu0 %v7203_v62  ;;  %v7259_v62 = vld [vmem:[%s9418_s1 + $0x438] sm:$0xff]  }
  0x69   :  { %6554 = vmatpush3.bf16.msra.mxu1 %v7204_v63  ;;  %6533 = vmatprep.subr.bf16.mxu0 %v7205_v0  ;;  %v7260_v63 = vld [vmem:[%s9418_s1 + $0x4b8] sm:$0xff]   ;;  %v23_v0 = vld [vmem:[%s9419_s0 + $0x40] sm:$0xff] }
  0x6a   :  { %6555 = vmatprep.subr.bf16.mxu1 %v7206_v1  ;;  %v55_v1 = vld [vmem:[%s9419_s0 + $0x140] sm:$0xff] }
  0x6c   :  { %6534 = vmatpush3.bf16.msra.mxu0 %v7207_v2  ;;  %v5837_v2 = vcombine.low %v23_v0, %v55_v1 }
  0x6d   :  { %6556 = vmatpush3.bf16.msra.mxu1 %v7208_v3  ;;  %6535 = vmatprep.subr.bf16.mxu0 %v7209_v4  ;;  %v5838_v3 = vcombine.high %v23_v0, %v55_v1  ;;  %v24_v4 = vld [vmem:[%s9419_s0 + $0x48] sm:$0xff]  ;;  %v7309_v0 = vld [vmem:[%s9418_s1 + $0x660] sm:$0xff]  }
  0x6e   :  { %6557 = vmatprep.subr.bf16.mxu1 %v7210_v5  ;;  %v56_v5 = vld [vmem:[%s9419_s0 + $0x148] sm:$0xff]  ;;  %v7310_v1 = vld [vmem:[%s9418_s1 + $0x6e0] sm:$0xff]  }
  0x70   :  { %6536 = vmatpush3.bf16.msra.mxu0 %v7211_v6  ;;  %v5839_v6 = vcombine.low %v24_v4, %v56_v5 }
  0x71   :  { %6558 = vmatpush3.bf16.msra.mxu1 %v7212_v7  ;;  %6537 = vmatprep.subr.bf16.mxu0 %v7213_v8  ;;  %v5840_v7 = vcombine.high %v24_v4, %v56_v5  ;;  %v7261_v8 = vld [vmem:[%s9418_s1 + $0x540] sm:$0xff]   ;;  %v7313_v4 = vld [vmem:[%s9418_s1 + $0x668] sm:$0xff]  }
  0x72   :  { %6559 = vmatprep.subr.bf16.mxu1 %v7214_v9  ;;  %v7262_v9 = vld [vmem:[%s9418_s1 + $0x5c0] sm:$0xff]   ;;  %v7314_v5 = vld [vmem:[%s9418_s1 + $0x6e8] sm:$0xff]  }
  0x74   :  { %6538 = vmatpush3.bf16.msra.mxu0 %v7215_v10  ;;  %v7263_v10 = vld [vmem:[%s9418_s1 + $0x500] sm:$0xff]  }
  0x75   :  { %6560 = vmatpush3.bf16.msra.mxu1 %v7216_v11  ;;  %6539 = vmatprep.subr.bf16.mxu0 %v7217_v12  ;;  %v7264_v11 = vld [vmem:[%s9418_s1 + $0x580] sm:$0xff]   ;;  %v7265_v12 = vld [vmem:[%s9418_s1 + $0x548] sm:$0xff]  }
  0x76   :  { %6561 = vmatprep.subr.bf16.mxu1 %v7218_v13  ;;  %v7266_v13 = vld [vmem:[%s9418_s1 + $0x5c8] sm:$0xff]  }
  0x78   :  { %6540 = vmatpush3.bf16.msra.mxu0 %v7219_v14  ;;  %v7267_v14 = vld [vmem:[%s9418_s1 + $0x508] sm:$0xff]  }
  0x79   :  { %6562 = vmatpush3.bf16.msra.mxu1 %v7220_v15  ;;  %6541 = vmatprep.subr.bf16.mxu0 %v7221_v16  ;;  %v7268_v15 = vld [vmem:[%s9418_s1 + $0x588] sm:$0xff]   ;;  %v7269_v16 = vld [vmem:[%s9418_s1 + $0x550] sm:$0xff]  }
  0x7a   :  { %6563 = vmatprep.subr.bf16.mxu1 %v7222_v17  ;;  %v7270_v17 = vld [vmem:[%s9418_s1 + $0x5d0] sm:$0xff]  }
  0x7c   :  { %6542 = vmatpush3.bf16.msra.mxu0 %v7223_v18  ;;  %v7271_v18 = vld [vmem:[%s9418_s1 + $0x510] sm:$0xff]  }
  0x7d   :  { %6564 = vmatpush3.bf16.msra.mxu1 %v7224_v19  ;;  %6543 = vmatprep.subr.bf16.mxu0 %v7225_v20  ;;  %v7272_v19 = vld [vmem:[%s9418_s1 + $0x590] sm:$0xff]   ;;  %v7273_v20 = vld [vmem:[%s9418_s1 + $0x558] sm:$0xff]  }
  0x7e   :  { %6565 = vmatprep.subr.bf16.mxu1 %v7226_v21  ;;  %v7274_v21 = vld [vmem:[%s9418_s1 + $0x5d8] sm:$0xff]  }
  0x80   :  { %6544 = vmatpush3.bf16.msra.mxu0 %v7227_v22  ;;  %v7275_v22 = vld [vmem:[%s9418_s1 + $0x518] sm:$0xff]  }
  0x81   :  { %6566 = vmatpush3.bf16.msra.mxu1 %v7228_v23  ;;  %6573 = vmatprep.subr.bf16.mxu0 %v7229_v32  ;;  %v7276_v23 = vld [vmem:[%s9418_s1 + $0x598] sm:$0xff]   ;;  %v7285_v32 = vld [vmem:[%s9418_s1 + $0x570] sm:$0xff]  }
  0x82   :  { %6595 = vmatprep.subr.bf16.mxu1 %v7230_v33  ;;  %v7286_v33 = vld [vmem:[%s9418_s1 + $0x5f0] sm:$0xff]  }
  0x83   :  { %4781 = vmatmul.mubr.bf16.vlgmr.msra.gmra.mrb[12].mxu0 %v5833_v27  ;;  %v7280_v27 = vld [vmem:[%s9418_s1 + $0x5a0] sm:$0xff]  }
  0x84   :  { %4822 = vmatmul.mubr.bf16.vlgmr.msra.gmra.mrb[12].mxu1 %v5835_v30  ;;  %6574 = vmatpush3.bf16.msra.mxu0 %v7231_v34  ;;  %v7283_v30 = vld [vmem:[%s9418_s1 + $0x528] sm:$0xff]   ;;  %v7287_v34 = vld [vmem:[%s9418_s1 + $0x530] sm:$0xff]  }
  0x85   :  { %6596 = vmatpush3.bf16.msra.mxu1 %v7232_v35  ;;  %6575 = vmatprep.subr.bf16.mxu0 %v7233_v36  ;;  %v7288_v35 = vld [vmem:[%s9418_s1 + $0x5b0] sm:$0xff]   ;;  %v7289_v36 = vld [vmem:[%s9418_s1 + $0x578] sm:$0xff]  }
  0x86   :  { %6597 = vmatprep.subr.bf16.mxu1 %v7234_v37  ;;  %4862 = vmatprep.mubr.bf16.mxu0 %v5838_v3  ;;  %v7290_v37 = vld [vmem:[%s9418_s1 + $0x5f8] sm:$0xff]   ;;  %v7312_v3 = vld [vmem:[%s9418_s1 + $0x6a0] sm:$0xff]  }
  0x87   :  { %4903 = vmatprep.mubr.bf16.mxu1 %v5840_v7  ;;  %v7316_v7 = vld [vmem:[%s9418_s1 + $0x6a8] sm:$0xff]  }
  0x88   :  { %6576 = vmatpush3.bf16.msra.mxu0 %v7235_v38  ;;  %v7291_v38 = vld [vmem:[%s9418_s1 + $0x538] sm:$0xff]  }
  0x89   :  { %6598 = vmatpush3.bf16.msra.mxu1 %v7236_v39  ;;  %6577 = vmatprep.subr.bf16.mxu0 %v7237_v40  ;;  %v7292_v39 = vld [vmem:[%s9418_s1 + $0x5b8] sm:$0xff]   ;;  %v25_v40 = vld [vmem:[%s9419_s0 + $0x50] sm:$0xff] }
  0x8a   :  { %6599 = vmatprep.subr.bf16.mxu1 %v7238_v41  ;;  %v57_v41 = vld [vmem:[%s9419_s0 + $0x150] sm:$0xff] }
  0x8c   :  { %6578 = vmatpush3.bf16.msra.mxu0 %v7239_v42  ;;  %v26_v42 = vld [vmem:[%s9419_s0 + $0x58] sm:$0xff] }
  0x8d   :  { %6600 = vmatpush3.bf16.msra.mxu1 %v7240_v43  ;;  %6579 = vmatprep.subr.bf16.mxu0 %v7241_v44  ;;  %v58_v43 = vld [vmem:[%s9419_s0 + $0x158] sm:$0xff]  ;;  %v5841_v44 = vcombine.low %v25_v40, %v57_v41 }
  0x8e   :  { %6601 = vmatprep.subr.bf16.mxu1 %v7242_v45  ;;  %v5842_v45 = vcombine.high %v25_v40, %v57_v41  ;;  %v7340_v41 = vld [vmem:[%s9418_s1 + $0x798] sm:$0xff]  }
  0x90   :  { %6580 = vmatpush3.bf16.msra.mxu0 %v7243_v46  ;;  %v5843_v46 = vcombine.low %v26_v42, %v58_v43 }
  0x91   :  { %6602 = vmatpush3.bf16.msra.mxu1 %v7244_v47  ;;  %6581 = vmatprep.subr.bf16.mxu0 %v7245_v48  ;;  %v5844_v47 = vcombine.high %v26_v42, %v58_v43  ;;  %v7293_v48 = vld [vmem:[%s9418_s1 + $0x640] sm:$0xff]  }
  0x92   :  { %6603 = vmatprep.subr.bf16.mxu1 %v7246_v49  ;;  %v7294_v49 = vld [vmem:[%s9418_s1 + $0x6c0] sm:$0xff]  }
  0x93   :  { %v7341_v43 = vld [vmem:[%s9418_s1 + $0x760] sm:$0xff]  }
  0x94   :  { %6582 = vmatpush3.bf16.msra.mxu0 %v7247_v50  ;;  %v7295_v50 = vld [vmem:[%s9418_s1 + $0x600] sm:$0xff]  }
  0x95   :  { %6604 = vmatpush3.bf16.msra.mxu1 %v7248_v51  ;;  %6583 = vmatprep.subr.bf16.mxu0 %v7249_v52  ;;  %v7296_v51 = vld [vmem:[%s9418_s1 + $0x680] sm:$0xff]   ;;  %v7297_v52 = vld [vmem:[%s9418_s1 + $0x648] sm:$0xff]  }
  0x96   :  { %6605 = vmatprep.subr.bf16.mxu1 %v7250_v53  ;;  %v7298_v53 = vld [vmem:[%s9418_s1 + $0x6c8] sm:$0xff]  }
  0x98   :  { %6584 = vmatpush3.bf16.msra.mxu0 %v7251_v54  ;;  %v7299_v54 = vld [vmem:[%s9418_s1 + $0x608] sm:$0xff]  }
  0x99   :  { %6606 = vmatpush3.bf16.msra.mxu1 %v7252_v55  ;;  %6585 = vmatprep.subr.bf16.mxu0 %v7253_v56  ;;  %v7300_v55 = vld [vmem:[%s9418_s1 + $0x688] sm:$0xff]   ;;  %v7301_v56 = vld [vmem:[%s9418_s1 + $0x650] sm:$0xff]  }
  0x9a   :  { %6607 = vmatprep.subr.bf16.mxu1 %v7254_v57  ;;  %v7302_v57 = vld [vmem:[%s9418_s1 + $0x6d0] sm:$0xff]  }
  0x9c   :  { %6586 = vmatpush3.bf16.msra.mxu0 %v7255_v58  ;;  %v7303_v58 = vld [vmem:[%s9418_s1 + $0x610] sm:$0xff]  }
  0x9d   :  { %6608 = vmatpush3.bf16.msra.mxu1 %v7256_v59  ;;  %6587 = vmatprep.subr.bf16.mxu0 %v7257_v60  ;;  %v7304_v59 = vld [vmem:[%s9418_s1 + $0x690] sm:$0xff]   ;;  %v7305_v60 = vld [vmem:[%s9418_s1 + $0x658] sm:$0xff]  }
  0x9e   :  { %6609 = vmatprep.subr.bf16.mxu1 %v7258_v61  ;;  %v7306_v61 = vld [vmem:[%s9418_s1 + $0x6d8] sm:$0xff]  }
  0xa0   :  { %6588 = vmatpush3.bf16.msra.mxu0 %v7259_v62  ;;  %v7307_v62 = vld [vmem:[%s9418_s1 + $0x618] sm:$0xff]  }
  0xa1   :  { %6610 = vmatpush3.bf16.msra.mxu1 %v7260_v63  ;;  %6617 = vmatprep.subr.bf16.mxu0 %v7261_v8  ;;  %v7308_v63 = vld [vmem:[%s9418_s1 + $0x698] sm:$0xff]   ;;  %v7317_v8 = vld [vmem:[%s9418_s1 + $0x670] sm:$0xff]  }
  0xa2   :  { %6639 = vmatprep.subr.bf16.mxu1 %v7262_v9  ;;  %v7318_v9 = vld [vmem:[%s9418_s1 + $0x6f0] sm:$0xff]  }
  0xa3   :  { %4863 = vmatmul.mubr.bf16.vlgmr.msra.gmra.mrb[16].mxu0 %v5837_v2  ;;  %v7311_v2 = vld [vmem:[%s9418_s1 + $0x620] sm:$0xff]  }
  0xa4   :  { %4904 = vmatmul.mubr.bf16.vlgmr.msra.gmra.mrb[16].mxu1 %v5839_v6  ;;  %6618 = vmatpush3.bf16.msra.mxu0 %v7263_v10  ;;  %v7315_v6 = vld [vmem:[%s9418_s1 + $0x628] sm:$0xff]   ;;  %v7319_v10 = vld [vmem:[%s9418_s1 + $0x630] sm:$0xff]  }
  0xa5   :  { %6640 = vmatpush3.bf16.msra.mxu1 %v7264_v11  ;;  %6619 = vmatprep.subr.bf16.mxu0 %v7265_v12  ;;  %v7320_v11 = vld [vmem:[%s9418_s1 + $0x6b0] sm:$0xff]   ;;  %v7321_v12 = vld [vmem:[%s9418_s1 + $0x678] sm:$0xff]  }
  0xa6   :  { %6641 = vmatprep.subr.bf16.mxu1 %v7266_v13  ;;  %4944 = vmatprep.mubr.bf16.mxu0 %v5842_v45  ;;  %v7322_v13 = vld [vmem:[%s9418_s1 + $0x6f8] sm:$0xff]  }
  0xa7   :  { %4985 = vmatprep.mubr.bf16.mxu1 %v5844_v47 }
  0xa8   :  { %6620 = vmatpush3.bf16.msra.mxu0 %v7267_v14  ;;  %v7323_v14 = vld [vmem:[%s9418_s1 + $0x638] sm:$0xff]  }
  0xa9   :  { %6642 = vmatpush3.bf16.msra.mxu1 %v7268_v15  ;;  %6621 = vmatprep.subr.bf16.mxu0 %v7269_v16  ;;  %v7324_v15 = vld [vmem:[%s9418_s1 + $0x6b8] sm:$0xff]   ;;  %v27_v16 = vld [vmem:[%s9419_s0 + $0x60] sm:$0xff] }
  0xaa   :  { %6643 = vmatprep.subr.bf16.mxu1 %v7270_v17  ;;  %v59_v17 = vld [vmem:[%s9419_s0 + $0x160] sm:$0xff] }
  0xac   :  { %6622 = vmatpush3.bf16.msra.mxu0 %v7271_v18  ;;  %v28_v18 = vld [vmem:[%s9419_s0 + $0x68] sm:$0xff] }
  0xad   :  { %6644 = vmatpush3.bf16.msra.mxu1 %v7272_v19  ;;  %6623 = vmatprep.subr.bf16.mxu0 %v7273_v20  ;;  %v5845_v19 = vcombine.low %v27_v16, %v59_v17  ;;  %v5846_v20 = vcombine.high %v27_v16, %v59_v17  ;;  %v7357_v17 = vld [vmem:[%s9418_s1 + $0x840] sm:$0xff]  }
  0xae   :  { %6645 = vmatprep.subr.bf16.mxu1 %v7274_v21  ;;  %v60_v21 = vld [vmem:[%s9419_s0 + $0x168] sm:$0xff] }
  0xb0   :  { %6624 = vmatpush3.bf16.msra.mxu0 %v7275_v22  ;;  %v5847_v22 = vcombine.low %v28_v18, %v60_v21 }
  0xb1   :  { %6646 = vmatpush3.bf16.msra.mxu1 %v7276_v23  ;;  %6625 = vmatprep.subr.bf16.mxu0 %v7277_v24  ;;  %v5848_v23 = vcombine.high %v28_v18, %v60_v21  ;;  %v7325_v24 = vld [vmem:[%s9418_s1 + $0x740] sm:$0xff]   ;;  %v7361_v21 = vld [vmem:[%s9418_s1 + $0x848] sm:$0xff]  }
  0xb2   :  { %6647 = vmatprep.subr.bf16.mxu1 %v7278_v25  ;;  %v7326_v25 = vld [vmem:[%s9418_s1 + $0x7c0] sm:$0xff]  }
  0xb3   :  { %v7358_v18 = vld [vmem:[%s9418_s1 + $0x8c0] sm:$0xff]  }
  0xb4   :  { %6626 = vmatpush3.bf16.msra.mxu0 %v7279_v26  ;;  %v7327_v26 = vld [vmem:[%s9418_s1 + $0x700] sm:$0xff]  }
  0xb5   :  { %6648 = vmatpush3.bf16.msra.mxu1 %v7280_v27  ;;  %6627 = vmatprep.subr.bf16.mxu0 %v7281_v28  ;;  %v7328_v27 = vld [vmem:[%s9418_s1 + $0x780] sm:$0xff]   ;;  %v7329_v28 = vld [vmem:[%s9418_s1 + $0x748] sm:$0xff]  }
  0xb6   :  { %6649 = vmatprep.subr.bf16.mxu1 %v7282_v29  ;;  %v7330_v29 = vld [vmem:[%s9418_s1 + $0x7c8] sm:$0xff]  }
  0xb8   :  { %6628 = vmatpush3.bf16.msra.mxu0 %v7283_v30  ;;  %v7331_v30 = vld [vmem:[%s9418_s1 + $0x708] sm:$0xff]  }
  0xb9   :  { %6650 = vmatpush3.bf16.msra.mxu1 %v7284_v31  ;;  %6629 = vmatprep.subr.bf16.mxu0 %v7285_v32  ;;  %v7332_v31 = vld [vmem:[%s9418_s1 + $0x788] sm:$0xff]   ;;  %v7333_v32 = vld [vmem:[%s9418_s1 + $0x750] sm:$0xff]  }
  0xba   :  { %6651 = vmatprep.subr.bf16.mxu1 %v7286_v33  ;;  %v7334_v33 = vld [vmem:[%s9418_s1 + $0x7d0] sm:$0xff]  }
  0xbc   :  { %6630 = vmatpush3.bf16.msra.mxu0 %v7287_v34  ;;  %v7335_v34 = vld [vmem:[%s9418_s1 + $0x710] sm:$0xff]  }
  0xbd   :  { %6652 = vmatpush3.bf16.msra.mxu1 %v7288_v35  ;;  %6631 = vmatprep.subr.bf16.mxu0 %v7289_v36  ;;  %v7336_v35 = vld [vmem:[%s9418_s1 + $0x790] sm:$0xff]   ;;  %v7337_v36 = vld [vmem:[%s9418_s1 + $0x758] sm:$0xff]  }
  0xbe   :  { %6653 = vmatprep.subr.bf16.mxu1 %v7290_v37  ;;  %v7338_v37 = vld [vmem:[%s9418_s1 + $0x7d8] sm:$0xff]  }
  0xc0   :  { %6632 = vmatpush3.bf16.msra.mxu0 %v7291_v38 }
  0xc1   :  { %6654 = vmatpush3.bf16.msra.mxu1 %v7292_v39  ;;  %6661 = vmatprep.subr.bf16.mxu0 %v7293_v48  ;;  %v7339_v39 = vld [vmem:[%s9418_s1 + $0x718] sm:$0xff]  }
  0xc2   :  { %6683 = vmatprep.subr.bf16.mxu1 %v7294_v49  ;;  %v7343_v49 = vld [vmem:[%s9418_s1 + $0x720] sm:$0xff]  }
  0xc3   :  { %4945 = vmatmul.mubr.bf16.vlgmr.msra.gmra.mrb[20].mxu0 %v5841_v44 }
  0xc4   :  { %4986 = vmatmul.mubr.bf16.vlgmr.msra.gmra.mrb[20].mxu1 %v5843_v46  ;;  %6662 = vmatpush3.bf16.msra.mxu0 %v7295_v50  ;;  %v7342_v46 = vld [vmem:[%s9418_s1 + $0x7e0] sm:$0xff]  }
  0xc5   :  { %6684 = vmatpush3.bf16.msra.mxu1 %v7296_v51  ;;  %6663 = vmatprep.subr.bf16.mxu0 %v7297_v52  ;;  %v7344_v51 = vld [vmem:[%s9418_s1 + $0x7a0] sm:$0xff]  }
  0xc6   :  { %6685 = vmatprep.subr.bf16.mxu1 %v7298_v53  ;;  %5026 = vmatprep.mubr.bf16.mxu0 %v5846_v20  ;;  %v5820_v52 = vld [vmem:[%s9420_s2] ss:$0 sm:$0xff] }
  0xc7   :  { %5067 = vmatprep.mubr.bf16.mxu1 %v5848_v23  ;;  %v7360_v20 = vld [vmem:[%s9418_s1 + $0x880] sm:$0xff]   ;;  %v7363_v23 = vld [vmem:[%s9418_s1 + $0x808] sm:$0xff]  }
  0xc8   :  { %6664 = vmatpush3.bf16.msra.mxu0 %v7299_v54 }
  0xc9   :  { %6686 = vmatpush3.bf16.msra.mxu1 %v7300_v55  ;;  %6665 = vmatprep.subr.bf16.mxu0 %v7301_v56  ;;  %v7345_v55 = vld [vmem:[%s9418_s1 + $0x768] sm:$0xff]  }
  0xca   :  { %6687 = vmatprep.subr.bf16.mxu1 %v7302_v57 }
  0xcc   :  { %6666 = vmatpush3.bf16.msra.mxu0 %v7303_v58  ;;  %v7346_v58 = vld [vmem:[%s9418_s1 + $0x7e8] sm:$0xff]  }
  0xcd   :  { %6688 = vmatpush3.bf16.msra.mxu1 %v7304_v59  ;;  %6667 = vmatprep.subr.bf16.mxu0 %v7305_v60 }
  0xce   :  { %6689 = vmatprep.subr.bf16.mxu1 %v7306_v61  ;;  %v7347_v61 = vld [vmem:[%s9418_s1 + $0x728] sm:$0xff]  }
  0xd0   :  { %6668 = vmatpush3.bf16.msra.mxu0 %v7307_v62 }
  0xd1   :  { %6690 = vmatpush3.bf16.msra.mxu1 %v7308_v63  ;;  %6669 = vmatprep.subr.bf16.mxu0 %v7309_v0  ;;  %v7348_v63 = vld [vmem:[%s9418_s1 + $0x7a8] sm:$0xff]  }
  0xd2   :  { %6691 = vmatprep.subr.bf16.mxu1 %v7310_v1  ;;  %v7349_v1 = vld [vmem:[%s9418_s1 + $0x770] sm:$0xff]  }
  0xd4   :  { %6670 = vmatpush3.bf16.msra.mxu0 %v7311_v2  ;;  %v7350_v2 = vld [vmem:[%s9418_s1 + $0x7f0] sm:$0xff]  }
  0xd5   :  { %6692 = vmatpush3.bf16.msra.mxu1 %v7312_v3  ;;  %6671 = vmatprep.subr.bf16.mxu0 %v7313_v4  ;;  %v7351_v3 = vld [vmem:[%s9418_s1 + $0x730] sm:$0xff]  }
  0xd6   :  { %6693 = vmatprep.subr.bf16.mxu1 %v7314_v5  ;;  %v7352_v4 = vld [vmem:[%s9418_s1 + $0x7b0] sm:$0xff]   ;;  %v7353_v5 = vld [vmem:[%s9418_s1 + $0x778] sm:$0xff]  }
  0xd8   :  { %6672 = vmatpush3.bf16.msra.mxu0 %v7315_v6  ;;  %v7354_v6 = vld [vmem:[%s9418_s1 + $0x7f8] sm:$0xff]  }
  0xd9   :  { %6694 = vmatpush3.bf16.msra.mxu1 %v7316_v7  ;;  %6673 = vmatprep.subr.bf16.mxu0 %v7317_v8  ;;  %v7355_v7 = vld [vmem:[%s9418_s1 + $0x738] sm:$0xff]  }
  0xda   :  { %6695 = vmatprep.subr.bf16.mxu1 %v7318_v9  ;;  %v7356_v8 = vld [vmem:[%s9418_s1 + $0x7b8] sm:$0xff]   ;;  %v29_v9 = vld [vmem:[%s9419_s0 + $0x70] sm:$0xff] }
  0xdc   :  { %6674 = vmatpush3.bf16.msra.mxu0 %v7319_v10  ;;  %v61_v10 = vld [vmem:[%s9419_s0 + $0x170] sm:$0xff] }
  0xdd   :  { %6696 = vmatpush3.bf16.msra.mxu1 %v7320_v11  ;;  %6675 = vmatprep.subr.bf16.mxu0 %v7321_v12  ;;  %v30_v11 = vld [vmem:[%s9419_s0 + $0x78] sm:$0xff] }
  0xde   :  { %6697 = vmatprep.subr.bf16.mxu1 %v7322_v13  ;;  %v62_v12 = vld [vmem:[%s9419_s0 + $0x178] sm:$0xff]  ;;  %v5849_v13 = vcombine.low %v29_v9, %v61_v10 }
  0xdf   :  { %v5852_v16 = vcombine.high %v30_v11, %v62_v12 }
  0xe0   :  { %6676 = vmatpush3.bf16.msra.mxu0 %v7323_v14  ;;  %v5850_v14 = vcombine.high %v29_v9, %v61_v10  ;;  %v7389_v9 = vld [vmem:[%s9418_s1 + $0x940] sm:$0xff]  }
  0xe1   :  { %6698 = vmatpush3.bf16.msra.mxu1 %v7324_v15  ;;  %6705 = vmatprep.subr.bf16.mxu0 %v7325_v24  ;;  %v5851_v15 = vcombine.low %v30_v11, %v62_v12  ;;  %v7364_v24 = vld [vmem:[%s9418_s1 + $0x888] sm:$0xff]   ;;  %v7390_v10 = vld [vmem:[%s9418_s1 + $0x9c0] sm:$0xff]  }
  0xe2   :  { %6727 = vmatprep.subr.bf16.mxu1 %v7326_v25  ;;  %v7365_v25 = vld [vmem:[%s9418_s1 + $0x850] sm:$0xff]   ;;  %v7391_v11 = vld [vmem:[%s9418_s1 + $0x900] sm:$0xff]  }
  0xe3   :  { %5027 = vmatmul.mubr.bf16.vlgmr.msra.gmra.mrb[24].mxu0 %v5845_v19  ;;  %v7359_v19 = vld [vmem:[%s9418_s1 + $0x800] sm:$0xff]  }
  0xe4   :  { %5068 = vmatmul.mubr.bf16.vlgmr.msra.gmra.mrb[24].mxu1 %v5847_v22  ;;  %6706 = vmatpush3.bf16.msra.mxu0 %v7327_v26  ;;  %v7362_v22 = vld [vmem:[%s9418_s1 + $0x8c8] sm:$0xff]   ;;  %v7366_v26 = vld [vmem:[%s9418_s1 + $0x8d0] sm:$0xff]   ;;  %v7392_v12 = vld [vmem:[%s9418_s1 + $0x980] sm:$0xff]  }
  0xe5   :  { %6728 = vmatpush3.bf16.msra.mxu1 %v7328_v27  ;;  %6707 = vmatprep.subr.bf16.mxu0 %v7329_v28  ;;  %v7367_v27 = vld [vmem:[%s9418_s1 + $0x810] sm:$0xff]  }
  0xe6   :  { %6729 = vmatprep.subr.bf16.mxu1 %v7330_v29  ;;  %5108 = vmatprep.mubr.bf16.mxu0 %v5850_v14  ;;  %v7368_v28 = vld [vmem:[%s9418_s1 + $0x890] sm:$0xff]   ;;  %v7369_v29 = vld [vmem:[%s9418_s1 + $0x858] sm:$0xff]   ;;  %v7394_v14 = vld [vmem:[%s9418_s1 + $0x9c8] sm:$0xff]  }
  0xe7   :  { %5149 = vmatprep.mubr.bf16.mxu1 %v5852_v16  ;;  %v7396_v16 = vld [vmem:[%s9418_s1 + $0x988] sm:$0xff]  }
  0xe8   :  { %6708 = vmatpush3.bf16.msra.mxu0 %v7331_v30  ;;  %v7370_v30 = vld [vmem:[%s9418_s1 + $0x8d8] sm:$0xff]  }
  0xe9   :  { %6730 = vmatpush3.bf16.msra.mxu1 %v7332_v31  ;;  %6709 = vmatprep.subr.bf16.mxu0 %v7333_v32  ;;  %v7371_v32 = vld [vmem:[%s9418_s1 + $0x818] sm:$0xff]  }
  0xea   :  { %6731 = vmatprep.subr.bf16.mxu1 %v7334_v33 }
  0xec   :  { %6710 = vmatpush3.bf16.msra.mxu0 %v7335_v34  ;;  %v7372_v34 = vld [vmem:[%s9418_s1 + $0x898] sm:$0xff]  }
  0xed   :  { %6732 = vmatpush3.bf16.msra.mxu1 %v7336_v35  ;;  %6711 = vmatprep.subr.bf16.mxu0 %v7337_v36  ;;  %v7373_v36 = vld [vmem:[%s9418_s1 + $0x860] sm:$0xff]  }
  0xee   :  { %6733 = vmatprep.subr.bf16.mxu1 %v7338_v37 }
  0xf0   :  { %6712 = vmatpush3.bf16.msra.mxu0 %v7339_v39  ;;  %v7374_v39 = vld [vmem:[%s9418_s1 + $0x8e0] sm:$0xff]  }
  0xf1   :  { %6734 = vmatpush3.bf16.msra.mxu1 %v7340_v41  ;;  %6713 = vmatprep.subr.bf16.mxu0 %v7341_v43 }
  0xf2   :  { %6735 = vmatprep.subr.bf16.mxu1 %v7342_v46 }
  0xf4   :  { %6714 = vmatpush3.bf16.msra.mxu0 %v7343_v49 }
  0xf5   :  { %6736 = vmatpush3.bf16.msra.mxu1 %v7344_v51  ;;  %6715 = vmatprep.subr.bf16.mxu0 %v7345_v55  ;;  %v7378_v51 = vld [vmem:[%s9418_s1 + $0x8e8] sm:$0xff]  }
  0xf6   :  { %v6413_v38 = vpop.f32.mrb[0].mxu0  ;;  %6737 = vmatprep.subr.bf16.mxu1 %v7346_v58  ;;  %v7380_v55 = vld [vmem:[%s9418_s1 + $0x8a8] sm:$0xff]   ;;  %v7382_v58 = vld [vmem:[%s9418_s1 + $0x8f0] sm:$0xff]  }
  0xf7   :  { %v6435_v40 = vpop.f32.mrb[0].mxu1  ;;  %v6414_v42 = vpop.f32.mrb[1].mxu0 }
  0xf8   :  { %v6415_v44 = vadd.f32 %v6414_v42, %v6413_v38  ;;  %v6436_v45 = vpop.f32.mrb[1].mxu1  ;;  %v6416_v48 = vpop.f32.mrb[2].mxu0  ;;  %6716 = vmatpush3.bf16.msra.mxu0 %v7347_v61  ;;  %v7375_v42 = vld [vmem:[%s9418_s1 + $0x820] sm:$0xff]   ;;  %v7385_v61 = vld [vmem:[%s9418_s1 + $0x878] sm:$0xff]  }
  0xf9   :  { %v6437_v47 = vadd.f32 %v6436_v45, %v6435_v40  ;;  %v6438_v50 = vpop.f32.mrb[2].mxu1  ;;  %v6417_v53 = vpop.f32.mrb[3].mxu0  ;;  %6738 = vmatpush3.bf16.msra.mxu1 %v7348_v63  ;;  %6717 = vmatprep.subr.bf16.mxu0 %v7349_v1  ;;  %v7376_v45 = vld [vmem:[%s9418_s1 + $0x8a0] sm:$0xff]   ;;  %v7387_v63 = vld [vmem:[%s9418_s1 + $0x838] sm:$0xff]  }
  0xfa   :  { %v4537_v54 = vadd.f32 %v6415_v44, %v5820_v52  ;;  %v6418_v56 = vadd.f32 %v6417_v53, %v6416_v48  ;;  %v6439_v57 = vpop.f32.mrb[3].mxu1  ;;  %6739 = vmatprep.subr.bf16.mxu1 %v7350_v2  ;;  %v7377_v48 = vld [vmem:[%s9418_s1 + $0x868] sm:$0xff]   ;;  %v31_v1 = vld [vmem:[%s9419_s0 + $0x80] sm:$0xff] }
  0xfb   :  { %v6440_v59 = vadd.f32 %v6439_v57, %v6438_v50  ;;  %v7379_v53 = vld [vmem:[%s9418_s1 + $0x828] sm:$0xff]   ;;  %v7381_v57 = vld [vmem:[%s9418_s1 + $0x870] sm:$0xff]   ;;  %v63_v2 = vld [vmem:[%s9419_s0 + $0x180] sm:$0xff] }
  0xfc   :  { %v8458_v60 = vadd.f32 %v6437_v47, %v4537_v54  ;;  %v4540_v62 = vadd.f32 %v6418_v56, %v5820_v52  ;;  %6718 = vmatpush3.bf16.msra.mxu0 %v7351_v3  ;;  %v32_v3 = vld [vmem:[%s9419_s0 + $0x88] sm:$0xff] }
  0xfd   :  { %6740 = vmatpush3.bf16.msra.mxu1 %v7352_v4  ;;  %6719 = vmatprep.subr.bf16.mxu0 %v7353_v5  ;;  %v5853_v4 = vcombine.low %v31_v1, %v63_v2  ;;  %v5854_v5 = vcombine.high %v31_v1, %v63_v2  ;;  %v7421_v1 = vld [vmem:[%s9418_s1 + $0xa40] sm:$0xff]  }
  0xfe   :  { %v8466_v0 = vadd.f32 %v6440_v59, %v4540_v62  ;;  %6741 = vmatprep.subr.bf16.mxu1 %v7354_v6  ;;  %v7383_v59 = vld [vmem:[%s9418_s1 + $0x830] sm:$0xff]   ;;  %v7386_v62 = vld [vmem:[%s9418_s1 + $0x8f8] sm:$0xff]   ;;  %v64_v6 = vld [vmem:[%s9419_s0 + $0x188] sm:$0xff] }
  0xff   :  { %v7422_v2 = vld [vmem:[%s9418_s1 + $0xac0] sm:$0xff]  }
 0x100   :  { %6720 = vmatpush3.bf16.msra.mxu0 %v7355_v7  ;;  %v5855_v7 = vcombine.low %v32_v3, %v64_v6 }
 0x101   :  { %6742 = vmatpush3.bf16.msra.mxu1 %v7356_v8  ;;  %6749 = vmatprep.subr.bf16.mxu0 %v7357_v17  ;;  %v5856_v8 = vcombine.high %v32_v3, %v64_v6  ;;  %v7397_v17 = vld [vmem:[%s9418_s1 + $0x950] sm:$0xff]   ;;  %v7423_v3 = vld [vmem:[%s9418_s1 + $0xa00] sm:$0xff]   ;;  %v7426_v6 = vld [vmem:[%s9418_s1 + $0xac8] sm:$0xff]  }
 0x102   :  { %6771 = vmatprep.subr.bf16.mxu1 %v7358_v18  ;;  %v7398_v18 = vld [vmem:[%s9418_s1 + $0x9d0] sm:$0xff]  }
 0x103   :  { %5109 = vmatmul.mubr.bf16.vlgmr.msra.gmra.mrb[28].mxu0 %v5849_v13  ;;  %v7393_v13 = vld [vmem:[%s9418_s1 + $0x948] sm:$0xff]  }
 0x104   :  { %5150 = vmatmul.mubr.bf16.vlgmr.msra.gmra.mrb[28].mxu1 %v5851_v15  ;;  %6750 = vmatpush3.bf16.msra.mxu0 %v7359_v19  ;;  %v7395_v15 = vld [vmem:[%s9418_s1 + $0x908] sm:$0xff]   ;;  %v7399_v19 = vld [vmem:[%s9418_s1 + $0x910] sm:$0xff]  }
 0x105   :  { %6772 = vmatpush3.bf16.msra.mxu1 %v7360_v20  ;;  %6751 = vmatprep.subr.bf16.mxu0 %v7361_v21  ;;  %v7400_v20 = vld [vmem:[%s9418_s1 + $0x990] sm:$0xff]   ;;  %v7401_v21 = vld [vmem:[%s9418_s1 + $0x958] sm:$0xff]  }
 0x106   :  { %6773 = vmatprep.subr.bf16.mxu1 %v7362_v22  ;;  %5190 = vmatprep.mubr.bf16.mxu0 %v5854_v5  ;;  %v7402_v22 = vld [vmem:[%s9418_s1 + $0x9d8] sm:$0xff]   ;;  %v7425_v5 = vld [vmem:[%s9418_s1 + $0xa48] sm:$0xff]  }
 0x107   :  { %5231 = vmatprep.mubr.bf16.mxu1 %v5856_v8  ;;  %v7428_v8 = vld [vmem:[%s9418_s1 + $0xa88] sm:$0xff]  }
 0x108   :  { %6752 = vmatpush3.bf16.msra.mxu0 %v7363_v23 }
 0x109   :  { %6774 = vmatpush3.bf16.msra.mxu1 %v7364_v24  ;;  %6753 = vmatprep.subr.bf16.mxu0 %v7365_v25  ;;  %v7403_v24 = vld [vmem:[%s9418_s1 + $0x918] sm:$0xff]  }
 0x10a   :  { %6775 = vmatprep.subr.bf16.mxu1 %v7366_v26  ;;  %v7404_v26 = vld [vmem:[%s9418_s1 + $0x998] sm:$0xff]  }
 0x10c   :  { %6754 = vmatpush3.bf16.msra.mxu0 %v7367_v27 }
 0x10d   :  { %6776 = vmatpush3.bf16.msra.mxu1 %v7368_v28  ;;  %6755 = vmatprep.subr.bf16.mxu0 %v7369_v29  ;;  %v7405_v28 = vld [vmem:[%s9418_s1 + $0x960] sm:$0xff]  }
 0x10e   :  { %6777 = vmatprep.subr.bf16.mxu1 %v7370_v30 }
 0x110   :  { %6756 = vmatpush3.bf16.msra.mxu0 %v7371_v32 }
 0x111   :  { %6778 = vmatpush3.bf16.msra.mxu1 %v7372_v34  ;;  %6757 = vmatprep.subr.bf16.mxu0 %v7373_v36  ;;  %v7407_v34 = vld [vmem:[%s9418_s1 + $0x920] sm:$0xff]  }
 0x112   :  { %6779 = vmatprep.subr.bf16.mxu1 %v7374_v39 }
 0x114   :  { %6758 = vmatpush3.bf16.msra.mxu0 %v7375_v42 }
 0x115   :  { %6780 = vmatpush3.bf16.msra.mxu1 %v7376_v45  ;;  %6759 = vmatprep.subr.bf16.mxu0 %v7377_v48  ;;  %v7411_v45 = vld [vmem:[%s9418_s1 + $0x928] sm:$0xff]  }
 0x116   :  { %v6457_v31 = vpop.f32.mrb[4].mxu0  ;;  %6781 = vmatprep.subr.bf16.mxu1 %v7378_v51  ;;  %v7415_v51 = vld [vmem:[%s9418_s1 + $0x930] sm:$0xff]  }
 0x117   :  { %v6479_v33 = vpop.f32.mrb[4].mxu1  ;;  %v6458_v35 = vpop.f32.mrb[5].mxu0 }
 0x118   :  { %v6459_v37 = vadd.f32 %v6458_v35, %v6457_v31  ;;  %v6480_v38 = vpop.f32.mrb[5].mxu1  ;;  %v6460_v41 = vpop.f32.mrb[6].mxu0  ;;  %6760 = vmatpush3.bf16.msra.mxu0 %v7379_v53  ;;  %v7406_v31 = vld [vmem:[%s9418_s1 + $0x9e0] sm:$0xff]   ;;  %v7417_v53 = vld [vmem:[%s9418_s1 + $0x978] sm:$0xff]  }
 0x119   :  { %v6481_v40 = vadd.f32 %v6480_v38, %v6479_v33  ;;  %v6482_v44 = vpop.f32.mrb[6].mxu1  ;;  %v6461_v46 = vpop.f32.mrb[7].mxu0  ;;  %6782 = vmatpush3.bf16.msra.mxu1 %v7380_v55  ;;  %6761 = vmatprep.subr.bf16.mxu0 %v7381_v57  ;;  %v7419_v55 = vld [vmem:[%s9418_s1 + $0x938] sm:$0xff]   ;;  %v33_v57 = vld [vmem:[%s9419_s0 + $0x90] sm:$0xff] }
 0x11a   :  { %v4619_v43 = vadd.f32 %v6459_v37, %v8458_v60  ;;  %v6462_v49 = vadd.f32 %v6461_v46, %v6460_v41  ;;  %v6483_v50 = vpop.f32.mrb[7].mxu1  ;;  %6783 = vmatprep.subr.bf16.mxu1 %v7382_v58  ;;  %v7384_v60 = vld [vmem:[%s9418_s1 + $0x8b0] sm:$0xff]   ;;  %v7408_v37 = vld [vmem:[%s9418_s1 + $0x9a0] sm:$0xff]  }
 0x11b   :  { %v6484_v52 = vadd.f32 %v6483_v50, %v6482_v44  ;;  %v7414_v50 = vld [vmem:[%s9418_s1 + $0x9f0] sm:$0xff]  }
 0x11c   :  { %v8565_v47 = vadd.f32 %v6481_v40, %v4619_v43  ;;  %v4622_v54 = vadd.f32 %v6462_v49, %v8466_v0  ;;  %6762 = vmatpush3.bf16.msra.mxu0 %v7383_v59  ;;  %v7388_v0 = vld [vmem:[%s9418_s1 + $0x8b8] sm:$0xff]   ;;  %v7409_v40 = vld [vmem:[%s9418_s1 + $0x968] sm:$0xff]   ;;  %v7413_v49 = vld [vmem:[%s9418_s1 + $0x970] sm:$0xff]  }
 0x11d   :  { %6784 = vmatpush3.bf16.msra.mxu1 %v7384_v60  ;;  %6763 = vmatprep.subr.bf16.mxu0 %v7385_v61  ;;  %v7410_v43 = vld [vmem:[%s9418_s1 + $0x9e8] sm:$0xff]   ;;  %v65_v58 = vld [vmem:[%s9419_s0 + $0x190] sm:$0xff]  ;;  %v34_v61 = vld [vmem:[%s9419_s0 + $0x98] sm:$0xff] }
 0x11e   :  { %v8580_v56 = vadd.f32 %v6484_v52, %v4622_v54  ;;  %6785 = vmatprep.subr.bf16.mxu1 %v7386_v62  ;;  %v7416_v52 = vld [vmem:[%s9418_s1 + $0x9b0] sm:$0xff]   ;;  %v7418_v54 = vld [vmem:[%s9418_s1 + $0x9f8] sm:$0xff]   ;;  %v5857_v59 = vcombine.low %v33_v57, %v65_v58  ;;  %v5858_v60 = vcombine.high %v33_v57, %v65_v58  ;;  %v7453_v57 = vld [vmem:[%s9418_s1 + $0xb40] sm:$0xff]  }
 0x11f   :  { %v66_v62 = vld [vmem:[%s9419_s0 + $0x198] sm:$0xff]  ;;  %v7454_v58 = vld [vmem:[%s9418_s1 + $0xbc0] sm:$0xff]  }
 0x120   :  { %6764 = vmatpush3.bf16.msra.mxu0 %v7387_v63  ;;  %v5859_v63 = vcombine.low %v34_v61, %v66_v62 }
 0x121   :  { %6786 = vmatpush3.bf16.msra.mxu1 %v7388_v0  ;;  %6793 = vmatprep.subr.bf16.mxu0 %v7389_v9  ;;  %v5860_v0 = vcombine.high %v34_v61, %v66_v62  ;;  %v7429_v9 = vld [vmem:[%s9418_s1 + $0xa50] sm:$0xff]   ;;  %v7457_v61 = vld [vmem:[%s9418_s1 + $0xb48] sm:$0xff]  }
 0x122   :  { %6815 = vmatprep.subr.bf16.mxu1 %v7390_v10  ;;  %v7430_v10 = vld [vmem:[%s9418_s1 + $0xad0] sm:$0xff]   ;;  %v7458_v62 = vld [vmem:[%s9418_s1 + $0xbc8] sm:$0xff]  }
 0x123   :  { %5191 = vmatmul.mubr.bf16.vlgmr.msra.gmra.mrb[32].mxu0 %v5853_v4  ;;  %v7424_v4 = vld [vmem:[%s9418_s1 + $0xa80] sm:$0xff]  }
 0x124   :  { %5232 = vmatmul.mubr.bf16.vlgmr.msra.gmra.mrb[32].mxu1 %v5855_v7  ;;  %6794 = vmatpush3.bf16.msra.mxu0 %v7391_v11  ;;  %v7427_v7 = vld [vmem:[%s9418_s1 + $0xa08] sm:$0xff]   ;;  %v7431_v11 = vld [vmem:[%s9418_s1 + $0xa10] sm:$0xff]  }
 0x125   :  { %6816 = vmatpush3.bf16.msra.mxu1 %v7392_v12  ;;  %6795 = vmatprep.subr.bf16.mxu0 %v7393_v13  ;;  %v7432_v12 = vld [vmem:[%s9418_s1 + $0xa90] sm:$0xff]   ;;  %v7433_v13 = vld [vmem:[%s9418_s1 + $0xa58] sm:$0xff]  }
 0x126   :  { %6817 = vmatprep.subr.bf16.mxu1 %v7394_v14  ;;  %5272 = vmatprep.mubr.bf16.mxu0 %v5858_v60  ;;  %v7434_v14 = vld [vmem:[%s9418_s1 + $0xad8] sm:$0xff]   ;;  %v7456_v60 = vld [vmem:[%s9418_s1 + $0xb80] sm:$0xff]  }
 0x127   :  { %5313 = vmatprep.mubr.bf16.mxu1 %v5860_v0  ;;  %v7460_v0 = vld [vmem:[%s9418_s1 + $0xb88] sm:$0xff]  }
 0x128   :  { %6796 = vmatpush3.bf16.msra.mxu0 %v7395_v15 }
 0x129   :  { %6818 = vmatpush3.bf16.msra.mxu1 %v7396_v16  ;;  %6797 = vmatprep.subr.bf16.mxu0 %v7397_v17  ;;  %v7435_v16 = vld [vmem:[%s9418_s1 + $0xa18] sm:$0xff]  }
 0x12a   :  { %6819 = vmatprep.subr.bf16.mxu1 %v7398_v18  ;;  %v7436_v18 = vld [vmem:[%s9418_s1 + $0xa98] sm:$0xff]  }
 0x12c   :  { %6798 = vmatpush3.bf16.msra.mxu0 %v7399_v19 }
 0x12d   :  { %6820 = vmatpush3.bf16.msra.mxu1 %v7400_v20  ;;  %6799 = vmatprep.subr.bf16.mxu0 %v7401_v21  ;;  %v7437_v20 = vld [vmem:[%s9418_s1 + $0xa60] sm:$0xff]  }
 0x12e   :  { %6821 = vmatprep.subr.bf16.mxu1 %v7402_v22 }
 0x130   :  { %6800 = vmatpush3.bf16.msra.mxu0 %v7403_v24 }
 0x131   :  { %6822 = vmatpush3.bf16.msra.mxu1 %v7404_v26  ;;  %6801 = vmatprep.subr.bf16.mxu0 %v7405_v28  ;;  %v7439_v26 = vld [vmem:[%s9418_s1 + $0xa20] sm:$0xff]  }
 0x132   :  { %6823 = vmatprep.subr.bf16.mxu1 %v7406_v31 }
 0x134   :  { %6802 = vmatpush3.bf16.msra.mxu0 %v7407_v34 }
 0x135   :  { %6824 = vmatpush3.bf16.msra.mxu1 %v7408_v37  ;;  %6803 = vmatprep.subr.bf16.mxu0 %v7409_v40  ;;  %v7443_v37 = vld [vmem:[%s9418_s1 + $0xa28] sm:$0xff]  }
 0x136   :  { %v6501_v23 = vpop.f32.mrb[8].mxu0  ;;  %6825 = vmatprep.subr.bf16.mxu1 %v7410_v43  ;;  %v7447_v43 = vld [vmem:[%s9418_s1 + $0xa30] sm:$0xff]  }
 0x137   :  { %v6523_v25 = vpop.f32.mrb[8].mxu1  ;;  %v6502_v27 = vpop.f32.mrb[9].mxu0 }
 0x138   :  { %v6503_v29 = vadd.f32 %v6502_v27, %v6501_v23  ;;  %v6524_v30 = vpop.f32.mrb[9].mxu1  ;;  %v6504_v33 = vpop.f32.mrb[10].mxu0  ;;  %6804 = vmatpush3.bf16.msra.mxu0 %v7411_v45  ;;  %v7438_v23 = vld [vmem:[%s9418_s1 + $0xae0] sm:$0xff]   ;;  %v7449_v45 = vld [vmem:[%s9418_s1 + $0xa78] sm:$0xff]  }
 0x139   :  { %v6525_v32 = vadd.f32 %v6524_v30, %v6523_v25  ;;  %v6526_v36 = vpop.f32.mrb[10].mxu1  ;;  %v6505_v38 = vpop.f32.mrb[11].mxu0  ;;  %6805 = vmatprep.subr.bf16.mxu0 %v7413_v49  ;;  %v35_v49 = vld [vmem:[%s9419_s0 + $0xa0] sm:$0xff] }
 0x13a   :  { %v4701_v35 = vadd.f32 %v6503_v29, %v8565_v47  ;;  %v6506_v41 = vadd.f32 %v6505_v38, %v6504_v33  ;;  %v6527_v42 = vpop.f32.mrb[11].mxu1  ;;  %v7412_v47 = vld [vmem:[%s9418_s1 + $0x9a8] sm:$0xff]   ;;  %v7440_v29 = vld [vmem:[%s9418_s1 + $0xaa0] sm:$0xff]  }
 0x13b   :  { %v6528_v44 = vadd.f32 %v6527_v42, %v6526_v36  ;;  %6826 = vmatpush3.bf16.msra.mxu1 %v7412_v47  ;;  %v7446_v42 = vld [vmem:[%s9418_s1 + $0xaf0] sm:$0xff]   ;;  %v7451_v47 = vld [vmem:[%s9418_s1 + $0xa38] sm:$0xff]  }
 0x13c   :  { %v8679_v39 = vadd.f32 %v6525_v32, %v4701_v35  ;;  %v4704_v46 = vadd.f32 %v6506_v41, %v8580_v56  ;;  %6827 = vmatprep.subr.bf16.mxu1 %v7414_v50  ;;  %6806 = vmatpush3.bf16.msra.mxu0 %v7415_v51  ;;  %v7420_v56 = vld [vmem:[%s9418_s1 + $0x9b8] sm:$0xff]   ;;  %v7441_v32 = vld [vmem:[%s9418_s1 + $0xa68] sm:$0xff]   ;;  %v7445_v41 = vld [vmem:[%s9418_s1 + $0xa70] sm:$0xff]  }
 0x13d   :  { %6807 = vmatprep.subr.bf16.mxu0 %v7417_v53  ;;  %v7442_v35 = vld [vmem:[%s9418_s1 + $0xae8] sm:$0xff]   ;;  %v67_v50 = vld [vmem:[%s9419_s0 + $0x1a0] sm:$0xff] }
 0x13e   :  { %v8694_v48 = vadd.f32 %v6528_v44, %v4704_v46  ;;  %v7448_v44 = vld [vmem:[%s9418_s1 + $0xab0] sm:$0xff]   ;;  %v7450_v46 = vld [vmem:[%s9418_s1 + $0xaf8] sm:$0xff]   ;;  %v36_v51 = vld [vmem:[%s9419_s0 + $0xa8] sm:$0xff]  ;;  %v5861_v53 = vcombine.low %v35_v49, %v67_v50 }
 0x13f   :  { %6828 = vmatpush3.bf16.msra.mxu1 %v7416_v52  ;;  %v68_v52 = vld [vmem:[%s9419_s0 + $0x1a8] sm:$0xff] }
 0x140   :  { %6829 = vmatprep.subr.bf16.mxu1 %v7418_v54  ;;  %6808 = vmatpush3.bf16.msra.mxu0 %v7419_v55  ;;  %v5862_v54 = vcombine.high %v35_v49, %v67_v50  ;;  %v5863_v55 = vcombine.low %v36_v51, %v68_v52  ;;  %v7485_v49 = vld [vmem:[%s9418_s1 + $0xc40] sm:$0xff]  }
 0x141   :  { %6837 = vmatprep.subr.bf16.mxu0 %v7421_v1  ;;  %v7461_v1 = vld [vmem:[%s9418_s1 + $0xb50] sm:$0xff]   ;;  %v7486_v50 = vld [vmem:[%s9418_s1 + $0xcc0] sm:$0xff]  }
 0x143   :  { %6830 = vmatpush3.bf16.msra.mxu1 %v7420_v56  ;;  %5273 = vmatmul.mubr.bf16.vlgmr.msra.gmra.mrb[36].mxu0 %v5857_v59  ;;  %v5864_v56 = vcombine.high %v36_v51, %v68_v52  ;;  %v7455_v59 = vld [vmem:[%s9418_s1 + $0xb00] sm:$0xff]  }
 0x144   :  { %6859 = vmatprep.subr.bf16.mxu1 %v7422_v2  ;;  %6838 = vmatpush3.bf16.msra.mxu0 %v7423_v3  ;;  %v7462_v2 = vld [vmem:[%s9418_s1 + $0xbd0] sm:$0xff]   ;;  %v7487_v51 = vld [vmem:[%s9418_s1 + $0xc00] sm:$0xff]  }
 0x145   :  { %6839 = vmatprep.subr.bf16.mxu0 %v7425_v5  ;;  %5354 = vmatprep.mubr.bf16.mxu0 %v5862_v54  ;;  %v7463_v3 = vld [vmem:[%s9418_s1 + $0xb10] sm:$0xff]   ;;  %v7465_v5 = vld [vmem:[%s9418_s1 + $0xb58] sm:$0xff]   ;;  %v7488_v52 = vld [vmem:[%s9418_s1 + $0xc80] sm:$0xff]  }
 0x146   :  { %5314 = vmatmul.mubr.bf16.vlgmr.msra.gmra.mrb[36].mxu1 %v5859_v63  ;;  %v7459_v63 = vld [vmem:[%s9418_s1 + $0xb08] sm:$0xff]  }
 0x147   :  { %6860 = vmatpush3.bf16.msra.mxu1 %v7424_v4  ;;  %5395 = vmatprep.mubr.bf16.mxu1 %v5864_v56  ;;  %v7464_v4 = vld [vmem:[%s9418_s1 + $0xb90] sm:$0xff]   ;;  %v7490_v54 = vld [vmem:[%s9418_s1 + $0xcc8] sm:$0xff]  }
 0x148   :  { %6861 = vmatprep.subr.bf16.mxu1 %v7426_v6  ;;  %6840 = vmatpush3.bf16.msra.mxu0 %v7427_v7  ;;  %v7466_v6 = vld [vmem:[%s9418_s1 + $0xbd8] sm:$0xff]   ;;  %v7492_v56 = vld [vmem:[%s9418_s1 + $0xc88] sm:$0xff]  }
 0x149   :  { %6841 = vmatprep.subr.bf16.mxu0 %v7429_v9 }
 0x14b   :  { %6862 = vmatpush3.bf16.msra.mxu1 %v7428_v8  ;;  %v7467_v8 = vld [vmem:[%s9418_s1 + $0xb18] sm:$0xff]  }
 0x14c   :  { %6863 = vmatprep.subr.bf16.mxu1 %v7430_v10  ;;  %6842 = vmatpush3.bf16.msra.mxu0 %v7431_v11  ;;  %v7468_v10 = vld [vmem:[%s9418_s1 + $0xb98] sm:$0xff]  }
 0x14d   :  { %6843 = vmatprep.subr.bf16.mxu0 %v7433_v13 }
 0x14f   :  { %6864 = vmatpush3.bf16.msra.mxu1 %v7432_v12  ;;  %v7469_v12 = vld [vmem:[%s9418_s1 + $0xb60] sm:$0xff]  }
 0x150   :  { %6865 = vmatprep.subr.bf16.mxu1 %v7434_v14  ;;  %6844 = vmatpush3.bf16.msra.mxu0 %v7435_v16 }
 0x151   :  { %6845 = vmatprep.subr.bf16.mxu0 %v7437_v20 }
 0x153   :  { %6866 = vmatpush3.bf16.msra.mxu1 %v7436_v18  ;;  %v7471_v18 = vld [vmem:[%s9418_s1 + $0xb20] sm:$0xff]  }
 0x154   :  { %6867 = vmatprep.subr.bf16.mxu1 %v7438_v23  ;;  %6846 = vmatpush3.bf16.msra.mxu0 %v7439_v26 }
 0x155   :  { %6847 = vmatprep.subr.bf16.mxu0 %v7441_v32 }
 0x156   :  { %v6545_v15 = vpop.f32.mrb[12].mxu0 }
 0x157   :  { %v6567_v17 = vpop.f32.mrb[12].mxu1  ;;  %v6546_v19 = vpop.f32.mrb[13].mxu0  ;;  %6868 = vmatpush3.bf16.msra.mxu1 %v7440_v29  ;;  %v7475_v29 = vld [vmem:[%s9418_s1 + $0xb28] sm:$0xff]  }
 0x158   :  { %v6547_v21 = vadd.f32 %v6546_v19, %v6545_v15  ;;  %v6568_v22 = vpop.f32.mrb[13].mxu1  ;;  %v6548_v25 = vpop.f32.mrb[14].mxu0  ;;  %6869 = vmatprep.subr.bf16.mxu1 %v7442_v35  ;;  %6848 = vmatpush3.bf16.msra.mxu0 %v7443_v37  ;;  %v7470_v15 = vld [vmem:[%s9418_s1 + $0xbe0] sm:$0xff]   ;;  %v7479_v35 = vld [vmem:[%s9418_s1 + $0xb30] sm:$0xff]   ;;  %v7481_v37 = vld [vmem:[%s9418_s1 + $0xb78] sm:$0xff]  }
 0x159   :  { %v6569_v24 = vadd.f32 %v6568_v22, %v6567_v17  ;;  %v6570_v28 = vpop.f32.mrb[14].mxu1  ;;  %v6549_v30 = vpop.f32.mrb[15].mxu0  ;;  %6849 = vmatprep.subr.bf16.mxu0 %v7445_v41  ;;  %v37_v41 = vld [vmem:[%s9419_s0 + $0xb0] sm:$0xff] }
 0x15a   :  { %v4783_v27 = vadd.f32 %v6547_v21, %v8679_v39  ;;  %v6550_v33 = vadd.f32 %v6549_v30, %v6548_v25  ;;  %v6571_v34 = vpop.f32.mrb[15].mxu1  ;;  %v7444_v39 = vld [vmem:[%s9418_s1 + $0xaa8] sm:$0xff]   ;;  %v7472_v21 = vld [vmem:[%s9418_s1 + $0xba0] sm:$0xff]  }
 0x15b   :  { %v6572_v36 = vadd.f32 %v6571_v34, %v6570_v28  ;;  %6870 = vmatpush3.bf16.msra.mxu1 %v7444_v39  ;;  %v7478_v34 = vld [vmem:[%s9418_s1 + $0xbf0] sm:$0xff]   ;;  %v7483_v39 = vld [vmem:[%s9418_s1 + $0xb38] sm:$0xff]  }
 0x15c   :  { %v8793_v31 = vadd.f32 %v6569_v24, %v4783_v27  ;;  %v4786_v38 = vadd.f32 %v6550_v33, %v8694_v48  ;;  %6871 = vmatprep.subr.bf16.mxu1 %v7446_v42  ;;  %6850 = vmatpush3.bf16.msra.mxu0 %v7447_v43  ;;  %v7452_v48 = vld [vmem:[%s9418_s1 + $0xab8] sm:$0xff]   ;;  %v7473_v24 = vld [vmem:[%s9418_s1 + $0xb68] sm:$0xff]   ;;  %v7477_v33 = vld [vmem:[%s9418_s1 + $0xb70] sm:$0xff]  }
 0x15d   :  { %6851 = vmatprep.subr.bf16.mxu0 %v7449_v45  ;;  %v7474_v27 = vld [vmem:[%s9418_s1 + $0xbe8] sm:$0xff]   ;;  %v69_v42 = vld [vmem:[%s9419_s0 + $0x1b0] sm:$0xff]  ;;  %v38_v43 = vld [vmem:[%s9419_s0 + $0xb8] sm:$0xff] }
 0x15e   :  { %v8808_v40 = vadd.f32 %v6572_v36, %v4786_v38  ;;  %v7480_v36 = vld [vmem:[%s9418_s1 + $0xbb0] sm:$0xff]   ;;  %v7482_v38 = vld [vmem:[%s9418_s1 + $0xbf8] sm:$0xff]   ;;  %v5866_v45 = vcombine.high %v37_v41, %v69_v42 }
 0x15f   :  { %6872 = vmatpush3.bf16.msra.mxu1 %v7448_v44  ;;  %v5865_v44 = vcombine.low %v37_v41, %v69_v42  ;;  %v7517_v41 = vld [vmem:[%s9418_s1 + $0xd40] sm:$0xff]  }
 0x160   :  { %6873 = vmatprep.subr.bf16.mxu1 %v7450_v46  ;;  %6852 = vmatpush3.bf16.msra.mxu0 %v7451_v47  ;;  %v70_v46 = vld [vmem:[%s9419_s0 + $0x1b8] sm:$0xff]  ;;  %v7518_v42 = vld [vmem:[%s9418_s1 + $0xdc0] sm:$0xff]  }
 0x161   :  { %6881 = vmatprep.subr.bf16.mxu0 %v7453_v57  ;;  %v5867_v47 = vcombine.low %v38_v43, %v70_v46  ;;  %v7493_v57 = vld [vmem:[%s9418_s1 + $0xc50] sm:$0xff]  }
 0x163   :  { %6874 = vmatpush3.bf16.msra.mxu1 %v7452_v48  ;;  %5355 = vmatmul.mubr.bf16.vlgmr.msra.gmra.mrb[40].mxu0 %v5861_v53  ;;  %v5868_v48 = vcombine.high %v38_v43, %v70_v46  ;;  %v7489_v53 = vld [vmem:[%s9418_s1 + $0xc48] sm:$0xff]   ;;  %v7519_v43 = vld [vmem:[%s9418_s1 + $0xd00] sm:$0xff]  }
 0x164   :  { %6903 = vmatprep.subr.bf16.mxu1 %v7454_v58  ;;  %6882 = vmatpush3.bf16.msra.mxu0 %v7455_v59  ;;  %v7494_v58 = vld [vmem:[%s9418_s1 + $0xcd0] sm:$0xff]   ;;  %v7522_v46 = vld [vmem:[%s9418_s1 + $0xdc8] sm:$0xff]  }
 0x165   :  { %6883 = vmatprep.subr.bf16.mxu0 %v7457_v61  ;;  %5436 = vmatprep.mubr.bf16.mxu0 %v5866_v45  ;;  %v7495_v59 = vld [vmem:[%s9418_s1 + $0xc10] sm:$0xff]   ;;  %v7497_v61 = vld [vmem:[%s9418_s1 + $0xc58] sm:$0xff]   ;;  %v7521_v45 = vld [vmem:[%s9418_s1 + $0xd48] sm:$0xff]  }
 0x166   :  { %5396 = vmatmul.mubr.bf16.vlgmr.msra.gmra.mrb[40].mxu1 %v5863_v55  ;;  %v7491_v55 = vld [vmem:[%s9418_s1 + $0xc08] sm:$0xff]  }
 0x167   :  { %6904 = vmatpush3.bf16.msra.mxu1 %v7456_v60  ;;  %5477 = vmatprep.mubr.bf16.mxu1 %v5868_v48  ;;  %v7496_v60 = vld [vmem:[%s9418_s1 + $0xc90] sm:$0xff]   ;;  %v7524_v48 = vld [vmem:[%s9418_s1 + $0xd88] sm:$0xff]  }
 0x168   :  { %6905 = vmatprep.subr.bf16.mxu1 %v7458_v62  ;;  %6884 = vmatpush3.bf16.msra.mxu0 %v7459_v63  ;;  %v7498_v62 = vld [vmem:[%s9418_s1 + $0xcd8] sm:$0xff]  }
 0x169   :  { %6885 = vmatprep.subr.bf16.mxu0 %v7461_v1 }
 0x16b   :  { %6906 = vmatpush3.bf16.msra.mxu1 %v7460_v0  ;;  %v7499_v0 = vld [vmem:[%s9418_s1 + $0xc18] sm:$0xff]  }
 0x16c   :  { %6907 = vmatprep.subr.bf16.mxu1 %v7462_v2  ;;  %6886 = vmatpush3.bf16.msra.mxu0 %v7463_v3  ;;  %v7500_v2 = vld [vmem:[%s9418_s1 + $0xc98] sm:$0xff]  }
 0x16d   :  { %6887 = vmatprep.subr.bf16.mxu0 %v7465_v5 }
 0x16f   :  { %6908 = vmatpush3.bf16.msra.mxu1 %v7464_v4  ;;  %v7501_v4 = vld [vmem:[%s9418_s1 + $0xc60] sm:$0xff]  }
 0x170   :  { %6909 = vmatprep.subr.bf16.mxu1 %v7466_v6  ;;  %6888 = vmatpush3.bf16.msra.mxu0 %v7467_v8 }
 0x171   :  { %6889 = vmatprep.subr.bf16.mxu0 %v7469_v12 }
 0x173   :  { %6910 = vmatpush3.bf16.msra.mxu1 %v7468_v10  ;;  %v7503_v10 = vld [vmem:[%s9418_s1 + $0xc20] sm:$0xff]  }
 0x174   :  { %6911 = vmatprep.subr.bf16.mxu1 %v7470_v15  ;;  %6890 = vmatpush3.bf16.msra.mxu0 %v7471_v18 }
 0x175   :  { %6891 = vmatprep.subr.bf16.mxu0 %v7473_v24 }
 0x176   :  { %v6589_v7 = vpop.f32.mrb[16].mxu0 }
 0x177   :  { %v6611_v9 = vpop.f32.mrb[16].mxu1  ;;  %v6590_v11 = vpop.f32.mrb[17].mxu0  ;;  %6912 = vmatpush3.bf16.msra.mxu1 %v7472_v21  ;;  %v7507_v21 = vld [vmem:[%s9418_s1 + $0xc28] sm:$0xff]  }
 0x178   :  { %v6591_v13 = vadd.f32 %v6590_v11, %v6589_v7  ;;  %v6612_v14 = vpop.f32.mrb[17].mxu1  ;;  %v6592_v17 = vpop.f32.mrb[18].mxu0  ;;  %6913 = vmatprep.subr.bf16.mxu1 %v7474_v27  ;;  %6892 = vmatpush3.bf16.msra.mxu0 %v7475_v29  ;;  %v7502_v7 = vld [vmem:[%s9418_s1 + $0xce0] sm:$0xff]   ;;  %v7511_v27 = vld [vmem:[%s9418_s1 + $0xc30] sm:$0xff]   ;;  %v7513_v29 = vld [vmem:[%s9418_s1 + $0xc78] sm:$0xff]  }
 0x179   :  { %v6613_v16 = vadd.f32 %v6612_v14, %v6611_v9  ;;  %v6614_v20 = vpop.f32.mrb[18].mxu1  ;;  %v6593_v22 = vpop.f32.mrb[19].mxu0  ;;  %6893 = vmatprep.subr.bf16.mxu0 %v7477_v33  ;;  %v39_v33 = vld [vmem:[%s9419_s0 + $0xc0] sm:$0xff] }
 0x17a   :  { %v4865_v19 = vadd.f32 %v6591_v13, %v8793_v31  ;;  %v6594_v25 = vadd.f32 %v6593_v22, %v6592_v17  ;;  %v6615_v26 = vpop.f32.mrb[19].mxu1  ;;  %v7476_v31 = vld [vmem:[%s9418_s1 + $0xba8] sm:$0xff]   ;;  %v7504_v13 = vld [vmem:[%s9418_s1 + $0xca0] sm:$0xff]  }
 0x17b   :  { %v6616_v28 = vadd.f32 %v6615_v26, %v6614_v20  ;;  %6914 = vmatpush3.bf16.msra.mxu1 %v7476_v31  ;;  %v7510_v26 = vld [vmem:[%s9418_s1 + $0xcf0] sm:$0xff]   ;;  %v7515_v31 = vld [vmem:[%s9418_s1 + $0xc38] sm:$0xff]  }
 0x17c   :  { %v8907_v23 = vadd.f32 %v6613_v16, %v4865_v19  ;;  %v4868_v30 = vadd.f32 %v6594_v25, %v8808_v40  ;;  %6915 = vmatprep.subr.bf16.mxu1 %v7478_v34  ;;  %6894 = vmatpush3.bf16.msra.mxu0 %v7479_v35  ;;  %v7484_v40 = vld [vmem:[%s9418_s1 + $0xbb8] sm:$0xff]   ;;  %v7505_v16 = vld [vmem:[%s9418_s1 + $0xc68] sm:$0xff]   ;;  %v7509_v25 = vld [vmem:[%s9418_s1 + $0xc70] sm:$0xff]  }
 0x17d   :  { %6895 = vmatprep.subr.bf16.mxu0 %v7481_v37  ;;  %v7506_v19 = vld [vmem:[%s9418_s1 + $0xce8] sm:$0xff]   ;;  %v71_v34 = vld [vmem:[%s9419_s0 + $0x1c0] sm:$0xff] }
 0x17e   :  { %v8922_v32 = vadd.f32 %v6616_v28, %v4868_v30  ;;  %v7512_v28 = vld [vmem:[%s9418_s1 + $0xcb0] sm:$0xff]   ;;  %v7514_v30 = vld [vmem:[%s9418_s1 + $0xcf8] sm:$0xff]   ;;  %v5869_v35 = vcombine.low %v39_v33, %v71_v34  ;;  %v40_v37 = vld [vmem:[%s9419_s0 + $0xc8] sm:$0xff] }
 0x17f   :  { %6916 = vmatpush3.bf16.msra.mxu1 %v7480_v36  ;;  %v5870_v36 = vcombine.high %v39_v33, %v71_v34  ;;  %v7549_v33 = vld [vmem:[%s9418_s1 + $0xe40] sm:$0xff]  }
 0x180   :  { %6917 = vmatprep.subr.bf16.mxu1 %v7482_v38  ;;  %6896 = vmatpush3.bf16.msra.mxu0 %v7483_v39  ;;  %v72_v38 = vld [vmem:[%s9419_s0 + $0x1c8] sm:$0xff]  ;;  %v7550_v34 = vld [vmem:[%s9418_s1 + $0xec0] sm:$0xff]  }
 0x181   :  { %6925 = vmatprep.subr.bf16.mxu0 %v7485_v49  ;;  %v5871_v39 = vcombine.low %v40_v37, %v72_v38  ;;  %v7525_v49 = vld [vmem:[%s9418_s1 + $0xd50] sm:$0xff]  }
 0x183   :  { %6918 = vmatpush3.bf16.msra.mxu1 %v7484_v40  ;;  %5437 = vmatmul.mubr.bf16.vlgmr.msra.gmra.mrb[44].mxu0 %v5865_v44  ;;  %v5872_v40 = vcombine.high %v40_v37, %v72_v38  ;;  %v7520_v44 = vld [vmem:[%s9418_s1 + $0xd80] sm:$0xff]   ;;  %v7553_v37 = vld [vmem:[%s9418_s1 + $0xe48] sm:$0xff]  }
 0x184   :  { %6947 = vmatprep.subr.bf16.mxu1 %v7486_v50  ;;  %6926 = vmatpush3.bf16.msra.mxu0 %v7487_v51  ;;  %v7526_v50 = vld [vmem:[%s9418_s1 + $0xdd0] sm:$0xff]   ;;  %v7554_v38 = vld [vmem:[%s9418_s1 + $0xec8] sm:$0xff]  }
 0x185   :  { %6927 = vmatprep.subr.bf16.mxu0 %v7489_v53  ;;  %5518 = vmatprep.mubr.bf16.mxu0 %v5870_v36  ;;  %v7527_v51 = vld [vmem:[%s9418_s1 + $0xd10] sm:$0xff]   ;;  %v7529_v53 = vld [vmem:[%s9418_s1 + $0xd58] sm:$0xff]   ;;  %v7552_v36 = vld [vmem:[%s9418_s1 + $0xe80] sm:$0xff]  }
 0x186   :  { %5478 = vmatmul.mubr.bf16.vlgmr.msra.gmra.mrb[44].mxu1 %v5867_v47  ;;  %v7523_v47 = vld [vmem:[%s9418_s1 + $0xd08] sm:$0xff]  }
 0x187   :  { %6948 = vmatpush3.bf16.msra.mxu1 %v7488_v52  ;;  %5559 = vmatprep.mubr.bf16.mxu1 %v5872_v40  ;;  %v7528_v52 = vld [vmem:[%s9418_s1 + $0xd90] sm:$0xff]   ;;  %v7556_v40 = vld [vmem:[%s9418_s1 + $0xe88] sm:$0xff]  }
 0x188   :  { %6949 = vmatprep.subr.bf16.mxu1 %v7490_v54  ;;  %6928 = vmatpush3.bf16.msra.mxu0 %v7491_v55  ;;  %v7530_v54 = vld [vmem:[%s9418_s1 + $0xdd8] sm:$0xff]  }
 0x189   :  { %6929 = vmatprep.subr.bf16.mxu0 %v7493_v57 }
 0x18b   :  { %6950 = vmatpush3.bf16.msra.mxu1 %v7492_v56  ;;  %v7531_v56 = vld [vmem:[%s9418_s1 + $0xd18] sm:$0xff]  }
 0x18c   :  { %6951 = vmatprep.subr.bf16.mxu1 %v7494_v58  ;;  %6930 = vmatpush3.bf16.msra.mxu0 %v7495_v59  ;;  %v7532_v58 = vld [vmem:[%s9418_s1 + $0xd98] sm:$0xff]  }
 0x18d   :  { %6931 = vmatprep.subr.bf16.mxu0 %v7497_v61 }
 0x18f   :  { %6952 = vmatpush3.bf16.msra.mxu1 %v7496_v60  ;;  %v7533_v60 = vld [vmem:[%s9418_s1 + $0xd60] sm:$0xff]  }
 0x190   :  { %6953 = vmatprep.subr.bf16.mxu1 %v7498_v62  ;;  %6932 = vmatpush3.bf16.msra.mxu0 %v7499_v0 }
 0x191   :  { %6933 = vmatprep.subr.bf16.mxu0 %v7501_v4 }
 0x193   :  { %6954 = vmatpush3.bf16.msra.mxu1 %v7500_v2  ;;  %v7535_v2 = vld [vmem:[%s9418_s1 + $0xd20] sm:$0xff]  }
 0x194   :  { %6955 = vmatprep.subr.bf16.mxu1 %v7502_v7  ;;  %6934 = vmatpush3.bf16.msra.mxu0 %v7503_v10 }
 0x195   :  { %6935 = vmatprep.subr.bf16.mxu0 %v7505_v16 }
 0x196   :  { %v6633_v63 = vpop.f32.mrb[20].mxu0 }
 0x197   :  { %v6655_v1 = vpop.f32.mrb[20].mxu1  ;;  %v6634_v3 = vpop.f32.mrb[21].mxu0  ;;  %6956 = vmatpush3.bf16.msra.mxu1 %v7504_v13  ;;  %v7539_v13 = vld [vmem:[%s9418_s1 + $0xd28] sm:$0xff]  }
 0x198   :  { %v6635_v5 = vadd.f32 %v6634_v3, %v6633_v63  ;;  %v6656_v6 = vpop.f32.mrb[21].mxu1  ;;  %v6636_v9 = vpop.f32.mrb[22].mxu0  ;;  %6957 = vmatprep.subr.bf16.mxu1 %v7506_v19  ;;  %6936 = vmatpush3.bf16.msra.mxu0 %v7507_v21  ;;  %v7534_v63 = vld [vmem:[%s9418_s1 + $0xde0] sm:$0xff]   ;;  %v7543_v19 = vld [vmem:[%s9418_s1 + $0xd30] sm:$0xff]   ;;  %v7545_v21 = vld [vmem:[%s9418_s1 + $0xd78] sm:$0xff]  }
 0x199   :  { %v6657_v8 = vadd.f32 %v6656_v6, %v6655_v1  ;;  %v6658_v12 = vpop.f32.mrb[22].mxu1  ;;  %v6637_v14 = vpop.f32.mrb[23].mxu0  ;;  %6937 = vmatprep.subr.bf16.mxu0 %v7509_v25  ;;  %v41_v25 = vld [vmem:[%s9419_s0 + $0xd0] sm:$0xff] }
 0x19a   :  { %v4947_v11 = vadd.f32 %v6635_v5, %v8907_v23  ;;  %v6638_v17 = vadd.f32 %v6637_v14, %v6636_v9  ;;  %v6659_v18 = vpop.f32.mrb[23].mxu1  ;;  %v7508_v23 = vld [vmem:[%s9418_s1 + $0xca8] sm:$0xff]   ;;  %v7536_v5 = vld [vmem:[%s9418_s1 + $0xda0] sm:$0xff]  }
 0x19b   :  { %v6660_v20 = vadd.f32 %v6659_v18, %v6658_v12  ;;  %6958 = vmatpush3.bf16.msra.mxu1 %v7508_v23  ;;  %v7542_v18 = vld [vmem:[%s9418_s1 + $0xdf0] sm:$0xff]   ;;  %v7547_v23 = vld [vmem:[%s9418_s1 + $0xd38] sm:$0xff]  }
 0x19c   :  { %v9021_v15 = vadd.f32 %v6657_v8, %v4947_v11  ;;  %v4950_v22 = vadd.f32 %v6638_v17, %v8922_v32  ;;  %6959 = vmatprep.subr.bf16.mxu1 %v7510_v26  ;;  %6938 = vmatpush3.bf16.msra.mxu0 %v7511_v27  ;;  %v7516_v32 = vld [vmem:[%s9418_s1 + $0xcb8] sm:$0xff]   ;;  %v7537_v8 = vld [vmem:[%s9418_s1 + $0xd68] sm:$0xff]   ;;  %v7541_v17 = vld [vmem:[%s9418_s1 + $0xd70] sm:$0xff]  }
 0x19d   :  { %6939 = vmatprep.subr.bf16.mxu0 %v7513_v29  ;;  %v7538_v11 = vld [vmem:[%s9418_s1 + $0xde8] sm:$0xff]   ;;  %v73_v26 = vld [vmem:[%s9419_s0 + $0x1d0] sm:$0xff]  ;;  %v42_v27 = vld [vmem:[%s9419_s0 + $0xd8] sm:$0xff] }
 0x19e   :  { %v9036_v24 = vadd.f32 %v6660_v20, %v4950_v22  ;;  %v7544_v20 = vld [vmem:[%s9418_s1 + $0xdb0] sm:$0xff]   ;;  %v7546_v22 = vld [vmem:[%s9418_s1 + $0xdf8] sm:$0xff]   ;;  %v5873_v29 = vcombine.low %v41_v25, %v73_v26 }
 0x19f   :  { %6960 = vmatpush3.bf16.msra.mxu1 %v7512_v28  ;;  %v74_v28 = vld [vmem:[%s9419_s0 + $0x1d8] sm:$0xff] }
 0x1a0   :  { %6961 = vmatprep.subr.bf16.mxu1 %v7514_v30  ;;  %6940 = vmatpush3.bf16.msra.mxu0 %v7515_v31  ;;  %v5874_v30 = vcombine.high %v41_v25, %v73_v26  ;;  %v5875_v31 = vcombine.low %v42_v27, %v74_v28  ;;  %v7581_v25 = vld [vmem:[%s9418_s1 + $0xf40] sm:$0xff]  }
 0x1a1   :  { %6969 = vmatprep.subr.bf16.mxu0 %v7517_v41  ;;  %v7557_v41 = vld [vmem:[%s9418_s1 + $0xe50] sm:$0xff]   ;;  %v7582_v26 = vld [vmem:[%s9418_s1 + $0xfc0] sm:$0xff]  }
 0x1a3   :  { %6962 = vmatpush3.bf16.msra.mxu1 %v7516_v32  ;;  %5519 = vmatmul.mubr.bf16.vlgmr.msra.gmra.mrb[48].mxu0 %v5869_v35  ;;  %v5876_v32 = vcombine.high %v42_v27, %v74_v28  ;;  %v7551_v35 = vld [vmem:[%s9418_s1 + $0xe00] sm:$0xff]  }
 0x1a4   :  { %6991 = vmatprep.subr.bf16.mxu1 %v7518_v42  ;;  %6970 = vmatpush3.bf16.msra.mxu0 %v7519_v43  ;;  %v7558_v42 = vld [vmem:[%s9418_s1 + $0xed0] sm:$0xff]   ;;  %v7583_v27 = vld [vmem:[%s9418_s1 + $0xf00] sm:$0xff]  }
 0x1a5   :  { %6971 = vmatprep.subr.bf16.mxu0 %v7521_v45  ;;  %5600 = vmatprep.mubr.bf16.mxu0 %v5874_v30  ;;  %v7559_v43 = vld [vmem:[%s9418_s1 + $0xe10] sm:$0xff]   ;;  %v7561_v45 = vld [vmem:[%s9418_s1 + $0xe58] sm:$0xff]   ;;  %v7584_v28 = vld [vmem:[%s9418_s1 + $0xf80] sm:$0xff]  }
 0x1a6   :  { %5560 = vmatmul.mubr.bf16.vlgmr.msra.gmra.mrb[48].mxu1 %v5871_v39  ;;  %v7555_v39 = vld [vmem:[%s9418_s1 + $0xe08] sm:$0xff]  }
 0x1a7   :  { %6992 = vmatpush3.bf16.msra.mxu1 %v7520_v44  ;;  %5641 = vmatprep.mubr.bf16.mxu1 %v5876_v32  ;;  %v7560_v44 = vld [vmem:[%s9418_s1 + $0xe90] sm:$0xff]   ;;  %v7586_v30 = vld [vmem:[%s9418_s1 + $0xfc8] sm:$0xff]  }
 0x1a8   :  { %6993 = vmatprep.subr.bf16.mxu1 %v7522_v46  ;;  %6972 = vmatpush3.bf16.msra.mxu0 %v7523_v47  ;;  %v7562_v46 = vld [vmem:[%s9418_s1 + $0xed8] sm:$0xff]   ;;  %v7588_v32 = vld [vmem:[%s9418_s1 + $0xf88] sm:$0xff]  }
 0x1a9   :  { %6973 = vmatprep.subr.bf16.mxu0 %v7525_v49  ;;  %v7563_v47 = vld [vmem:[%s9418_s1 + $0xe18] sm:$0xff]  }
 0x1aa   :  { %v7564_v49 = vld [vmem:[%s9418_s1 + $0xe98] sm:$0xff]  }
 0x1ab   :  { %6994 = vmatpush3.bf16.msra.mxu1 %v7524_v48 }
 0x1ac   :  { %6995 = vmatprep.subr.bf16.mxu1 %v7526_v50  ;;  %6974 = vmatpush3.bf16.msra.mxu0 %v7527_v51  ;;  %v7565_v51 = vld [vmem:[%s9418_s1 + $0xe60] sm:$0xff]  }
 0x1ad   :  { %6975 = vmatprep.subr.bf16.mxu0 %v7529_v53  ;;  %v7566_v53 = vld [vmem:[%s9418_s1 + $0xee0] sm:$0xff]  }
 0x1af   :  { %6996 = vmatpush3.bf16.msra.mxu1 %v7528_v52 }
 0x1b0   :  { %6997 = vmatprep.subr.bf16.mxu1 %v7530_v54  ;;  %6976 = vmatpush3.bf16.msra.mxu0 %v7531_v56  ;;  %v7567_v56 = vld [vmem:[%s9418_s1 + $0xe20] sm:$0xff]  }
 0x1b1   :  { %6977 = vmatprep.subr.bf16.mxu0 %v7533_v60 }
 0x1b3   :  { %6998 = vmatpush3.bf16.msra.mxu1 %v7532_v58 }
 0x1b4   :  { %6999 = vmatprep.subr.bf16.mxu1 %v7534_v63  ;;  %6978 = vmatpush3.bf16.msra.mxu0 %v7535_v2 }
 0x1b5   :  { %6979 = vmatprep.subr.bf16.mxu0 %v7537_v8  ;;  %v7573_v8 = vld [vmem:[%s9418_s1 + $0xe70] sm:$0xff]  }
 0x1b6   :  { %v6677_v55 = vpop.f32.mrb[24].mxu0 }
 0x1b7   :  { %v6699_v57 = vpop.f32.mrb[24].mxu1  ;;  %v6678_v59 = vpop.f32.mrb[25].mxu0  ;;  %7000 = vmatpush3.bf16.msra.mxu1 %v7536_v5 }
 0x1b8   :  { %v6679_v61 = vadd.f32 %v6678_v59, %v6677_v55  ;;  %v6700_v62 = vpop.f32.mrb[25].mxu1  ;;  %v6680_v1 = vpop.f32.mrb[26].mxu0  ;;  %7001 = vmatprep.subr.bf16.mxu1 %v7538_v11  ;;  %6980 = vmatpush3.bf16.msra.mxu0 %v7539_v13  ;;  %v7568_v59 = vld [vmem:[%s9418_s1 + $0xea0] sm:$0xff]   ;;  %v7575_v11 = vld [vmem:[%s9418_s1 + $0xe30] sm:$0xff]   ;;  %v7577_v13 = vld [vmem:[%s9418_s1 + $0xe78] sm:$0xff]  }
 0x1b9   :  { %v6701_v0 = vadd.f32 %v6700_v62, %v6699_v57  ;;  %v6702_v4 = vpop.f32.mrb[26].mxu1  ;;  %v6681_v6 = vpop.f32.mrb[27].mxu0  ;;  %6981 = vmatprep.subr.bf16.mxu0 %v7541_v17  ;;  %v7569_v62 = vld [vmem:[%s9418_s1 + $0xe68] sm:$0xff]   ;;  %v43_v17 = vld [vmem:[%s9419_s0 + $0xe0] sm:$0xff] }
 0x1ba   :  { %v5029_v3 = vadd.f32 %v6679_v61, %v9021_v15  ;;  %v6682_v9 = vadd.f32 %v6681_v6, %v6680_v1  ;;  %v6703_v10 = vpop.f32.mrb[27].mxu1  ;;  %v7540_v15 = vld [vmem:[%s9418_s1 + $0xda8] sm:$0xff]  }
 0x1bb   :  { %v6704_v12 = vadd.f32 %v6703_v10, %v6702_v4  ;;  %7002 = vmatpush3.bf16.msra.mxu1 %v7540_v15  ;;  %v7570_v1 = vld [vmem:[%s9418_s1 + $0xee8] sm:$0xff]   ;;  %v7574_v10 = vld [vmem:[%s9418_s1 + $0xef0] sm:$0xff]   ;;  %v7579_v15 = vld [vmem:[%s9418_s1 + $0xe38] sm:$0xff]  }
 0x1bc   :  { %v9135_v7 = vadd.f32 %v6701_v0, %v5029_v3  ;;  %v5032_v14 = vadd.f32 %v6682_v9, %v9036_v24  ;;  %7003 = vmatprep.subr.bf16.mxu1 %v7542_v18  ;;  %6982 = vmatpush3.bf16.msra.mxu0 %v7543_v19  ;;  %v7548_v24 = vld [vmem:[%s9418_s1 + $0xdb8] sm:$0xff]   ;;  %v7571_v4 = vld [vmem:[%s9418_s1 + $0xe28] sm:$0xff]   ;;  %v75_v18 = vld [vmem:[%s9419_s0 + $0x1e0] sm:$0xff] }
 0x1bd   :  { %6983 = vmatprep.subr.bf16.mxu0 %v7545_v21  ;;  %v7572_v6 = vld [vmem:[%s9418_s1 + $0xea8] sm:$0xff]   ;;  %v5878_v21 = vcombine.high %v43_v17, %v75_v18 }
 0x1be   :  { %v9150_v16 = vadd.f32 %v6704_v12, %v5032_v14  ;;  %v7576_v12 = vld [vmem:[%s9418_s1 + $0xeb0] sm:$0xff]   ;;  %v7578_v14 = vld [vmem:[%s9418_s1 + $0xef8] sm:$0xff]   ;;  %v44_v19 = vld [vmem:[%s9419_s0 + $0xe8] sm:$0xff] }
 0x1bf   :  { %7004 = vmatpush3.bf16.msra.mxu1 %v7544_v20  ;;  %v5877_v20 = vcombine.low %v43_v17, %v75_v18 }
 0x1c0   :  { %7005 = vmatprep.subr.bf16.mxu1 %v7546_v22  ;;  %6984 = vmatpush3.bf16.msra.mxu0 %v7547_v23  ;;  %v76_v22 = vld [vmem:[%s9419_s0 + $0x1e8] sm:$0xff] }
 0x1c1   :  { %7013 = vmatprep.subr.bf16.mxu0 %v7549_v33  ;;  %v5879_v23 = vcombine.low %v44_v19, %v76_v22  ;;  %v7589_v33 = vld [vmem:[%s9418_s1 + $0xf50] sm:$0xff]  }
 0x1c3   :  { %7006 = vmatpush3.bf16.msra.mxu1 %v7548_v24  ;;  %5601 = vmatmul.mubr.bf16.vlgmr.msra.gmra.mrb[52].mxu0 %v5873_v29  ;;  %v5880_v24 = vcombine.high %v44_v19, %v76_v22  ;;  %v7585_v29 = vld [vmem:[%s9418_s1 + $0xf48] sm:$0xff]  }
 0x1c4   :  { %7035 = vmatprep.subr.bf16.mxu1 %v7550_v34  ;;  %7014 = vmatpush3.bf16.msra.mxu0 %v7551_v35  ;;  %v7590_v34 = vld [vmem:[%s9418_s1 + $0xfd0] sm:$0xff]  }
 0x1c5   :  { %7015 = vmatprep.subr.bf16.mxu0 %v7553_v37  ;;  %5682 = vmatprep.mubr.bf16.mxu0 %v5878_v21  ;;  %v7591_v35 = vld [vmem:[%s9418_s1 + $0xf10] sm:$0xff]   ;;  %v7593_v37 = vld [vmem:[%s9418_s1 + $0xf58] sm:$0xff]  }
 0x1c6   :  { %5642 = vmatmul.mubr.bf16.vlgmr.msra.gmra.mrb[52].mxu1 %v5875_v31  ;;  %v7587_v31 = vld [vmem:[%s9418_s1 + $0xf08] sm:$0xff]  }
 0x1c7   :  { %7036 = vmatpush3.bf16.msra.mxu1 %v7552_v36  ;;  %5723 = vmatprep.mubr.bf16.mxu1 %v5880_v24  ;;  %v7592_v36 = vld [vmem:[%s9418_s1 + $0xf90] sm:$0xff]  }
 0x1c8   :  { %7037 = vmatprep.subr.bf16.mxu1 %v7554_v38  ;;  %7016 = vmatpush3.bf16.msra.mxu0 %v7555_v39  ;;  %v7594_v38 = vld [vmem:[%s9418_s1 + $0xfd8] sm:$0xff]  }
 0x1c9   :  { %7017 = vmatprep.subr.bf16.mxu0 %v7557_v41 }
 0x1cb   :  { %7038 = vmatpush3.bf16.msra.mxu1 %v7556_v40  ;;  %v7595_v40 = vld [vmem:[%s9418_s1 + $0xf18] sm:$0xff]  }
 0x1cc   :  { %7039 = vmatprep.subr.bf16.mxu1 %v7558_v42  ;;  %7018 = vmatpush3.bf16.msra.mxu0 %v7559_v43  ;;  %v7596_v42 = vld [vmem:[%s9418_s1 + $0xf98] sm:$0xff]  }
 0x1cd   :  { %7019 = vmatprep.subr.bf16.mxu0 %v7561_v45 }
 0x1cf   :  { %7040 = vmatpush3.bf16.msra.mxu1 %v7560_v44  ;;  %v7597_v44 = vld [vmem:[%s9418_s1 + $0xf60] sm:$0xff]  }
 0x1d0   :  { %7041 = vmatprep.subr.bf16.mxu1 %v7562_v46  ;;  %7020 = vmatpush3.bf16.msra.mxu0 %v7563_v47  ;;  %v7598_v47 = vld [vmem:[%s9418_s1 + $0xfe0] sm:$0xff]  }
 0x1d1   :  { %7021 = vmatprep.subr.bf16.mxu0 %v7565_v51 }
 0x1d3   :  { %7042 = vmatpush3.bf16.msra.mxu1 %v7564_v49 }
 0x1d4   :  { %7043 = vmatprep.subr.bf16.mxu1 %v7566_v53  ;;  %7022 = vmatpush3.bf16.msra.mxu0 %v7567_v56  ;;  %v7600_v53 = vld [vmem:[%s9418_s1 + $0xfa0] sm:$0xff]   ;;  %v7601_v56 = vld [vmem:[%s9418_s1 + $0xf68] sm:$0xff]  }
 0x1d5   :  { %7023 = vmatprep.subr.bf16.mxu0 %v7569_v62 }
 0x1d6   :  { %v6721_v48 = vpop.f32.mrb[28].mxu0 }
 0x1d7   :  { %v6743_v50 = vpop.f32.mrb[28].mxu1  ;;  %v6722_v52 = vpop.f32.mrb[29].mxu0  ;;  %7044 = vmatpush3.bf16.msra.mxu1 %v7568_v59  ;;  %v7602_v59 = vld [vmem:[%s9418_s1 + $0xfe8] sm:$0xff]  }
 0x1d8   :  { %v6723_v54 = vadd.f32 %v6722_v52, %v6721_v48  ;;  %v6744_v55 = vpop.f32.mrb[29].mxu1  ;;  %v6724_v58 = vpop.f32.mrb[30].mxu0  ;;  %7045 = vmatprep.subr.bf16.mxu1 %v7570_v1  ;;  %7024 = vmatpush3.bf16.msra.mxu0 %v7571_v4  ;;  %v7605_v1 = vld [vmem:[%s9418_s1 + $0xf70] sm:$0xff]  }
 0x1d9   :  { %v6745_v57 = vadd.f32 %v6744_v55, %v6743_v50  ;;  %v6746_v61 = vpop.f32.mrb[30].mxu1  ;;  %v6725_v63 = vpop.f32.mrb[31].mxu0  ;;  %7025 = vmatprep.subr.bf16.mxu0 %v7573_v8  ;;  %v7599_v50 = vld [vmem:[%s9418_s1 + $0xf20] sm:$0xff]   ;;  %v7608_v4 = vld [vmem:[%s9418_s1 + $0xfb0] sm:$0xff]   ;;  %v7612_v8 = vld [vmem:[%s9418_s1 + $0xfb8] sm:$0xff]  }
 0x1da   :  { %v5111_v60 = vadd.f32 %v6723_v54, %v9135_v7  ;;  %v6726_v2 = vadd.f32 %v6725_v63, %v6724_v58  ;;  %v6747_v3 = vpop.f32.mrb[31].mxu1  ;;  %v7604_v63 = vld [vmem:[%s9418_s1 + $0xfa8] sm:$0xff]  }
 0x1db   :  { %v6748_v5 = vadd.f32 %v6747_v3, %v6746_v61  ;;  %7046 = vmatpush3.bf16.msra.mxu1 %v7572_v6  ;;  %v7603_v61 = vld [vmem:[%s9418_s1 + $0xf28] sm:$0xff]   ;;  %v7607_v3 = vld [vmem:[%s9418_s1 + $0xf30] sm:$0xff]   ;;  %v7610_v6 = vld [vmem:[%s9418_s1 + $0xff8] sm:$0xff]  }
 0x1dc   :  { %v9252_v0 = vadd.f32 %v6745_v57, %v5111_v60  ;;  %v5114_v7 = vadd.f32 %v6726_v2, %v9150_v16  ;;  %7047 = vmatprep.subr.bf16.mxu1 %v7574_v10  ;;  %7026 = vmatpush3.bf16.msra.mxu0 %v7575_v11  ;;  %v7580_v16 = vld [vmem:[%s9418_s1 + $0xeb8] sm:$0xff]   ;;  %v7606_v2 = vld [vmem:[%s9418_s1 + $0xff0] sm:$0xff]  }
 0x1dd   :  { %7027 = vmatprep.subr.bf16.mxu0 %v7577_v13  ;;  %v77_v10 = vld [vmem:[%s9419_s0 + $0x1f0] sm:$0xff]  ;;  %v46_v13 = vld [vmem:[%s9419_s0 + $0xf8] sm:$0xff] }
 0x1de   :  { %v9267_v9 = vadd.f32 %v6748_v5, %v5114_v7  ;;  %v7609_v5 = vld [vmem:[%s9418_s1 + $0xf78] sm:$0xff]  }
 0x1df   :  { %7048 = vmatpush3.bf16.msra.mxu1 %v7576_v12  ;;  %v7611_v7 = vld [vmem:[%s9418_s1 + $0xf38] sm:$0xff]  }
 0x1e0   :  { %7049 = vmatprep.subr.bf16.mxu1 %v7578_v14  ;;  %7028 = vmatpush3.bf16.msra.mxu0 %v7579_v15  ;;  %v78_v14 = vld [vmem:[%s9419_s0 + $0x1f8] sm:$0xff] }
 0x1e1   :  { %7057 = vmatprep.subr.bf16.mxu0 %v7581_v25  ;;  %v5883_v15 = vcombine.low %v46_v13, %v78_v14 }
 0x1e3   :  { %7050 = vmatpush3.bf16.msra.mxu1 %v7580_v16  ;;  %5683 = vmatmul.mubr.bf16.vlgmr.msra.gmra.mrb[56].mxu0 %v5877_v20  ;;  %v5884_v16 = vcombine.high %v46_v13, %v78_v14 }
 0x1e4   :  { %7079 = vmatprep.subr.bf16.mxu1 %v7582_v26  ;;  %7058 = vmatpush3.bf16.msra.mxu0 %v7583_v27 }
 0x1e5   :  { %7059 = vmatprep.subr.bf16.mxu0 %v7585_v29 }
 0x1e6   :  { %5724 = vmatmul.mubr.bf16.vlgmr.msra.gmra.mrb[56].mxu1 %v5879_v23 }
 0x1e7   :  { %7080 = vmatpush3.bf16.msra.mxu1 %v7584_v28  ;;  %5805 = vmatprep.mubr.bf16.mxu1 %v5884_v16 }
 0x1e8   :  { %7081 = vmatprep.subr.bf16.mxu1 %v7586_v30  ;;  %7060 = vmatpush3.bf16.msra.mxu0 %v7587_v31 }
 0x1e9   :  { %7061 = vmatprep.subr.bf16.mxu0 %v7589_v33 }
 0x1eb   :  { %7082 = vmatpush3.bf16.msra.mxu1 %v7588_v32 }
 0x1ec   :  { %7083 = vmatprep.subr.bf16.mxu1 %v7590_v34  ;;  %7062 = vmatpush3.bf16.msra.mxu0 %v7591_v35 }
 0x1ed   :  { %7063 = vmatprep.subr.bf16.mxu0 %v7593_v37 }
 0x1ef   :  { %7084 = vmatpush3.bf16.msra.mxu1 %v7592_v36 }
 0x1f0   :  { %7085 = vmatprep.subr.bf16.mxu1 %v7594_v38  ;;  %7064 = vmatpush3.bf16.msra.mxu0 %v7595_v40 }
 0x1f1   :  { %7065 = vmatprep.subr.bf16.mxu0 %v7597_v44 }
 0x1f3   :  { %7086 = vmatpush3.bf16.msra.mxu1 %v7596_v42 }
 0x1f4   :  { %7087 = vmatprep.subr.bf16.mxu1 %v7598_v47  ;;  %7066 = vmatpush3.bf16.msra.mxu0 %v7599_v50 }
 0x1f5   :  { %7067 = vmatprep.subr.bf16.mxu0 %v7601_v56 }
 0x1f6   :  { %v6765_v39 = vpop.f32.mrb[32].mxu0 }
 0x1f7   :  { %v6787_v41 = vpop.f32.mrb[32].mxu1  ;;  %v6766_v43 = vpop.f32.mrb[33].mxu0  ;;  %7088 = vmatpush3.bf16.msra.mxu1 %v7600_v53 }
 0x1f8   :  { %v6767_v45 = vadd.f32 %v6766_v43, %v6765_v39  ;;  %v6788_v46 = vpop.f32.mrb[33].mxu1  ;;  %v6768_v49 = vpop.f32.mrb[34].mxu0  ;;  %7089 = vmatprep.subr.bf16.mxu1 %v7602_v59  ;;  %7068 = vmatpush3.bf16.msra.mxu0 %v7603_v61 }
 0x1f9   :  { %v6789_v48 = vadd.f32 %v6788_v46, %v6787_v41  ;;  %v6790_v52 = vpop.f32.mrb[34].mxu1  ;;  %v6769_v54 = vpop.f32.mrb[35].mxu0  ;;  %7069 = vmatprep.subr.bf16.mxu0 %v7605_v1 }
 0x1fa   :  { %v5193_v51 = vadd.f32 %v6767_v45, %v9252_v0  ;;  %v6770_v57 = vadd.f32 %v6769_v54, %v6768_v49  ;;  %v6791_v58 = vpop.f32.mrb[35].mxu1 }
 0x1fb   :  { %v6792_v60 = vadd.f32 %v6791_v58, %v6790_v52  ;;  %7090 = vmatpush3.bf16.msra.mxu1 %v7604_v63 }
 0x1fc   :  { %v5234_v55 = vadd.f32 %v6789_v48, %v5193_v51  ;;  %v5196_v62 = vadd.f32 %v6770_v57, %v9267_v9  ;;  %7091 = vmatprep.subr.bf16.mxu1 %v7606_v2  ;;  %7070 = vmatpush3.bf16.msra.mxu0 %v7607_v3  ;;  %v45_v9 = vld [vmem:[%s9419_s0 + $0xf0] sm:$0xff] }
 0x1fd   :  { %7071 = vmatprep.subr.bf16.mxu0 %v7609_v5  ;;  %v5881_v11 = vcombine.low %v45_v9, %v77_v10  ;;  %v5882_v12 = vcombine.high %v45_v9, %v77_v10 }
 0x1fe   :  { %v5237_v0 = vadd.f32 %v6792_v60, %v5196_v62 }
 0x1ff   :  { %7092 = vmatpush3.bf16.msra.mxu1 %v7608_v4  ;;  %5764 = vmatprep.mubr.bf16.mxu0 %v5882_v12 }
 0x200   :  { %7093 = vmatprep.subr.bf16.mxu1 %v7610_v6  ;;  %7072 = vmatpush3.bf16.msra.mxu0 %v7611_v7 }
 0x203   :  { %7094 = vmatpush3.bf16.msra.mxu1 %v7612_v8  ;;  %5765 = vmatmul.mubr.bf16.vlgmr.msra.gmra.mrb[60].mxu0 %v5881_v11 }
 0x206   :  { %5806 = vmatmul.mubr.bf16.vlgmr.msra.gmra.mrb[60].mxu1 %v5883_v15 }
 0x216   :  { %v6809_v17 = vpop.f32.mrb[36].mxu0 }
 0x217   :  { %v6810_v19 = vpop.f32.mrb[37].mxu0 }
 0x218   :  { %v6811_v20 = vadd.f32 %v6810_v19, %v6809_v17  ;;  %v6812_v22 = vpop.f32.mrb[38].mxu0 }
 0x219   :  { %v6831_v18 = vpop.f32.mrb[36].mxu1  ;;  %v6813_v25 = vpop.f32.mrb[39].mxu0 }
 0x21a   :  { %v6832_v21 = vpop.f32.mrb[37].mxu1  ;;  %v5275_v26 = vadd.f32 %v6811_v20, %v5234_v55  ;;  %v6814_v27 = vadd.f32 %v6813_v25, %v6812_v22 }
 0x21b   :  { %v6833_v23 = vadd.f32 %v6832_v21, %v6831_v18  ;;  %v6834_v24 = vpop.f32.mrb[38].mxu1 }
 0x21c   :  { %v6835_v28 = vpop.f32.mrb[39].mxu1  ;;  %v5278_v31 = vadd.f32 %v6814_v27, %v5237_v0 }
 0x21d   :  { %v6836_v29 = vadd.f32 %v6835_v28, %v6834_v24  ;;  %v5316_v30 = vadd.f32 %v6833_v23, %v5275_v26 }
 0x21f   :  { %v5319_v32 = vadd.f32 %v6836_v29, %v5278_v31 }
 0x236   :  { %v6853_v33 = vpop.f32.mrb[40].mxu0 }
 0x237   :  { %v6854_v35 = vpop.f32.mrb[41].mxu0 }
 0x238   :  { %v6855_v37 = vadd.f32 %v6854_v35, %v6853_v33  ;;  %v6856_v39 = vpop.f32.mrb[42].mxu0 }
 0x239   :  { %v6875_v34 = vpop.f32.mrb[40].mxu1  ;;  %v6857_v41 = vpop.f32.mrb[43].mxu0 }
 0x23a   :  { %v6876_v36 = vpop.f32.mrb[41].mxu1  ;;  %v5357_v43 = vadd.f32 %v6855_v37, %v5316_v30  ;;  %v6858_v44 = vadd.f32 %v6857_v41, %v6856_v39 }
 0x23b   :  { %v6877_v38 = vadd.f32 %v6876_v36, %v6875_v34  ;;  %v6878_v40 = vpop.f32.mrb[42].mxu1 }
 0x23c   :  { %v6879_v42 = vpop.f32.mrb[43].mxu1  ;;  %v5360_v47 = vadd.f32 %v6858_v44, %v5319_v32 }
 0x23d   :  { %v6880_v45 = vadd.f32 %v6879_v42, %v6878_v40  ;;  %v5398_v46 = vadd.f32 %v6877_v38, %v5357_v43 }
 0x23f   :  { %v5401_v48 = vadd.f32 %v6880_v45, %v5360_v47 }
 0x256   :  { %v6897_v49 = vpop.f32.mrb[44].mxu0 }
 0x257   :  { %v6898_v51 = vpop.f32.mrb[45].mxu0 }
 0x258   :  { %v6899_v52 = vadd.f32 %v6898_v51, %v6897_v49  ;;  %v6900_v54 = vpop.f32.mrb[46].mxu0 }
 0x259   :  { %v6919_v50 = vpop.f32.mrb[44].mxu1  ;;  %v6901_v57 = vpop.f32.mrb[47].mxu0 }
 0x25a   :  { %v6920_v53 = vpop.f32.mrb[45].mxu1  ;;  %v5439_v58 = vadd.f32 %v6899_v52, %v5398_v46  ;;  %v6902_v59 = vadd.f32 %v6901_v57, %v6900_v54 }
 0x25b   :  { %v6921_v55 = vadd.f32 %v6920_v53, %v6919_v50  ;;  %v6922_v56 = vpop.f32.mrb[46].mxu1 }
 0x25c   :  { %v6923_v60 = vpop.f32.mrb[47].mxu1  ;;  %v5442_v63 = vadd.f32 %v6902_v59, %v5401_v48 }
 0x25d   :  { %v6924_v61 = vadd.f32 %v6923_v60, %v6922_v56  ;;  %v5480_v62 = vadd.f32 %v6921_v55, %v5439_v58 }
 0x25f   :  { %v5483_v0 = vadd.f32 %v6924_v61, %v5442_v63 }
 0x276   :  { %v6941_v1 = vpop.f32.mrb[48].mxu0 }
 0x277   :  { %v6942_v3 = vpop.f32.mrb[49].mxu0 }
 0x278   :  { %v6943_v4 = vadd.f32 %v6942_v3, %v6941_v1  ;;  %v6944_v6 = vpop.f32.mrb[50].mxu0 }
 0x279   :  { %v6963_v2 = vpop.f32.mrb[48].mxu1  ;;  %v6945_v9 = vpop.f32.mrb[51].mxu0 }
 0x27a   :  { %v6964_v5 = vpop.f32.mrb[49].mxu1  ;;  %v5521_v10 = vadd.f32 %v6943_v4, %v5480_v62  ;;  %v6946_v11 = vadd.f32 %v6945_v9, %v6944_v6 }
 0x27b   :  { %v6965_v7 = vadd.f32 %v6964_v5, %v6963_v2  ;;  %v6966_v8 = vpop.f32.mrb[50].mxu1 }
 0x27c   :  { %v6967_v12 = vpop.f32.mrb[51].mxu1  ;;  %v5524_v15 = vadd.f32 %v6946_v11, %v5483_v0 }
 0x27d   :  { %v6968_v13 = vadd.f32 %v6967_v12, %v6966_v8  ;;  %v5562_v14 = vadd.f32 %v6965_v7, %v5521_v10 }
 0x27f   :  { %v5565_v16 = vadd.f32 %v6968_v13, %v5524_v15 }
 0x296   :  { %v6985_v17 = vpop.f32.mrb[52].mxu0 }
 0x297   :  { %v6986_v19 = vpop.f32.mrb[53].mxu0 }
 0x298   :  { %v6987_v21 = vadd.f32 %v6986_v19, %v6985_v17  ;;  %v6988_v23 = vpop.f32.mrb[54].mxu0 }
 0x299   :  { %v7007_v18 = vpop.f32.mrb[52].mxu1  ;;  %v6989_v25 = vpop.f32.mrb[55].mxu0 }
 0x29a   :  { %v7008_v20 = vpop.f32.mrb[53].mxu1  ;;  %v5603_v27 = vadd.f32 %v6987_v21, %v5562_v14  ;;  %v6990_v28 = vadd.f32 %v6989_v25, %v6988_v23 }
 0x29b   :  { %v7009_v22 = vadd.f32 %v7008_v20, %v7007_v18  ;;  %v7010_v24 = vpop.f32.mrb[54].mxu1 }
 0x29c   :  { %v7011_v26 = vpop.f32.mrb[55].mxu1  ;;  %v5606_v31 = vadd.f32 %v6990_v28, %v5565_v16 }
 0x29d   :  { %v7012_v29 = vadd.f32 %v7011_v26, %v7010_v24  ;;  %v5644_v30 = vadd.f32 %v7009_v22, %v5603_v27 }
 0x29f   :  { %v5647_v32 = vadd.f32 %v7012_v29, %v5606_v31 }
 0x2b6   :  { %v7029_v33 = vpop.f32.mrb[56].mxu0 }
 0x2b7   :  { %v7030_v35 = vpop.f32.mrb[57].mxu0 }
 0x2b8   :  { %v7031_v36 = vadd.f32 %v7030_v35, %v7029_v33  ;;  %v7032_v38 = vpop.f32.mrb[58].mxu0 }
 0x2b9   :  { %v7051_v34 = vpop.f32.mrb[56].mxu1  ;;  %v7033_v41 = vpop.f32.mrb[59].mxu0 }
 0x2ba   :  { %v7052_v37 = vpop.f32.mrb[57].mxu1  ;;  %v5685_v42 = vadd.f32 %v7031_v36, %v5644_v30  ;;  %v7034_v43 = vadd.f32 %v7033_v41, %v7032_v38 }
 0x2bb   :  { %v7053_v39 = vadd.f32 %v7052_v37, %v7051_v34  ;;  %v7054_v40 = vpop.f32.mrb[58].mxu1 }
 0x2bc   :  { %v7055_v44 = vpop.f32.mrb[59].mxu1  ;;  %v5688_v47 = vadd.f32 %v7034_v43, %v5647_v32 }
 0x2bd   :  { %v7056_v45 = vadd.f32 %v7055_v44, %v7054_v40  ;;  %v5726_v46 = vadd.f32 %v7053_v39, %v5685_v42 }
 0x2bf   :  { %v5729_v48 = vadd.f32 %v7056_v45, %v5688_v47 }
 0x2d6   :  { %v7073_v49 = vpop.f32.mrb[60].mxu0 }
 0x2d7   :  { %v7074_v51 = vpop.f32.mrb[61].mxu0 }
 0x2d8   :  { %v7075_v52 = vadd.f32 %v7074_v51, %v7073_v49  ;;  %v7076_v54 = vpop.f32.mrb[62].mxu0 }
 0x2d9   :  { %v7095_v50 = vpop.f32.mrb[60].mxu1  ;;  %v7077_v57 = vpop.f32.mrb[63].mxu0 }
 0x2da   :  { %v7096_v53 = vpop.f32.mrb[61].mxu1  ;;  %v5767_v58 = vadd.f32 %v7075_v52, %v5726_v46  ;;  %v7078_v59 = vadd.f32 %v7077_v57, %v7076_v54 }
 0x2db   :  { %v7097_v55 = vadd.f32 %v7096_v53, %v7095_v50  ;;  %v7098_v56 = vpop.f32.mrb[62].mxu1 }
 0x2dc   :  { %v7099_v60 = vpop.f32.mrb[63].mxu1  ;;  %v5770_v63 = vadd.f32 %v7078_v59, %v5729_v48 }
 0x2dd   :  { %v7100_v61 = vadd.f32 %v7099_v60, %v7098_v56  ;;  %v5808_v62 = vadd.f32 %v7097_v55, %v5767_v58 }
 0x2df   :  { %5814 = vst [vmem:[%s9421_s3] sm:$0xff] %v5808_v62  ;;  %v5811_v0 = vadd.f32 %v7100_v61, %v5770_v63 }
 0x2e1   :  { %5815 = vst [vmem:[%s9421_s3 + $0x8] sm:$0xff] %v5811_v0 }

</bundles_post_ra>
